<compile_context>
chip_gen: v6e
topology: v6e:2x2x1
jax: 0.10.0
libtpu: 0.0.40
codegen_flags: <defaults>
</compile_context>

<pallas_src>
import jax
import jax.numpy as jnp
from jax import lax
from jax.experimental import pallas as pl
from jax.experimental.pallas import tpu as pltpu


def _round_up(n, m):
    return ((n + m - 1) // m) * m


def _pad_gate_weight(w, rows_pad, h_pad):
    """(rows, 4*H) gate-ordered (i,f,g,o) -> (rows_pad, 4*h_pad), per-gate zero pad."""
    rows, four_h = w.shape
    h = four_h // 4
    w4 = w.reshape(rows, 4, h)
    out = jnp.zeros((rows_pad, 4, h_pad), w.dtype)
    out = out.at[:rows, :, :h].set(w4)
    return out.reshape(rows_pad, 4 * h_pad)


def _pad_2d(a, rows_pad, cols_pad):
    out = jnp.zeros((rows_pad, cols_pad), a.dtype)
    return out.at[:a.shape[0], :a.shape[1]].set(a)


def _vmem_ceiling_bytes():
    """Generation-aware VMEM ceiling: v7x has 64 MiB/TC, v5e/v6e have 128 MiB."""
    try:
        kind = jax.devices()[0].device_kind.lower()
    except Exception:  # pragma: no cover - defensive
        kind = ""
    if "v7" in kind or "7x" in kind:
        return 56 * 1024 * 1024
    return 100 * 1024 * 1024


def _make_kernel(CS, BT, Hp):
    unroll = max(1, min(CS, 8))

    def _sigmoid(v):
        # sigmoid(x) = 0.5*(tanh(0.5*x)+1): one EUP push + cheap VPU ops.
        return 0.5 * jnp.tanh(0.5 * v) + 0.5

    def kernel(x_ref, wih1_ref, b1_ref, whh1_ref, w2ih_ref, w2hh_ref, b2_ref,
               wlin_ref, blin_ref, out_ref,
               h1_sc, c1_sc, h2_sc, c2_sc, g1_sc, h2all_sc):
        sc_idx = pl.program_id(1)

        # ---- reset the recurrence state at the start of each sequence (chunk 0)
        @pl.when(sc_idx == 0)
        def _():
            z = jnp.zeros((BT, Hp), jnp.float32)
            h1_sc[...] = z
            c1_sc[...] = z
            h2_sc[...] = z
            c2_sc[...] = z

        # ---- hoisted (non-recurrent) layer-1 input projection for this chunk:
        #      one bf16 MXU matmul, f32 accumulation.
        g1_sc[...] = (jnp.dot(x_ref[...], wih1_ref[...],
                              preferred_element_type=jnp.float32)
                      + b1_ref[...])

        # ---- layer-2 bias broadcast hoisted out of the time loop
        b2_b = jnp.broadcast_to(b2_ref[...], (BT, 4 * Hp))

        def step(t, carry):
            h1, c1, h2, c2 = carry
            row = pl.multiple_of(t * BT, BT)

            # -------- layer-1 cell: only the recurrent matmul is per-step
            gates1 = g1_sc[pl.ds(row, BT), :] + jnp.dot(
                h1, whh1_ref[...], preferred_element_type=jnp.float32)
            i1 = _sigmoid(gates1[:, 0 * Hp:1 * Hp])
            f1 = _sigmoid(gates1[:, 1 * Hp:2 * Hp])
            g1 = jnp.tanh(gates1[:, 2 * Hp:3 * Hp])
            o1 = _sigmoid(gates1[:, 3 * Hp:4 * Hp])
            c1n = f1 * c1 + i1 * g1
            h1n = o1 * jnp.tanh(c1n)

            # -------- layer-2 cell: two MXU dots accumulate directly (no concat)
            gates2 = (jnp.dot(h1n, w2ih_ref[...],
                              preferred_element_type=jnp.float32)
                      + jnp.dot(h2, w2hh_ref[...],
                                preferred_element_type=jnp.float32)
                      + b2_b)
            i2 = _sigmoid(gates2[:, 0 * Hp:1 * Hp])
            f2 = _sigmoid(gates2[:, 1 * Hp:2 * Hp])
            g2 = jnp.tanh(gates2[:, 2 * Hp:3 * Hp])
            o2 = _sigmoid(gates2[:, 3 * Hp:4 * Hp])
            c2n = f2 * c2 + i2 * g2
            h2n = o2 * jnp.tanh(c2n)

            h2all_sc[pl.ds(row, BT), :] = h2n
            return (h1n, c1n, h2n, c2n)

        carry0 = (h1_sc[...], c1_sc[...], h2_sc[...], c2_sc[...])
        h1, c1, h2, c2 = lax.fori_loop(0, CS, step, carry0, unroll=unroll)
        h1_sc[...] = h1
        c1_sc[...] = c1
        h2_sc[...] = h2
        c2_sc[...] = c2

        # ---- hoisted output head for this chunk: one bf16 MXU matmul + tanh,
        #      lane-dense store into the pipelined output block.
        out = jnp.tanh(jnp.dot(h2all_sc[...].astype(jnp.bfloat16), wlin_ref[...],
                               preferred_element_type=jnp.float32)
                       + blin_ref[...])
        out_ref[...] = out.astype(out_ref.dtype)

    return kernel


def lstm_forward(x, params):
    """x: (S, B, I) float32.  Returns (S, B, O) float32 (PyTorch module semantics)."""
    S, B, I = x.shape
    H = params["whh1"].shape[0]          # whh1 is (H, 4H) (pre-transposed)
    O = params["wlin"].shape[1]          # wlin is (H, O)  (pre-transposed)

    # ---- padded / tiled sizes -------------------------------------------------
    BT = min(_round_up(B, 8), 128)       # rows per batch tile (sublane-aligned)
    Bp = _round_up(B, BT)                # total padded batch
    n_bt = Bp // BT
    Ip = _round_up(I, 128)
    Hp = _round_up(H, 128)
    Op = _round_up(O, 128)
    CS = min(S, 32)                      # timesteps per streamed chunk
    Sp = _round_up(S, CS)
    n_sc = Sp // CS

    # ---- zero-padded, lane/sublane-aligned operands ---------------------------
    # x: (S,B,I) -> (n_bt, Sp*BT, Ip), batch-tile-major, rows = t*BT + b. bf16.
    x_p = (jnp.zeros((Sp, Bp, Ip), jnp.float32)
           .at[:S, :B, :I].set(x.astype(jnp.float32))
           .reshape(Sp, n_bt, BT, Ip)
           .transpose(1, 0, 2, 3)
           .reshape(n_bt, Sp * BT, Ip)
           .astype(jnp.bfloat16))

    wih1_p = _pad_gate_weight(params["wih1"], Ip, Hp).astype(jnp.bfloat16)
    b1_p = _pad_gate_weight(params["b1"], 1, Hp)
    whh1_p = _pad_gate_weight(params["whh1"], Hp, Hp)
    w2ih_p = _pad_gate_weight(params["wih2"], Hp, Hp)
    w2hh_p = _pad_gate_weight(params["whh2"], Hp, Hp)
    b2_p = _pad_gate_weight(params["b2"], 1, Hp)
    wlin_p = _pad_2d(params["wlin"], Hp, Op).astype(jnp.bfloat16)
    blin_p = _pad_2d(params["blin"], 1, Op)

    # ---- shape-aware VMEM limit with a generation-aware ceiling ---------------
    weight_bytes = sum(int(a.size) * a.dtype.itemsize for a in
                       (wih1_p, b1_p, whh1_p, w2ih_p, w2hh_p, b2_p, wlin_p, blin_p))
    block_bytes = CS * BT * Ip * 2 + CS * BT * Op * 4      # x (bf16) + out (f32)
    scratch_bytes = (4 * BT * Hp + CS * BT * 4 * Hp + CS * BT * Hp) * 4
    need = 2 * (weight_bytes + block_bytes) + scratch_bytes + (4 << 20)
    vmem_limit = int(min(_vmem_ceiling_bytes(), max(32 << 20, need)))

    full2d = lambda a: pl.BlockSpec(a.shape, lambda bt, sc: (0, 0))

    out_flat = pl.pallas_call(
        _make_kernel(CS, BT, Hp),
        out_shape=jax.ShapeDtypeStruct((n_bt, Sp * BT, Op), jnp.float32),
        grid=(n_bt, n_sc),
        in_specs=[
            pl.BlockSpec((None, CS * BT, Ip), lambda bt, sc: (bt, sc, 0)),  # x chunk
            full2d(wih1_p), full2d(b1_p), full2d(whh1_p),
            full2d(w2ih_p), full2d(w2hh_p), full2d(b2_p),
            full2d(wlin_p), full2d(blin_p),
        ],
        out_specs=pl.BlockSpec((None, CS * BT, Op), lambda bt, sc: (bt, sc, 0)),
        scratch_shapes=[
            pltpu.VMEM((BT, Hp), jnp.float32),            # h1 carry
            pltpu.VMEM((BT, Hp), jnp.float32),            # c1 carry
            pltpu.VMEM((BT, Hp), jnp.float32),            # h2 carry
            pltpu.VMEM((BT, Hp), jnp.float32),            # c2 carry
            pltpu.VMEM((CS * BT, 4 * Hp), jnp.float32),   # chunk layer-1 input proj
            pltpu.VMEM((CS * BT, Hp), jnp.float32),       # chunk h2 history
        ],
        compiler_params=pltpu.CompilerParams(
            dimension_semantics=("parallel", "arbitrary"),  # batch tiles || seq chunks
            vmem_limit_bytes=vmem_limit),
    )(x_p, wih1_p, b1_p, whh1_p, w2ih_p, w2hh_p, b2_p, wlin_p, blin_p)

    out = (out_flat.reshape(n_bt, Sp, BT, Op)
           .transpose(1, 0, 2, 3)
           .reshape(Sp, n_bt * BT, Op))
    return out[:S, :B, :O]


def ref_forward(x, p):
    """Pure-JAX f32 reference with identical PyTorch LSTM semantics."""
    S, B, _ = x.shape
    H = p["whh1"].shape[0]

    def cell(x_in, h, c, wih, whh, b):
        g = x_in @ wih + h @ whh + b
        i_g = jax.nn.sigmoid(g[:, 0 * H:1 * H])
        f_g = jax.nn.sigmoid(g[:, 1 * H:2 * H])
        g_g = jnp.tanh(g[:, 2 * H:3 * H])
        o_g = jax.nn.sigmoid(g[:, 3 * H:4 * H])
        c_new = f_g * c + i_g * g_g
        h_new = o_g * jnp.tanh(c_new)
        return h_new, c_new

    def step(carry, x_t):
        h1, c1, h2, c2 = carry
        h1, c1 = cell(x_t, h1, c1, p["wih1"], p["whh1"], p["b1"])
        h2, c2 = cell(h1, h2, c2, p["wih2"], p["whh2"], p["b2"])
        y = jnp.tanh(h2 @ p["wlin"] + p["blin"])
        return (h1, c1, h2, c2), y

    z = jnp.zeros((B, H), jnp.float32)
    _, ys = jax.lax.scan(step, (z, z, z, z), x)
    return ys


def make_params(key, input_size=3, hidden_size=4, output_size=1):
    """PyTorch-style U(-1/sqrt(H), 1/sqrt(H)) init. Stored pre-transposed:
    W_ih^T (in, 4H), W_hh^T (H, 4H), combined bias (1, 4H) = b_ih + b_hh."""
    H = hidden_size
    bound = 1.0 / jnp.sqrt(jnp.float32(H))
    ks = jax.random.split(key, 10)
    u = lambda k, shape: jax.random.uniform(k, shape, jnp.float32, -bound, bound)
    return {
        "wih1": u(ks[0], (input_size, 4 * H)),
        "whh1": u(ks[1], (H, 4 * H)),
        "b1":   u(ks[2], (1, 4 * H)) + u(ks[3], (1, 4 * H)),
        "wih2": u(ks[4], (H, 4 * H)),
        "whh2": u(ks[5], (H, 4 * H)),
        "b2":   u(ks[6], (1, 4 * H)) + u(ks[7], (1, 4 * H)),
        "wlin": u(ks[8], (H, output_size)),
        "blin": u(ks[9], (1, output_size)),
    }


if __name__ == "__main__":
    key = jax.random.PRNGKey(0)
    k_x, k_p = jax.random.split(key)

    S, B, I, H, O = 8, 2, 3, 4, 1   # seq=8, batch=2, input=3, hidden=4, output=1
    x = jax.random.normal(k_x, (S, B, I), jnp.float32)
    params = make_params(k_p, input_size=I, hidden_size=H, output_size=O)

    out = jax.block_until_ready(lstm_forward(x, params))
    ref = jax.block_until_ready(ref_forward(x, params))

    assert out.shape == (S, B, O), out.shape
    # bf16 MXU inputs (f32 accumulation / carries) => wider tolerance than pure f32.
    assert jnp.allclose(out, ref, atol=2e-2, rtol=2e-2), \
        f"max err {jnp.max(jnp.abs(out - ref))}"
    print("KERNEL_OK")
</pallas_src>

<mosaic_0001>
module attributes {stable_mosaic.version = 11 : i64} {
  func.func @kernel(%arg0: i32, %arg1: i32, %arg2: memref<1x64x128xbf16, #tpu.memory_space<vmem>>, %arg3: memref<128x512xbf16, #tpu.memory_space<vmem>>, %arg4: memref<1x512xf32, #tpu.memory_space<vmem>>, %arg5: memref<128x512xf32, #tpu.memory_space<vmem>>, %arg6: memref<128x512xf32, #tpu.memory_space<vmem>>, %arg7: memref<128x512xf32, #tpu.memory_space<vmem>>, %arg8: memref<1x512xf32, #tpu.memory_space<vmem>>, %arg9: memref<128x128xbf16, #tpu.memory_space<vmem>>, %arg10: memref<1x128xf32, #tpu.memory_space<vmem>>, %arg11: memref<1x64x128xf32, #tpu.memory_space<vmem>>, %arg12: memref<8x128xf32, #tpu.memory_space<vmem>>, %arg13: memref<8x128xf32, #tpu.memory_space<vmem>>, %arg14: memref<8x128xf32, #tpu.memory_space<vmem>>, %arg15: memref<8x128xf32, #tpu.memory_space<vmem>>, %arg16: memref<64x512xf32, #tpu.memory_space<vmem>>, %arg17: memref<64x128xf32, #tpu.memory_space<vmem>>) attributes {dimension_semantics = [#tpu.dimension_semantics<parallel>, #tpu.dimension_semantics<arbitrary>], iteration_bounds = array<i64: 1, 1>, scalar_prefetch = 0 : i64, scratch_operands = 6 : i64, tpu.core_type = #tpu.core_type<tc>, window_params = [{transform_indices = @transform_0, window_bounds = array<i64: 1, 64, 128>}, {pipeline_mode = #tpu.pipeline_mode<synchronous>, transform_indices = @transform_1, window_bounds = array<i64: 128, 512>}, {pipeline_mode = #tpu.pipeline_mode<synchronous>, transform_indices = @transform_2, window_bounds = array<i64: 1, 512>}, {pipeline_mode = #tpu.pipeline_mode<synchronous>, transform_indices = @transform_3, window_bounds = array<i64: 128, 512>}, {pipeline_mode = #tpu.pipeline_mode<synchronous>, transform_indices = @transform_4, window_bounds = array<i64: 128, 512>}, {pipeline_mode = #tpu.pipeline_mode<synchronous>, transform_indices = @transform_5, window_bounds = array<i64: 128, 512>}, {pipeline_mode = #tpu.pipeline_mode<synchronous>, transform_indices = @transform_6, window_bounds = array<i64: 1, 512>}, {pipeline_mode = #tpu.pipeline_mode<synchronous>, transform_indices = @transform_7, window_bounds = array<i64: 128, 128>}, {pipeline_mode = #tpu.pipeline_mode<synchronous>, transform_indices = @transform_8, window_bounds = array<i64: 1, 128>}, {transform_indices = @transform_9, window_bounds = array<i64: 1, 64, 128>}]} {
    %c0_i32 = arith.constant 0 : i32
    %0 = arith.cmpi eq, %arg1, %c0_i32 : i32
    %1 = arith.extui %0 : i1 to i32
    %c0_i32_0 = arith.constant 0 : i32
    %2 = arith.cmpi ne, %1, %c0_i32_0 : i32
    scf.if %2 {
      %cst_278 = arith.constant 0.000000e+00 : f32
      %649 = vector.broadcast %cst_278 : f32 to vector<8x128xf32>
      %c0_279 = arith.constant 0 : index
      %c0_280 = arith.constant 0 : index
      %650 = vector.load %arg12[%c0_279, %c0_280] : memref<8x128xf32, #tpu.memory_space<vmem>>, vector<8x128xf32>
      tpu.vector_store %arg12[%c0_279, %c0_280], %649 {strides = array<i32>} : memref<8x128xf32, #tpu.memory_space<vmem>>, vector<8x128xf32>,
      %c0_281 = arith.constant 0 : index
      %c0_282 = arith.constant 0 : index
      %651 = vector.load %arg13[%c0_281, %c0_282] : memref<8x128xf32, #tpu.memory_space<vmem>>, vector<8x128xf32>
      tpu.vector_store %arg13[%c0_281, %c0_282], %649 {strides = array<i32>} : memref<8x128xf32, #tpu.memory_space<vmem>>, vector<8x128xf32>,
      %c0_283 = arith.constant 0 : index
      %c0_284 = arith.constant 0 : index
      %652 = vector.load %arg14[%c0_283, %c0_284] : memref<8x128xf32, #tpu.memory_space<vmem>>, vector<8x128xf32>
      tpu.vector_store %arg14[%c0_283, %c0_284], %649 {strides = array<i32>} : memref<8x128xf32, #tpu.memory_space<vmem>>, vector<8x128xf32>,
      %c0_285 = arith.constant 0 : index
      %c0_286 = arith.constant 0 : index
      %653 = vector.load %arg15[%c0_285, %c0_286] : memref<8x128xf32, #tpu.memory_space<vmem>>, vector<8x128xf32>
      tpu.vector_store %arg15[%c0_285, %c0_286], %649 {strides = array<i32>} : memref<8x128xf32, #tpu.memory_space<vmem>>, vector<8x128xf32>,
    } else {
    }
    %c0 = arith.constant 0 : index
    %c0_1 = arith.constant 0 : index
    %c0_2 = arith.constant 0 : index
    %3 = vector.load %arg2[%c0, %c0_1, %c0_2] : memref<1x64x128xbf16, #tpu.memory_space<vmem>>, vector<1x64x128xbf16>
    %4 = vector.shape_cast %3 : vector<1x64x128xbf16> to vector<64x128xbf16>
    %c0_3 = arith.constant 0 : index
    %c0_4 = arith.constant 0 : index
    %5 = vector.load %arg3[%c0_3, %c0_4] : memref<128x512xbf16, #tpu.memory_space<vmem>>, vector<128x512xbf16>
    %cst = arith.constant dense<0.000000e+00> : vector<64x512xf32>
    %6 = tpu.matmul %4, %5, %cst {dimension_numbers = #tpu.dot_dimension_numbers<[1], [0], [0], [1], [0, 0, 1, 1], [], []>} : vector<64x128xbf16>, vector<128x512xbf16>, vector<64x512xf32> -> vector<64x512xf32>
    %c0_5 = arith.constant 0 : index
    %c0_6 = arith.constant 0 : index
    %7 = vector.load %arg4[%c0_5, %c0_6] : memref<1x512xf32, #tpu.memory_space<vmem>>, vector<1x512xf32>
    %8 = vector.broadcast %7 : vector<1x512xf32> to vector<64x512xf32>
    %9 = arith.addf %6, %8 : vector<64x512xf32>
    %c0_7 = arith.constant 0 : index
    %c0_8 = arith.constant 0 : index
    %10 = vector.load %arg16[%c0_7, %c0_8] : memref<64x512xf32, #tpu.memory_space<vmem>>, vector<64x512xf32>
    tpu.vector_store %arg16[%c0_7, %c0_8], %9 {strides = array<i32>} : memref<64x512xf32, #tpu.memory_space<vmem>>, vector<64x512xf32>,
    %c0_9 = arith.constant 0 : index
    %c0_10 = arith.constant 0 : index
    %11 = vector.load %arg8[%c0_9, %c0_10] : memref<1x512xf32, #tpu.memory_space<vmem>>, vector<1x512xf32>
    %12 = vector.shape_cast %11 : vector<1x512xf32> to vector<1x512xf32>
    %13 = vector.broadcast %12 : vector<1x512xf32> to vector<8x512xf32>
    %c0_11 = arith.constant 0 : index
    %c0_12 = arith.constant 0 : index
    %14 = vector.load %arg12[%c0_11, %c0_12] : memref<8x128xf32, #tpu.memory_space<vmem>>, vector<8x128xf32>
    %c0_13 = arith.constant 0 : index
    %c0_14 = arith.constant 0 : index
    %15 = vector.load %arg13[%c0_13, %c0_14] : memref<8x128xf32, #tpu.memory_space<vmem>>, vector<8x128xf32>
    %c0_15 = arith.constant 0 : index
    %c0_16 = arith.constant 0 : index
    %16 = vector.load %arg14[%c0_15, %c0_16] : memref<8x128xf32, #tpu.memory_space<vmem>>, vector<8x128xf32>
    %c0_17 = arith.constant 0 : index
    %c0_18 = arith.constant 0 : index
    %17 = vector.load %arg15[%c0_17, %c0_18] : memref<8x128xf32, #tpu.memory_space<vmem>>, vector<8x128xf32>
    %c0_i32_19 = arith.constant 0 : i32
    %c8_i32 = arith.constant 8 : i32
    %18 = arith.muli %c0_i32_19, %c8_i32 : i32
    %19 = tpu.assume_multiple %18, 8 : i32
    %20 = arith.index_cast %19 : i32 to index
    %c0_20 = arith.constant 0 : index
    %21 = vector.load %arg16[%20, %c0_20] : memref<64x512xf32, #tpu.memory_space<vmem>>, vector<8x512xf32>
    %c0_21 = arith.constant 0 : index
    %c0_22 = arith.constant 0 : index
    %22 = vector.load %arg5[%c0_21, %c0_22] : memref<128x512xf32, #tpu.memory_space<vmem>>, vector<128x512xf32>
    %cst_23 = arith.constant dense<0.000000e+00> : vector<8x512xf32>
    %23 = tpu.matmul %14, %22, %cst_23 {dimension_numbers = #tpu.dot_dimension_numbers<[1], [0], [0], [1], [0, 0, 1, 1], [], []>} : vector<8x128xf32>, vector<128x512xf32>, vector<8x512xf32> -> vector<8x512xf32>
    %24 = arith.addf %21, %23 : vector<8x512xf32>
    %25 = vector.extract_strided_slice %24 {offsets = [0, 0], sizes = [8, 128], strides = [1, 1]} : vector<8x512xf32> to vector<8x128xf32>
    %cst_24 = arith.constant 5.000000e-01 : f32
    %26 = vector.broadcast %cst_24 : f32 to vector<8x128xf32>
    %27 = arith.mulf %26, %25 : vector<8x128xf32>
    %28 = math.tanh %27 : vector<8x128xf32>
    %cst_25 = arith.constant 5.000000e-01 : f32
    %29 = vector.broadcast %cst_25 : f32 to vector<8x128xf32>
    %30 = arith.mulf %29, %28 : vector<8x128xf32>
    %cst_26 = arith.constant 5.000000e-01 : f32
    %31 = vector.broadcast %cst_26 : f32 to vector<8x128xf32>
    %32 = arith.addf %30, %31 : vector<8x128xf32>
    %33 = vector.extract_strided_slice %24 {offsets = [0, 128], sizes = [8, 128], strides = [1, 1]} : vector<8x512xf32> to vector<8x128xf32>
    %cst_27 = arith.constant 5.000000e-01 : f32
    %34 = vector.broadcast %cst_27 : f32 to vector<8x128xf32>
    %35 = arith.mulf %34, %33 : vector<8x128xf32>
    %36 = math.tanh %35 : vector<8x128xf32>
    %cst_28 = arith.constant 5.000000e-01 : f32
    %37 = vector.broadcast %cst_28 : f32 to vector<8x128xf32>
    %38 = arith.mulf %37, %36 : vector<8x128xf32>
    %cst_29 = arith.constant 5.000000e-01 : f32
    %39 = vector.broadcast %cst_29 : f32 to vector<8x128xf32>
    %40 = arith.addf %38, %39 : vector<8x128xf32>
    %41 = vector.extract_strided_slice %24 {offsets = [0, 256], sizes = [8, 128], strides = [1, 1]} : vector<8x512xf32> to vector<8x128xf32>
    %42 = math.tanh %41 : vector<8x128xf32>
    %43 = vector.extract_strided_slice %24 {offsets = [0, 384], sizes = [8, 128], strides = [1, 1]} : vector<8x512xf32> to vector<8x128xf32>
    %cst_30 = arith.constant 5.000000e-01 : f32
    %44 = vector.broadcast %cst_30 : f32 to vector<8x128xf32>
    %45 = arith.mulf %44, %43 : vector<8x128xf32>
    %46 = math.tanh %45 : vector<8x128xf32>
    %cst_31 = arith.constant 5.000000e-01 : f32
    %47 = vector.broadcast %cst_31 : f32 to vector<8x128xf32>
    %48 = arith.mulf %47, %46 : vector<8x128xf32>
    %cst_32 = arith.constant 5.000000e-01 : f32
    %49 = vector.broadcast %cst_32 : f32 to vector<8x128xf32>
    %50 = arith.addf %48, %49 : vector<8x128xf32>
    %51 = arith.mulf %40, %15 : vector<8x128xf32>
    %52 = arith.mulf %32, %42 : vector<8x128xf32>
    %53 = arith.addf %51, %52 : vector<8x128xf32>
    %54 = math.tanh %53 : vector<8x128xf32>
    %55 = arith.mulf %50, %54 : vector<8x128xf32>
    %c0_33 = arith.constant 0 : index
    %c0_34 = arith.constant 0 : index
    %56 = vector.load %arg6[%c0_33, %c0_34] : memref<128x512xf32, #tpu.memory_space<vmem>>, vector<128x512xf32>
    %cst_35 = arith.constant dense<0.000000e+00> : vector<8x512xf32>
    %57 = tpu.matmul %55, %56, %cst_35 {dimension_numbers = #tpu.dot_dimension_numbers<[1], [0], [0], [1], [0, 0, 1, 1], [], []>} : vector<8x128xf32>, vector<128x512xf32>, vector<8x512xf32> -> vector<8x512xf32>
    %c0_36 = arith.constant 0 : index
    %c0_37 = arith.constant 0 : index
    %58 = vector.load %arg7[%c0_36, %c0_37] : memref<128x512xf32, #tpu.memory_space<vmem>>, vector<128x512xf32>
    %cst_38 = arith.constant dense<0.000000e+00> : vector<8x512xf32>
    %59 = tpu.matmul %16, %58, %cst_38 {dimension_numbers = #tpu.dot_dimension_numbers<[1], [0], [0], [1], [0, 0, 1, 1], [], []>} : vector<8x128xf32>, vector<128x512xf32>, vector<8x512xf32> -> vector<8x512xf32>
    %60 = arith.addf %57, %59 : vector<8x512xf32>
    %61 = arith.addf %60, %13 : vector<8x512xf32>
    %62 = vector.extract_strided_slice %61 {offsets = [0, 0], sizes = [8, 128], strides = [1, 1]} : vector<8x512xf32> to vector<8x128xf32>
    %cst_39 = arith.constant 5.000000e-01 : f32
    %63 = vector.broadcast %cst_39 : f32 to vector<8x128xf32>
    %64 = arith.mulf %63, %62 : vector<8x128xf32>
    %65 = math.tanh %64 : vector<8x128xf32>
    %cst_40 = arith.constant 5.000000e-01 : f32
    %66 = vector.broadcast %cst_40 : f32 to vector<8x128xf32>
    %67 = arith.mulf %66, %65 : vector<8x128xf32>
    %cst_41 = arith.constant 5.000000e-01 : f32
    %68 = vector.broadcast %cst_41 : f32 to vector<8x128xf32>
    %69 = arith.addf %67, %68 : vector<8x128xf32>
    %70 = vector.extract_strided_slice %61 {offsets = [0, 128], sizes = [8, 128], strides = [1, 1]} : vector<8x512xf32> to vector<8x128xf32>
    %cst_42 = arith.constant 5.000000e-01 : f32
    %71 = vector.broadcast %cst_42 : f32 to vector<8x128xf32>
    %72 = arith.mulf %71, %70 : vector<8x128xf32>
    %73 = math.tanh %72 : vector<8x128xf32>
    %cst_43 = arith.constant 5.000000e-01 : f32
    %74 = vector.broadcast %cst_43 : f32 to vector<8x128xf32>
    %75 = arith.mulf %74, %73 : vector<8x128xf32>
    %cst_44 = arith.constant 5.000000e-01 : f32
    %76 = vector.broadcast %cst_44 : f32 to vector<8x128xf32>
    %77 = arith.addf %75, %76 : vector<8x128xf32>
    %78 = vector.extract_strided_slice %61 {offsets = [0, 256], sizes = [8, 128], strides = [1, 1]} : vector<8x512xf32> to vector<8x128xf32>
    %79 = math.tanh %78 : vector<8x128xf32>
    %80 = vector.extract_strided_slice %61 {offsets = [0, 384], sizes = [8, 128], strides = [1, 1]} : vector<8x512xf32> to vector<8x128xf32>
    %cst_45 = arith.constant 5.000000e-01 : f32
    %81 = vector.broadcast %cst_45 : f32 to vector<8x128xf32>
    %82 = arith.mulf %81, %80 : vector<8x128xf32>
    %83 = math.tanh %82 : vector<8x128xf32>
    %cst_46 = arith.constant 5.000000e-01 : f32
    %84 = vector.broadcast %cst_46 : f32 to vector<8x128xf32>
    %85 = arith.mulf %84, %83 : vector<8x128xf32>
    %cst_47 = arith.constant 5.000000e-01 : f32
    %86 = vector.broadcast %cst_47 : f32 to vector<8x128xf32>
    %87 = arith.addf %85, %86 : vector<8x128xf32>
    %88 = arith.mulf %77, %17 : vector<8x128xf32>
    %89 = arith.mulf %69, %79 : vector<8x128xf32>
    %90 = arith.addf %88, %89 : vector<8x128xf32>
    %91 = math.tanh %90 : vector<8x128xf32>
    %92 = arith.mulf %87, %91 : vector<8x128xf32>
    %93 = arith.index_cast %19 : i32 to index
    %c0_48 = arith.constant 0 : index
    %94 = vector.load %arg17[%93, %c0_48] : memref<64x128xf32, #tpu.memory_space<vmem>>, vector<8x128xf32>
    tpu.vector_store %arg17[%93, %c0_48], %92 {strides = array<i32>} : memref<64x128xf32, #tpu.memory_space<vmem>>, vector<8x128xf32>,
    %c1_i32 = arith.constant 1 : i32
    %c8_i32_49 = arith.constant 8 : i32
    %95 = arith.muli %c1_i32, %c8_i32_49 : i32
    %96 = tpu.assume_multiple %95, 8 : i32
    %97 = arith.index_cast %96 : i32 to index
    %c0_50 = arith.constant 0 : index
    %98 = vector.load %arg16[%97, %c0_50] : memref<64x512xf32, #tpu.memory_space<vmem>>, vector<8x512xf32>
    %c0_51 = arith.constant 0 : index
    %c0_52 = arith.constant 0 : index
    %99 = vector.load %arg5[%c0_51, %c0_52] : memref<128x512xf32, #tpu.memory_space<vmem>>, vector<128x512xf32>
    %cst_53 = arith.constant dense<0.000000e+00> : vector<8x512xf32>
    %100 = tpu.matmul %55, %99, %cst_53 {dimension_numbers = #tpu.dot_dimension_numbers<[1], [0], [0], [1], [0, 0, 1, 1], [], []>} : vector<8x128xf32>, vector<128x512xf32>, vector<8x512xf32> -> vector<8x512xf32>
    %101 = arith.addf %98, %100 : vector<8x512xf32>
    %102 = vector.extract_strided_slice %101 {offsets = [0, 0], sizes = [8, 128], strides = [1, 1]} : vector<8x512xf32> to vector<8x128xf32>
    %cst_54 = arith.constant 5.000000e-01 : f32
    %103 = vector.broadcast %cst_54 : f32 to vector<8x128xf32>
    %104 = arith.mulf %103, %102 : vector<8x128xf32>
    %105 = math.tanh %104 : vector<8x128xf32>
    %cst_55 = arith.constant 5.000000e-01 : f32
    %106 = vector.broadcast %cst_55 : f32 to vector<8x128xf32>
    %107 = arith.mulf %106, %105 : vector<8x128xf32>
    %cst_56 = arith.constant 5.000000e-01 : f32
    %108 = vector.broadcast %cst_56 : f32 to vector<8x128xf32>
    %109 = arith.addf %107, %108 : vector<8x128xf32>
    %110 = vector.extract_strided_slice %101 {offsets = [0, 128], sizes = [8, 128], strides = [1, 1]} : vector<8x512xf32> to vector<8x128xf32>
    %cst_57 = arith.constant 5.000000e-01 : f32
    %111 = vector.broadcast %cst_57 : f32 to vector<8x128xf32>
    %112 = arith.mulf %111, %110 : vector<8x128xf32>
    %113 = math.tanh %112 : vector<8x128xf32>
    %cst_58 = arith.constant 5.000000e-01 : f32
    %114 = vector.broadcast %cst_58 : f32 to vector<8x128xf32>
    %115 = arith.mulf %114, %113 : vector<8x128xf32>
    %cst_59 = arith.constant 5.000000e-01 : f32
    %116 = vector.broadcast %cst_59 : f32 to vector<8x128xf32>
    %117 = arith.addf %115, %116 : vector<8x128xf32>
    %118 = vector.extract_strided_slice %101 {offsets = [0, 256], sizes = [8, 128], strides = [1, 1]} : vector<8x512xf32> to vector<8x128xf32>
    %119 = math.tanh %118 : vector<8x128xf32>
    %120 = vector.extract_strided_slice %101 {offsets = [0, 384], sizes = [8, 128], strides = [1, 1]} : vector<8x512xf32> to vector<8x128xf32>
    %cst_60 = arith.constant 5.000000e-01 : f32
    %121 = vector.broadcast %cst_60 : f32 to vector<8x128xf32>
    %122 = arith.mulf %121, %120 : vector<8x128xf32>
    %123 = math.tanh %122 : vector<8x128xf32>
    %cst_61 = arith.constant 5.000000e-01 : f32
    %124 = vector.broadcast %cst_61 : f32 to vector<8x128xf32>
    %125 = arith.mulf %124, %123 : vector<8x128xf32>
    %cst_62 = arith.constant 5.000000e-01 : f32
    %126 = vector.broadcast %cst_62 : f32 to vector<8x128xf32>
    %127 = arith.addf %125, %126 : vector<8x128xf32>
    %128 = arith.mulf %117, %53 : vector<8x128xf32>
    %129 = arith.mulf %109, %119 : vector<8x128xf32>
    %130 = arith.addf %128, %129 : vector<8x128xf32>
    %131 = math.tanh %130 : vector<8x128xf32>
    %132 = arith.mulf %127, %131 : vector<8x128xf32>
    %c0_63 = arith.constant 0 : index
    %c0_64 = arith.constant 0 : index
    %133 = vector.load %arg6[%c0_63, %c0_64] : memref<128x512xf32, #tpu.memory_space<vmem>>, vector<128x512xf32>
    %cst_65 = arith.constant dense<0.000000e+00> : vector<8x512xf32>
    %134 = tpu.matmul %132, %133, %cst_65 {dimension_numbers = #tpu.dot_dimension_numbers<[1], [0], [0], [1], [0, 0, 1, 1], [], []>} : vector<8x128xf32>, vector<128x512xf32>, vector<8x512xf32> -> vector<8x512xf32>
    %c0_66 = arith.constant 0 : index
    %c0_67 = arith.constant 0 : index
    %135 = vector.load %arg7[%c0_66, %c0_67] : memref<128x512xf32, #tpu.memory_space<vmem>>, vector<128x512xf32>
    %cst_68 = arith.constant dense<0.000000e+00> : vector<8x512xf32>
    %136 = tpu.matmul %92, %135, %cst_68 {dimension_numbers = #tpu.dot_dimension_numbers<[1], [0], [0], [1], [0, 0, 1, 1], [], []>} : vector<8x128xf32>, vector<128x512xf32>, vector<8x512xf32> -> vector<8x512xf32>
    %137 = arith.addf %134, %136 : vector<8x512xf32>
    %138 = arith.addf %137, %13 : vector<8x512xf32>
    %139 = vector.extract_strided_slice %138 {offsets = [0, 0], sizes = [8, 128], strides = [1, 1]} : vector<8x512xf32> to vector<8x128xf32>
    %cst_69 = arith.constant 5.000000e-01 : f32
    %140 = vector.broadcast %cst_69 : f32 to vector<8x128xf32>
    %141 = arith.mulf %140, %139 : vector<8x128xf32>
    %142 = math.tanh %141 : vector<8x128xf32>
    %cst_70 = arith.constant 5.000000e-01 : f32
    %143 = vector.broadcast %cst_70 : f32 to vector<8x128xf32>
    %144 = arith.mulf %143, %142 : vector<8x128xf32>
    %cst_71 = arith.constant 5.000000e-01 : f32
    %145 = vector.broadcast %cst_71 : f32 to vector<8x128xf32>
    %146 = arith.addf %144, %145 : vector<8x128xf32>
    %147 = vector.extract_strided_slice %138 {offsets = [0, 128], sizes = [8, 128], strides = [1, 1]} : vector<8x512xf32> to vector<8x128xf32>
    %cst_72 = arith.constant 5.000000e-01 : f32
    %148 = vector.broadcast %cst_72 : f32 to vector<8x128xf32>
    %149 = arith.mulf %148, %147 : vector<8x128xf32>
    %150 = math.tanh %149 : vector<8x128xf32>
    %cst_73 = arith.constant 5.000000e-01 : f32
    %151 = vector.broadcast %cst_73 : f32 to vector<8x128xf32>
    %152 = arith.mulf %151, %150 : vector<8x128xf32>
    %cst_74 = arith.constant 5.000000e-01 : f32
    %153 = vector.broadcast %cst_74 : f32 to vector<8x128xf32>
    %154 = arith.addf %152, %153 : vector<8x128xf32>
    %155 = vector.extract_strided_slice %138 {offsets = [0, 256], sizes = [8, 128], strides = [1, 1]} : vector<8x512xf32> to vector<8x128xf32>
    %156 = math.tanh %155 : vector<8x128xf32>
    %157 = vector.extract_strided_slice %138 {offsets = [0, 384], sizes = [8, 128], strides = [1, 1]} : vector<8x512xf32> to vector<8x128xf32>
    %cst_75 = arith.constant 5.000000e-01 : f32
    %158 = vector.broadcast %cst_75 : f32 to vector<8x128xf32>
    %159 = arith.mulf %158, %157 : vector<8x128xf32>
    %160 = math.tanh %159 : vector<8x128xf32>
    %cst_76 = arith.constant 5.000000e-01 : f32
    %161 = vector.broadcast %cst_76 : f32 to vector<8x128xf32>
    %162 = arith.mulf %161, %160 : vector<8x128xf32>
    %cst_77 = arith.constant 5.000000e-01 : f32
    %163 = vector.broadcast %cst_77 : f32 to vector<8x128xf32>
    %164 = arith.addf %162, %163 : vector<8x128xf32>
    %165 = arith.mulf %154, %90 : vector<8x128xf32>
    %166 = arith.mulf %146, %156 : vector<8x128xf32>
    %167 = arith.addf %165, %166 : vector<8x128xf32>
    %168 = math.tanh %167 : vector<8x128xf32>
    %169 = arith.mulf %164, %168 : vector<8x128xf32>
    %170 = arith.index_cast %96 : i32 to index
    %c0_78 = arith.constant 0 : index
    %171 = vector.load %arg17[%170, %c0_78] : memref<64x128xf32, #tpu.memory_space<vmem>>, vector<8x128xf32>
    tpu.vector_store %arg17[%170, %c0_78], %169 {strides = array<i32>} : memref<64x128xf32, #tpu.memory_space<vmem>>, vector<8x128xf32>,
    %c2_i32 = arith.constant 2 : i32
    %c8_i32_79 = arith.constant 8 : i32
    %172 = arith.muli %c2_i32, %c8_i32_79 : i32
    %173 = tpu.assume_multiple %172, 8 : i32
    %174 = arith.index_cast %173 : i32 to index
    %c0_80 = arith.constant 0 : index
    %175 = vector.load %arg16[%174, %c0_80] : memref<64x512xf32, #tpu.memory_space<vmem>>, vector<8x512xf32>
    %c0_81 = arith.constant 0 : index
    %c0_82 = arith.constant 0 : index
    %176 = vector.load %arg5[%c0_81, %c0_82] : memref<128x512xf32, #tpu.memory_space<vmem>>, vector<128x512xf32>
    %cst_83 = arith.constant dense<0.000000e+00> : vector<8x512xf32>
    %177 = tpu.matmul %132, %176, %cst_83 {dimension_numbers = #tpu.dot_dimension_numbers<[1], [0], [0], [1], [0, 0, 1, 1], [], []>} : vector<8x128xf32>, vector<128x512xf32>, vector<8x512xf32> -> vector<8x512xf32>
    %178 = arith.addf %175, %177 : vector<8x512xf32>
    %179 = vector.extract_strided_slice %178 {offsets = [0, 0], sizes = [8, 128], strides = [1, 1]} : vector<8x512xf32> to vector<8x128xf32>
    %cst_84 = arith.constant 5.000000e-01 : f32
    %180 = vector.broadcast %cst_84 : f32 to vector<8x128xf32>
    %181 = arith.mulf %180, %179 : vector<8x128xf32>
    %182 = math.tanh %181 : vector<8x128xf32>
    %cst_85 = arith.constant 5.000000e-01 : f32
    %183 = vector.broadcast %cst_85 : f32 to vector<8x128xf32>
    %184 = arith.mulf %183, %182 : vector<8x128xf32>
    %cst_86 = arith.constant 5.000000e-01 : f32
    %185 = vector.broadcast %cst_86 : f32 to vector<8x128xf32>
    %186 = arith.addf %184, %185 : vector<8x128xf32>
    %187 = vector.extract_strided_slice %178 {offsets = [0, 128], sizes = [8, 128], strides = [1, 1]} : vector<8x512xf32> to vector<8x128xf32>
    %cst_87 = arith.constant 5.000000e-01 : f32
    %188 = vector.broadcast %cst_87 : f32 to vector<8x128xf32>
    %189 = arith.mulf %188, %187 : vector<8x128xf32>
    %190 = math.tanh %189 : vector<8x128xf32>
    %cst_88 = arith.constant 5.000000e-01 : f32
    %191 = vector.broadcast %cst_88 : f32 to vector<8x128xf32>
    %192 = arith.mulf %191, %190 : vector<8x128xf32>
    %cst_89 = arith.constant 5.000000e-01 : f32
    %193 = vector.broadcast %cst_89 : f32 to vector<8x128xf32>
    %194 = arith.addf %192, %193 : vector<8x128xf32>
    %195 = vector.extract_strided_slice %178 {offsets = [0, 256], sizes = [8, 128], strides = [1, 1]} : vector<8x512xf32> to vector<8x128xf32>
    %196 = math.tanh %195 : vector<8x128xf32>
    %197 = vector.extract_strided_slice %178 {offsets = [0, 384], sizes = [8, 128], strides = [1, 1]} : vector<8x512xf32> to vector<8x128xf32>
    %cst_90 = arith.constant 5.000000e-01 : f32
    %198 = vector.broadcast %cst_90 : f32 to vector<8x128xf32>
    %199 = arith.mulf %198, %197 : vector<8x128xf32>
    %200 = math.tanh %199 : vector<8x128xf32>
    %cst_91 = arith.constant 5.000000e-01 : f32
    %201 = vector.broadcast %cst_91 : f32 to vector<8x128xf32>
    %202 = arith.mulf %201, %200 : vector<8x128xf32>
    %cst_92 = arith.constant 5.000000e-01 : f32
    %203 = vector.broadcast %cst_92 : f32 to vector<8x128xf32>
    %204 = arith.addf %202, %203 : vector<8x128xf32>
    %205 = arith.mulf %194, %130 : vector<8x128xf32>
    %206 = arith.mulf %186, %196 : vector<8x128xf32>
    %207 = arith.addf %205, %206 : vector<8x128xf32>
    %208 = math.tanh %207 : vector<8x128xf32>
    %209 = arith.mulf %204, %208 : vector<8x128xf32>
    %c0_93 = arith.constant 0 : index
    %c0_94 = arith.constant 0 : index
    %210 = vector.load %arg6[%c0_93, %c0_94] : memref<128x512xf32, #tpu.memory_space<vmem>>, vector<128x512xf32>
    %cst_95 = arith.constant dense<0.000000e+00> : vector<8x512xf32>
    %211 = tpu.matmul %209, %210, %cst_95 {dimension_numbers = #tpu.dot_dimension_numbers<[1], [0], [0], [1], [0, 0, 1, 1], [], []>} : vector<8x128xf32>, vector<128x512xf32>, vector<8x512xf32> -> vector<8x512xf32>
    %c0_96 = arith.constant 0 : index
    %c0_97 = arith.constant 0 : index
    %212 = vector.load %arg7[%c0_96, %c0_97] : memref<128x512xf32, #tpu.memory_space<vmem>>, vector<128x512xf32>
    %cst_98 = arith.constant dense<0.000000e+00> : vector<8x512xf32>
    %213 = tpu.matmul %169, %212, %cst_98 {dimension_numbers = #tpu.dot_dimension_numbers<[1], [0], [0], [1], [0, 0, 1, 1], [], []>} : vector<8x128xf32>, vector<128x512xf32>, vector<8x512xf32> -> vector<8x512xf32>
    %214 = arith.addf %211, %213 : vector<8x512xf32>
    %215 = arith.addf %214, %13 : vector<8x512xf32>
    %216 = vector.extract_strided_slice %215 {offsets = [0, 0], sizes = [8, 128], strides = [1, 1]} : vector<8x512xf32> to vector<8x128xf32>
    %cst_99 = arith.constant 5.000000e-01 : f32
    %217 = vector.broadcast %cst_99 : f32 to vector<8x128xf32>
    %218 = arith.mulf %217, %216 : vector<8x128xf32>
    %219 = math.tanh %218 : vector<8x128xf32>
    %cst_100 = arith.constant 5.000000e-01 : f32
    %220 = vector.broadcast %cst_100 : f32 to vector<8x128xf32>
    %221 = arith.mulf %220, %219 : vector<8x128xf32>
    %cst_101 = arith.constant 5.000000e-01 : f32
    %222 = vector.broadcast %cst_101 : f32 to vector<8x128xf32>
    %223 = arith.addf %221, %222 : vector<8x128xf32>
    %224 = vector.extract_strided_slice %215 {offsets = [0, 128], sizes = [8, 128], strides = [1, 1]} : vector<8x512xf32> to vector<8x128xf32>
    %cst_102 = arith.constant 5.000000e-01 : f32
    %225 = vector.broadcast %cst_102 : f32 to vector<8x128xf32>
    %226 = arith.mulf %225, %224 : vector<8x128xf32>
    %227 = math.tanh %226 : vector<8x128xf32>
    %cst_103 = arith.constant 5.000000e-01 : f32
    %228 = vector.broadcast %cst_103 : f32 to vector<8x128xf32>
    %229 = arith.mulf %228, %227 : vector<8x128xf32>
    %cst_104 = arith.constant 5.000000e-01 : f32
    %230 = vector.broadcast %cst_104 : f32 to vector<8x128xf32>
    %231 = arith.addf %229, %230 : vector<8x128xf32>
    %232 = vector.extract_strided_slice %215 {offsets = [0, 256], sizes = [8, 128], strides = [1, 1]} : vector<8x512xf32> to vector<8x128xf32>
    %233 = math.tanh %232 : vector<8x128xf32>
    %234 = vector.extract_strided_slice %215 {offsets = [0, 384], sizes = [8, 128], strides = [1, 1]} : vector<8x512xf32> to vector<8x128xf32>
    %cst_105 = arith.constant 5.000000e-01 : f32
    %235 = vector.broadcast %cst_105 : f32 to vector<8x128xf32>
    %236 = arith.mulf %235, %234 : vector<8x128xf32>
    %237 = math.tanh %236 : vector<8x128xf32>
    %cst_106 = arith.constant 5.000000e-01 : f32
    %238 = vector.broadcast %cst_106 : f32 to vector<8x128xf32>
    %239 = arith.mulf %238, %237 : vector<8x128xf32>
    %cst_107 = arith.constant 5.000000e-01 : f32
    %240 = vector.broadcast %cst_107 : f32 to vector<8x128xf32>
    %241 = arith.addf %239, %240 : vector<8x128xf32>
    %242 = arith.mulf %231, %167 : vector<8x128xf32>
    %243 = arith.mulf %223, %233 : vector<8x128xf32>
    %244 = arith.addf %242, %243 : vector<8x128xf32>
    %245 = math.tanh %244 : vector<8x128xf32>
    %246 = arith.mulf %241, %245 : vector<8x128xf32>
    %247 = arith.index_cast %173 : i32 to index
    %c0_108 = arith.constant 0 : index
    %248 = vector.load %arg17[%247, %c0_108] : memref<64x128xf32, #tpu.memory_space<vmem>>, vector<8x128xf32>
    tpu.vector_store %arg17[%247, %c0_108], %246 {strides = array<i32>} : memref<64x128xf32, #tpu.memory_space<vmem>>, vector<8x128xf32>,
    %c3_i32 = arith.constant 3 : i32
    %c8_i32_109 = arith.constant 8 : i32
    %249 = arith.muli %c3_i32, %c8_i32_109 : i32
    %250 = tpu.assume_multiple %249, 8 : i32
    %251 = arith.index_cast %250 : i32 to index
    %c0_110 = arith.constant 0 : index
    %252 = vector.load %arg16[%251, %c0_110] : memref<64x512xf32, #tpu.memory_space<vmem>>, vector<8x512xf32>
    %c0_111 = arith.constant 0 : index
    %c0_112 = arith.constant 0 : index
    %253 = vector.load %arg5[%c0_111, %c0_112] : memref<128x512xf32, #tpu.memory_space<vmem>>, vector<128x512xf32>
    %cst_113 = arith.constant dense<0.000000e+00> : vector<8x512xf32>
    %254 = tpu.matmul %209, %253, %cst_113 {dimension_numbers = #tpu.dot_dimension_numbers<[1], [0], [0], [1], [0, 0, 1, 1], [], []>} : vector<8x128xf32>, vector<128x512xf32>, vector<8x512xf32> -> vector<8x512xf32>
    %255 = arith.addf %252, %254 : vector<8x512xf32>
    %256 = vector.extract_strided_slice %255 {offsets = [0, 0], sizes = [8, 128], strides = [1, 1]} : vector<8x512xf32> to vector<8x128xf32>
    %cst_114 = arith.constant 5.000000e-01 : f32
    %257 = vector.broadcast %cst_114 : f32 to vector<8x128xf32>
    %258 = arith.mulf %257, %256 : vector<8x128xf32>
    %259 = math.tanh %258 : vector<8x128xf32>
    %cst_115 = arith.constant 5.000000e-01 : f32
    %260 = vector.broadcast %cst_115 : f32 to vector<8x128xf32>
    %261 = arith.mulf %260, %259 : vector<8x128xf32>
    %cst_116 = arith.constant 5.000000e-01 : f32
    %262 = vector.broadcast %cst_116 : f32 to vector<8x128xf32>
    %263 = arith.addf %261, %262 : vector<8x128xf32>
    %264 = vector.extract_strided_slice %255 {offsets = [0, 128], sizes = [8, 128], strides = [1, 1]} : vector<8x512xf32> to vector<8x128xf32>
    %cst_117 = arith.constant 5.000000e-01 : f32
    %265 = vector.broadcast %cst_117 : f32 to vector<8x128xf32>
    %266 = arith.mulf %265, %264 : vector<8x128xf32>
    %267 = math.tanh %266 : vector<8x128xf32>
    %cst_118 = arith.constant 5.000000e-01 : f32
    %268 = vector.broadcast %cst_118 : f32 to vector<8x128xf32>
    %269 = arith.mulf %268, %267 : vector<8x128xf32>
    %cst_119 = arith.constant 5.000000e-01 : f32
    %270 = vector.broadcast %cst_119 : f32 to vector<8x128xf32>
    %271 = arith.addf %269, %270 : vector<8x128xf32>
    %272 = vector.extract_strided_slice %255 {offsets = [0, 256], sizes = [8, 128], strides = [1, 1]} : vector<8x512xf32> to vector<8x128xf32>
    %273 = math.tanh %272 : vector<8x128xf32>
    %274 = vector.extract_strided_slice %255 {offsets = [0, 384], sizes = [8, 128], strides = [1, 1]} : vector<8x512xf32> to vector<8x128xf32>
    %cst_120 = arith.constant 5.000000e-01 : f32
    %275 = vector.broadcast %cst_120 : f32 to vector<8x128xf32>
    %276 = arith.mulf %275, %274 : vector<8x128xf32>
    %277 = math.tanh %276 : vector<8x128xf32>
    %cst_121 = arith.constant 5.000000e-01 : f32
    %278 = vector.broadcast %cst_121 : f32 to vector<8x128xf32>
    %279 = arith.mulf %278, %277 : vector<8x128xf32>
    %cst_122 = arith.constant 5.000000e-01 : f32
    %280 = vector.broadcast %cst_122 : f32 to vector<8x128xf32>
    %281 = arith.addf %279, %280 : vector<8x128xf32>
    %282 = arith.mulf %271, %207 : vector<8x128xf32>
    %283 = arith.mulf %263, %273 : vector<8x128xf32>
    %284 = arith.addf %282, %283 : vector<8x128xf32>
    %285 = math.tanh %284 : vector<8x128xf32>
    %286 = arith.mulf %281, %285 : vector<8x128xf32>
    %c0_123 = arith.constant 0 : index
    %c0_124 = arith.constant 0 : index
    %287 = vector.load %arg6[%c0_123, %c0_124] : memref<128x512xf32, #tpu.memory_space<vmem>>, vector<128x512xf32>
    %cst_125 = arith.constant dense<0.000000e+00> : vector<8x512xf32>
    %288 = tpu.matmul %286, %287, %cst_125 {dimension_numbers = #tpu.dot_dimension_numbers<[1], [0], [0], [1], [0, 0, 1, 1], [], []>} : vector<8x128xf32>, vector<128x512xf32>, vector<8x512xf32> -> vector<8x512xf32>
    %c0_126 = arith.constant 0 : index
    %c0_127 = arith.constant 0 : index
    %289 = vector.load %arg7[%c0_126, %c0_127] : memref<128x512xf32, #tpu.memory_space<vmem>>, vector<128x512xf32>
    %cst_128 = arith.constant dense<0.000000e+00> : vector<8x512xf32>
    %290 = tpu.matmul %246, %289, %cst_128 {dimension_numbers = #tpu.dot_dimension_numbers<[1], [0], [0], [1], [0, 0, 1, 1], [], []>} : vector<8x128xf32>, vector<128x512xf32>, vector<8x512xf32> -> vector<8x512xf32>
    %291 = arith.addf %288, %290 : vector<8x512xf32>
    %292 = arith.addf %291, %13 : vector<8x512xf32>
    %293 = vector.extract_strided_slice %292 {offsets = [0, 0], sizes = [8, 128], strides = [1, 1]} : vector<8x512xf32> to vector<8x128xf32>
    %cst_129 = arith.constant 5.000000e-01 : f32
    %294 = vector.broadcast %cst_129 : f32 to vector<8x128xf32>
    %295 = arith.mulf %294, %293 : vector<8x128xf32>
    %296 = math.tanh %295 : vector<8x128xf32>
    %cst_130 = arith.constant 5.000000e-01 : f32
    %297 = vector.broadcast %cst_130 : f32 to vector<8x128xf32>
    %298 = arith.mulf %297, %296 : vector<8x128xf32>
    %cst_131 = arith.constant 5.000000e-01 : f32
    %299 = vector.broadcast %cst_131 : f32 to vector<8x128xf32>
    %300 = arith.addf %298, %299 : vector<8x128xf32>
    %301 = vector.extract_strided_slice %292 {offsets = [0, 128], sizes = [8, 128], strides = [1, 1]} : vector<8x512xf32> to vector<8x128xf32>
    %cst_132 = arith.constant 5.000000e-01 : f32
    %302 = vector.broadcast %cst_132 : f32 to vector<8x128xf32>
    %303 = arith.mulf %302, %301 : vector<8x128xf32>
    %304 = math.tanh %303 : vector<8x128xf32>
    %cst_133 = arith.constant 5.000000e-01 : f32
    %305 = vector.broadcast %cst_133 : f32 to vector<8x128xf32>
    %306 = arith.mulf %305, %304 : vector<8x128xf32>
    %cst_134 = arith.constant 5.000000e-01 : f32
    %307 = vector.broadcast %cst_134 : f32 to vector<8x128xf32>
    %308 = arith.addf %306, %307 : vector<8x128xf32>
    %309 = vector.extract_strided_slice %292 {offsets = [0, 256], sizes = [8, 128], strides = [1, 1]} : vector<8x512xf32> to vector<8x128xf32>
    %310 = math.tanh %309 : vector<8x128xf32>
    %311 = vector.extract_strided_slice %292 {offsets = [0, 384], sizes = [8, 128], strides = [1, 1]} : vector<8x512xf32> to vector<8x128xf32>
    %cst_135 = arith.constant 5.000000e-01 : f32
    %312 = vector.broadcast %cst_135 : f32 to vector<8x128xf32>
    %313 = arith.mulf %312, %311 : vector<8x128xf32>
    %314 = math.tanh %313 : vector<8x128xf32>
    %cst_136 = arith.constant 5.000000e-01 : f32
    %315 = vector.broadcast %cst_136 : f32 to vector<8x128xf32>
    %316 = arith.mulf %315, %314 : vector<8x128xf32>
    %cst_137 = arith.constant 5.000000e-01 : f32
    %317 = vector.broadcast %cst_137 : f32 to vector<8x128xf32>
    %318 = arith.addf %316, %317 : vector<8x128xf32>
    %319 = arith.mulf %308, %244 : vector<8x128xf32>
    %320 = arith.mulf %300, %310 : vector<8x128xf32>
    %321 = arith.addf %319, %320 : vector<8x128xf32>
    %322 = math.tanh %321 : vector<8x128xf32>
    %323 = arith.mulf %318, %322 : vector<8x128xf32>
    %324 = arith.index_cast %250 : i32 to index
    %c0_138 = arith.constant 0 : index
    %325 = vector.load %arg17[%324, %c0_138] : memref<64x128xf32, #tpu.memory_space<vmem>>, vector<8x128xf32>
    tpu.vector_store %arg17[%324, %c0_138], %323 {strides = array<i32>} : memref<64x128xf32, #tpu.memory_space<vmem>>, vector<8x128xf32>,
    %c4_i32 = arith.constant 4 : i32
    %c8_i32_139 = arith.constant 8 : i32
    %326 = arith.muli %c4_i32, %c8_i32_139 : i32
    %327 = tpu.assume_multiple %326, 8 : i32
    %328 = arith.index_cast %327 : i32 to index
    %c0_140 = arith.constant 0 : index
    %329 = vector.load %arg16[%328, %c0_140] : memref<64x512xf32, #tpu.memory_space<vmem>>, vector<8x512xf32>
    %c0_141 = arith.constant 0 : index
    %c0_142 = arith.constant 0 : index
    %330 = vector.load %arg5[%c0_141, %c0_142] : memref<128x512xf32, #tpu.memory_space<vmem>>, vector<128x512xf32>
    %cst_143 = arith.constant dense<0.000000e+00> : vector<8x512xf32>
    %331 = tpu.matmul %286, %330, %cst_143 {dimension_numbers = #tpu.dot_dimension_numbers<[1], [0], [0], [1], [0, 0, 1, 1], [], []>} : vector<8x128xf32>, vector<128x512xf32>, vector<8x512xf32> -> vector<8x512xf32>
    %332 = arith.addf %329, %331 : vector<8x512xf32>
    %333 = vector.extract_strided_slice %332 {offsets = [0, 0], sizes = [8, 128], strides = [1, 1]} : vector<8x512xf32> to vector<8x128xf32>
    %cst_144 = arith.constant 5.000000e-01 : f32
    %334 = vector.broadcast %cst_144 : f32 to vector<8x128xf32>
    %335 = arith.mulf %334, %333 : vector<8x128xf32>
    %336 = math.tanh %335 : vector<8x128xf32>
    %cst_145 = arith.constant 5.000000e-01 : f32
    %337 = vector.broadcast %cst_145 : f32 to vector<8x128xf32>
    %338 = arith.mulf %337, %336 : vector<8x128xf32>
    %cst_146 = arith.constant 5.000000e-01 : f32
    %339 = vector.broadcast %cst_146 : f32 to vector<8x128xf32>
    %340 = arith.addf %338, %339 : vector<8x128xf32>
    %341 = vector.extract_strided_slice %332 {offsets = [0, 128], sizes = [8, 128], strides = [1, 1]} : vector<8x512xf32> to vector<8x128xf32>
    %cst_147 = arith.constant 5.000000e-01 : f32
    %342 = vector.broadcast %cst_147 : f32 to vector<8x128xf32>
    %343 = arith.mulf %342, %341 : vector<8x128xf32>
    %344 = math.tanh %343 : vector<8x128xf32>
    %cst_148 = arith.constant 5.000000e-01 : f32
    %345 = vector.broadcast %cst_148 : f32 to vector<8x128xf32>
    %346 = arith.mulf %345, %344 : vector<8x128xf32>
    %cst_149 = arith.constant 5.000000e-01 : f32
    %347 = vector.broadcast %cst_149 : f32 to vector<8x128xf32>
    %348 = arith.addf %346, %347 : vector<8x128xf32>
    %349 = vector.extract_strided_slice %332 {offsets = [0, 256], sizes = [8, 128], strides = [1, 1]} : vector<8x512xf32> to vector<8x128xf32>
    %350 = math.tanh %349 : vector<8x128xf32>
    %351 = vector.extract_strided_slice %332 {offsets = [0, 384], sizes = [8, 128], strides = [1, 1]} : vector<8x512xf32> to vector<8x128xf32>
    %cst_150 = arith.constant 5.000000e-01 : f32
    %352 = vector.broadcast %cst_150 : f32 to vector<8x128xf32>
    %353 = arith.mulf %352, %351 : vector<8x128xf32>
    %354 = math.tanh %353 : vector<8x128xf32>
    %cst_151 = arith.constant 5.000000e-01 : f32
    %355 = vector.broadcast %cst_151 : f32 to vector<8x128xf32>
    %356 = arith.mulf %355, %354 : vector<8x128xf32>
    %cst_152 = arith.constant 5.000000e-01 : f32
    %357 = vector.broadcast %cst_152 : f32 to vector<8x128xf32>
    %358 = arith.addf %356, %357 : vector<8x128xf32>
    %359 = arith.mulf %348, %284 : vector<8x128xf32>
    %360 = arith.mulf %340, %350 : vector<8x128xf32>
    %361 = arith.addf %359, %360 : vector<8x128xf32>
    %362 = math.tanh %361 : vector<8x128xf32>
    %363 = arith.mulf %358, %362 : vector<8x128xf32>
    %c0_153 = arith.constant 0 : index
    %c0_154 = arith.constant 0 : index
    %364 = vector.load %arg6[%c0_153, %c0_154] : memref<128x512xf32, #tpu.memory_space<vmem>>, vector<128x512xf32>
    %cst_155 = arith.constant dense<0.000000e+00> : vector<8x512xf32>
    %365 = tpu.matmul %363, %364, %cst_155 {dimension_numbers = #tpu.dot_dimension_numbers<[1], [0], [0], [1], [0, 0, 1, 1], [], []>} : vector<8x128xf32>, vector<128x512xf32>, vector<8x512xf32> -> vector<8x512xf32>
    %c0_156 = arith.constant 0 : index
    %c0_157 = arith.constant 0 : index
    %366 = vector.load %arg7[%c0_156, %c0_157] : memref<128x512xf32, #tpu.memory_space<vmem>>, vector<128x512xf32>
    %cst_158 = arith.constant dense<0.000000e+00> : vector<8x512xf32>
    %367 = tpu.matmul %323, %366, %cst_158 {dimension_numbers = #tpu.dot_dimension_numbers<[1], [0], [0], [1], [0, 0, 1, 1], [], []>} : vector<8x128xf32>, vector<128x512xf32>, vector<8x512xf32> -> vector<8x512xf32>
    %368 = arith.addf %365, %367 : vector<8x512xf32>
    %369 = arith.addf %368, %13 : vector<8x512xf32>
    %370 = vector.extract_strided_slice %369 {offsets = [0, 0], sizes = [8, 128], strides = [1, 1]} : vector<8x512xf32> to vector<8x128xf32>
    %cst_159 = arith.constant 5.000000e-01 : f32
    %371 = vector.broadcast %cst_159 : f32 to vector<8x128xf32>
    %372 = arith.mulf %371, %370 : vector<8x128xf32>
    %373 = math.tanh %372 : vector<8x128xf32>
    %cst_160 = arith.constant 5.000000e-01 : f32
    %374 = vector.broadcast %cst_160 : f32 to vector<8x128xf32>
    %375 = arith.mulf %374, %373 : vector<8x128xf32>
    %cst_161 = arith.constant 5.000000e-01 : f32
    %376 = vector.broadcast %cst_161 : f32 to vector<8x128xf32>
    %377 = arith.addf %375, %376 : vector<8x128xf32>
    %378 = vector.extract_strided_slice %369 {offsets = [0, 128], sizes = [8, 128], strides = [1, 1]} : vector<8x512xf32> to vector<8x128xf32>
    %cst_162 = arith.constant 5.000000e-01 : f32
    %379 = vector.broadcast %cst_162 : f32 to vector<8x128xf32>
    %380 = arith.mulf %379, %378 : vector<8x128xf32>
    %381 = math.tanh %380 : vector<8x128xf32>
    %cst_163 = arith.constant 5.000000e-01 : f32
    %382 = vector.broadcast %cst_163 : f32 to vector<8x128xf32>
    %383 = arith.mulf %382, %381 : vector<8x128xf32>
    %cst_164 = arith.constant 5.000000e-01 : f32
    %384 = vector.broadcast %cst_164 : f32 to vector<8x128xf32>
    %385 = arith.addf %383, %384 : vector<8x128xf32>
    %386 = vector.extract_strided_slice %369 {offsets = [0, 256], sizes = [8, 128], strides = [1, 1]} : vector<8x512xf32> to vector<8x128xf32>
    %387 = math.tanh %386 : vector<8x128xf32>
    %388 = vector.extract_strided_slice %369 {offsets = [0, 384], sizes = [8, 128], strides = [1, 1]} : vector<8x512xf32> to vector<8x128xf32>
    %cst_165 = arith.constant 5.000000e-01 : f32
    %389 = vector.broadcast %cst_165 : f32 to vector<8x128xf32>
    %390 = arith.mulf %389, %388 : vector<8x128xf32>
    %391 = math.tanh %390 : vector<8x128xf32>
    %cst_166 = arith.constant 5.000000e-01 : f32
    %392 = vector.broadcast %cst_166 : f32 to vector<8x128xf32>
    %393 = arith.mulf %392, %391 : vector<8x128xf32>
    %cst_167 = arith.constant 5.000000e-01 : f32
    %394 = vector.broadcast %cst_167 : f32 to vector<8x128xf32>
    %395 = arith.addf %393, %394 : vector<8x128xf32>
    %396 = arith.mulf %385, %321 : vector<8x128xf32>
    %397 = arith.mulf %377, %387 : vector<8x128xf32>
    %398 = arith.addf %396, %397 : vector<8x128xf32>
    %399 = math.tanh %398 : vector<8x128xf32>
    %400 = arith.mulf %395, %399 : vector<8x128xf32>
    %401 = arith.index_cast %327 : i32 to index
    %c0_168 = arith.constant 0 : index
    %402 = vector.load %arg17[%401, %c0_168] : memref<64x128xf32, #tpu.memory_space<vmem>>, vector<8x128xf32>
    tpu.vector_store %arg17[%401, %c0_168], %400 {strides = array<i32>} : memref<64x128xf32, #tpu.memory_space<vmem>>, vector<8x128xf32>,
    %c5_i32 = arith.constant 5 : i32
    %c8_i32_169 = arith.constant 8 : i32
    %403 = arith.muli %c5_i32, %c8_i32_169 : i32
    %404 = tpu.assume_multiple %403, 8 : i32
    %405 = arith.index_cast %404 : i32 to index
    %c0_170 = arith.constant 0 : index
    %406 = vector.load %arg16[%405, %c0_170] : memref<64x512xf32, #tpu.memory_space<vmem>>, vector<8x512xf32>
    %c0_171 = arith.constant 0 : index
    %c0_172 = arith.constant 0 : index
    %407 = vector.load %arg5[%c0_171, %c0_172] : memref<128x512xf32, #tpu.memory_space<vmem>>, vector<128x512xf32>
    %cst_173 = arith.constant dense<0.000000e+00> : vector<8x512xf32>
    %408 = tpu.matmul %363, %407, %cst_173 {dimension_numbers = #tpu.dot_dimension_numbers<[1], [0], [0], [1], [0, 0, 1, 1], [], []>} : vector<8x128xf32>, vector<128x512xf32>, vector<8x512xf32> -> vector<8x512xf32>
    %409 = arith.addf %406, %408 : vector<8x512xf32>
    %410 = vector.extract_strided_slice %409 {offsets = [0, 0], sizes = [8, 128], strides = [1, 1]} : vector<8x512xf32> to vector<8x128xf32>
    %cst_174 = arith.constant 5.000000e-01 : f32
    %411 = vector.broadcast %cst_174 : f32 to vector<8x128xf32>
    %412 = arith.mulf %411, %410 : vector<8x128xf32>
    %413 = math.tanh %412 : vector<8x128xf32>
    %cst_175 = arith.constant 5.000000e-01 : f32
    %414 = vector.broadcast %cst_175 : f32 to vector<8x128xf32>
    %415 = arith.mulf %414, %413 : vector<8x128xf32>
    %cst_176 = arith.constant 5.000000e-01 : f32
    %416 = vector.broadcast %cst_176 : f32 to vector<8x128xf32>
    %417 = arith.addf %415, %416 : vector<8x128xf32>
    %418 = vector.extract_strided_slice %409 {offsets = [0, 128], sizes = [8, 128], strides = [1, 1]} : vector<8x512xf32> to vector<8x128xf32>
    %cst_177 = arith.constant 5.000000e-01 : f32
    %419 = vector.broadcast %cst_177 : f32 to vector<8x128xf32>
    %420 = arith.mulf %419, %418 : vector<8x128xf32>
    %421 = math.tanh %420 : vector<8x128xf32>
    %cst_178 = arith.constant 5.000000e-01 : f32
    %422 = vector.broadcast %cst_178 : f32 to vector<8x128xf32>
    %423 = arith.mulf %422, %421 : vector<8x128xf32>
    %cst_179 = arith.constant 5.000000e-01 : f32
    %424 = vector.broadcast %cst_179 : f32 to vector<8x128xf32>
    %425 = arith.addf %423, %424 : vector<8x128xf32>
    %426 = vector.extract_strided_slice %409 {offsets = [0, 256], sizes = [8, 128], strides = [1, 1]} : vector<8x512xf32> to vector<8x128xf32>
    %427 = math.tanh %426 : vector<8x128xf32>
    %428 = vector.extract_strided_slice %409 {offsets = [0, 384], sizes = [8, 128], strides = [1, 1]} : vector<8x512xf32> to vector<8x128xf32>
    %cst_180 = arith.constant 5.000000e-01 : f32
    %429 = vector.broadcast %cst_180 : f32 to vector<8x128xf32>
    %430 = arith.mulf %429, %428 : vector<8x128xf32>
    %431 = math.tanh %430 : vector<8x128xf32>
    %cst_181 = arith.constant 5.000000e-01 : f32
    %432 = vector.broadcast %cst_181 : f32 to vector<8x128xf32>
    %433 = arith.mulf %432, %431 : vector<8x128xf32>
    %cst_182 = arith.constant 5.000000e-01 : f32
    %434 = vector.broadcast %cst_182 : f32 to vector<8x128xf32>
    %435 = arith.addf %433, %434 : vector<8x128xf32>
    %436 = arith.mulf %425, %361 : vector<8x128xf32>
    %437 = arith.mulf %417, %427 : vector<8x128xf32>
    %438 = arith.addf %436, %437 : vector<8x128xf32>
    %439 = math.tanh %438 : vector<8x128xf32>
    %440 = arith.mulf %435, %439 : vector<8x128xf32>
    %c0_183 = arith.constant 0 : index
    %c0_184 = arith.constant 0 : index
    %441 = vector.load %arg6[%c0_183, %c0_184] : memref<128x512xf32, #tpu.memory_space<vmem>>, vector<128x512xf32>
    %cst_185 = arith.constant dense<0.000000e+00> : vector<8x512xf32>
    %442 = tpu.matmul %440, %441, %cst_185 {dimension_numbers = #tpu.dot_dimension_numbers<[1], [0], [0], [1], [0, 0, 1, 1], [], []>} : vector<8x128xf32>, vector<128x512xf32>, vector<8x512xf32> -> vector<8x512xf32>
    %c0_186 = arith.constant 0 : index
    %c0_187 = arith.constant 0 : index
    %443 = vector.load %arg7[%c0_186, %c0_187] : memref<128x512xf32, #tpu.memory_space<vmem>>, vector<128x512xf32>
    %cst_188 = arith.constant dense<0.000000e+00> : vector<8x512xf32>
    %444 = tpu.matmul %400, %443, %cst_188 {dimension_numbers = #tpu.dot_dimension_numbers<[1], [0], [0], [1], [0, 0, 1, 1], [], []>} : vector<8x128xf32>, vector<128x512xf32>, vector<8x512xf32> -> vector<8x512xf32>
    %445 = arith.addf %442, %444 : vector<8x512xf32>
    %446 = arith.addf %445, %13 : vector<8x512xf32>
    %447 = vector.extract_strided_slice %446 {offsets = [0, 0], sizes = [8, 128], strides = [1, 1]} : vector<8x512xf32> to vector<8x128xf32>
    %cst_189 = arith.constant 5.000000e-01 : f32
    %448 = vector.broadcast %cst_189 : f32 to vector<8x128xf32>
    %449 = arith.mulf %448, %447 : vector<8x128xf32>
    %450 = math.tanh %449 : vector<8x128xf32>
    %cst_190 = arith.constant 5.000000e-01 : f32
    %451 = vector.broadcast %cst_190 : f32 to vector<8x128xf32>
    %452 = arith.mulf %451, %450 : vector<8x128xf32>
    %cst_191 = arith.constant 5.000000e-01 : f32
    %453 = vector.broadcast %cst_191 : f32 to vector<8x128xf32>
    %454 = arith.addf %452, %453 : vector<8x128xf32>
    %455 = vector.extract_strided_slice %446 {offsets = [0, 128], sizes = [8, 128], strides = [1, 1]} : vector<8x512xf32> to vector<8x128xf32>
    %cst_192 = arith.constant 5.000000e-01 : f32
    %456 = vector.broadcast %cst_192 : f32 to vector<8x128xf32>
    %457 = arith.mulf %456, %455 : vector<8x128xf32>
    %458 = math.tanh %457 : vector<8x128xf32>
    %cst_193 = arith.constant 5.000000e-01 : f32
    %459 = vector.broadcast %cst_193 : f32 to vector<8x128xf32>
    %460 = arith.mulf %459, %458 : vector<8x128xf32>
    %cst_194 = arith.constant 5.000000e-01 : f32
    %461 = vector.broadcast %cst_194 : f32 to vector<8x128xf32>
    %462 = arith.addf %460, %461 : vector<8x128xf32>
    %463 = vector.extract_strided_slice %446 {offsets = [0, 256], sizes = [8, 128], strides = [1, 1]} : vector<8x512xf32> to vector<8x128xf32>
    %464 = math.tanh %463 : vector<8x128xf32>
    %465 = vector.extract_strided_slice %446 {offsets = [0, 384], sizes = [8, 128], strides = [1, 1]} : vector<8x512xf32> to vector<8x128xf32>
    %cst_195 = arith.constant 5.000000e-01 : f32
    %466 = vector.broadcast %cst_195 : f32 to vector<8x128xf32>
    %467 = arith.mulf %466, %465 : vector<8x128xf32>
    %468 = math.tanh %467 : vector<8x128xf32>
    %cst_196 = arith.constant 5.000000e-01 : f32
    %469 = vector.broadcast %cst_196 : f32 to vector<8x128xf32>
    %470 = arith.mulf %469, %468 : vector<8x128xf32>
    %cst_197 = arith.constant 5.000000e-01 : f32
    %471 = vector.broadcast %cst_197 : f32 to vector<8x128xf32>
    %472 = arith.addf %470, %471 : vector<8x128xf32>
    %473 = arith.mulf %462, %398 : vector<8x128xf32>
    %474 = arith.mulf %454, %464 : vector<8x128xf32>
    %475 = arith.addf %473, %474 : vector<8x128xf32>
    %476 = math.tanh %475 : vector<8x128xf32>
    %477 = arith.mulf %472, %476 : vector<8x128xf32>
    %478 = arith.index_cast %404 : i32 to index
    %c0_198 = arith.constant 0 : index
    %479 = vector.load %arg17[%478, %c0_198] : memref<64x128xf32, #tpu.memory_space<vmem>>, vector<8x128xf32>
    tpu.vector_store %arg17[%478, %c0_198], %477 {strides = array<i32>} : memref<64x128xf32, #tpu.memory_space<vmem>>, vector<8x128xf32>,
    %c6_i32 = arith.constant 6 : i32
    %c8_i32_199 = arith.constant 8 : i32
    %480 = arith.muli %c6_i32, %c8_i32_199 : i32
    %481 = tpu.assume_multiple %480, 8 : i32
    %482 = arith.index_cast %481 : i32 to index
    %c0_200 = arith.constant 0 : index
    %483 = vector.load %arg16[%482, %c0_200] : memref<64x512xf32, #tpu.memory_space<vmem>>, vector<8x512xf32>
    %c0_201 = arith.constant 0 : index
    %c0_202 = arith.constant 0 : index
    %484 = vector.load %arg5[%c0_201, %c0_202] : memref<128x512xf32, #tpu.memory_space<vmem>>, vector<128x512xf32>
    %cst_203 = arith.constant dense<0.000000e+00> : vector<8x512xf32>
    %485 = tpu.matmul %440, %484, %cst_203 {dimension_numbers = #tpu.dot_dimension_numbers<[1], [0], [0], [1], [0, 0, 1, 1], [], []>} : vector<8x128xf32>, vector<128x512xf32>, vector<8x512xf32> -> vector<8x512xf32>
    %486 = arith.addf %483, %485 : vector<8x512xf32>
    %487 = vector.extract_strided_slice %486 {offsets = [0, 0], sizes = [8, 128], strides = [1, 1]} : vector<8x512xf32> to vector<8x128xf32>
    %cst_204 = arith.constant 5.000000e-01 : f32
    %488 = vector.broadcast %cst_204 : f32 to vector<8x128xf32>
    %489 = arith.mulf %488, %487 : vector<8x128xf32>
    %490 = math.tanh %489 : vector<8x128xf32>
    %cst_205 = arith.constant 5.000000e-01 : f32
    %491 = vector.broadcast %cst_205 : f32 to vector<8x128xf32>
    %492 = arith.mulf %491, %490 : vector<8x128xf32>
    %cst_206 = arith.constant 5.000000e-01 : f32
    %493 = vector.broadcast %cst_206 : f32 to vector<8x128xf32>
    %494 = arith.addf %492, %493 : vector<8x128xf32>
    %495 = vector.extract_strided_slice %486 {offsets = [0, 128], sizes = [8, 128], strides = [1, 1]} : vector<8x512xf32> to vector<8x128xf32>
    %cst_207 = arith.constant 5.000000e-01 : f32
    %496 = vector.broadcast %cst_207 : f32 to vector<8x128xf32>
    %497 = arith.mulf %496, %495 : vector<8x128xf32>
    %498 = math.tanh %497 : vector<8x128xf32>
    %cst_208 = arith.constant 5.000000e-01 : f32
    %499 = vector.broadcast %cst_208 : f32 to vector<8x128xf32>
    %500 = arith.mulf %499, %498 : vector<8x128xf32>
    %cst_209 = arith.constant 5.000000e-01 : f32
    %501 = vector.broadcast %cst_209 : f32 to vector<8x128xf32>
    %502 = arith.addf %500, %501 : vector<8x128xf32>
    %503 = vector.extract_strided_slice %486 {offsets = [0, 256], sizes = [8, 128], strides = [1, 1]} : vector<8x512xf32> to vector<8x128xf32>
    %504 = math.tanh %503 : vector<8x128xf32>
    %505 = vector.extract_strided_slice %486 {offsets = [0, 384], sizes = [8, 128], strides = [1, 1]} : vector<8x512xf32> to vector<8x128xf32>
    %cst_210 = arith.constant 5.000000e-01 : f32
    %506 = vector.broadcast %cst_210 : f32 to vector<8x128xf32>
    %507 = arith.mulf %506, %505 : vector<8x128xf32>
    %508 = math.tanh %507 : vector<8x128xf32>
    %cst_211 = arith.constant 5.000000e-01 : f32
    %509 = vector.broadcast %cst_211 : f32 to vector<8x128xf32>
    %510 = arith.mulf %509, %508 : vector<8x128xf32>
    %cst_212 = arith.constant 5.000000e-01 : f32
    %511 = vector.broadcast %cst_212 : f32 to vector<8x128xf32>
    %512 = arith.addf %510, %511 : vector<8x128xf32>
    %513 = arith.mulf %502, %438 : vector<8x128xf32>
    %514 = arith.mulf %494, %504 : vector<8x128xf32>
    %515 = arith.addf %513, %514 : vector<8x128xf32>
    %516 = math.tanh %515 : vector<8x128xf32>
    %517 = arith.mulf %512, %516 : vector<8x128xf32>
    %c0_213 = arith.constant 0 : index
    %c0_214 = arith.constant 0 : index
    %518 = vector.load %arg6[%c0_213, %c0_214] : memref<128x512xf32, #tpu.memory_space<vmem>>, vector<128x512xf32>
    %cst_215 = arith.constant dense<0.000000e+00> : vector<8x512xf32>
    %519 = tpu.matmul %517, %518, %cst_215 {dimension_numbers = #tpu.dot_dimension_numbers<[1], [0], [0], [1], [0, 0, 1, 1], [], []>} : vector<8x128xf32>, vector<128x512xf32>, vector<8x512xf32> -> vector<8x512xf32>
    %c0_216 = arith.constant 0 : index
    %c0_217 = arith.constant 0 : index
    %520 = vector.load %arg7[%c0_216, %c0_217] : memref<128x512xf32, #tpu.memory_space<vmem>>, vector<128x512xf32>
    %cst_218 = arith.constant dense<0.000000e+00> : vector<8x512xf32>
    %521 = tpu.matmul %477, %520, %cst_218 {dimension_numbers = #tpu.dot_dimension_numbers<[1], [0], [0], [1], [0, 0, 1, 1], [], []>} : vector<8x128xf32>, vector<128x512xf32>, vector<8x512xf32> -> vector<8x512xf32>
    %522 = arith.addf %519, %521 : vector<8x512xf32>
    %523 = arith.addf %522, %13 : vector<8x512xf32>
    %524 = vector.extract_strided_slice %523 {offsets = [0, 0], sizes = [8, 128], strides = [1, 1]} : vector<8x512xf32> to vector<8x128xf32>
    %cst_219 = arith.constant 5.000000e-01 : f32
    %525 = vector.broadcast %cst_219 : f32 to vector<8x128xf32>
    %526 = arith.mulf %525, %524 : vector<8x128xf32>
    %527 = math.tanh %526 : vector<8x128xf32>
    %cst_220 = arith.constant 5.000000e-01 : f32
    %528 = vector.broadcast %cst_220 : f32 to vector<8x128xf32>
    %529 = arith.mulf %528, %527 : vector<8x128xf32>
    %cst_221 = arith.constant 5.000000e-01 : f32
    %530 = vector.broadcast %cst_221 : f32 to vector<8x128xf32>
    %531 = arith.addf %529, %530 : vector<8x128xf32>
    %532 = vector.extract_strided_slice %523 {offsets = [0, 128], sizes = [8, 128], strides = [1, 1]} : vector<8x512xf32> to vector<8x128xf32>
    %cst_222 = arith.constant 5.000000e-01 : f32
    %533 = vector.broadcast %cst_222 : f32 to vector<8x128xf32>
    %534 = arith.mulf %533, %532 : vector<8x128xf32>
    %535 = math.tanh %534 : vector<8x128xf32>
    %cst_223 = arith.constant 5.000000e-01 : f32
    %536 = vector.broadcast %cst_223 : f32 to vector<8x128xf32>
    %537 = arith.mulf %536, %535 : vector<8x128xf32>
    %cst_224 = arith.constant 5.000000e-01 : f32
    %538 = vector.broadcast %cst_224 : f32 to vector<8x128xf32>
    %539 = arith.addf %537, %538 : vector<8x128xf32>
    %540 = vector.extract_strided_slice %523 {offsets = [0, 256], sizes = [8, 128], strides = [1, 1]} : vector<8x512xf32> to vector<8x128xf32>
    %541 = math.tanh %540 : vector<8x128xf32>
    %542 = vector.extract_strided_slice %523 {offsets = [0, 384], sizes = [8, 128], strides = [1, 1]} : vector<8x512xf32> to vector<8x128xf32>
    %cst_225 = arith.constant 5.000000e-01 : f32
    %543 = vector.broadcast %cst_225 : f32 to vector<8x128xf32>
    %544 = arith.mulf %543, %542 : vector<8x128xf32>
    %545 = math.tanh %544 : vector<8x128xf32>
    %cst_226 = arith.constant 5.000000e-01 : f32
    %546 = vector.broadcast %cst_226 : f32 to vector<8x128xf32>
    %547 = arith.mulf %546, %545 : vector<8x128xf32>
    %cst_227 = arith.constant 5.000000e-01 : f32
    %548 = vector.broadcast %cst_227 : f32 to vector<8x128xf32>
    %549 = arith.addf %547, %548 : vector<8x128xf32>
    %550 = arith.mulf %539, %475 : vector<8x128xf32>
    %551 = arith.mulf %531, %541 : vector<8x128xf32>
    %552 = arith.addf %550, %551 : vector<8x128xf32>
    %553 = math.tanh %552 : vector<8x128xf32>
    %554 = arith.mulf %549, %553 : vector<8x128xf32>
    %555 = arith.index_cast %481 : i32 to index
    %c0_228 = arith.constant 0 : index
    %556 = vector.load %arg17[%555, %c0_228] : memref<64x128xf32, #tpu.memory_space<vmem>>, vector<8x128xf32>
    tpu.vector_store %arg17[%555, %c0_228], %554 {strides = array<i32>} : memref<64x128xf32, #tpu.memory_space<vmem>>, vector<8x128xf32>,
    %c7_i32 = arith.constant 7 : i32
    %c8_i32_229 = arith.constant 8 : i32
    %557 = arith.muli %c7_i32, %c8_i32_229 : i32
    %558 = tpu.assume_multiple %557, 8 : i32
    %559 = arith.index_cast %558 : i32 to index
    %c0_230 = arith.constant 0 : index
    %560 = vector.load %arg16[%559, %c0_230] : memref<64x512xf32, #tpu.memory_space<vmem>>, vector<8x512xf32>
    %c0_231 = arith.constant 0 : index
    %c0_232 = arith.constant 0 : index
    %561 = vector.load %arg5[%c0_231, %c0_232] : memref<128x512xf32, #tpu.memory_space<vmem>>, vector<128x512xf32>
    %cst_233 = arith.constant dense<0.000000e+00> : vector<8x512xf32>
    %562 = tpu.matmul %517, %561, %cst_233 {dimension_numbers = #tpu.dot_dimension_numbers<[1], [0], [0], [1], [0, 0, 1, 1], [], []>} : vector<8x128xf32>, vector<128x512xf32>, vector<8x512xf32> -> vector<8x512xf32>
    %563 = arith.addf %560, %562 : vector<8x512xf32>
    %564 = vector.extract_strided_slice %563 {offsets = [0, 0], sizes = [8, 128], strides = [1, 1]} : vector<8x512xf32> to vector<8x128xf32>
    %cst_234 = arith.constant 5.000000e-01 : f32
    %565 = vector.broadcast %cst_234 : f32 to vector<8x128xf32>
    %566 = arith.mulf %565, %564 : vector<8x128xf32>
    %567 = math.tanh %566 : vector<8x128xf32>
    %cst_235 = arith.constant 5.000000e-01 : f32
    %568 = vector.broadcast %cst_235 : f32 to vector<8x128xf32>
    %569 = arith.mulf %568, %567 : vector<8x128xf32>
    %cst_236 = arith.constant 5.000000e-01 : f32
    %570 = vector.broadcast %cst_236 : f32 to vector<8x128xf32>
    %571 = arith.addf %569, %570 : vector<8x128xf32>
    %572 = vector.extract_strided_slice %563 {offsets = [0, 128], sizes = [8, 128], strides = [1, 1]} : vector<8x512xf32> to vector<8x128xf32>
    %cst_237 = arith.constant 5.000000e-01 : f32
    %573 = vector.broadcast %cst_237 : f32 to vector<8x128xf32>
    %574 = arith.mulf %573, %572 : vector<8x128xf32>
    %575 = math.tanh %574 : vector<8x128xf32>
    %cst_238 = arith.constant 5.000000e-01 : f32
    %576 = vector.broadcast %cst_238 : f32 to vector<8x128xf32>
    %577 = arith.mulf %576, %575 : vector<8x128xf32>
    %cst_239 = arith.constant 5.000000e-01 : f32
    %578 = vector.broadcast %cst_239 : f32 to vector<8x128xf32>
    %579 = arith.addf %577, %578 : vector<8x128xf32>
    %580 = vector.extract_strided_slice %563 {offsets = [0, 256], sizes = [8, 128], strides = [1, 1]} : vector<8x512xf32> to vector<8x128xf32>
    %581 = math.tanh %580 : vector<8x128xf32>
    %582 = vector.extract_strided_slice %563 {offsets = [0, 384], sizes = [8, 128], strides = [1, 1]} : vector<8x512xf32> to vector<8x128xf32>
    %cst_240 = arith.constant 5.000000e-01 : f32
    %583 = vector.broadcast %cst_240 : f32 to vector<8x128xf32>
    %584 = arith.mulf %583, %582 : vector<8x128xf32>
    %585 = math.tanh %584 : vector<8x128xf32>
    %cst_241 = arith.constant 5.000000e-01 : f32
    %586 = vector.broadcast %cst_241 : f32 to vector<8x128xf32>
    %587 = arith.mulf %586, %585 : vector<8x128xf32>
    %cst_242 = arith.constant 5.000000e-01 : f32
    %588 = vector.broadcast %cst_242 : f32 to vector<8x128xf32>
    %589 = arith.addf %587, %588 : vector<8x128xf32>
    %590 = arith.mulf %579, %515 : vector<8x128xf32>
    %591 = arith.mulf %571, %581 : vector<8x128xf32>
    %592 = arith.addf %590, %591 : vector<8x128xf32>
    %593 = math.tanh %592 : vector<8x128xf32>
    %594 = arith.mulf %589, %593 : vector<8x128xf32>
    %c0_243 = arith.constant 0 : index
    %c0_244 = arith.constant 0 : index
    %595 = vector.load %arg6[%c0_243, %c0_244] : memref<128x512xf32, #tpu.memory_space<vmem>>, vector<128x512xf32>
    %cst_245 = arith.constant dense<0.000000e+00> : vector<8x512xf32>
    %596 = tpu.matmul %594, %595, %cst_245 {dimension_numbers = #tpu.dot_dimension_numbers<[1], [0], [0], [1], [0, 0, 1, 1], [], []>} : vector<8x128xf32>, vector<128x512xf32>, vector<8x512xf32> -> vector<8x512xf32>
    %c0_246 = arith.constant 0 : index
    %c0_247 = arith.constant 0 : index
    %597 = vector.load %arg7[%c0_246, %c0_247] : memref<128x512xf32, #tpu.memory_space<vmem>>, vector<128x512xf32>
    %cst_248 = arith.constant dense<0.000000e+00> : vector<8x512xf32>
    %598 = tpu.matmul %554, %597, %cst_248 {dimension_numbers = #tpu.dot_dimension_numbers<[1], [0], [0], [1], [0, 0, 1, 1], [], []>} : vector<8x128xf32>, vector<128x512xf32>, vector<8x512xf32> -> vector<8x512xf32>
    %599 = arith.addf %596, %598 : vector<8x512xf32>
    %600 = arith.addf %599, %13 : vector<8x512xf32>
    %601 = vector.extract_strided_slice %600 {offsets = [0, 0], sizes = [8, 128], strides = [1, 1]} : vector<8x512xf32> to vector<8x128xf32>
    %cst_249 = arith.constant 5.000000e-01 : f32
    %602 = vector.broadcast %cst_249 : f32 to vector<8x128xf32>
    %603 = arith.mulf %602, %601 : vector<8x128xf32>
    %604 = math.tanh %603 : vector<8x128xf32>
    %cst_250 = arith.constant 5.000000e-01 : f32
    %605 = vector.broadcast %cst_250 : f32 to vector<8x128xf32>
    %606 = arith.mulf %605, %604 : vector<8x128xf32>
    %cst_251 = arith.constant 5.000000e-01 : f32
    %607 = vector.broadcast %cst_251 : f32 to vector<8x128xf32>
    %608 = arith.addf %606, %607 : vector<8x128xf32>
    %609 = vector.extract_strided_slice %600 {offsets = [0, 128], sizes = [8, 128], strides = [1, 1]} : vector<8x512xf32> to vector<8x128xf32>
    %cst_252 = arith.constant 5.000000e-01 : f32
    %610 = vector.broadcast %cst_252 : f32 to vector<8x128xf32>
    %611 = arith.mulf %610, %609 : vector<8x128xf32>
    %612 = math.tanh %611 : vector<8x128xf32>
    %cst_253 = arith.constant 5.000000e-01 : f32
    %613 = vector.broadcast %cst_253 : f32 to vector<8x128xf32>
    %614 = arith.mulf %613, %612 : vector<8x128xf32>
    %cst_254 = arith.constant 5.000000e-01 : f32
    %615 = vector.broadcast %cst_254 : f32 to vector<8x128xf32>
    %616 = arith.addf %614, %615 : vector<8x128xf32>
    %617 = vector.extract_strided_slice %600 {offsets = [0, 256], sizes = [8, 128], strides = [1, 1]} : vector<8x512xf32> to vector<8x128xf32>
    %618 = math.tanh %617 : vector<8x128xf32>
    %619 = vector.extract_strided_slice %600 {offsets = [0, 384], sizes = [8, 128], strides = [1, 1]} : vector<8x512xf32> to vector<8x128xf32>
    %cst_255 = arith.constant 5.000000e-01 : f32
    %620 = vector.broadcast %cst_255 : f32 to vector<8x128xf32>
    %621 = arith.mulf %620, %619 : vector<8x128xf32>
    %622 = math.tanh %621 : vector<8x128xf32>
    %cst_256 = arith.constant 5.000000e-01 : f32
    %623 = vector.broadcast %cst_256 : f32 to vector<8x128xf32>
    %624 = arith.mulf %623, %622 : vector<8x128xf32>
    %cst_257 = arith.constant 5.000000e-01 : f32
    %625 = vector.broadcast %cst_257 : f32 to vector<8x128xf32>
    %626 = arith.addf %624, %625 : vector<8x128xf32>
    %627 = arith.mulf %616, %552 : vector<8x128xf32>
    %628 = arith.mulf %608, %618 : vector<8x128xf32>
    %629 = arith.addf %627, %628 : vector<8x128xf32>
    %630 = math.tanh %629 : vector<8x128xf32>
    %631 = arith.mulf %626, %630 : vector<8x128xf32>
    %632 = arith.index_cast %558 : i32 to index
    %c0_258 = arith.constant 0 : index
    %633 = vector.load %arg17[%632, %c0_258] : memref<64x128xf32, #tpu.memory_space<vmem>>, vector<8x128xf32>
    tpu.vector_store %arg17[%632, %c0_258], %631 {strides = array<i32>} : memref<64x128xf32, #tpu.memory_space<vmem>>, vector<8x128xf32>,
    %c8_i32_259 = arith.constant 8 : i32
    %c0_260 = arith.constant 0 : index
    %c0_261 = arith.constant 0 : index
    %634 = vector.load %arg12[%c0_260, %c0_261] : memref<8x128xf32, #tpu.memory_space<vmem>>, vector<8x128xf32>
    tpu.vector_store %arg12[%c0_260, %c0_261], %594 {strides = array<i32>} : memref<8x128xf32, #tpu.memory_space<vmem>>, vector<8x128xf32>,
    %c0_262 = arith.constant 0 : index
    %c0_263 = arith.constant 0 : index
    %635 = vector.load %arg13[%c0_262, %c0_263] : memref<8x128xf32, #tpu.memory_space<vmem>>, vector<8x128xf32>
    tpu.vector_store %arg13[%c0_262, %c0_263], %592 {strides = array<i32>} : memref<8x128xf32, #tpu.memory_space<vmem>>, vector<8x128xf32>,
    %c0_264 = arith.constant 0 : index
    %c0_265 = arith.constant 0 : index
    %636 = vector.load %arg14[%c0_264, %c0_265] : memref<8x128xf32, #tpu.memory_space<vmem>>, vector<8x128xf32>
    tpu.vector_store %arg14[%c0_264, %c0_265], %631 {strides = array<i32>} : memref<8x128xf32, #tpu.memory_space<vmem>>, vector<8x128xf32>,
    %c0_266 = arith.constant 0 : index
    %c0_267 = arith.constant 0 : index
    %637 = vector.load %arg15[%c0_266, %c0_267] : memref<8x128xf32, #tpu.memory_space<vmem>>, vector<8x128xf32>
    tpu.vector_store %arg15[%c0_266, %c0_267], %629 {strides = array<i32>} : memref<8x128xf32, #tpu.memory_space<vmem>>, vector<8x128xf32>,
    %c0_268 = arith.constant 0 : index
    %c0_269 = arith.constant 0 : index
    %638 = vector.load %arg17[%c0_268, %c0_269] : memref<64x128xf32, #tpu.memory_space<vmem>>, vector<64x128xf32>
    %639 = arith.truncf %638 : vector<64x128xf32> to vector<64x128xbf16>
    %c0_270 = arith.constant 0 : index
    %c0_271 = arith.constant 0 : index
    %640 = vector.load %arg9[%c0_270, %c0_271] : memref<128x128xbf16, #tpu.memory_space<vmem>>, vector<128x128xbf16>
    %cst_272 = arith.constant dense<0.000000e+00> : vector<64x128xf32>
    %641 = tpu.matmul %639, %640, %cst_272 {dimension_numbers = #tpu.dot_dimension_numbers<[1], [0], [0], [1], [0, 0, 1, 1], [], []>} : vector<64x128xbf16>, vector<128x128xbf16>, vector<64x128xf32> -> vector<64x128xf32>
    %c0_273 = arith.constant 0 : index
    %c0_274 = arith.constant 0 : index
    %642 = vector.load %arg10[%c0_273, %c0_274] : memref<1x128xf32, #tpu.memory_space<vmem>>, vector<1x128xf32>
    %643 = vector.broadcast %642 : vector<1x128xf32> to vector<64x128xf32>
    %644 = arith.addf %641, %643 : vector<64x128xf32>
    %645 = math.tanh %644 : vector<64x128xf32>
    %c0_275 = arith.constant 0 : index
    %c0_276 = arith.constant 0 : index
    %c0_277 = arith.constant 0 : index
    %646 = vector.load %arg11[%c0_275, %c0_276, %c0_277] : memref<1x64x128xf32, #tpu.memory_space<vmem>>, vector<1x64x128xf32>
    %647 = vector.shape_cast %646 : vector<1x64x128xf32> to vector<64x128xf32>
    %648 = vector.shape_cast %645 : vector<64x128xf32> to vector<1x64x128xf32>
    tpu.vector_store %arg11[%c0_275, %c0_276, %c0_277], %648 {strides = array<i32>} : memref<1x64x128xf32, #tpu.memory_space<vmem>>, vector<1x64x128xf32>,
    return
  }
  func.func @transform_0(%arg0: i32, %arg1: i32) -> (i32, i32, i32) {
    %c0_i32 = arith.constant 0 : i32
    %c0_i32_0 = arith.constant 0 : i32
    return %arg0, %arg1, %c0_i32 : i32, i32, i32
  }
  func.func @transform_1(%arg0: i32, %arg1: i32) -> (i32, i32) {
    %c0_i32 = arith.constant 0 : i32
    %c0_i32_0 = arith.constant 0 : i32
    %c0_i32_1 = arith.constant 0 : i32
    return %c0_i32, %c0_i32_0 : i32, i32
  }
  func.func @transform_2(%arg0: i32, %arg1: i32) -> (i32, i32) {
    %c0_i32 = arith.constant 0 : i32
    %c0_i32_0 = arith.constant 0 : i32
    %c0_i32_1 = arith.constant 0 : i32
    return %c0_i32, %c0_i32_0 : i32, i32
  }
  func.func @transform_3(%arg0: i32, %arg1: i32) -> (i32, i32) {
    %c0_i32 = arith.constant 0 : i32
    %c0_i32_0 = arith.constant 0 : i32
    %c0_i32_1 = arith.constant 0 : i32
    return %c0_i32, %c0_i32_0 : i32, i32
  }
  func.func @transform_4(%arg0: i32, %arg1: i32) -> (i32, i32) {
    %c0_i32 = arith.constant 0 : i32
    %c0_i32_0 = arith.constant 0 : i32
    %c0_i32_1 = arith.constant 0 : i32
    return %c0_i32, %c0_i32_0 : i32, i32
  }
  func.func @transform_5(%arg0: i32, %arg1: i32) -> (i32, i32) {
    %c0_i32 = arith.constant 0 : i32
    %c0_i32_0 = arith.constant 0 : i32
    %c0_i32_1 = arith.constant 0 : i32
    return %c0_i32, %c0_i32_0 : i32, i32
  }
  func.func @transform_6(%arg0: i32, %arg1: i32) -> (i32, i32) {
    %c0_i32 = arith.constant 0 : i32
    %c0_i32_0 = arith.constant 0 : i32
    %c0_i32_1 = arith.constant 0 : i32
    return %c0_i32, %c0_i32_0 : i32, i32
  }
  func.func @transform_7(%arg0: i32, %arg1: i32) -> (i32, i32) {
    %c0_i32 = arith.constant 0 : i32
    %c0_i32_0 = arith.constant 0 : i32
    %c0_i32_1 = arith.constant 0 : i32
    return %c0_i32, %c0_i32_0 : i32, i32
  }
  func.func @transform_8(%arg0: i32, %arg1: i32) -> (i32, i32) {
    %c0_i32 = arith.constant 0 : i32
    %c0_i32_0 = arith.constant 0 : i32
    %c0_i32_1 = arith.constant 0 : i32
    return %c0_i32, %c0_i32_0 : i32, i32
  }
  func.func @transform_9(%arg0: i32, %arg1: i32) -> (i32, i32, i32) {
    %c0_i32 = arith.constant 0 : i32
    %c0_i32_0 = arith.constant 0 : i32
    return %arg0, %arg1, %c0_i32 : i32, i32, i32
  }
}

</mosaic_0001>

<bundles_post_ra>
// kernel: tpu_custom_call.1
= control target key start
LH: loop header
LB: loop body
LE: loop exit
PB: predicated region body
PF: predicated region fallthrough
CT: control target
= control target key end

     0   :  { %14 = vsyncpa [#allocation9], 0  ;;  %s10052_s0 = inlined_call_operand.hbm [shape: bf16[1,64,128], index: 0, kind: input, shape index: {}]   ;;  %s10053_s1 = inlined_call_operand.hbm [shape: bf16[128,512], index: 1, kind: input, shape index: {}]   ;;  %s10054_s2 = inlined_call_operand.hbm [shape: f32[1,512], index: 2, kind: input, shape index: {}]   ;;  %s10055_s3 = inlined_call_operand.hbm [shape: f32[128,512], index: 3, kind: input, shape index: {}]   ;;  %s10056_s4 = inlined_call_operand.hbm [shape: f32[128,512], index: 4, kind: input, shape index: {}]   ;;  %s10057_s5 = inlined_call_operand.hbm [shape: f32[128,512], index: 5, kind: input, shape index: {}]   ;;  %s10058_s6 = inlined_call_operand.vmem [shape: f32[1,512], index: 6, kind: input, shape index: {}]   ;;  %s10059_s7 = inlined_call_operand.hbm [shape: bf16[128,128], index: 7, kind: input, shape index: {}]   ;;  %s10060_s8 = inlined_call_operand.vmem [shape: f32[1,128], index: 8, kind: input, shape index: {}]   ;;  %s10061_s9 = inlined_call_operand.hbm [shape: f32[1,64,128], index: 9, kind: output, shape index: {}]  }
   0x1   :  { %15 = vsyncpa [#allocation12], 0 }
   0x2   :  { %16 = vsyncpa [#allocation15], 0 }
   0x3   :  { %17 = vsyncpa [#allocation18], 0 }
   0x4   :  { %18 = vsyncpa [#allocation10], 0  ;;  %s6652_s30 = smov [#allocation11]  }
   0x5   :  { %s36_s10 = sshll.u32 %s6652_s30, 4  ;;  %s37_s10 = int_to_ptr.vmem [resolvable:$true] %s36_s10 }
   0x6   :  { %s6490_s11 = scalar_lea.vmem %s37_s10, 4096  ;;  %p6495_p1 = scmp.lt.s32.totalorder %s37_s10, %s37_s10 }
   0x7   :  { %p6491_p0 = scmp.ne.s32.totalorder %s37_s10, %s6490_s11  ;;  %p6496_p2 = scmp.lt.s32.totalorder %s6490_s11, %s6490_s11 }
   0x9   :  { %p6497_p3 = por %p6496_p2, %p6495_p1 }
   0xb   :  { %p6498_p4 = pnand %p6497_p3, %p6491_p0 }
   0xd   :  { %6501 = shalt.err (!%p6498_p4)
}
   0xe   :  { %s6653_s12 = smov 256   ;;  %s6654_s13 = smov 16  }
   0xf   :  { %42 = dma.hbm_to_vmem [thread:$0]  %s10053_s1, 4096, %s37_s10, [#allocation12], %s6653_s12, %s6653_s12, %s6654_s13  }
  0x10   :  { %s6655_s16 = smov [#allocation14]  }
  0x11   :  { %s58_s17 = sshll.u32 %s6655_s16, 4  ;;  %s59_s17 = int_to_ptr.vmem [resolvable:$true] %s58_s17 }
  0x12   :  { %s6510_s18 = scalar_lea.vmem %s59_s17, 8192  ;;  %p6515_p6 = scmp.lt.s32.totalorder %s59_s17, %s59_s17 }
  0x13   :  { %p6511_p5 = scmp.ne.s32.totalorder %s59_s17, %s6510_s18  ;;  %p6516_p7 = scmp.lt.s32.totalorder %s6510_s18, %s6510_s18 }
  0x15   :  { %p6517_p8 = por %p6516_p7, %p6515_p6 }
  0x17   :  { %p6518_p9 = pnand %p6517_p8, %p6511_p5 }
  0x19   :  { %6521 = shalt.err (!%p6518_p9)
}
  0x1a   :  { %s6656_s19 = smov 512   ;;  %s6657_s20 = smov 32  }
  0x1b   :  { %64 = dma.hbm_to_vmem [thread:$0]  %s10055_s3, 8192, %s59_s17, [#allocation15], %s6656_s19, %s6656_s19, %s6657_s20  }
  0x1c   :  { %s6658_s1 = smov [#allocation17]   ;;  %s6659_s24 = smov [#allocation8]  }
  0x1d   :  { %s82_s23 = sshll.u32 %s6658_s1, 4  ;;  %s24_s25 = sshll.u32 %s6659_s24, 4  ;;  %s83_s23 = int_to_ptr.vmem [resolvable:$true] %s82_s23  ;;  %s25_s25 = int_to_ptr.vmem [resolvable:$true] %s24_s25 }
  0x1e   :  { %s6530_s26 = scalar_lea.vmem %s83_s23, 8192  ;;  %p6535_p11 = scmp.lt.s32.totalorder %s83_s23, %s83_s23 }
  0x1f   :  { %p6531_p10 = scmp.ne.s32.totalorder %s83_s23, %s6530_s26  ;;  %p6536_p12 = scmp.lt.s32.totalorder %s6530_s26, %s6530_s26 }
  0x21   :  { %p6537_p13 = por %p6536_p12, %p6535_p11 }
  0x23   :  { %p6538_p0 = pnand %p6537_p13, %p6531_p10 }
  0x25   :  { %6541 = shalt.err (!%p6538_p0)
}
  0x26   :  { %88 = dma.hbm_to_vmem [thread:$0]  %s10057_s5, 8192, %s83_s23, [#allocation18], %s6656_s19, %s6656_s19, %s6657_s20  }
  0x27   :  { %s6550_s3 = scalar_lea.vmem %s25_s25, 512  ;;  %p6555_p2 = scmp.lt.s32.totalorder %s25_s25, %s25_s25 }
  0x28   :  { %p6551_p1 = scmp.ne.s32.totalorder %s25_s25, %s6550_s3  ;;  %p6556_p3 = scmp.lt.s32.totalorder %s6550_s3, %s6550_s3 }
  0x2a   :  { %p6557_p4 = por %p6556_p3, %p6555_p2 }
  0x2c   :  { %p6558_p5 = pnand %p6557_p4, %p6551_p1 }
  0x2e   :  { %6561 = shalt.err (!%p6558_p5)
}
  0x2f   :  { %s6660_s29 = smov 64   ;;  %s6661_s30 = smov 4  }
  0x30   :  { %30 = dma.hbm_to_vmem [thread:$0]  %s10052_s0, 512, %s25_s25, [#allocation9], %s6660_s29, %s6660_s29, %s6661_s30  }
  0x31   :  { %s6662_s12 = smov [#allocation13]   ;;  %s6663_s14 = smov [#allocation16]  }
  0x32   :  { %s49_s13 = sshll.u32 %s6662_s12, 4  ;;  %s70_s5 = sshll.u32 %s6663_s14, 4  ;;  %s50_s13 = int_to_ptr.vmem [resolvable:$true] %s49_s13  ;;  %s71_s5 = int_to_ptr.vmem [resolvable:$true] %s70_s5 }
  0x33   :  { %s6570_s15 = scalar_lea.vmem %s50_s13, 64  ;;  %p6575_p7 = scmp.lt.s32.totalorder %s50_s13, %s50_s13 }
  0x34   :  { %p6571_p6 = scmp.ne.s32.totalorder %s50_s13, %s6570_s15  ;;  %p6576_p8 = scmp.lt.s32.totalorder %s6570_s15, %s6570_s15 }
  0x36   :  { %p6577_p9 = por %p6576_p8, %p6575_p7 }
  0x38   :  { %p6578_p10 = pnand %p6577_p9, %p6571_p6 }
  0x3a   :  { %6581 = shalt.err (!%p6578_p10)
}
  0x3b   :  { %52 = dma.hbm_to_vmem [thread:$0]  %s10054_s2, 64, %s50_s13, [#allocation12]  }
  0x3c   :  { %s6590_s18 = scalar_lea.vmem %s71_s5, 8192  ;;  %p6595_p12 = scmp.lt.s32.totalorder %s71_s5, %s71_s5 }
  0x3d   :  { %p6591_p11 = scmp.ne.s32.totalorder %s71_s5, %s6590_s18  ;;  %p6596_p13 = scmp.lt.s32.totalorder %s6590_s18, %s6590_s18 }
  0x3f   :  { %p6597_p0 = por %p6596_p13, %p6595_p12 }
  0x41   :  { %p6598_p1 = pnand %p6597_p0, %p6591_p11 }
  0x43   :  { %6601 = shalt.err (!%p6598_p1)
}
  0x44   :  { %76 = dma.hbm_to_vmem [thread:$0]  %s10056_s4, 8192, %s71_s5, [#allocation15], %s6656_s19, %s6656_s19, %s6657_s20  }
  0x45   :  { %s6664_s22 = smov [#allocation19]  }
  0x46   :  { %s96_s1 = sshll.u32 %s6664_s22, 4  ;;  %s97_s1 = int_to_ptr.vmem [resolvable:$true] %s96_s1 }
  0x47   :  { %s6610_s23 = scalar_lea.vmem %s97_s1, 1024  ;;  %p6615_p3 = scmp.lt.s32.totalorder %s97_s1, %s97_s1 }
  0x48   :  { %p6611_p2 = scmp.ne.s32.totalorder %s97_s1, %s6610_s23  ;;  %p6616_p4 = scmp.lt.s32.totalorder %s6610_s23, %s6610_s23 }
  0x4a   :  { %p6617_p5 = por %p6616_p4, %p6615_p3 }
  0x4c   :  { %p6618_p6 = pnand %p6617_p5, %p6611_p2 }
  0x4e   :  { %6621 = shalt.err (!%p6618_p6)
}
  0x4f   :  { %102 = dma.hbm_to_vmem [thread:$0]  %s10059_s7, 1024, %s97_s1, [#allocation18], %s6660_s29, %s6660_s29, %s6661_s30  }
  0x50   :  { %6642 = dma.done.wait [#allocation9], 512  }
  0x51   :  { %6643 = vsyncadd [#allocation9], 4294966784 }
  0x52   :  { %6644 = dma.done.wait [#allocation12], 4160  }
  0x53   :  { %6645 = vsyncadd [#allocation12], 4294963136 }
  0x54   :  { %6646 = dma.done.wait [#allocation15], 16384  }
  0x55   :  { %6647 = vsyncadd [#allocation15], 4294950912 }
  0x56   :  { %6648 = dma.done.wait [#allocation18], 9216  }
  0x57   :  { %6649 = vsyncadd [#allocation18], 4294958080  ;;  %v6665_v0 = vmov 0   ;;  %v10062_v1 = vmov 0.0   ;;  %v6246_v2 = vld [vmem:[#allocation11 + $0xe4] ss:$16 sps:$4 sm:$0xff]  }
  0x58   :  { %413 = vmatprep.mubr.bf16.mxu1 %v6665_v0  ;;  %720 = vmatprep.mubr.f32.mxu0 %v10062_v1  ;;  %v6248_v3 = vld [vmem:[#allocation11 + $0xe0] ss:$16 sps:$4 sm:$0xff]   ;;  %v652_v5 = vld [vmem:[#allocation14 + $0x1e0] sm:$0xff]  ;;  %v6273_v48 = vld [vmem:[#allocation11 + $0xec] ss:$16 sps:$4 sm:$0xff]  }
  0x59   :  { %v653_v4 = vld [vmem:[#allocation14 + $0x1e8] sm:$0xff]  ;;  %381 = vmatprep.subr.bf16.mxu1 %v6246_v2  ;;  %v6249_v6 = vld [vmem:[#allocation11 + $0xc4] ss:$16 sps:$4 sm:$0xff]   ;;  %v6271_v52 = vld [vmem:[#allocation11 + $0xe8] ss:$16 sps:$4 sm:$0xff]  }
  0x5a   :  { %656 = vmatprep.subr.mxu0 %v653_v4  ;;  %382 = vmatpush1.bf16.msra.mxu1 %v6248_v3  ;;  %v649_v7 = vld [vmem:[#allocation14 + $0x1c8] sm:$0xff]  ;;  %v648_v9 = vld [vmem:[#allocation14 + $0x1c0] sm:$0xff]  ;;  %v6763_v4 = vld [vmem:[#allocation8 + $0x18] sm:$0xff]  }
  0x5b   :  { %657 = vmatpush1.msra.mxu0 %v652_v5  ;;  %v6251_v8 = vld [vmem:[#allocation11 + $0xc0] ss:$16 sps:$4 sm:$0xff]   ;;  %383 = vmatprep.subr.bf16.mxu1 %v6249_v6  ;;  %v644_v11 = vld [vmem:[#allocation14 + $0x1a0] sm:$0xff]  ;;  %v6276_v53 = vld [vmem:[#allocation11 + $0xcc] ss:$16 sps:$4 sm:$0xff]  }
  0x5c   :  { %658 = vmatprep.subr.mxu0 %v649_v7  ;;  %v645_v10 = vld [vmem:[#allocation14 + $0x1a8] sm:$0xff]  ;;  %v6252_v12 = vld [vmem:[#allocation11 + $0xa4] ss:$16 sps:$4 sm:$0xff]   ;;  %v6274_v54 = vld [vmem:[#allocation11 + $0xc8] ss:$16 sps:$4 sm:$0xff]  }
  0x5d   :  { %659 = vmatpush1.msra.mxu0 %v648_v9  ;;  %v641_v13 = vld [vmem:[#allocation14 + $0x188] sm:$0xff]  ;;  %v640_v15 = vld [vmem:[#allocation14 + $0x180] sm:$0xff]  ;;  %v6770_v9 = vld [vmem:[#allocation14 + $0x1f0] sm:$0xff] }
  0x5e   :  { %660 = vmatprep.subr.mxu0 %v645_v10  ;;  %v6254_v14 = vld [vmem:[#allocation11 + $0xa0] ss:$16 sps:$4 sm:$0xff]   ;;  %384 = vmatpush1.bf16.msra.mxu1 %v6251_v8  ;;  %v636_v17 = vld [vmem:[#allocation14 + $0x160] sm:$0xff]  ;;  %v6280_v55 = vld [vmem:[#allocation11 + $0xac] ss:$16 sps:$4 sm:$0xff]  }
  0x5f   :  { %661 = vmatpush1.msra.mxu0 %v644_v11  ;;  %v637_v16 = vld [vmem:[#allocation14 + $0x168] sm:$0xff]  ;;  %385 = vmatprep.subr.bf16.mxu1 %v6252_v12  ;;  %v6255_v18 = vld [vmem:[#allocation11 + $0x84] ss:$16 sps:$4 sm:$0xff]   ;;  %v6278_v57 = vld [vmem:[#allocation11 + $0xa8] ss:$16 sps:$4 sm:$0xff]  }
  0x60   :  { %662 = vmatprep.subr.mxu0 %v641_v13  ;;  %v633_v19 = vld [vmem:[#allocation14 + $0x148] sm:$0xff]  ;;  %v632_v20 = vld [vmem:[#allocation14 + $0x140] sm:$0xff]  ;;  %v6767_v8 = vld [vmem:[#allocation14 + $0x1f8] sm:$0xff] }
  0x61   :  { %663 = vmatpush1.msra.mxu0 %v640_v15  ;;  %v6257_v21 = vld [vmem:[#allocation11 + $0x80] ss:$16 sps:$4 sm:$0xff]   ;;  %v628_v23 = vld [vmem:[#allocation14 + $0x120] sm:$0xff]  ;;  %v6283_v58 = vld [vmem:[#allocation11 + $0x8c] ss:$16 sps:$4 sm:$0xff]  }
  0x62   :  { %664 = vmatprep.subr.mxu0 %v637_v16  ;;  %386 = vmatpush1.bf16.msra.mxu1 %v6254_v14  ;;  %v629_v22 = vld [vmem:[#allocation14 + $0x128] sm:$0xff]  ;;  %v6258_v24 = vld [vmem:[#allocation11 + $0x64] ss:$16 sps:$4 sm:$0xff]   ;;  %v6281_v59 = vld [vmem:[#allocation11 + $0x88] ss:$16 sps:$4 sm:$0xff]  }
  0x63   :  { %665 = vmatpush1.msra.mxu0 %v636_v17  ;;  %387 = vmatprep.subr.bf16.mxu1 %v6255_v18  ;;  %v625_v25 = vld [vmem:[#allocation14 + $0x108] sm:$0xff]  ;;  %v624_v27 = vld [vmem:[#allocation14 + $0x100] sm:$0xff]  ;;  %v6772_v10 = vld [vmem:[#allocation14 + $0x1d8] sm:$0xff] }
  0x64   :  { %666 = vmatprep.subr.mxu0 %v633_v19  ;;  %v6260_v26 = vld [vmem:[#allocation11 + $0x60] ss:$16 sps:$4 sm:$0xff]   ;;  %v620_v29 = vld [vmem:[#allocation14 + $0xe0] sm:$0xff]  ;;  %v6287_v60 = vld [vmem:[#allocation11 + $0x6c] ss:$16 sps:$4 sm:$0xff]  }
  0x65   :  { %667 = vmatpush1.msra.mxu0 %v632_v20  ;;  %v621_v28 = vld [vmem:[#allocation14 + $0xe8] sm:$0xff]  ;;  %v6261_v30 = vld [vmem:[#allocation11 + $0x44] ss:$16 sps:$4 sm:$0xff]   ;;  %v6285_v62 = vld [vmem:[#allocation11 + $0x68] ss:$16 sps:$4 sm:$0xff]  }
  0x66   :  { %668 = vmatprep.subr.mxu0 %v629_v22  ;;  %388 = vmatpush1.bf16.msra.mxu1 %v6257_v21  ;;  %v617_v31 = vld [vmem:[#allocation14 + $0xc8] sm:$0xff]  ;;  %v616_v32 = vld [vmem:[#allocation14 + $0xc0] sm:$0xff]  ;;  %v6774_v11 = vld [vmem:[#allocation14 + $0x1d0] sm:$0xff] }
  0x67   :  { %669 = vmatpush1.msra.mxu0 %v628_v23  ;;  %389 = vmatprep.subr.bf16.mxu1 %v6258_v24  ;;  %v6263_v33 = vld [vmem:[#allocation11 + $0x40] ss:$16 sps:$4 sm:$0xff]   ;;  %v612_v35 = vld [vmem:[#allocation14 + $0xa0] sm:$0xff]  ;;  %v6290_v63 = vld [vmem:[#allocation11 + $0x4c] ss:$16 sps:$4 sm:$0xff]  }
  0x68   :  { %670 = vmatprep.subr.mxu0 %v625_v25  ;;  %v613_v34 = vld [vmem:[#allocation14 + $0xa8] sm:$0xff]  ;;  %v6264_v36 = vld [vmem:[#allocation11 + $0x24] ss:$16 sps:$4 sm:$0xff]   ;;  %v6288_v2 = vld [vmem:[#allocation11 + $0x48] ss:$16 sps:$4 sm:$0xff]  }
  0x69   :  { %671 = vmatpush1.msra.mxu0 %v624_v27  ;;  %v609_v37 = vld [vmem:[#allocation14 + $0x88] sm:$0xff]  ;;  %v608_v39 = vld [vmem:[#allocation14 + $0x80] sm:$0xff]  ;;  %v6777_v12 = vld [vmem:[#allocation14 + $0x1b8] sm:$0xff] }
  0x6a   :  { %672 = vmatprep.subr.mxu0 %v621_v28  ;;  %390 = vmatpush1.bf16.msra.mxu1 %v6260_v26  ;;  %v6266_v38 = vld [vmem:[#allocation11 + $0x20] ss:$16 sps:$4 sm:$0xff]   ;;  %v604_v41 = vld [vmem:[#allocation14 + $0x60] sm:$0xff]  ;;  %v6294_v3 = vld [vmem:[#allocation11 + $0x2c] ss:$16 sps:$4 sm:$0xff]  }
  0x6b   :  { %673 = vmatpush1.msra.mxu0 %v620_v29  ;;  %391 = vmatprep.subr.bf16.mxu1 %v6261_v30  ;;  %v605_v40 = vld [vmem:[#allocation14 + $0x68] sm:$0xff]  ;;  %v6267_v42 = vld [vmem:[#allocation11 + $0x4] ss:$16 sps:$4 sm:$0xff]   ;;  %v6292_v5 = vld [vmem:[#allocation11 + $0x28] ss:$16 sps:$4 sm:$0xff]  }
  0x6c   :  { %674 = vmatprep.subr.mxu0 %v617_v31  ;;  %v601_v43 = vld [vmem:[#allocation14 + $0x48] sm:$0xff]  ;;  %v600_v45 = vld [vmem:[#allocation14 + $0x40] sm:$0xff]  ;;  %v6781_v13 = vld [vmem:[#allocation14 + $0x1b0] sm:$0xff] }
  0x6d   :  { %675 = vmatpush1.msra.mxu0 %v616_v32  ;;  %v6269_v44 = vld [vmem:[#allocation11] ss:$16 sps:$4 sm:$0xff]   ;;  %v596_v47 = vld [vmem:[#allocation14 + $0x20] sm:$0xff]  ;;  %v6297_v6 = vld [vmem:[#allocation11 + $0xc] ss:$16 sps:$4 sm:$0xff]  }
  0x6e   :  { %676 = vmatprep.subr.mxu0 %v613_v34  ;;  %392 = vmatpush1.bf16.msra.mxu1 %v6263_v33  ;;  %v597_v46 = vld [vmem:[#allocation14 + $0x28] sm:$0xff]  ;;  %v6270_v50 = vld [vmem:[#allocation8] sm:$0xff]   ;;  %v6295_v7 = vld [vmem:[#allocation11 + $0x8] ss:$16 sps:$4 sm:$0xff]  }
  0x6f   :  { %677 = vmatpush1.msra.mxu0 %v612_v35  ;;  %393 = vmatprep.subr.bf16.mxu1 %v6264_v36  ;;  %v593_v49 = vld [vmem:[#allocation14 + $0x8] sm:$0xff]  ;;  %v592_v51 = vld [vmem:[#allocation14] sm:$0xff]  ;;  %v6784_v14 = vld [vmem:[#allocation14 + $0x198] sm:$0xff] }
  0x70   :  { %678 = vmatprep.subr.mxu0 %v609_v37  ;;  %v6277_v56 = vld [vmem:[#allocation8 + $0x8] sm:$0xff]   ;;  %v6284_v61 = vld [vmem:[#allocation8 + $0x10] sm:$0xff]   ;;  %v6790_v16 = vld [vmem:[#allocation14 + $0x178] sm:$0xff] }
  0x71   :  { %679 = vmatpush1.msra.mxu0 %v608_v39  ;;  %v6787_v15 = vld [vmem:[#allocation14 + $0x190] sm:$0xff]  ;;  %v6796_v18 = vld [vmem:[#allocation14 + $0x158] sm:$0xff]  ;;  %v6870_v39 = vld [vmem:[#allocation17 + $0x1e8] sm:$0xff] }
  0x72   :  { %680 = vmatprep.subr.mxu0 %v605_v40  ;;  %394 = vmatpush1.bf16.msra.mxu1 %v6266_v38  ;;  %v6793_v17 = vld [vmem:[#allocation14 + $0x170] sm:$0xff]  ;;  %v6802_v20 = vld [vmem:[#allocation14 + $0x138] sm:$0xff] }
  0x73   :  { %681 = vmatpush1.msra.mxu0 %v604_v41  ;;  %395 = vmatprep.subr.bf16.mxu1 %v6267_v42  ;;  %v6799_v19 = vld [vmem:[#allocation14 + $0x150] sm:$0xff]  ;;  %v6809_v22 = vld [vmem:[#allocation14 + $0x118] sm:$0xff]  ;;  %v6876_v41 = vld [vmem:[#allocation17 + $0x1e0] sm:$0xff] }
  0x74   :  { %682 = vmatprep.subr.mxu0 %v601_v43  ;;  %v6806_v21 = vld [vmem:[#allocation14 + $0x130] sm:$0xff]  ;;  %v6815_v24 = vld [vmem:[#allocation14 + $0xf8] sm:$0xff]  ;;  %v6882_v43 = vld [vmem:[#allocation17 + $0x1c8] sm:$0xff] }
  0x75   :  { %683 = vmatpush1.msra.mxu0 %v600_v45  ;;  %v6812_v23 = vld [vmem:[#allocation14 + $0x110] sm:$0xff]  ;;  %v6821_v26 = vld [vmem:[#allocation14 + $0xd8] sm:$0xff]  ;;  %v6888_v45 = vld [vmem:[#allocation17 + $0x1c0] sm:$0xff] }
  0x76   :  { %684 = vmatprep.subr.mxu0 %v597_v46  ;;  %396 = vmatpush1.bf16.msra.mxu1 %v6269_v44  ;;  %v6818_v25 = vld [vmem:[#allocation14 + $0xf0] sm:$0xff]  ;;  %v6827_v28 = vld [vmem:[#allocation14 + $0xb8] sm:$0xff] }
  0x77   :  { %685 = vmatpush1.msra.mxu0 %v596_v47  ;;  %454 = vmatprep.subr.bf16.mxu1 %v6273_v48  ;;  %v6824_v27 = vld [vmem:[#allocation14 + $0xd0] sm:$0xff]  ;;  %v6834_v30 = vld [vmem:[#allocation14 + $0x98] sm:$0xff]  ;;  %v6894_v47 = vld [vmem:[#allocation17 + $0x1a8] sm:$0xff] }
  0x78   :  { %686 = vmatprep.subr.mxu0 %v593_v49  ;;  %v6831_v29 = vld [vmem:[#allocation14 + $0xb0] sm:$0xff]  ;;  %v6840_v32 = vld [vmem:[#allocation14 + $0x78] sm:$0xff]  ;;  %10547 = vst [vmem:[#allocation27_spill] sm:$0xff] %v6894_v47  ;;  %v6900_v49 = vld [vmem:[#allocation17 + $0x1a0] sm:$0xff] }
  0x79   :  { %687 = vmatpush1.msra.mxu0 %v592_v51  ;;  %414 = vmatmul.mubr.bf16.vlgmr.msra.gmra.mxu1 %v6270_v50  ;;  %v6837_v31 = vld [vmem:[#allocation14 + $0x90] sm:$0xff]  ;;  %v6853_v35 = vld [vmem:[#allocation14 + $0x38] sm:$0xff]  ;;  %10549 = vst [vmem:[#allocation29_spill] sm:$0xff] %v6900_v49  ;;  %v6906_v51 = vld [vmem:[#allocation17 + $0x188] sm:$0xff] }
  0x7a   :  { %721 = vmatmul.mubr.f32.vlgmr.msra.gmra.mxu0 %v10062_v1  ;;  %455 = vmatpush1.bf16.msra.mxu1 %v6271_v52  ;;  %v6843_v33 = vld [vmem:[#allocation14 + $0x70] sm:$0xff]  ;;  %v6860_v37 = vld [vmem:[#allocation14 + $0x18] sm:$0xff]  ;;  %10551 = vst [vmem:[#allocation31_spill] sm:$0xff] %v6906_v51 }
  0x7b   :  { %423 = vmatprep.mubr.bf16.mxu1 %v6665_v0  ;;  %456 = vmatprep.subr.bf16.mxu1 %v6276_v53  ;;  %v6850_v34 = vld [vmem:[#allocation14 + $0x50] sm:$0xff]  ;;  %v6872_v40 = vld [vmem:[#allocation17 + $0x1f8] sm:$0xff]  ;;  %v6912_v53 = vld [vmem:[#allocation17 + $0x180] sm:$0xff] }
  0x7c   :  { %1012 = vmatprep.mubr.f32.mxu0 %v10062_v1  ;;  %v6857_v36 = vld [vmem:[#allocation14 + $0x30] sm:$0xff]  ;;  %948 = vmatprep.subr.mxu0 %v6870_v39  ;;  %v6884_v44 = vld [vmem:[#allocation17 + $0x1d8] sm:$0xff]  ;;  %10553 = vst [vmem:[#allocation33_spill] sm:$0xff] %v6912_v53 }
  0x7d   :  { %v6863_v38 = vld [vmem:[#allocation14 + $0x10] sm:$0xff]  ;;  %949 = vmatpush1.msra.mxu0 %v6876_v41  ;;  %v6896_v48 = vld [vmem:[#allocation17 + $0x1b8] sm:$0xff] }
  0x7e   :  { %457 = vmatpush1.bf16.msra.mxu1 %v6274_v54  ;;  %v6878_v42 = vld [vmem:[#allocation17 + $0x1f0] sm:$0xff]  ;;  %950 = vmatprep.subr.mxu0 %v6882_v43  ;;  %10548 = vst [vmem:[#allocation28_spill] sm:$0xff] %v6896_v48  ;;  %v6908_v52 = vld [vmem:[#allocation17 + $0x198] sm:$0xff] }
  0x7f   :  { %458 = vmatprep.subr.bf16.mxu1 %v6280_v55  ;;  %v6890_v46 = vld [vmem:[#allocation17 + $0x1d0] sm:$0xff]  ;;  %951 = vmatpush1.msra.mxu0 %v6888_v45  ;;  %10552 = vst [vmem:[#allocation32_spill] sm:$0xff] %v6908_v52  ;;  %v6918_v55 = vld [vmem:[#allocation17 + $0x168] sm:$0xff] }
  0x80   :  { %10546 = vst [vmem:[#allocation26_spill] sm:$0xff] %v6890_v46  ;;  %952 = vmatprep.subr.mxu0 %v6894_v47  ;;  %v6914_v54 = vld [vmem:[#allocation17 + $0x190] sm:$0xff]  ;;  %10555 = vst [vmem:[#allocation35_spill] sm:$0xff] %v6918_v55 }
  0x81   :  { %424 = vmatmul.mubr.bf16.gmra.mxu1 %v6277_v56  ;;  %953 = vmatpush1.msra.mxu0 %v6900_v49  ;;  %10554 = vst [vmem:[#allocation34_spill] sm:$0xff] %v6914_v54 }
  0x82   :  { %459 = vmatpush1.bf16.msra.mxu1 %v6278_v57  ;;  %433 = vmatprep.mubr.bf16.mxu1 %v6665_v0  ;;  %v6924_v57 = vld [vmem:[#allocation17 + $0x160] sm:$0xff] }
  0x83   :  { %460 = vmatprep.subr.bf16.mxu1 %v6283_v58  ;;  %954 = vmatprep.subr.mxu0 %v6906_v51  ;;  %10557 = vst [vmem:[#allocation37_spill] sm:$0xff] %v6924_v57  ;;  %v6926_v58 = vld [vmem:[#allocation17 + $0x170] sm:$0xff] }
  0x84   :  { %955 = vmatpush1.msra.mxu0 %v6912_v53  ;;  %10558 = vst [vmem:[#allocation38_spill] sm:$0xff] %v6926_v58 }
  0x85   :  { %956 = vmatprep.subr.mxu0 %v6918_v55 }
  0x86   :  { %461 = vmatpush1.bf16.msra.mxu1 %v6281_v59  ;;  %957 = vmatpush1.msra.mxu0 %v6924_v57  ;;  %v6930_v59 = vld [vmem:[#allocation17 + $0x148] sm:$0xff] }
  0x87   :  { %462 = vmatprep.subr.bf16.mxu1 %v6287_v60  ;;  %10559 = vst [vmem:[#allocation39_spill] sm:$0xff] %v6930_v59  ;;  %v6932_v60 = vld [vmem:[#allocation17 + $0x158] sm:$0xff]  ;;  %958 = vmatprep.subr.mxu0 %v6930_v59  ;;  %v7210_v59 = vld [vmem:[#allocation16 + $0x60] sm:$0xff] }
  0x88   :  { %10560 = vst [vmem:[#allocation40_spill] sm:$0xff] %v6932_v60  ;;  %10654 = vst [vmem:[#allocation133_spill] sm:$0xff] %v7210_v59 }
  0x89   :  { %434 = vmatmul.mubr.bf16.gmra.mxu1 %v6284_v61 }
  0x8a   :  { %463 = vmatpush1.bf16.msra.mxu1 %v6285_v62  ;;  %443 = vmatprep.mubr.bf16.mxu1 %v6665_v0  ;;  %v6938_v62 = vld [vmem:[#allocation17 + $0x150] sm:$0xff] }
  0x8b   :  { %464 = vmatprep.subr.bf16.mxu1 %v6290_v63  ;;  %10562 = vst [vmem:[#allocation42_spill] sm:$0xff] %v6938_v62  ;;  %v6942_v63 = vld [vmem:[#allocation17 + $0x128] sm:$0xff] }
  0x8c   :  { %10563 = vst [vmem:[#allocation43_spill] sm:$0xff] %v6942_v63 }
  0x8e   :  { %465 = vmatpush1.bf16.msra.mxu1 %v6288_v2  ;;  %v6944_v2 = vld [vmem:[#allocation17 + $0x138] sm:$0xff] }
  0x8f   :  { %466 = vmatprep.subr.bf16.mxu1 %v6294_v3  ;;  %10564 = vst [vmem:[#allocation44_spill] sm:$0xff] %v6944_v2  ;;  %v6948_v3 = vld [vmem:[#allocation17 + $0x120] sm:$0xff] }
  0x90   :  { %10565 = vst [vmem:[#allocation45_spill] sm:$0xff] %v6948_v3 }
  0x91   :  { %444 = vmatmul.mubr.bf16.gmra.mxu1 %v6763_v4 }
  0x92   :  { %467 = vmatpush1.bf16.msra.mxu1 %v6292_v5  ;;  %486 = vmatprep.mubr.bf16.mxu1 %v6665_v0  ;;  %v6954_v5 = vld [vmem:[#allocation17 + $0x108] sm:$0xff] }
  0x93   :  { %468 = vmatprep.subr.bf16.mxu1 %v6297_v6  ;;  %10567 = vst [vmem:[#allocation47_spill] sm:$0xff] %v6954_v5  ;;  %v6956_v6 = vld [vmem:[#allocation17 + $0x118] sm:$0xff] }
  0x94   :  { %10568 = vst [vmem:[#allocation48_spill] sm:$0xff] %v6956_v6 }
  0x96   :  { %469 = vmatpush1.bf16.msra.mxu1 %v6295_v7  ;;  %v6960_v7 = vld [vmem:[#allocation17 + $0x100] sm:$0xff] }
  0x97   :  { %727 = vmatprep.subr.mxu1 %v6767_v8  ;;  %10569 = vst [vmem:[#allocation49_spill] sm:$0xff] %v6960_v7 }
  0x99   :  { %487 = vmatmul.mubr.bf16.vlgmr.msra.gmra.mxu1 %v6270_v50  ;;  %v6902_v50 = vld [vmem:[#allocation17 + $0x1b0] sm:$0xff] }
  0x9a   :  { %728 = vmatpush1.msra.mxu1 %v6770_v9  ;;  %496 = vmatprep.mubr.bf16.mxu1 %v6665_v0  ;;  %10550 = vst [vmem:[#allocation30_spill] sm:$0xff] %v6902_v50 }
  0x9b   :  { %729 = vmatprep.subr.mxu1 %v6772_v10 }
  0x9c   :  { %730 = vmatpush1.msra.mxu1 %v6774_v11 }
  0x9d   :  { %731 = vmatprep.subr.mxu1 %v6777_v12 }
  0x9e   :  { %732 = vmatpush1.msra.mxu1 %v6781_v13 }
  0x9f   :  { %733 = vmatprep.subr.mxu1 %v6784_v14 }
  0xa0   :  { %734 = vmatpush1.msra.mxu1 %v6787_v15 }
  0xa1   :  { %497 = vmatmul.mubr.bf16.gmra.mxu1 %v6277_v56  ;;  %735 = vmatprep.subr.mxu1 %v6790_v16  ;;  %v6920_v56 = vld [vmem:[#allocation17 + $0x178] sm:$0xff] }
  0xa2   :  { %736 = vmatpush1.msra.mxu1 %v6793_v17  ;;  %506 = vmatprep.mubr.bf16.mxu1 %v6665_v0  ;;  %10556 = vst [vmem:[#allocation36_spill] sm:$0xff] %v6920_v56 }
  0xa3   :  { %737 = vmatprep.subr.mxu1 %v6796_v18 }
  0xa4   :  { %738 = vmatpush1.msra.mxu1 %v6799_v19 }
  0xa5   :  { %739 = vmatprep.subr.mxu1 %v6802_v20 }
  0xa6   :  { %740 = vmatpush1.msra.mxu1 %v6806_v21 }
  0xa7   :  { %741 = vmatprep.subr.mxu1 %v6809_v22 }
  0xa8   :  { %742 = vmatpush1.msra.mxu1 %v6812_v23 }
  0xa9   :  { %507 = vmatmul.mubr.bf16.gmra.mxu1 %v6284_v61  ;;  %743 = vmatprep.subr.mxu1 %v6815_v24  ;;  %v6936_v61 = vld [vmem:[#allocation17 + $0x140] sm:$0xff] }
  0xaa   :  { %744 = vmatpush1.msra.mxu1 %v6818_v25  ;;  %516 = vmatprep.mubr.bf16.mxu1 %v6665_v0  ;;  %v6846_v0 = vld [vmem:[#allocation14 + $0x58] sm:$0xff]  ;;  %10561 = vst [vmem:[#allocation41_spill] sm:$0xff] %v6936_v61 }
  0xab   :  { %745 = vmatprep.subr.mxu1 %v6821_v26  ;;  %959 = vmatpush1.msra.mxu0 %v6936_v61  ;;  %v7092_v61 = vld [vmem:[#allocation16 + $0x1a0] sm:$0xff] }
  0xac   :  { %746 = vmatpush1.msra.mxu1 %v6824_v27  ;;  %960 = vmatprep.subr.mxu0 %v6942_v63  ;;  %v7074_v63 = vld [vmem:[#allocation16 + $0x1c8] sm:$0xff]  ;;  %10614 = vst [vmem:[#allocation93_spill] sm:$0xff] %v7092_v61 }
  0xad   :  { %747 = vmatprep.subr.mxu1 %v6827_v28  ;;  %961 = vmatpush1.msra.mxu0 %v6948_v3  ;;  %v6968_v3 = vld [vmem:[#allocation17 + $0xf8] sm:$0xff]  ;;  %10608 = vst [vmem:[#allocation87_spill] sm:$0xff] %v7074_v63 }
  0xae   :  { %748 = vmatpush1.msra.mxu1 %v6831_v29  ;;  %962 = vmatprep.subr.mxu0 %v6954_v5  ;;  %10572 = vst [vmem:[#allocation52_spill] sm:$0xff] %v6968_v3  ;;  %v6974_v5 = vld [vmem:[#allocation17 + $0xf0] sm:$0xff] }
  0xaf   :  { %749 = vmatprep.subr.mxu1 %v6834_v30  ;;  %963 = vmatpush1.msra.mxu0 %v6960_v7  ;;  %10574 = vst [vmem:[#allocation54_spill] sm:$0xff] %v6974_v5  ;;  %v6980_v7 = vld [vmem:[#allocation17 + $0xd8] sm:$0xff] }
  0xb0   :  { %750 = vmatpush1.msra.mxu1 %v6837_v31  ;;  %10576 = vst [vmem:[#allocation56_spill] sm:$0xff] %v6980_v7 }
  0xb1   :  { %517 = vmatmul.mubr.bf16.gmra.mxu1 %v6763_v4  ;;  %751 = vmatprep.subr.mxu1 %v6840_v32  ;;  %v6950_v4 = vld [vmem:[#allocation17 + $0x130] sm:$0xff] }
  0xb2   :  { %752 = vmatpush1.msra.mxu1 %v6843_v33  ;;  %791 = vmatprep.mubr.f32.mxu1 %v10062_v1  ;;  %10566 = vst [vmem:[#allocation46_spill] sm:$0xff] %v6950_v4 }
  0xb3   :  { %753 = vmatprep.subr.mxu1 %v6846_v0 }
  0xb4   :  { %754 = vmatpush1.msra.mxu1 %v6850_v34 }
  0xb5   :  { %755 = vmatprep.subr.mxu1 %v6853_v35 }
  0xb6   :  { %756 = vmatpush1.msra.mxu1 %v6857_v36 }
  0xb7   :  { %757 = vmatprep.subr.mxu1 %v6860_v37 }
  0xb8   :  { %758 = vmatpush1.msra.mxu1 %v6863_v38 }
  0xb9   :  { %792 = vmatmul.mubr.f32.vlgmr.msra.gmra.mxu1 %v10062_v1  ;;  %1019 = vmatprep.subr.mxu1 %v6872_v40 }
  0xba   :  { %1083 = vmatprep.mubr.f32.mxu1 %v10062_v1  ;;  %1020 = vmatpush1.msra.mxu1 %v6878_v42  ;;  %v6962_v1 = vld [vmem:[#allocation17 + $0x110] sm:$0xff] }
  0xbb   :  { %1021 = vmatprep.subr.mxu1 %v6884_v44  ;;  %10570 = vst [vmem:[#allocation50_spill] sm:$0xff] %v6962_v1 }
  0xbc   :  { %1022 = vmatpush1.msra.mxu1 %v6890_v46 }
  0xbd   :  { %1023 = vmatprep.subr.mxu1 %v6896_v48 }
  0xbe   :  { %1024 = vmatpush1.msra.mxu1 %v6902_v50 }
  0xbf   :  { %1025 = vmatprep.subr.mxu1 %v6908_v52 }
  0xc0   :  { %1026 = vmatpush1.msra.mxu1 %v6914_v54 }
  0xc1   :  { %1027 = vmatprep.subr.mxu1 %v6920_v56 }
  0xc2   :  { %1028 = vmatpush1.msra.mxu1 %v6926_v58 }
  0xc3   :  { %1029 = vmatprep.subr.mxu1 %v6932_v60  ;;  %v7194_v60 = vld [vmem:[#allocation16 + $0x98] sm:$0xff] }
  0xc4   :  { %1030 = vmatpush1.msra.mxu1 %v6938_v62  ;;  %v7088_v62 = vld [vmem:[#allocation16 + $0x1b8] sm:$0xff]  ;;  %10649 = vst [vmem:[#allocation128_spill] sm:$0xff] %v7194_v60 }
  0xc5   :  { %1031 = vmatprep.subr.mxu1 %v6944_v2  ;;  %v6966_v2 = vld [vmem:[#allocation17 + $0xe8] sm:$0xff]  ;;  %10613 = vst [vmem:[#allocation92_spill] sm:$0xff] %v7088_v62 }
  0xc6   :  { %1032 = vmatpush1.msra.mxu1 %v6950_v4  ;;  %10571 = vst [vmem:[#allocation51_spill] sm:$0xff] %v6966_v2  ;;  %964 = vmatprep.subr.mxu0 %v6966_v2  ;;  %v6972_v4 = vld [vmem:[#allocation17 + $0xe0] sm:$0xff]  ;;  %v6986_v2 = vld [vmem:[#allocation17 + $0xd0] sm:$0xff] }
  0xc7   :  { %1033 = vmatprep.subr.mxu1 %v6956_v6  ;;  %10573 = vst [vmem:[#allocation53_spill] sm:$0xff] %v6972_v4  ;;  %965 = vmatpush1.msra.mxu0 %v6972_v4  ;;  %v6978_v6 = vld [vmem:[#allocation17 + $0xc8] sm:$0xff]  ;;  %10578 = vst [vmem:[#allocation58_spill] sm:$0xff] %v6986_v2  ;;  %v6992_v4 = vld [vmem:[#allocation17 + $0xb8] sm:$0xff] }
  0xc8   :  { %1034 = vmatpush1.msra.mxu1 %v6962_v1  ;;  %10575 = vst [vmem:[#allocation55_spill] sm:$0xff] %v6978_v6  ;;  %966 = vmatprep.subr.mxu0 %v6978_v6  ;;  %v6984_v1 = vld [vmem:[#allocation17 + $0xc0] sm:$0xff]  ;;  %10580 = vst [vmem:[#allocation60_spill] sm:$0xff] %v6992_v4  ;;  %v6998_v6 = vld [vmem:[#allocation17 + $0xb0] sm:$0xff] }
  0xc9   :  { %1035 = vmatprep.subr.mxu1 %v6968_v3  ;;  %10577 = vst [vmem:[#allocation57_spill] sm:$0xff] %v6984_v1  ;;  %967 = vmatpush1.msra.mxu0 %v6984_v1  ;;  %v6990_v3 = vld [vmem:[#allocation17 + $0xa8] sm:$0xff]  ;;  %10582 = vst [vmem:[#allocation62_spill] sm:$0xff] %v6998_v6  ;;  %v7004_v1 = vld [vmem:[#allocation17 + $0x98] sm:$0xff] }
  0xca   :  { %1036 = vmatpush1.msra.mxu1 %v6974_v5  ;;  %10579 = vst [vmem:[#allocation59_spill] sm:$0xff] %v6990_v3  ;;  %968 = vmatprep.subr.mxu0 %v6990_v3  ;;  %v6996_v5 = vld [vmem:[#allocation17 + $0xa0] sm:$0xff]  ;;  %10584 = vst [vmem:[#allocation64_spill] sm:$0xff] %v7004_v1  ;;  %v7010_v3 = vld [vmem:[#allocation17 + $0x90] sm:$0xff] }
  0xcb   :  { %1037 = vmatprep.subr.mxu1 %v6980_v7  ;;  %10581 = vst [vmem:[#allocation61_spill] sm:$0xff] %v6996_v5  ;;  %969 = vmatpush1.msra.mxu0 %v6996_v5  ;;  %v7002_v7 = vld [vmem:[#allocation17 + $0x88] sm:$0xff]  ;;  %10586 = vst [vmem:[#allocation66_spill] sm:$0xff] %v7010_v3  ;;  %v7016_v5 = vld [vmem:[#allocation17 + $0x78] sm:$0xff] }
  0xcc   :  { %1038 = vmatpush1.msra.mxu1 %v6986_v2  ;;  %10583 = vst [vmem:[#allocation63_spill] sm:$0xff] %v7002_v7  ;;  %970 = vmatprep.subr.mxu0 %v7002_v7  ;;  %v7008_v2 = vld [vmem:[#allocation17 + $0x80] sm:$0xff]  ;;  %10588 = vst [vmem:[#allocation68_spill] sm:$0xff] %v7016_v5  ;;  %v7022_v7 = vld [vmem:[#allocation17 + $0x70] sm:$0xff] }
  0xcd   :  { %1039 = vmatprep.subr.mxu1 %v6992_v4  ;;  %10585 = vst [vmem:[#allocation65_spill] sm:$0xff] %v7008_v2  ;;  %971 = vmatpush1.msra.mxu0 %v7008_v2  ;;  %v7014_v4 = vld [vmem:[#allocation17 + $0x68] sm:$0xff]  ;;  %10590 = vst [vmem:[#allocation70_spill] sm:$0xff] %v7022_v7  ;;  %v7028_v2 = vld [vmem:[#allocation17 + $0x58] sm:$0xff] }
  0xce   :  { %1040 = vmatpush1.msra.mxu1 %v6998_v6  ;;  %10587 = vst [vmem:[#allocation67_spill] sm:$0xff] %v7014_v4  ;;  %972 = vmatprep.subr.mxu0 %v7014_v4  ;;  %v7020_v6 = vld [vmem:[#allocation17 + $0x60] sm:$0xff]  ;;  %10592 = vst [vmem:[#allocation72_spill] sm:$0xff] %v7028_v2  ;;  %v7034_v4 = vld [vmem:[#allocation17 + $0x50] sm:$0xff] }
  0xcf   :  { %1041 = vmatprep.subr.mxu1 %v7004_v1  ;;  %10589 = vst [vmem:[#allocation69_spill] sm:$0xff] %v7020_v6  ;;  %973 = vmatpush1.msra.mxu0 %v7020_v6  ;;  %v7026_v1 = vld [vmem:[#allocation17 + $0x48] sm:$0xff]  ;;  %10594 = vst [vmem:[#allocation74_spill] sm:$0xff] %v7034_v4  ;;  %v7040_v6 = vld [vmem:[#allocation17 + $0x38] sm:$0xff] }
  0xd0   :  { %1042 = vmatpush1.msra.mxu1 %v7010_v3  ;;  %10591 = vst [vmem:[#allocation71_spill] sm:$0xff] %v7026_v1  ;;  %974 = vmatprep.subr.mxu0 %v7026_v1  ;;  %v7032_v3 = vld [vmem:[#allocation17 + $0x40] sm:$0xff]  ;;  %10596 = vst [vmem:[#allocation76_spill] sm:$0xff] %v7040_v6  ;;  %v7046_v1 = vld [vmem:[#allocation17 + $0x30] sm:$0xff] }
  0xd1   :  { %1043 = vmatprep.subr.mxu1 %v7016_v5  ;;  %10593 = vst [vmem:[#allocation73_spill] sm:$0xff] %v7032_v3  ;;  %975 = vmatpush1.msra.mxu0 %v7032_v3  ;;  %v7038_v5 = vld [vmem:[#allocation17 + $0x28] sm:$0xff]  ;;  %10598 = vst [vmem:[#allocation78_spill] sm:$0xff] %v7046_v1  ;;  %v7052_v3 = vld [vmem:[#allocation17 + $0x18] sm:$0xff] }
  0xd2   :  { %1044 = vmatpush1.msra.mxu1 %v7022_v7  ;;  %10595 = vst [vmem:[#allocation75_spill] sm:$0xff] %v7038_v5  ;;  %976 = vmatprep.subr.mxu0 %v7038_v5  ;;  %v7044_v7 = vld [vmem:[#allocation17 + $0x20] sm:$0xff]  ;;  %10600 = vst [vmem:[#allocation80_spill] sm:$0xff] %v7052_v3  ;;  %v7058_v5 = vld [vmem:[#allocation17 + $0x10] sm:$0xff] }
  0xd3   :  { %1045 = vmatprep.subr.mxu1 %v7028_v2  ;;  %10597 = vst [vmem:[#allocation77_spill] sm:$0xff] %v7044_v7  ;;  %977 = vmatpush1.msra.mxu0 %v7044_v7  ;;  %v7050_v2 = vld [vmem:[#allocation17 + $0x8] sm:$0xff]  ;;  %10602 = vst [vmem:[#allocation82_spill] sm:$0xff] %v7058_v5  ;;  %v7064_v7 = vld [vmem:[#allocation16 + $0x1f8] sm:$0xff] }
  0xd4   :  { %1046 = vmatpush1.msra.mxu1 %v7034_v4  ;;  %10599 = vst [vmem:[#allocation79_spill] sm:$0xff] %v7050_v2  ;;  %978 = vmatprep.subr.mxu0 %v7050_v2  ;;  %v7056_v4 = vld [vmem:[#allocation17] sm:$0xff]  ;;  %10604 = vst [vmem:[#allocation84_spill] sm:$0xff] %v7064_v7  ;;  %v7070_v2 = vld [vmem:[#allocation16 + $0x1f0] sm:$0xff] }
  0xd5   :  { %1047 = vmatprep.subr.mxu1 %v7040_v6  ;;  %10601 = vst [vmem:[#allocation81_spill] sm:$0xff] %v7056_v4  ;;  %979 = vmatpush1.msra.mxu0 %v7056_v4  ;;  %v7062_v6 = vld [vmem:[#allocation16 + $0x1e8] sm:$0xff]  ;;  %10606 = vst [vmem:[#allocation86_spill] sm:$0xff] %v7070_v2  ;;  %v7076_v4 = vld [vmem:[#allocation16 + $0x1d8] sm:$0xff] }
  0xd6   :  { %1048 = vmatpush1.msra.mxu1 %v7046_v1  ;;  %10603 = vst [vmem:[#allocation83_spill] sm:$0xff] %v7062_v6  ;;  %1090 = vmatprep.subr.mxu0 %v7062_v6  ;;  %v7068_v1 = vld [vmem:[#allocation16 + $0x1e0] sm:$0xff]  ;;  %10609 = vst [vmem:[#allocation88_spill] sm:$0xff] %v7076_v4  ;;  %v7082_v6 = vld [vmem:[#allocation16 + $0x1d0] sm:$0xff] }
  0xd7   :  { %1049 = vmatprep.subr.mxu1 %v7052_v3  ;;  %10605 = vst [vmem:[#allocation85_spill] sm:$0xff] %v7068_v1  ;;  %v10607_v3 = vmov 0.0   ;;  %10611 = vst [vmem:[#allocation90_spill] sm:$0xff] %v7082_v6 }
  0xd8   :  { %1050 = vmatpush1.msra.mxu1 %v7058_v5  ;;  %1013 = vmatmul.mubr.f32.vlgmr.msra.gmra.mxu0 %v10607_v3  ;;  %v7080_v5 = vld [vmem:[#allocation16 + $0x1c0] sm:$0xff] }
  0xd9   :  { %1161 = vmatprep.subr.mxu1 %v7064_v7  ;;  %1084 = vmatmul.mubr.f32.vlgmr.msra.gmra.mxu1 %v10607_v3  ;;  %10610 = vst [vmem:[#allocation89_spill] sm:$0xff] %v7080_v5  ;;  %v7086_v7 = vld [vmem:[#allocation16 + $0x1a8] sm:$0xff] }
  0xda   :  { %1091 = vmatpush1.msra.mxu0 %v7068_v1  ;;  %1162 = vmatpush1.msra.mxu1 %v7070_v2  ;;  %10612 = vst [vmem:[#allocation91_spill] sm:$0xff] %v7086_v7  ;;  %v7094_v1 = vld [vmem:[#allocation16 + $0x1b0] sm:$0xff]  ;;  %v7098_v2 = vld [vmem:[#allocation16 + $0x188] sm:$0xff] }
  0xdb   :  { %1092 = vmatprep.subr.mxu0 %v7074_v63  ;;  %1163 = vmatprep.subr.mxu1 %v7076_v4  ;;  %10615 = vst [vmem:[#allocation94_spill] sm:$0xff] %v7094_v1  ;;  %10616 = vst [vmem:[#allocation95_spill] sm:$0xff] %v7098_v2  ;;  %v7100_v63 = vld [vmem:[#allocation16 + $0x198] sm:$0xff]  ;;  %v7104_v4 = vld [vmem:[#allocation16 + $0x180] sm:$0xff] }
  0xdc   :  { %1093 = vmatpush1.msra.mxu0 %v7080_v5  ;;  %1164 = vmatpush1.msra.mxu1 %v7082_v6  ;;  %10617 = vst [vmem:[#allocation96_spill] sm:$0xff] %v7100_v63  ;;  %10618 = vst [vmem:[#allocation97_spill] sm:$0xff] %v7104_v4  ;;  %v7106_v5 = vld [vmem:[#allocation16 + $0x190] sm:$0xff]  ;;  %v7110_v6 = vld [vmem:[#allocation16 + $0x168] sm:$0xff] }
  0xdd   :  { %1094 = vmatprep.subr.mxu0 %v7086_v7  ;;  %1165 = vmatprep.subr.mxu1 %v7088_v62  ;;  %10619 = vst [vmem:[#allocation98_spill] sm:$0xff] %v7106_v5  ;;  %10620 = vst [vmem:[#allocation99_spill] sm:$0xff] %v7110_v6  ;;  %v7112_v7 = vld [vmem:[#allocation16 + $0x178] sm:$0xff]  ;;  %v7116_v62 = vld [vmem:[#allocation16 + $0x160] sm:$0xff] }
  0xde   :  { %1095 = vmatpush1.msra.mxu0 %v7092_v61  ;;  %1166 = vmatpush1.msra.mxu1 %v7094_v1  ;;  %10621 = vst [vmem:[#allocation100_spill] sm:$0xff] %v7112_v7  ;;  %10622 = vst [vmem:[#allocation101_spill] sm:$0xff] %v7116_v62  ;;  %v7118_v61 = vld [vmem:[#allocation16 + $0x170] sm:$0xff]  ;;  %v7122_v1 = vld [vmem:[#allocation16 + $0x148] sm:$0xff] }
  0xdf   :  { %1096 = vmatprep.subr.mxu0 %v7098_v2  ;;  %1167 = vmatprep.subr.mxu1 %v7100_v63  ;;  %10623 = vst [vmem:[#allocation102_spill] sm:$0xff] %v7118_v61  ;;  %10624 = vst [vmem:[#allocation103_spill] sm:$0xff] %v7122_v1  ;;  %v7124_v2 = vld [vmem:[#allocation16 + $0x158] sm:$0xff]  ;;  %v7128_v63 = vld [vmem:[#allocation16 + $0x140] sm:$0xff] }
  0xe0   :  { %1097 = vmatpush1.msra.mxu0 %v7104_v4  ;;  %1168 = vmatpush1.msra.mxu1 %v7106_v5  ;;  %10625 = vst [vmem:[#allocation104_spill] sm:$0xff] %v7124_v2  ;;  %10626 = vst [vmem:[#allocation105_spill] sm:$0xff] %v7128_v63  ;;  %v7130_v4 = vld [vmem:[#allocation16 + $0x150] sm:$0xff]  ;;  %v7134_v5 = vld [vmem:[#allocation16 + $0x128] sm:$0xff] }
  0xe1   :  { %1098 = vmatprep.subr.mxu0 %v7110_v6  ;;  %1169 = vmatprep.subr.mxu1 %v7112_v7  ;;  %10627 = vst [vmem:[#allocation106_spill] sm:$0xff] %v7130_v4  ;;  %10628 = vst [vmem:[#allocation107_spill] sm:$0xff] %v7134_v5  ;;  %v7136_v6 = vld [vmem:[#allocation16 + $0x138] sm:$0xff]  ;;  %v7140_v7 = vld [vmem:[#allocation16 + $0x120] sm:$0xff] }
  0xe2   :  { %1099 = vmatpush1.msra.mxu0 %v7116_v62  ;;  %1170 = vmatpush1.msra.mxu1 %v7118_v61  ;;  %10629 = vst [vmem:[#allocation108_spill] sm:$0xff] %v7136_v6  ;;  %10630 = vst [vmem:[#allocation109_spill] sm:$0xff] %v7140_v7  ;;  %v7142_v62 = vld [vmem:[#allocation16 + $0x130] sm:$0xff]  ;;  %v7146_v61 = vld [vmem:[#allocation16 + $0x108] sm:$0xff] }
  0xe3   :  { %1100 = vmatprep.subr.mxu0 %v7122_v1  ;;  %1171 = vmatprep.subr.mxu1 %v7124_v2  ;;  %10631 = vst [vmem:[#allocation110_spill] sm:$0xff] %v7142_v62  ;;  %10632 = vst [vmem:[#allocation111_spill] sm:$0xff] %v7146_v61  ;;  %v7148_v1 = vld [vmem:[#allocation16 + $0x118] sm:$0xff]  ;;  %v7152_v2 = vld [vmem:[#allocation16 + $0x100] sm:$0xff] }
  0xe4   :  { %1101 = vmatpush1.msra.mxu0 %v7128_v63  ;;  %1172 = vmatpush1.msra.mxu1 %v7130_v4  ;;  %10633 = vst [vmem:[#allocation112_spill] sm:$0xff] %v7148_v1  ;;  %10634 = vst [vmem:[#allocation113_spill] sm:$0xff] %v7152_v2  ;;  %v7154_v63 = vld [vmem:[#allocation16 + $0x110] sm:$0xff]  ;;  %v7158_v4 = vld [vmem:[#allocation16 + $0xe8] sm:$0xff] }
  0xe5   :  { %1102 = vmatprep.subr.mxu0 %v7134_v5  ;;  %1173 = vmatprep.subr.mxu1 %v7136_v6  ;;  %10635 = vst [vmem:[#allocation114_spill] sm:$0xff] %v7154_v63  ;;  %10636 = vst [vmem:[#allocation115_spill] sm:$0xff] %v7158_v4  ;;  %v7160_v5 = vld [vmem:[#allocation16 + $0xf8] sm:$0xff]  ;;  %v7164_v6 = vld [vmem:[#allocation16 + $0xe0] sm:$0xff] }
  0xe6   :  { %1103 = vmatpush1.msra.mxu0 %v7140_v7  ;;  %1174 = vmatpush1.msra.mxu1 %v7142_v62  ;;  %10637 = vst [vmem:[#allocation116_spill] sm:$0xff] %v7160_v5  ;;  %10638 = vst [vmem:[#allocation117_spill] sm:$0xff] %v7164_v6  ;;  %v7166_v7 = vld [vmem:[#allocation16 + $0xf0] sm:$0xff]  ;;  %v7170_v62 = vld [vmem:[#allocation16 + $0xc8] sm:$0xff] }
  0xe7   :  { %1104 = vmatprep.subr.mxu0 %v7146_v61  ;;  %1175 = vmatprep.subr.mxu1 %v7148_v1  ;;  %10639 = vst [vmem:[#allocation118_spill] sm:$0xff] %v7166_v7  ;;  %10640 = vst [vmem:[#allocation119_spill] sm:$0xff] %v7170_v62  ;;  %v7172_v61 = vld [vmem:[#allocation16 + $0xd8] sm:$0xff]  ;;  %v7176_v1 = vld [vmem:[#allocation16 + $0xc0] sm:$0xff] }
  0xe8   :  { %1105 = vmatpush1.msra.mxu0 %v7152_v2  ;;  %1176 = vmatpush1.msra.mxu1 %v7154_v63  ;;  %10641 = vst [vmem:[#allocation120_spill] sm:$0xff] %v7172_v61  ;;  %10642 = vst [vmem:[#allocation121_spill] sm:$0xff] %v7176_v1  ;;  %v7178_v2 = vld [vmem:[#allocation16 + $0xd0] sm:$0xff]  ;;  %v7182_v63 = vld [vmem:[#allocation16 + $0xa8] sm:$0xff] }
  0xe9   :  { %1106 = vmatprep.subr.mxu0 %v7158_v4  ;;  %1177 = vmatprep.subr.mxu1 %v7160_v5  ;;  %10643 = vst [vmem:[#allocation122_spill] sm:$0xff] %v7178_v2  ;;  %10644 = vst [vmem:[#allocation123_spill] sm:$0xff] %v7182_v63  ;;  %v7184_v4 = vld [vmem:[#allocation16 + $0xb8] sm:$0xff]  ;;  %v7186_v5 = vld [vmem:[#allocation16 + $0xa0] sm:$0xff] }
  0xea   :  { %1107 = vmatpush1.msra.mxu0 %v7164_v6  ;;  %1178 = vmatpush1.msra.mxu1 %v7166_v7  ;;  %10645 = vst [vmem:[#allocation124_spill] sm:$0xff] %v7184_v4  ;;  %10646 = vst [vmem:[#allocation125_spill] sm:$0xff] %v7186_v5  ;;  %v7190_v6 = vld [vmem:[#allocation16 + $0xb0] sm:$0xff]  ;;  %v7192_v7 = vld [vmem:[#allocation16 + $0x88] sm:$0xff] }
  0xeb   :  { %1108 = vmatprep.subr.mxu0 %v7170_v62  ;;  %1179 = vmatprep.subr.mxu1 %v7172_v61  ;;  %10647 = vst [vmem:[#allocation126_spill] sm:$0xff] %v7190_v6  ;;  %10648 = vst [vmem:[#allocation127_spill] sm:$0xff] %v7192_v7  ;;  %v7198_v61 = vld [vmem:[#allocation16 + $0x80] sm:$0xff]  ;;  %v7200_v62 = vld [vmem:[#allocation16 + $0x90] sm:$0xff] }
  0xec   :  { %1109 = vmatpush1.msra.mxu0 %v7176_v1  ;;  %1180 = vmatpush1.msra.mxu1 %v7178_v2  ;;  %10650 = vst [vmem:[#allocation129_spill] sm:$0xff] %v7198_v61  ;;  %10651 = vst [vmem:[#allocation130_spill] sm:$0xff] %v7200_v62  ;;  %v7204_v1 = vld [vmem:[#allocation16 + $0x68] sm:$0xff]  ;;  %v7206_v2 = vld [vmem:[#allocation16 + $0x78] sm:$0xff] }
  0xed   :  { %1110 = vmatprep.subr.mxu0 %v7182_v63  ;;  %1181 = vmatprep.subr.mxu1 %v7184_v4  ;;  %10652 = vst [vmem:[#allocation131_spill] sm:$0xff] %v7204_v1  ;;  %10653 = vst [vmem:[#allocation132_spill] sm:$0xff] %v7206_v2  ;;  %v7212_v63 = vld [vmem:[#allocation16 + $0x70] sm:$0xff]  ;;  %v7216_v4 = vld [vmem:[#allocation16 + $0x48] sm:$0xff] }
  0xee   :  { %1111 = vmatpush1.msra.mxu0 %v7186_v5  ;;  %1182 = vmatpush1.msra.mxu1 %v7190_v6  ;;  %10655 = vst [vmem:[#allocation134_spill] sm:$0xff] %v7212_v63  ;;  %10656 = vst [vmem:[#allocation135_spill] sm:$0xff] %v7216_v4  ;;  %v7218_v5 = vld [vmem:[#allocation16 + $0x58] sm:$0xff]  ;;  %v7222_v6 = vld [vmem:[#allocation16 + $0x40] sm:$0xff] }
  0xef   :  { %1112 = vmatprep.subr.mxu0 %v7192_v7  ;;  %1183 = vmatprep.subr.mxu1 %v7194_v60  ;;  %10657 = vst [vmem:[#allocation136_spill] sm:$0xff] %v7218_v5  ;;  %10658 = vst [vmem:[#allocation137_spill] sm:$0xff] %v7222_v6  ;;  %v7224_v7 = vld [vmem:[#allocation16 + $0x50] sm:$0xff]  ;;  %v7228_v60 = vld [vmem:[#allocation16 + $0x28] sm:$0xff] }
  0xf0   :  { %1113 = vmatpush1.msra.mxu0 %v7198_v61  ;;  %1184 = vmatpush1.msra.mxu1 %v7200_v62  ;;  %10659 = vst [vmem:[#allocation138_spill] sm:$0xff] %v7224_v7  ;;  %10660 = vst [vmem:[#allocation139_spill] sm:$0xff] %v7228_v60  ;;  %v7230_v61 = vld [vmem:[#allocation16 + $0x38] sm:$0xff]  ;;  %v7234_v62 = vld [vmem:[#allocation16 + $0x20] sm:$0xff] }
  0xf1   :  { %1114 = vmatprep.subr.mxu0 %v7204_v1  ;;  %1185 = vmatprep.subr.mxu1 %v7206_v2  ;;  %10661 = vst [vmem:[#allocation140_spill] sm:$0xff] %v7230_v61  ;;  %10662 = vst [vmem:[#allocation141_spill] sm:$0xff] %v7234_v62  ;;  %v7236_v1 = vld [vmem:[#allocation16 + $0x30] sm:$0xff]  ;;  %v7240_v2 = vld [vmem:[#allocation16 + $0x8] sm:$0xff] }
  0xf2   :  { %1115 = vmatpush1.msra.mxu0 %v7210_v59  ;;  %1186 = vmatpush1.msra.mxu1 %v7212_v63  ;;  %10663 = vst [vmem:[#allocation142_spill] sm:$0xff] %v7236_v1  ;;  %10664 = vst [vmem:[#allocation143_spill] sm:$0xff] %v7240_v2  ;;  %v7242_v59 = vld [vmem:[#allocation16 + $0x18] sm:$0xff]  ;;  %v7246_v63 = vld [vmem:[#allocation16] sm:$0xff] }
  0xf3   :  { %1116 = vmatprep.subr.mxu0 %v7216_v4  ;;  %1187 = vmatprep.subr.mxu1 %v7218_v5  ;;  %10665 = vst [vmem:[#allocation144_spill] sm:$0xff] %v7242_v59  ;;  %10666 = vst [vmem:[#allocation145_spill] sm:$0xff] %v7246_v63  ;;  %v7248_v4 = vld [vmem:[#allocation16 + $0x10] sm:$0xff] }
  0xf4   :  { %1117 = vmatpush1.msra.mxu0 %v7222_v6  ;;  %1188 = vmatpush1.msra.mxu1 %v7224_v7  ;;  %10667 = vst [vmem:[#allocation146_spill] sm:$0xff] %v7248_v4  ;;  %v7254_v7 = vld [vmem:[#allocation14 + $0x1e8] sm:$0xff] }
  0xf5   :  { %1118 = vmatprep.subr.mxu0 %v7228_v60  ;;  %1189 = vmatprep.subr.mxu1 %v7230_v61  ;;  %10668 = vst [vmem:[#allocation147_spill] sm:$0xff] %v7254_v7 }
  0xf6   :  { %1119 = vmatpush1.msra.mxu0 %v7234_v62  ;;  %1190 = vmatpush1.msra.mxu1 %v7236_v1  ;;  %v177_v62 = vlaneseq }
  0xf7   :  { %1120 = vmatprep.subr.mxu0 %v7240_v2  ;;  %1191 = vmatprep.subr.mxu1 %v7242_v59  ;;  %v175_v59 = vld [vmem:[#allocation13] sm:$0xf] }
  0xf8   :  { %1121 = vmatpush1.msra.mxu0 %v7246_v63  ;;  %1192 = vmatpush1.msra.mxu1 %v7248_v4  ;;  %v7262_v1 = vshrl.u32 %v177_v62, 7 }
  0xf9   :  { %1154 = vmatprep.mubr.f32.mxu0 %v10607_v3  ;;  %1225 = vmatprep.mubr.f32.mxu1 %v10607_v3 }
  0xfa   :  { %1326 = vmatprep.subr.mxu0 %v7254_v7  ;;  %1397 = vmatprep.subr.mxu1 %v6767_v8  ;;  %10669 = vst [vmem:[#allocation148_spill] sm:$0xff] %v7262_v1  ;;  %v10180_v2 = vsub.s32 0, %v7262_v1  ;;  %v10183_v60 = vsub.s32 1, %v7262_v1 }
  0xfc   :  { %v180_v4 = vrot.slane %v175_v59, %v10180_v2  ;;  %v184_v5 = vrot.slane %v175_v59, %v10183_v60 }
 0x139   :  { %v415_v61 = vpop.f32.mrf.mxu1 }
 0x13b   :  { %v417_v63 = vpop.f32.mrf.mxu1 }
 0x13c   :  { %v418_v48 = vadd.f32 %v417_v63, %v184_v5 }
 0x13d   :  { %v419_v6 = vpop.f32.mrf.mxu1 }
 0x13e   :  { %v7270_v7 = vadd.f32 %v419_v6, %v180_v4 }
 0x13f   :  { %v421_v8 = vpop.f32.mrf.mxu1 }
 0x140   :  { %10670 = vst [vmem:[#allocation149_spill] sm:$0xff] %v7270_v7  ;;  %v7272_v58 = vadd.f32 %v421_v8, %v184_v5 }
 0x141   :  { %v425_v62 = vpop.f32.mrf.mxu1 }
 0x142   :  { %10671 = vst [vmem:[#allocation150_spill] sm:$0xff] %v7272_v58  ;;  %v7274_v57 = vadd.f32 %v425_v62, %v180_v4 }
 0x143   :  { %v427_v56 = vpop.f32.mrf.mxu1 }
 0x144   :  { %10672 = vst [vmem:[#allocation151_spill] sm:$0xff] %v7274_v57  ;;  %v7276_v55 = vadd.f32 %v427_v56, %v184_v5 }
 0x145   :  { %v429_v54 = vpop.f32.mrf.mxu1 }
 0x146   :  { %10673 = vst [vmem:[#allocation152_spill] sm:$0xff] %v7276_v55  ;;  %v7278_v53 = vadd.f32 %v429_v54, %v180_v4 }
 0x147   :  { %v431_v52 = vpop.f32.mrf.mxu1 }
 0x148   :  { %10674 = vst [vmem:[#allocation153_spill] sm:$0xff] %v7278_v53  ;;  %v7280_v2 = vadd.f32 %v431_v52, %v184_v5 }
 0x149   :  { %v435_v51 = vpop.f32.mrf.mxu1 }
 0x14a   :  { %10675 = vst [vmem:[#allocation154_spill] sm:$0xff] %v7280_v2  ;;  %v7282_v50 = vadd.f32 %v435_v51, %v180_v4 }
 0x14b   :  { %v437_v6 = vpop.f32.mrf.mxu1 }
 0x14c   :  { %10676 = vst [vmem:[#allocation155_spill] sm:$0xff] %v7282_v50  ;;  %v7284_v60 = vadd.f32 %v437_v6, %v184_v5  ;;  %v10187_v6 = vsub.s32 2, %v7262_v1 }
 0x14d   :  { %v439_v8 = vpop.f32.mrf.mxu1 }
 0x14e   :  { %10677 = vst [vmem:[#allocation156_spill] sm:$0xff] %v7284_v60  ;;  %v7286_v58 = vadd.f32 %v439_v8, %v180_v4  ;;  %v10191_v8 = vsub.s32 3, %v7262_v1  ;;  %v416_v1 = vadd.f32 %v415_v61, %v180_v4 }
 0x14f   :  { %v441_v62 = vpop.f32.mrf.mxu1 }
 0x150   :  { %10678 = vst [vmem:[#allocation157_spill] sm:$0xff] %v7286_v58  ;;  %v7288_v57 = vadd.f32 %v441_v62, %v184_v5  ;;  %v188_v62 = vrot.slane %v175_v59, %v10187_v6 }
 0x151   :  { %v445_v56 = vpop.f32.mrf.mxu1 }
 0x152   :  { %10679 = vst [vmem:[#allocation158_spill] sm:$0xff] %v7288_v57  ;;  %v7290_v55 = vadd.f32 %v445_v56, %v180_v4 }
 0x153   :  { %v447_v54 = vpop.f32.mrf.mxu1 }
 0x154   :  { %10680 = vst [vmem:[#allocation159_spill] sm:$0xff] %v7290_v55  ;;  %v7292_v53 = vadd.f32 %v447_v54, %v184_v5  ;;  %v192_v54 = vrot.slane %v175_v59, %v10191_v8  ;;  %v722_v55 = vpop.f32.mrf.mxu0 }
 0x155   :  { %v449_v52 = vpop.f32.mrf.mxu1 }
 0x156   :  { %10681 = vst [vmem:[#allocation160_spill] sm:$0xff] %v7292_v53  ;;  %v7294_v2 = vadd.f32 %v449_v52, %v180_v4  ;;  %v724_v6 = vpop.f32.mrf.mxu0 }
 0x157   :  { %v451_v51 = vpop.f32.mrf.mxu1  ;;  %v799_v8 = vadd.f32 %v724_v6, %v418_v48 }
 0x158   :  { %10682 = vst [vmem:[#allocation161_spill] sm:$0xff] %v7294_v2  ;;  %v7296_v50 = vadd.f32 %v451_v51, %v184_v5 }
 0x159   :  { %v488_v60 = vpop.f32.mrf.mxu1 }
 0x15a   :  { %10683 = vst [vmem:[#allocation162_spill] sm:$0xff] %v7296_v50 }
 0x15b   :  { %v490_v58 = vpop.f32.mrf.mxu1 }
 0x15d   :  { %v492_v56 = vpop.f32.mrf.mxu1 }
 0x15e   :  { %v7304_v53 = vadd.f32 %v492_v56, %v188_v62 }
 0x15f   :  { %v494_v52 = vpop.f32.mrf.mxu1 }
 0x160   :  { %10684 = vst [vmem:[#allocation163_spill] sm:$0xff] %v7304_v53  ;;  %v7306_v2 = vadd.f32 %v494_v52, %v192_v54 }
 0x161   :  { %v498_v51 = vpop.f32.mrf.mxu1 }
 0x162   :  { %10685 = vst [vmem:[#allocation164_spill] sm:$0xff] %v7306_v2  ;;  %v7308_v50 = vadd.f32 %v498_v51, %v188_v62  ;;  %v798_v51 = vadd.f32 %v722_v55, %v416_v1 }
 0x163   :  { %v500_v57 = vpop.f32.mrf.mxu1 }
 0x164   :  { %10686 = vst [vmem:[#allocation165_spill] sm:$0xff] %v7308_v50  ;;  %v7310_v7 = vadd.f32 %v500_v57, %v192_v54  ;;  %v806_v57 = vmul.f32 0.5, %v799_v8 }
 0x165   :  { %v502_v49 = vpop.f32.mrf.mxu1 }
 0x166   :  { %10687 = vst [vmem:[#allocation166_spill] sm:$0xff] %v7310_v7  ;;  %v7312_v47 = vadd.f32 %v502_v49, %v188_v62  ;;  %v802_v49 = vmul.f32 0.5, %v798_v51  ;;  %6306 = vtanh.f32 %v806_v57  ;;  %v491_v51 = vadd.f32 %v490_v58, %v192_v54 }
 0x167   :  { %v504_v46 = vpop.f32.mrf.mxu1 }
 0x168   :  { %10688 = vst [vmem:[#allocation167_spill] sm:$0xff] %v7312_v47  ;;  %v7314_v59 = vadd.f32 %v504_v46, %v192_v54  ;;  %6308 = vtanh.f32 %v802_v49 }
 0x169   :  { %v508_v56 = vpop.f32.mrf.mxu1 }
 0x16a   :  { %10689 = vst [vmem:[#allocation168_spill] sm:$0xff] %v7314_v59  ;;  %v7316_v52 = vadd.f32 %v508_v56, %v188_v62  ;;  %v7847_v59 = vld [vmem:[#allocation17 + $0x128] sm:$0xff] }
 0x16b   :  { %v510_v2 = vpop.f32.mrf.mxu1 }
 0x16c   :  { %10690 = vst [vmem:[#allocation169_spill] sm:$0xff] %v7316_v52  ;;  %v7318_v50 = vadd.f32 %v510_v2, %v192_v54  ;;  %v489_v2 = vadd.f32 %v488_v60, %v188_v62  ;;  %v7843_v52 = vld [vmem:[#allocation17 + $0x150] sm:$0xff] }
 0x16d   :  { %v512_v53 = vpop.f32.mrf.mxu1 }
 0x16e   :  { %10691 = vst [vmem:[#allocation170_spill] sm:$0xff] %v7318_v50  ;;  %v7320_v7 = vadd.f32 %v512_v53, %v188_v62  ;;  %v7841_v50 = vld [vmem:[#allocation17 + $0x140] sm:$0xff] }
 0x16f   :  { %v514_v63 = vpop.f32.mrf.mxu1 }
 0x170   :  { %10692 = vst [vmem:[#allocation171_spill] sm:$0xff] %v7320_v7  ;;  %v7322_v5 = vadd.f32 %v514_v63, %v192_v54 }
 0x171   :  { %v518_v47 = vpop.f32.mrf.mxu1 }
 0x172   :  { %10693 = vst [vmem:[#allocation172_spill] sm:$0xff] %v7322_v5  ;;  %v7324_v46 = vadd.f32 %v518_v47, %v188_v62 }
 0x173   :  { %v520_v61 = vpop.f32.mrf.mxu1  ;;  %v6307_v57 = vpop.eup %6306 }
 0x174   :  { %10694 = vst [vmem:[#allocation173_spill] sm:$0xff] %v7324_v46  ;;  %v7326_v48 = vadd.f32 %v520_v61, %v192_v54  ;;  %v808_v46 = vmul.f32 0.5, %v6307_v57  ;;  %v10715_v57 = vld [vmem:[#allocation43_spill] sm:$0xff] }
 0x175   :  { %v522_v4 = vpop.f32.mrf.mxu1  ;;  %v6309_v47 = vpop.eup %6308 }
 0x176   :  { %10695 = vst [vmem:[#allocation174_spill] sm:$0xff] %v7326_v48  ;;  %v7328_v1 = vadd.f32 %v522_v4, %v188_v62  ;;  %v804_v49 = vmul.f32 0.5, %v6309_v47  ;;  %v809_v61 = vadd.f32 0.5, %v808_v46  ;;  %v7351_v46 = vld [vmem:[#allocation14 + $0x1a0] sm:$0xff]  ;;  %v10716_v47 = vld [vmem:[#allocation44_spill] sm:$0xff] }
 0x177   :  { %v524_v55 = vpop.f32.mrf.mxu1  ;;  %10847 = vst [vmem:[#allocation44_spill] sm:$0xff] %v7841_v50 }
 0x178   :  { %10696 = vst [vmem:[#allocation175_spill] sm:$0xff] %v7328_v1  ;;  %v7330_v6 = vadd.f32 %v524_v55, %v192_v54  ;;  %v805_v48 = vadd.f32 0.5, %v804_v49  ;;  %v815_v1 = vmul.f32 0.0, %v809_v61  ;;  %v10717_v49 = vld [vmem:[#allocation45_spill] sm:$0xff]  ;;  %v10718_v61 = vld [vmem:[#allocation46_spill] sm:$0xff] }
 0x179   :  { %v793_v53 = vpop.f32.mrf.mxu1  ;;  %10848 = vst [vmem:[#allocation45_spill] sm:$0xff] %v7843_v52  ;;  %10849 = vst [vmem:[#allocation46_spill] sm:$0xff] %v7847_v59 }
 0x17a   :  { %10697 = vst [vmem:[#allocation176_spill] sm:$0xff] %v7330_v6  ;;  %v800_v8 = vadd.f32 %v793_v53, %v489_v2  ;;  %v7337_v53 = vld [vmem:[#allocation14 + $0x1e0] sm:$0xff]  ;;  %v7837_v6 = vld [vmem:[#allocation17 + $0x158] sm:$0xff] }
 0x17b   :  { %v795_v56 = vpop.f32.mrf.mxu1  ;;  %10846 = vst [vmem:[#allocation43_spill] sm:$0xff] %v7837_v6 }
 0x17c   :  { %6310 = vtanh.f32 %v800_v8  ;;  %v801_v63 = vadd.f32 %v795_v56, %v491_v51  ;;  %v7339_v8 = vld [vmem:[#allocation14 + $0x1c8] sm:$0xff]  ;;  %v10712_v56 = vld [vmem:[#allocation40_spill] sm:$0xff]  ;;  %v10713_v51 = vld [vmem:[#allocation41_spill] sm:$0xff] }
 0x17e   :  { %v811_v5 = vmul.f32 0.5, %v801_v63  ;;  %v10714_v63 = vld [vmem:[#allocation42_spill] sm:$0xff] }
 0x180   :  { %6312 = vtanh.f32 %v811_v5  ;;  %v7343_v5 = vld [vmem:[#allocation14 + $0x1c0] sm:$0xff] }
 0x189   :  { %v6311_v4 = vpop.eup %6310 }
 0x18a   :  { %v816_v7 = vmul.f32 %v6311_v4, %v805_v48  ;;  %v7355_v48 = vld [vmem:[#allocation14 + $0x188] sm:$0xff] }
 0x18b   :  { %v10719_v4 = vld [vmem:[#allocation47_spill] sm:$0xff] }
 0x18c   :  { %v7332_v60 = vadd.f32 %v816_v7, %v815_v1  ;;  %v7347_v7 = vld [vmem:[#allocation14 + $0x1a8] sm:$0xff]  ;;  %v7359_v1 = vld [vmem:[#allocation14 + $0x180] sm:$0xff] }
 0x18d   :  { %v6313_v62 = vpop.eup %6312 }
 0x18e   :  { %6314 = vtanh.f32 %v7332_v60  ;;  %v813_v55 = vmul.f32 0.5, %v6313_v62  ;;  %v10720_v62 = vld [vmem:[#allocation48_spill] sm:$0xff] }
 0x190   :  { %v814_v58 = vadd.f32 0.5, %v813_v55  ;;  %v10721_v55 = vld [vmem:[#allocation49_spill] sm:$0xff] }
 0x19b   :  { %v6315_v54 = vpop.eup %6314 }
 0x19c   :  { %v7335_v2 = vmul.f32 %v6315_v54, %v814_v58  ;;  %v10722_v58 = vld [vmem:[#allocation50_spill] sm:$0xff]  ;;  %v10723_v54 = vld [vmem:[#allocation51_spill] sm:$0xff] }
 0x19e   :  { %1155 = vmatmul.mubr.f32.vlgmr.msra.gmra.mxu0 %v7335_v2  ;;  %1226 = vmatmul.mubr.f32.vlgmr.msra.gmra.mxu1 %v7335_v2 }
 0x19f   :  { %1327 = vmatpush1.msra.mxu0 %v7337_v53  ;;  %1398 = vmatpush1.msra.mxu1 %v6770_v9  ;;  %v7363_v9 = vld [vmem:[#allocation14 + $0x168] sm:$0xff] }
 0x1a0   :  { %1328 = vmatprep.subr.mxu0 %v7339_v8  ;;  %1399 = vmatprep.subr.mxu1 %v6772_v10  ;;  %v7367_v10 = vld [vmem:[#allocation14 + $0x160] sm:$0xff] }
 0x1a1   :  { %1329 = vmatpush1.msra.mxu0 %v7343_v5  ;;  %1400 = vmatpush1.msra.mxu1 %v6774_v11  ;;  %v7371_v11 = vld [vmem:[#allocation14 + $0x148] sm:$0xff] }
 0x1a2   :  { %1330 = vmatprep.subr.mxu0 %v7347_v7  ;;  %1401 = vmatprep.subr.mxu1 %v6777_v12  ;;  %v7375_v12 = vld [vmem:[#allocation14 + $0x140] sm:$0xff] }
 0x1a3   :  { %1331 = vmatpush1.msra.mxu0 %v7351_v46  ;;  %1402 = vmatpush1.msra.mxu1 %v6781_v13  ;;  %v7379_v13 = vld [vmem:[#allocation14 + $0x128] sm:$0xff] }
 0x1a4   :  { %1332 = vmatprep.subr.mxu0 %v7355_v48  ;;  %1403 = vmatprep.subr.mxu1 %v6784_v14  ;;  %v7383_v14 = vld [vmem:[#allocation14 + $0x120] sm:$0xff] }
 0x1a5   :  { %1333 = vmatpush1.msra.mxu0 %v7359_v1  ;;  %1404 = vmatpush1.msra.mxu1 %v6787_v15  ;;  %v7387_v15 = vld [vmem:[#allocation14 + $0x108] sm:$0xff] }
 0x1a6   :  { %1334 = vmatprep.subr.mxu0 %v7363_v9  ;;  %1405 = vmatprep.subr.mxu1 %v6790_v16  ;;  %v7391_v16 = vld [vmem:[#allocation14 + $0x100] sm:$0xff] }
 0x1a7   :  { %1335 = vmatpush1.msra.mxu0 %v7367_v10  ;;  %1406 = vmatpush1.msra.mxu1 %v6793_v17  ;;  %v7395_v17 = vld [vmem:[#allocation14 + $0xe8] sm:$0xff] }
 0x1a8   :  { %1336 = vmatprep.subr.mxu0 %v7371_v11  ;;  %1407 = vmatprep.subr.mxu1 %v6796_v18  ;;  %v7399_v18 = vld [vmem:[#allocation14 + $0xe0] sm:$0xff] }
 0x1a9   :  { %1337 = vmatpush1.msra.mxu0 %v7375_v12  ;;  %1408 = vmatpush1.msra.mxu1 %v6799_v19  ;;  %v7403_v19 = vld [vmem:[#allocation14 + $0xc8] sm:$0xff] }
 0x1aa   :  { %1338 = vmatprep.subr.mxu0 %v7379_v13  ;;  %1409 = vmatprep.subr.mxu1 %v6802_v20  ;;  %v7407_v20 = vld [vmem:[#allocation14 + $0xc0] sm:$0xff] }
 0x1ab   :  { %1339 = vmatpush1.msra.mxu0 %v7383_v14  ;;  %1410 = vmatpush1.msra.mxu1 %v6806_v21  ;;  %v7411_v21 = vld [vmem:[#allocation14 + $0xa8] sm:$0xff] }
 0x1ac   :  { %1340 = vmatprep.subr.mxu0 %v7387_v15  ;;  %1411 = vmatprep.subr.mxu1 %v6809_v22  ;;  %v7415_v22 = vld [vmem:[#allocation14 + $0xa0] sm:$0xff] }
 0x1ad   :  { %1341 = vmatpush1.msra.mxu0 %v7391_v16  ;;  %1412 = vmatpush1.msra.mxu1 %v6812_v23  ;;  %v7419_v23 = vld [vmem:[#allocation14 + $0x88] sm:$0xff] }
 0x1ae   :  { %1342 = vmatprep.subr.mxu0 %v7395_v17  ;;  %1413 = vmatprep.subr.mxu1 %v6815_v24  ;;  %v7423_v24 = vld [vmem:[#allocation14 + $0x80] sm:$0xff] }
 0x1af   :  { %1343 = vmatpush1.msra.mxu0 %v7399_v18  ;;  %1414 = vmatpush1.msra.mxu1 %v6818_v25  ;;  %v7427_v25 = vld [vmem:[#allocation14 + $0x68] sm:$0xff] }
 0x1b0   :  { %1344 = vmatprep.subr.mxu0 %v7403_v19  ;;  %1415 = vmatprep.subr.mxu1 %v6821_v26  ;;  %v7431_v26 = vld [vmem:[#allocation14 + $0x60] sm:$0xff] }
 0x1b1   :  { %1345 = vmatpush1.msra.mxu0 %v7407_v20  ;;  %1416 = vmatpush1.msra.mxu1 %v6824_v27  ;;  %v7435_v27 = vld [vmem:[#allocation14 + $0x48] sm:$0xff] }
 0x1b2   :  { %1346 = vmatprep.subr.mxu0 %v7411_v21  ;;  %1417 = vmatprep.subr.mxu1 %v6827_v28  ;;  %v7439_v28 = vld [vmem:[#allocation14 + $0x40] sm:$0xff] }
 0x1b3   :  { %1347 = vmatpush1.msra.mxu0 %v7415_v22  ;;  %1418 = vmatpush1.msra.mxu1 %v6831_v29  ;;  %v7443_v29 = vld [vmem:[#allocation14 + $0x28] sm:$0xff] }
 0x1b4   :  { %1348 = vmatprep.subr.mxu0 %v7419_v23  ;;  %1419 = vmatprep.subr.mxu1 %v6834_v30  ;;  %v7447_v30 = vld [vmem:[#allocation14 + $0x20] sm:$0xff] }
 0x1b5   :  { %1349 = vmatpush1.msra.mxu0 %v7423_v24  ;;  %1420 = vmatpush1.msra.mxu1 %v6837_v31  ;;  %v7451_v31 = vld [vmem:[#allocation14 + $0x8] sm:$0xff] }
 0x1b6   :  { %1350 = vmatprep.subr.mxu0 %v7427_v25  ;;  %1421 = vmatprep.subr.mxu1 %v6840_v32  ;;  %v7455_v32 = vld [vmem:[#allocation14] sm:$0xff] }
 0x1b7   :  { %1351 = vmatpush1.msra.mxu0 %v7431_v26  ;;  %1422 = vmatpush1.msra.mxu1 %v6843_v33  ;;  %v10698_v33 = vld [vmem:[#allocation26_spill] sm:$0xff] }
 0x1b8   :  { %1352 = vmatprep.subr.mxu0 %v7435_v27  ;;  %1423 = vmatprep.subr.mxu1 %v6846_v0  ;;  %v10699_v0 = vld [vmem:[#allocation27_spill] sm:$0xff] }
 0x1b9   :  { %1353 = vmatpush1.msra.mxu0 %v7439_v28  ;;  %1424 = vmatpush1.msra.mxu1 %v6850_v34  ;;  %v10700_v34 = vld [vmem:[#allocation28_spill] sm:$0xff] }
 0x1ba   :  { %1354 = vmatprep.subr.mxu0 %v7443_v29  ;;  %1425 = vmatprep.subr.mxu1 %v6853_v35  ;;  %v10701_v35 = vld [vmem:[#allocation29_spill] sm:$0xff] }
 0x1bb   :  { %1355 = vmatpush1.msra.mxu0 %v7447_v30  ;;  %1426 = vmatpush1.msra.mxu1 %v6857_v36  ;;  %v10702_v36 = vld [vmem:[#allocation30_spill] sm:$0xff] }
 0x1bc   :  { %1356 = vmatprep.subr.mxu0 %v7451_v31  ;;  %1427 = vmatprep.subr.mxu1 %v6860_v37  ;;  %v10703_v37 = vld [vmem:[#allocation31_spill] sm:$0xff] }
 0x1bd   :  { %1357 = vmatpush1.msra.mxu0 %v7455_v32  ;;  %1390 = vmatprep.mubr.f32.mxu0 %v10607_v3 }
 0x1be   :  { %1428 = vmatpush1.msra.mxu1 %v6863_v38  ;;  %1461 = vmatprep.mubr.f32.mxu1 %v10607_v3  ;;  %v10704_v38 = vld [vmem:[#allocation32_spill] sm:$0xff] }
 0x1bf   :  { %1391 = vmatmul.mubr.f32.vlgmr.msra.gmra.mxu0 %v7335_v2  ;;  %1462 = vmatmul.mubr.f32.vlgmr.msra.gmra.mxu1 %v7335_v2  ;;  %v10724_v2 = vld [vmem:[#allocation52_spill] sm:$0xff] }
 0x1c0   :  { %1618 = vmatprep.subr.mxu0 %v6870_v39  ;;  %1689 = vmatprep.subr.mxu1 %v6872_v40  ;;  %v10705_v39 = vld [vmem:[#allocation33_spill] sm:$0xff]  ;;  %v10706_v40 = vld [vmem:[#allocation34_spill] sm:$0xff] }
 0x1c1   :  { %1619 = vmatpush1.msra.mxu0 %v6876_v41  ;;  %1690 = vmatpush1.msra.mxu1 %v6878_v42  ;;  %v10707_v41 = vld [vmem:[#allocation35_spill] sm:$0xff]  ;;  %v10708_v42 = vld [vmem:[#allocation36_spill] sm:$0xff] }
 0x1c2   :  { %1620 = vmatprep.subr.mxu0 %v6882_v43  ;;  %1691 = vmatprep.subr.mxu1 %v6884_v44  ;;  %v10709_v43 = vld [vmem:[#allocation37_spill] sm:$0xff]  ;;  %v10710_v44 = vld [vmem:[#allocation38_spill] sm:$0xff] }
 0x1c3   :  { %1621 = vmatpush1.msra.mxu0 %v6888_v45  ;;  %1692 = vmatpush1.msra.mxu1 %v10698_v33  ;;  %v10711_v45 = vld [vmem:[#allocation39_spill] sm:$0xff]  ;;  %v10725_v33 = vld [vmem:[#allocation53_spill] sm:$0xff] }
 0x1c4   :  { %1622 = vmatprep.subr.mxu0 %v10699_v0  ;;  %1693 = vmatprep.subr.mxu1 %v10700_v34  ;;  %v10726_v0 = vld [vmem:[#allocation54_spill] sm:$0xff]  ;;  %v10727_v34 = vld [vmem:[#allocation55_spill] sm:$0xff] }
 0x1c5   :  { %1623 = vmatpush1.msra.mxu0 %v10701_v35  ;;  %1694 = vmatpush1.msra.mxu1 %v10702_v36  ;;  %v10728_v35 = vld [vmem:[#allocation56_spill] sm:$0xff]  ;;  %v10729_v36 = vld [vmem:[#allocation57_spill] sm:$0xff] }
 0x1c6   :  { %1624 = vmatprep.subr.mxu0 %v10703_v37  ;;  %1695 = vmatprep.subr.mxu1 %v10704_v38  ;;  %v10730_v37 = vld [vmem:[#allocation58_spill] sm:$0xff]  ;;  %v10731_v38 = vld [vmem:[#allocation59_spill] sm:$0xff] }
 0x1c7   :  { %1625 = vmatpush1.msra.mxu0 %v10705_v39  ;;  %1696 = vmatpush1.msra.mxu1 %v10706_v40  ;;  %v10732_v39 = vld [vmem:[#allocation60_spill] sm:$0xff]  ;;  %v10733_v40 = vld [vmem:[#allocation61_spill] sm:$0xff] }
 0x1c8   :  { %1626 = vmatprep.subr.mxu0 %v10707_v41  ;;  %1697 = vmatprep.subr.mxu1 %v10708_v42  ;;  %v10734_v41 = vld [vmem:[#allocation62_spill] sm:$0xff]  ;;  %v10735_v42 = vld [vmem:[#allocation63_spill] sm:$0xff] }
 0x1c9   :  { %1627 = vmatpush1.msra.mxu0 %v10709_v43  ;;  %1698 = vmatpush1.msra.mxu1 %v10710_v44  ;;  %v10736_v43 = vld [vmem:[#allocation64_spill] sm:$0xff]  ;;  %v10737_v44 = vld [vmem:[#allocation65_spill] sm:$0xff] }
 0x1ca   :  { %1628 = vmatprep.subr.mxu0 %v10711_v45  ;;  %1699 = vmatprep.subr.mxu1 %v10712_v56  ;;  %v10738_v45 = vld [vmem:[#allocation66_spill] sm:$0xff]  ;;  %v10739_v56 = vld [vmem:[#allocation67_spill] sm:$0xff] }
 0x1cb   :  { %1629 = vmatpush1.msra.mxu0 %v10713_v51  ;;  %1700 = vmatpush1.msra.mxu1 %v10714_v63  ;;  %v10740_v51 = vld [vmem:[#allocation68_spill] sm:$0xff]  ;;  %v10741_v63 = vld [vmem:[#allocation69_spill] sm:$0xff] }
 0x1cc   :  { %1630 = vmatprep.subr.mxu0 %v10715_v57  ;;  %1701 = vmatprep.subr.mxu1 %v10716_v47  ;;  %v10742_v57 = vld [vmem:[#allocation70_spill] sm:$0xff]  ;;  %v10743_v47 = vld [vmem:[#allocation71_spill] sm:$0xff] }
 0x1cd   :  { %1631 = vmatpush1.msra.mxu0 %v10717_v49  ;;  %1702 = vmatpush1.msra.mxu1 %v10718_v61  ;;  %v10744_v49 = vld [vmem:[#allocation72_spill] sm:$0xff]  ;;  %v10745_v61 = vld [vmem:[#allocation73_spill] sm:$0xff] }
 0x1ce   :  { %1632 = vmatprep.subr.mxu0 %v10719_v4  ;;  %1703 = vmatprep.subr.mxu1 %v10720_v62  ;;  %v10746_v4 = vld [vmem:[#allocation74_spill] sm:$0xff]  ;;  %v10747_v62 = vld [vmem:[#allocation75_spill] sm:$0xff] }
 0x1cf   :  { %1633 = vmatpush1.msra.mxu0 %v10721_v55  ;;  %1704 = vmatpush1.msra.mxu1 %v10722_v58  ;;  %v10748_v55 = vld [vmem:[#allocation76_spill] sm:$0xff]  ;;  %v10749_v58 = vld [vmem:[#allocation77_spill] sm:$0xff] }
 0x1d0   :  { %1634 = vmatprep.subr.mxu0 %v10723_v54  ;;  %1705 = vmatprep.subr.mxu1 %v10724_v2  ;;  %v10750_v54 = vld [vmem:[#allocation78_spill] sm:$0xff]  ;;  %v10751_v2 = vld [vmem:[#allocation79_spill] sm:$0xff] }
 0x1d1   :  { %1635 = vmatpush1.msra.mxu0 %v10725_v33  ;;  %1706 = vmatpush1.msra.mxu1 %v10726_v0  ;;  %v10752_v33 = vld [vmem:[#allocation80_spill] sm:$0xff]  ;;  %v10753_v0 = vld [vmem:[#allocation81_spill] sm:$0xff] }
 0x1d2   :  { %1636 = vmatprep.subr.mxu0 %v10727_v34  ;;  %1707 = vmatprep.subr.mxu1 %v10728_v35  ;;  %v10754_v34 = vld [vmem:[#allocation82_spill] sm:$0xff]  ;;  %v10755_v35 = vld [vmem:[#allocation83_spill] sm:$0xff] }
 0x1d3   :  { %1637 = vmatpush1.msra.mxu0 %v10729_v36  ;;  %1708 = vmatpush1.msra.mxu1 %v10730_v37  ;;  %v10756_v36 = vld [vmem:[#allocation84_spill] sm:$0xff]  ;;  %v1014_v37 = vpop.f32.mrf.mxu0 }
 0x1d4   :  { %1638 = vmatprep.subr.mxu0 %v10731_v38  ;;  %1709 = vmatprep.subr.mxu1 %v10732_v39  ;;  %v1085_v38 = vpop.f32.mrf.mxu1  ;;  %v559_v39 = vld [vmem:[%s10058_s6] sm:$0xf] }
 0x1d5   :  { %1639 = vmatpush1.msra.mxu0 %v10733_v40  ;;  %1710 = vmatpush1.msra.mxu1 %v10734_v41  ;;  %v1016_v40 = vpop.f32.mrf.mxu0  ;;  %v10757_v41 = vld [vmem:[#allocation148_spill] sm:$0xff] }
 0x1d6   :  { %1640 = vmatprep.subr.mxu0 %v10735_v42  ;;  %1711 = vmatprep.subr.mxu1 %v10736_v43  ;;  %v10758_v42 = vsub.s32 0, %v10757_v41 }
 0x1d7   :  { %1641 = vmatpush1.msra.mxu0 %v10737_v44  ;;  %1712 = vmatpush1.msra.mxu1 %v10738_v45  ;;  %v1087_v44 = vpop.f32.mrf.mxu1 }
 0x1d8   :  { %1642 = vmatprep.subr.mxu0 %v10739_v56  ;;  %1713 = vmatprep.subr.mxu1 %v10740_v51  ;;  %v7540_v43 = vrot.slane %v559_v39, %v10758_v42  ;;  %v10759_v51 = vsub.s32 1, %v10757_v41 }
 0x1d9   :  { %1643 = vmatpush1.msra.mxu0 %v10741_v63  ;;  %1714 = vmatpush1.msra.mxu1 %v10742_v57 }
 0x1da   :  { %1644 = vmatprep.subr.mxu0 %v10743_v47  ;;  %1715 = vmatprep.subr.mxu1 %v10744_v49  ;;  %v7544_v63 = vrot.slane %v559_v39, %v10759_v51 }
 0x1db   :  { %1645 = vmatpush1.msra.mxu0 %v10745_v61  ;;  %1716 = vmatpush1.msra.mxu1 %v10746_v4 }
 0x1dc   :  { %1646 = vmatprep.subr.mxu0 %v10747_v62  ;;  %1717 = vmatprep.subr.mxu1 %v10748_v55  ;;  %v10760_v62 = vsub.s32 2, %v10757_v41 }
 0x1dd   :  { %1647 = vmatpush1.msra.mxu0 %v10749_v58  ;;  %1718 = vmatpush1.msra.mxu1 %v10750_v54 }
 0x1de   :  { %1648 = vmatprep.subr.mxu0 %v10751_v2  ;;  %1719 = vmatprep.subr.mxu1 %v10752_v33  ;;  %v7549_v55 = vrot.slane %v559_v39, %v10760_v62 }
 0x1df   :  { %1649 = vmatpush1.msra.mxu0 %v10753_v0  ;;  %1720 = vmatpush1.msra.mxu1 %v10754_v34  ;;  %v10761_v34 = vsub.s32 3, %v10757_v41  ;;  %v10762_v41 = vld [vmem:[#allocation149_spill] sm:$0xff] }
 0x1e0   :  { %1682 = vmatprep.mubr.f32.mxu0 %v10607_v3  ;;  %1753 = vmatprep.mubr.f32.mxu1 %v10607_v3 }
 0x1e1   :  { %1760 = vmatprep.subr.mxu0 %v10755_v35  ;;  %1831 = vmatprep.subr.mxu1 %v10756_v36  ;;  %v7555_v35 = vrot.slane %v559_v39, %v10761_v34  ;;  %v10764_v34 = vld [vmem:[#allocation163_spill] sm:$0xff] }
 0x25e   :  { %v1156_v45 = vpop.f32.mrf.mxu0  ;;  %v1227_v57 = vpop.f32.mrf.mxu1 }
 0x25f   :  { %v1157_v56 = vadd.f32 %v1156_v45, %v1014_v37  ;;  %v1228_v58 = vadd.f32 %v1227_v57, %v1085_v38 }
 0x260   :  { %v1158_v47 = vpop.f32.mrf.mxu0  ;;  %v1229_v33 = vpop.f32.mrf.mxu1 }
 0x261   :  { %v1232_v49 = vadd.f32 %v1157_v56, %v7540_v43  ;;  %v1159_v61 = vadd.f32 %v1158_v47, %v1016_v40  ;;  %v1234_v0 = vadd.f32 %v1228_v58, %v7549_v55  ;;  %v1230_v36 = vadd.f32 %v1229_v33, %v1087_v44  ;;  %v10763_v33 = vld [vmem:[#allocation150_spill] sm:$0xff] }
 0x263   :  { %v1236_v4 = vmul.f32 0.5, %v1232_v49  ;;  %v1233_v54 = vadd.f32 %v1159_v61, %v7544_v63  ;;  %v1235_v37 = vadd.f32 %v1230_v36, %v7555_v35 }
 0x265   :  { %6316 = vtanh.f32 %v1236_v4  ;;  %v1240_v2 = vmul.f32 0.5, %v1233_v54  ;;  %v1245_v40 = vmul.f32 0.5, %v1235_v37 }
 0x267   :  { %6318 = vtanh.f32 %v1240_v2 }
 0x268   :  { %6320 = vtanh.f32 %v1234_v0 }
 0x269   :  { %6322 = vtanh.f32 %v1245_v40 }
 0x272   :  { %v6317_v42 = vpop.eup %6316 }
 0x273   :  { %v1238_v45 = vmul.f32 0.5, %v6317_v42 }
 0x274   :  { %v6319_v38 = vpop.eup %6318 }
 0x275   :  { %v1239_v56 = vadd.f32 0.5, %v1238_v45  ;;  %v1242_v51 = vmul.f32 0.5, %v6319_v38  ;;  %v6321_v47 = vpop.eup %6320 }
 0x276   :  { %v6323_v54 = vpop.eup %6322 }
 0x277   :  { %v1243_v57 = vadd.f32 0.5, %v1242_v51  ;;  %v1250_v61 = vmul.f32 %v6321_v47, %v1239_v56  ;;  %v1247_v40 = vmul.f32 0.5, %v6323_v54  ;;  %v10766_v51 = vld [vmem:[#allocation164_spill] sm:$0xff]  ;;  %v10767_v47 = vld [vmem:[#allocation85_spill] sm:$0xff] }
 0x278   :  { %v10774_v54 = vld [vmem:[#allocation92_spill] sm:$0xff] }
 0x279   :  { %v1249_v49 = vmul.f32 0.0, %v1243_v57  ;;  %v1248_v42 = vadd.f32 0.5, %v1247_v40  ;;  %v10778_v40 = vld [vmem:[#allocation96_spill] sm:$0xff] }
 0x27b   :  { %v7558_v4 = vadd.f32 %v1250_v61, %v1249_v49  ;;  %v10768_v49 = vld [vmem:[#allocation86_spill] sm:$0xff]  ;;  %v10769_v61 = vld [vmem:[#allocation87_spill] sm:$0xff] }
 0x27d   :  { %6324 = vtanh.f32 %v7558_v4 }
 0x27f   :  { %v1392_v39 = vpop.f32.mrf.mxu0  ;;  %v1463_v62 = vpop.f32.mrf.mxu1 }
 0x280   :  { %v1468_v44 = vadd.f32 %v1392_v39, %v10762_v41  ;;  %v1470_v36 = vadd.f32 %v1463_v62, %v10764_v34  ;;  %v10770_v39 = vld [vmem:[#allocation88_spill] sm:$0xff]  ;;  %v10771_v41 = vld [vmem:[#allocation89_spill] sm:$0xff]  ;;  %v10776_v34 = vld [vmem:[#allocation94_spill] sm:$0xff] }
 0x281   :  { %v1394_v58 = vpop.f32.mrf.mxu0  ;;  %v1465_v38 = vpop.f32.mrf.mxu1 }
 0x282   :  { %v1472_v2 = vmul.f32 0.5, %v1468_v44  ;;  %v1469_v0 = vadd.f32 %v1394_v58, %v10763_v33  ;;  %v1471_v57 = vadd.f32 %v1465_v38, %v10766_v51  ;;  %v10772_v44 = vld [vmem:[#allocation90_spill] sm:$0xff]  ;;  %v10773_v58 = vld [vmem:[#allocation91_spill] sm:$0xff]  ;;  %v10779_v38 = vld [vmem:[#allocation97_spill] sm:$0xff] }
 0x283   :  { %v10780_v51 = vld [vmem:[#allocation98_spill] sm:$0xff] }
 0x284   :  { %6326 = vtanh.f32 %v1472_v2  ;;  %v1476_v37 = vmul.f32 0.5, %v1469_v0  ;;  %v1481_v33 = vmul.f32 0.5, %v1471_v57  ;;  %v10775_v0 = vld [vmem:[#allocation93_spill] sm:$0xff] }
 0x286   :  { %6328 = vtanh.f32 %v1476_v37  ;;  %v10777_v37 = vld [vmem:[#allocation95_spill] sm:$0xff] }
 0x287   :  { %6330 = vtanh.f32 %v1470_v36 }
 0x288   :  { %6332 = vtanh.f32 %v1481_v33  ;;  %v10791_v33 = vld [vmem:[#allocation109_spill] sm:$0xff] }
 0x28a   :  { %v6325_v45 = vpop.eup %6324 }
 0x28b   :  { %v7564_v56 = vmul.f32 %v6325_v45, %v1248_v42 }
 0x28d   :  { %10765 = vst [vmem:[#allocation26_spill] sm:$0xff] %v7564_v56  ;;  %1683 = vmatmul.mubr.f32.vlgmr.msra.gmra.mxu0 %v7564_v56  ;;  %1754 = vmatmul.mubr.f32.vlgmr.msra.gmra.mxu1 %v7564_v56  ;;  %v7835_v56 = vld [vmem:[#allocation17 + $0x148] sm:$0xff] }
 0x28e   :  { %1761 = vmatpush1.msra.mxu0 %v10767_v47  ;;  %1832 = vmatpush1.msra.mxu1 %v10768_v49  ;;  %v10781_v49 = vld [vmem:[#allocation99_spill] sm:$0xff]  ;;  %10845 = vst [vmem:[#allocation42_spill] sm:$0xff] %v7835_v56 }
 0x28f   :  { %1762 = vmatprep.subr.mxu0 %v10769_v61  ;;  %1833 = vmatprep.subr.mxu1 %v10770_v39  ;;  %v10782_v61 = vld [vmem:[#allocation100_spill] sm:$0xff] }
 0x290   :  { %1763 = vmatpush1.msra.mxu0 %v10771_v41  ;;  %1834 = vmatpush1.msra.mxu1 %v10772_v44  ;;  %v10783_v41 = vld [vmem:[#allocation101_spill] sm:$0xff]  ;;  %v10784_v44 = vld [vmem:[#allocation102_spill] sm:$0xff] }
 0x291   :  { %v6327_v62 = vpop.eup %6326  ;;  %1764 = vmatprep.subr.mxu0 %v10773_v58  ;;  %1835 = vmatprep.subr.mxu1 %v10774_v54  ;;  %v10786_v58 = vld [vmem:[#allocation104_spill] sm:$0xff] }
 0x292   :  { %v1474_v2 = vmul.f32 0.5, %v6327_v62  ;;  %1765 = vmatpush1.msra.mxu0 %v10775_v0  ;;  %1836 = vmatpush1.msra.mxu1 %v10776_v34  ;;  %v10785_v62 = vld [vmem:[#allocation103_spill] sm:$0xff]  ;;  %v10788_v0 = vld [vmem:[#allocation106_spill] sm:$0xff] }
 0x293   :  { %v6329_v36 = vpop.eup %6328  ;;  %1766 = vmatprep.subr.mxu0 %v10777_v37  ;;  %1837 = vmatprep.subr.mxu1 %v10778_v40  ;;  %v10789_v34 = vld [vmem:[#allocation107_spill] sm:$0xff]  ;;  %v10792_v40 = vld [vmem:[#allocation110_spill] sm:$0xff] }
 0x294   :  { %v1475_v42 = vadd.f32 0.5, %v1474_v2  ;;  %v1478_v45 = vmul.f32 0.5, %v6329_v36  ;;  %1767 = vmatpush1.msra.mxu0 %v10779_v38  ;;  %1838 = vmatpush1.msra.mxu1 %v10780_v51  ;;  %v6331_v47 = vpop.eup %6330  ;;  %v10787_v2 = vld [vmem:[#allocation105_spill] sm:$0xff]  ;;  %v10790_v36 = vld [vmem:[#allocation108_spill] sm:$0xff]  ;;  %v10796_v38 = vld [vmem:[#allocation114_spill] sm:$0xff] }
 0x295   :  { %1768 = vmatprep.subr.mxu0 %v10781_v49  ;;  %1839 = vmatprep.subr.mxu1 %v10782_v61  ;;  %v10797_v51 = vld [vmem:[#allocation115_spill] sm:$0xff]  ;;  %v10799_v49 = vld [vmem:[#allocation117_spill] sm:$0xff]  ;;  %v10800_v61 = vld [vmem:[#allocation118_spill] sm:$0xff] }
 0x296   :  { %v1479_v57 = vadd.f32 0.5, %v1478_v45  ;;  %v1486_v39 = vmul.f32 %v6331_v47, %v1475_v42  ;;  %1769 = vmatpush1.msra.mxu0 %v10783_v41  ;;  %1840 = vmatpush1.msra.mxu1 %v10784_v44  ;;  %v10793_v42 = vld [vmem:[#allocation111_spill] sm:$0xff]  ;;  %v10794_v45 = vld [vmem:[#allocation112_spill] sm:$0xff]  ;;  %v10803_v41 = vld [vmem:[#allocation121_spill] sm:$0xff] }
 0x297   :  { %1770 = vmatprep.subr.mxu0 %v10785_v62  ;;  %1841 = vmatprep.subr.mxu1 %v10786_v58  ;;  %v10798_v47 = vld [vmem:[#allocation116_spill] sm:$0xff]  ;;  %v10804_v44 = vld [vmem:[#allocation122_spill] sm:$0xff]  ;;  %v10805_v62 = vld [vmem:[#allocation123_spill] sm:$0xff] }
 0x298   :  { %v1485_v54 = vmul.f32 %v1479_v57, %v7332_v60  ;;  %1771 = vmatpush1.msra.mxu0 %v10787_v2  ;;  %1842 = vmatpush1.msra.mxu1 %v10788_v0  ;;  %v10795_v60 = vld [vmem:[#allocation113_spill] sm:$0xff]  ;;  %v10801_v57 = vld [vmem:[#allocation119_spill] sm:$0xff]  ;;  %v10806_v58 = vld [vmem:[#allocation124_spill] sm:$0xff]  ;;  %v6333_v0 = vpop.eup %6332 }
 0x299   :  { %1772 = vmatprep.subr.mxu0 %v10789_v34  ;;  %1843 = vmatprep.subr.mxu1 %v10790_v36  ;;  %v10808_v2 = vld [vmem:[#allocation126_spill] sm:$0xff]  ;;  %v10809_v34 = vld [vmem:[#allocation127_spill] sm:$0xff]  ;;  %v10810_v36 = vld [vmem:[#allocation128_spill] sm:$0xff] }
 0x29a   :  { %v7594_v37 = vadd.f32 %v1486_v39, %v1485_v54  ;;  %1773 = vmatpush1.msra.mxu0 %v10791_v33  ;;  %1844 = vmatpush1.msra.mxu1 %v10792_v40  ;;  %v10802_v39 = vld [vmem:[#allocation120_spill] sm:$0xff]  ;;  %v10807_v54 = vld [vmem:[#allocation125_spill] sm:$0xff]  ;;  %v10812_v40 = vld [vmem:[#allocation130_spill] sm:$0xff] }
 0x29b   :  { %1774 = vmatprep.subr.mxu0 %v10793_v42  ;;  %1845 = vmatprep.subr.mxu1 %v10794_v45  ;;  %v10811_v33 = vld [vmem:[#allocation129_spill] sm:$0xff]  ;;  %v10813_v42 = vld [vmem:[#allocation131_spill] sm:$0xff]  ;;  %v10814_v45 = vld [vmem:[#allocation132_spill] sm:$0xff] }
 0x29c   :  { %6334 = vtanh.f32 %v7594_v37  ;;  %1775 = vmatpush1.msra.mxu0 %v10795_v60  ;;  %1846 = vmatpush1.msra.mxu1 %v10796_v38  ;;  %v1483_v60 = vmul.f32 0.5, %v6333_v0  ;;  %v10815_v38 = vld [vmem:[#allocation133_spill] sm:$0xff]  ;;  %v10826_v0 = vld [vmem:[#allocation144_spill] sm:$0xff] }
 0x29d   :  { %1776 = vmatprep.subr.mxu0 %v10797_v51  ;;  %1847 = vmatprep.subr.mxu1 %v10798_v47  ;;  %v10816_v51 = vld [vmem:[#allocation134_spill] sm:$0xff]  ;;  %v10817_v47 = vld [vmem:[#allocation135_spill] sm:$0xff] }
 0x29e   :  { %1777 = vmatpush1.msra.mxu0 %v10799_v49  ;;  %1848 = vmatpush1.msra.mxu1 %v10800_v61  ;;  %v10818_v49 = vld [vmem:[#allocation136_spill] sm:$0xff]  ;;  %v10819_v61 = vld [vmem:[#allocation137_spill] sm:$0xff] }
 0x29f   :  { %1778 = vmatprep.subr.mxu0 %v10801_v57  ;;  %1849 = vmatprep.subr.mxu1 %v10802_v39  ;;  %v10820_v57 = vld [vmem:[#allocation138_spill] sm:$0xff] }
 0x2a0   :  { %1779 = vmatpush1.msra.mxu0 %v10803_v41  ;;  %1850 = vmatpush1.msra.mxu1 %v10804_v44  ;;  %v10821_v41 = vld [vmem:[#allocation139_spill] sm:$0xff]  ;;  %v10822_v44 = vld [vmem:[#allocation140_spill] sm:$0xff] }
 0x2a1   :  { %1780 = vmatprep.subr.mxu0 %v10805_v62  ;;  %1851 = vmatprep.subr.mxu1 %v10806_v58  ;;  %v1484_v62 = vadd.f32 0.5, %v1483_v60  ;;  %v10823_v58 = vld [vmem:[#allocation141_spill] sm:$0xff]  ;;  %v10829_v60 = vld [vmem:[#allocation147_spill] sm:$0xff] }
 0x2a2   :  { %1781 = vmatpush1.msra.mxu0 %v10807_v54  ;;  %1852 = vmatpush1.msra.mxu1 %v10808_v2  ;;  %v10824_v54 = vld [vmem:[#allocation142_spill] sm:$0xff]  ;;  %v10825_v2 = vld [vmem:[#allocation143_spill] sm:$0xff] }
 0x2a3   :  { %1782 = vmatprep.subr.mxu0 %v10809_v34  ;;  %1853 = vmatprep.subr.mxu1 %v10810_v36  ;;  %v10827_v34 = vld [vmem:[#allocation145_spill] sm:$0xff] }
 0x2a4   :  { %1783 = vmatpush1.msra.mxu0 %v10811_v33  ;;  %1854 = vmatpush1.msra.mxu1 %v10812_v40  ;;  %v7637_v33 = vld [vmem:[#allocation14 + $0x1f8] sm:$0xff]  ;;  %v10828_v40 = vld [vmem:[#allocation146_spill] sm:$0xff] }
 0x2a5   :  { %1784 = vmatprep.subr.mxu0 %v10813_v42  ;;  %1855 = vmatprep.subr.mxu1 %v10814_v45  ;;  %v7641_v42 = vld [vmem:[#allocation14 + $0x1f0] sm:$0xff]  ;;  %v7645_v45 = vld [vmem:[#allocation14 + $0x1d8] sm:$0xff] }
 0x2a6   :  { %1785 = vmatpush1.msra.mxu0 %v10815_v38  ;;  %1856 = vmatpush1.msra.mxu1 %v10816_v51  ;;  %v7649_v38 = vld [vmem:[#allocation14 + $0x1d0] sm:$0xff]  ;;  %v7653_v51 = vld [vmem:[#allocation14 + $0x1b8] sm:$0xff] }
 0x2a7   :  { %1786 = vmatprep.subr.mxu0 %v10817_v47  ;;  %1857 = vmatprep.subr.mxu1 %v10818_v49  ;;  %v7657_v47 = vld [vmem:[#allocation14 + $0x1b0] sm:$0xff]  ;;  %v7661_v49 = vld [vmem:[#allocation14 + $0x198] sm:$0xff] }
 0x2a8   :  { %1787 = vmatpush1.msra.mxu0 %v10819_v61  ;;  %1858 = vmatpush1.msra.mxu1 %v10820_v57  ;;  %v7793_v61 = vld [vmem:[#allocation17 + $0x1c0] sm:$0xff]  ;;  %v7795_v57 = vld [vmem:[#allocation17 + $0x1d0] sm:$0xff] }
 0x2a9   :  { %v6335_v39 = vpop.eup %6334  ;;  %1788 = vmatprep.subr.mxu0 %v10821_v41  ;;  %1859 = vmatprep.subr.mxu1 %v10822_v44  ;;  %10831 = vst [vmem:[#allocation28_spill] sm:$0xff] %v7793_v61  ;;  %10832 = vst [vmem:[#allocation29_spill] sm:$0xff] %v7795_v57  ;;  %v7801_v41 = vld [vmem:[#allocation17 + $0x1b8] sm:$0xff]  ;;  %v7805_v44 = vld [vmem:[#allocation17 + $0x1a0] sm:$0xff] }
 0x2aa   :  { %1789 = vmatpush1.msra.mxu0 %v10823_v58  ;;  %1860 = vmatpush1.msra.mxu1 %v10824_v54  ;;  %v7635_v36 = vmul.f32 %v6335_v39, %v1484_v62  ;;  %v7799_v39 = vld [vmem:[#allocation17 + $0x1a8] sm:$0xff]  ;;  %10834 = vst [vmem:[#allocation31_spill] sm:$0xff] %v7801_v41  ;;  %10835 = vst [vmem:[#allocation32_spill] sm:$0xff] %v7805_v44  ;;  %v7807_v62 = vld [vmem:[#allocation17 + $0x1b0] sm:$0xff] }
 0x2ab   :  { %1790 = vmatprep.subr.mxu0 %v10825_v2  ;;  %1861 = vmatprep.subr.mxu1 %v10826_v0  ;;  %10833 = vst [vmem:[#allocation30_spill] sm:$0xff] %v7799_v39  ;;  %10836 = vst [vmem:[#allocation33_spill] sm:$0xff] %v7807_v62  ;;  %v7811_v58 = vld [vmem:[#allocation17 + $0x188] sm:$0xff]  ;;  %v7813_v54 = vld [vmem:[#allocation17 + $0x198] sm:$0xff] }
 0x2ac   :  { %1791 = vmatpush1.msra.mxu0 %v10827_v34  ;;  %1824 = vmatprep.mubr.f32.mxu0 %v10607_v3  ;;  %10837 = vst [vmem:[#allocation34_spill] sm:$0xff] %v7811_v58  ;;  %10838 = vst [vmem:[#allocation35_spill] sm:$0xff] %v7813_v54  ;;  %v7817_v2 = vld [vmem:[#allocation17 + $0x180] sm:$0xff]  ;;  %v7819_v0 = vld [vmem:[#allocation17 + $0x190] sm:$0xff] }
 0x2ad   :  { %1862 = vmatpush1.msra.mxu1 %v10828_v40  ;;  %1895 = vmatprep.mubr.f32.mxu1 %v10607_v3  ;;  %10839 = vst [vmem:[#allocation36_spill] sm:$0xff] %v7817_v2  ;;  %10840 = vst [vmem:[#allocation37_spill] sm:$0xff] %v7819_v0  ;;  %v7823_v34 = vld [vmem:[#allocation17 + $0x168] sm:$0xff]  ;;  %v7829_v40 = vld [vmem:[#allocation17 + $0x160] sm:$0xff] }
 0x2ae   :  { %1825 = vmatmul.mubr.f32.vlgmr.msra.gmra.mxu0 %v7635_v36  ;;  %1896 = vmatmul.mubr.f32.vlgmr.msra.gmra.mxu1 %v7635_v36  ;;  %10841 = vst [vmem:[#allocation38_spill] sm:$0xff] %v7823_v34  ;;  %10843 = vst [vmem:[#allocation40_spill] sm:$0xff] %v7829_v40 }
 0x2af   :  { %1997 = vmatprep.subr.mxu0 %v10829_v60  ;;  %2068 = vmatprep.subr.mxu1 %v7637_v33  ;;  %v7831_v60 = vld [vmem:[#allocation17 + $0x170] sm:$0xff] }
 0x2b0   :  { %1998 = vmatpush1.msra.mxu0 %v7337_v53  ;;  %2069 = vmatpush1.msra.mxu1 %v7641_v42  ;;  %v7665_v53 = vld [vmem:[#allocation14 + $0x190] sm:$0xff]  ;;  %10844 = vst [vmem:[#allocation41_spill] sm:$0xff] %v7831_v60 }
 0x2b1   :  { %1999 = vmatprep.subr.mxu0 %v7339_v8  ;;  %2070 = vmatprep.subr.mxu1 %v7645_v45  ;;  %v7669_v8 = vld [vmem:[#allocation14 + $0x178] sm:$0xff] }
 0x2b2   :  { %2000 = vmatpush1.msra.mxu0 %v7343_v5  ;;  %2071 = vmatpush1.msra.mxu1 %v7649_v38  ;;  %v7673_v5 = vld [vmem:[#allocation14 + $0x170] sm:$0xff] }
 0x2b3   :  { %2001 = vmatprep.subr.mxu0 %v7347_v7  ;;  %2072 = vmatprep.subr.mxu1 %v7653_v51  ;;  %v7677_v7 = vld [vmem:[#allocation14 + $0x158] sm:$0xff] }
 0x2b4   :  { %2002 = vmatpush1.msra.mxu0 %v7351_v46  ;;  %2073 = vmatpush1.msra.mxu1 %v7657_v47  ;;  %v7681_v46 = vld [vmem:[#allocation14 + $0x150] sm:$0xff] }
 0x2b5   :  { %2003 = vmatprep.subr.mxu0 %v7355_v48  ;;  %2074 = vmatprep.subr.mxu1 %v7661_v49  ;;  %v7685_v48 = vld [vmem:[#allocation14 + $0x138] sm:$0xff] }
 0x2b6   :  { %2004 = vmatpush1.msra.mxu0 %v7359_v1  ;;  %2075 = vmatpush1.msra.mxu1 %v7665_v53  ;;  %v7689_v1 = vld [vmem:[#allocation14 + $0x130] sm:$0xff] }
 0x2b7   :  { %2005 = vmatprep.subr.mxu0 %v7363_v9  ;;  %2076 = vmatprep.subr.mxu1 %v7669_v8  ;;  %v7693_v9 = vld [vmem:[#allocation14 + $0x118] sm:$0xff] }
 0x2b8   :  { %2006 = vmatpush1.msra.mxu0 %v7367_v10  ;;  %2077 = vmatpush1.msra.mxu1 %v7673_v5  ;;  %v7697_v10 = vld [vmem:[#allocation14 + $0x110] sm:$0xff] }
 0x2b9   :  { %2007 = vmatprep.subr.mxu0 %v7371_v11  ;;  %2078 = vmatprep.subr.mxu1 %v7677_v7  ;;  %v7701_v11 = vld [vmem:[#allocation14 + $0xf8] sm:$0xff] }
 0x2ba   :  { %2008 = vmatpush1.msra.mxu0 %v7375_v12  ;;  %2079 = vmatpush1.msra.mxu1 %v7681_v46  ;;  %v7705_v12 = vld [vmem:[#allocation14 + $0xf0] sm:$0xff] }
 0x2bb   :  { %2009 = vmatprep.subr.mxu0 %v7379_v13  ;;  %2080 = vmatprep.subr.mxu1 %v7685_v48  ;;  %v7709_v13 = vld [vmem:[#allocation14 + $0xd8] sm:$0xff] }
 0x2bc   :  { %2010 = vmatpush1.msra.mxu0 %v7383_v14  ;;  %2081 = vmatpush1.msra.mxu1 %v7689_v1  ;;  %v7713_v14 = vld [vmem:[#allocation14 + $0xd0] sm:$0xff] }
 0x2bd   :  { %2011 = vmatprep.subr.mxu0 %v7387_v15  ;;  %2082 = vmatprep.subr.mxu1 %v7693_v9  ;;  %v7717_v15 = vld [vmem:[#allocation14 + $0xb8] sm:$0xff] }
 0x2be   :  { %2012 = vmatpush1.msra.mxu0 %v7391_v16  ;;  %2083 = vmatpush1.msra.mxu1 %v7697_v10  ;;  %v7721_v16 = vld [vmem:[#allocation14 + $0xb0] sm:$0xff] }
 0x2bf   :  { %2013 = vmatprep.subr.mxu0 %v7395_v17  ;;  %2084 = vmatprep.subr.mxu1 %v7701_v11  ;;  %v7725_v17 = vld [vmem:[#allocation14 + $0x98] sm:$0xff] }
 0x2c0   :  { %2014 = vmatpush1.msra.mxu0 %v7399_v18  ;;  %2085 = vmatpush1.msra.mxu1 %v7705_v12  ;;  %v7729_v18 = vld [vmem:[#allocation14 + $0x90] sm:$0xff] }
 0x2c1   :  { %2015 = vmatprep.subr.mxu0 %v7403_v19  ;;  %2086 = vmatprep.subr.mxu1 %v7709_v13  ;;  %v7733_v19 = vld [vmem:[#allocation14 + $0x78] sm:$0xff] }
 0x2c2   :  { %2016 = vmatpush1.msra.mxu0 %v7407_v20  ;;  %2087 = vmatpush1.msra.mxu1 %v7713_v14  ;;  %v7737_v20 = vld [vmem:[#allocation14 + $0x70] sm:$0xff] }
 0x2c3   :  { %2017 = vmatprep.subr.mxu0 %v7411_v21  ;;  %2088 = vmatprep.subr.mxu1 %v7717_v15  ;;  %v7741_v21 = vld [vmem:[#allocation14 + $0x58] sm:$0xff] }
 0x2c4   :  { %2018 = vmatpush1.msra.mxu0 %v7415_v22  ;;  %2089 = vmatpush1.msra.mxu1 %v7721_v16  ;;  %v7745_v22 = vld [vmem:[#allocation14 + $0x50] sm:$0xff] }
 0x2c5   :  { %2019 = vmatprep.subr.mxu0 %v7419_v23  ;;  %2090 = vmatprep.subr.mxu1 %v7725_v17  ;;  %v7749_v23 = vld [vmem:[#allocation14 + $0x38] sm:$0xff] }
 0x2c6   :  { %2020 = vmatpush1.msra.mxu0 %v7423_v24  ;;  %2091 = vmatpush1.msra.mxu1 %v7729_v18  ;;  %v7753_v24 = vld [vmem:[#allocation14 + $0x30] sm:$0xff] }
 0x2c7   :  { %2021 = vmatprep.subr.mxu0 %v7427_v25  ;;  %2092 = vmatprep.subr.mxu1 %v7733_v19  ;;  %v7757_v25 = vld [vmem:[#allocation14 + $0x18] sm:$0xff] }
 0x2c8   :  { %2022 = vmatpush1.msra.mxu0 %v7431_v26  ;;  %2093 = vmatpush1.msra.mxu1 %v7737_v20  ;;  %v7763_v26 = vld [vmem:[#allocation14 + $0x10] sm:$0xff] }
 0x2c9   :  { %2023 = vmatprep.subr.mxu0 %v7435_v27  ;;  %2094 = vmatprep.subr.mxu1 %v7741_v21  ;;  %v7775_v27 = vld [vmem:[#allocation17 + $0x1e8] sm:$0xff] }
 0x2ca   :  { %2024 = vmatpush1.msra.mxu0 %v7439_v28  ;;  %2095 = vmatpush1.msra.mxu1 %v7745_v22  ;;  %v7777_v28 = vld [vmem:[#allocation17 + $0x1f8] sm:$0xff] }
 0x2cb   :  { %2025 = vmatprep.subr.mxu0 %v7443_v29  ;;  %2096 = vmatprep.subr.mxu1 %v7749_v23  ;;  %v7781_v29 = vld [vmem:[#allocation17 + $0x1e0] sm:$0xff] }
 0x2cc   :  { %2026 = vmatpush1.msra.mxu0 %v7447_v30  ;;  %2097 = vmatpush1.msra.mxu1 %v7753_v24  ;;  %v7783_v30 = vld [vmem:[#allocation17 + $0x1f0] sm:$0xff] }
 0x2cd   :  { %2027 = vmatprep.subr.mxu0 %v7451_v31  ;;  %2098 = vmatprep.subr.mxu1 %v7757_v25  ;;  %v7787_v31 = vld [vmem:[#allocation17 + $0x1c8] sm:$0xff] }
 0x2ce   :  { %2028 = vmatpush1.msra.mxu0 %v7455_v32  ;;  %2061 = vmatprep.mubr.f32.mxu0 %v10607_v3  ;;  %v7789_v32 = vld [vmem:[#allocation17 + $0x1d8] sm:$0xff] }
 0x2cf   :  { %2099 = vmatpush1.msra.mxu1 %v7763_v26  ;;  %2132 = vmatprep.mubr.f32.mxu1 %v10607_v3  ;;  %10830 = vst [vmem:[#allocation27_spill] sm:$0xff] %v7789_v32 }
 0x2d0   :  { %2062 = vmatmul.mubr.f32.vlgmr.msra.gmra.mxu0 %v7635_v36  ;;  %2133 = vmatmul.mubr.f32.vlgmr.msra.gmra.mxu1 %v7635_v36  ;;  %v7825_v36 = vld [vmem:[#allocation17 + $0x178] sm:$0xff] }
 0x2d1   :  { %2353 = vmatprep.mubr.f32.mxu0 %v10607_v3  ;;  %2424 = vmatprep.mubr.f32.mxu1 %v10607_v3  ;;  %10842 = vst [vmem:[#allocation39_spill] sm:$0xff] %v7825_v36 }
 0x2d2   :  { %2289 = vmatprep.subr.mxu0 %v7775_v27  ;;  %2360 = vmatprep.subr.mxu1 %v7777_v28 }
 0x2d3   :  { %2290 = vmatpush1.msra.mxu0 %v7781_v29  ;;  %2361 = vmatpush1.msra.mxu1 %v7783_v30 }
 0x2d4   :  { %2291 = vmatprep.subr.mxu0 %v7787_v31  ;;  %2362 = vmatprep.subr.mxu1 %v7789_v32 }
 0x2d5   :  { %2292 = vmatpush1.msra.mxu0 %v7793_v61  ;;  %2363 = vmatpush1.msra.mxu1 %v7795_v57 }
 0x2d6   :  { %2293 = vmatprep.subr.mxu0 %v7799_v39  ;;  %2364 = vmatprep.subr.mxu1 %v7801_v41 }
 0x2d7   :  { %2294 = vmatpush1.msra.mxu0 %v7805_v44  ;;  %2365 = vmatpush1.msra.mxu1 %v7807_v62 }
 0x2d8   :  { %2295 = vmatprep.subr.mxu0 %v7811_v58  ;;  %2366 = vmatprep.subr.mxu1 %v7813_v54 }
 0x2d9   :  { %2296 = vmatpush1.msra.mxu0 %v7817_v2  ;;  %2367 = vmatpush1.msra.mxu1 %v7819_v0 }
 0x2da   :  { %2297 = vmatprep.subr.mxu0 %v7823_v34  ;;  %2368 = vmatprep.subr.mxu1 %v7825_v36  ;;  %v7891_v36 = vld [vmem:[#allocation17 + $0xd0] sm:$0xff] }
 0x2db   :  { %2298 = vmatpush1.msra.mxu0 %v7829_v40  ;;  %2369 = vmatpush1.msra.mxu1 %v7831_v60  ;;  %v7849_v40 = vld [vmem:[#allocation17 + $0x138] sm:$0xff]  ;;  %v7853_v60 = vld [vmem:[#allocation17 + $0x120] sm:$0xff]  ;;  %10864 = vst [vmem:[#allocation61_spill] sm:$0xff] %v7891_v36 }
 0x2dc   :  { %2299 = vmatprep.subr.mxu0 %v7835_v56  ;;  %2370 = vmatprep.subr.mxu1 %v7837_v6  ;;  %10850 = vst [vmem:[#allocation47_spill] sm:$0xff] %v7849_v40  ;;  %10851 = vst [vmem:[#allocation48_spill] sm:$0xff] %v7853_v60  ;;  %v7855_v56 = vld [vmem:[#allocation17 + $0x130] sm:$0xff]  ;;  %v7859_v6 = vld [vmem:[#allocation17 + $0x108] sm:$0xff] }
 0x2dd   :  { %2300 = vmatpush1.msra.mxu0 %v7841_v50  ;;  %2371 = vmatpush1.msra.mxu1 %v7843_v52  ;;  %10852 = vst [vmem:[#allocation49_spill] sm:$0xff] %v7855_v56  ;;  %10853 = vst [vmem:[#allocation50_spill] sm:$0xff] %v7859_v6  ;;  %v7861_v50 = vld [vmem:[#allocation17 + $0x118] sm:$0xff]  ;;  %v7865_v52 = vld [vmem:[#allocation17 + $0x100] sm:$0xff] }
 0x2de   :  { %2301 = vmatprep.subr.mxu0 %v7847_v59  ;;  %2372 = vmatprep.subr.mxu1 %v7849_v40  ;;  %10854 = vst [vmem:[#allocation51_spill] sm:$0xff] %v7861_v50  ;;  %10855 = vst [vmem:[#allocation52_spill] sm:$0xff] %v7865_v52  ;;  %v7867_v59 = vld [vmem:[#allocation17 + $0x110] sm:$0xff]  ;;  %v7871_v40 = vld [vmem:[#allocation17 + $0xe8] sm:$0xff] }
 0x2df   :  { %2302 = vmatpush1.msra.mxu0 %v7853_v60  ;;  %2373 = vmatpush1.msra.mxu1 %v7855_v56  ;;  %10856 = vst [vmem:[#allocation53_spill] sm:$0xff] %v7867_v59  ;;  %10857 = vst [vmem:[#allocation54_spill] sm:$0xff] %v7871_v40  ;;  %v7873_v60 = vld [vmem:[#allocation17 + $0xf8] sm:$0xff]  ;;  %v7875_v56 = vld [vmem:[#allocation17 + $0xe0] sm:$0xff] }
 0x2e0   :  { %2303 = vmatprep.subr.mxu0 %v7859_v6  ;;  %2374 = vmatprep.subr.mxu1 %v7861_v50  ;;  %10858 = vst [vmem:[#allocation55_spill] sm:$0xff] %v7873_v60  ;;  %10859 = vst [vmem:[#allocation56_spill] sm:$0xff] %v7875_v56  ;;  %v7879_v6 = vld [vmem:[#allocation17 + $0xf0] sm:$0xff]  ;;  %v7883_v50 = vld [vmem:[#allocation17 + $0xc8] sm:$0xff] }
 0x2e1   :  { %2304 = vmatpush1.msra.mxu0 %v7865_v52  ;;  %2375 = vmatpush1.msra.mxu1 %v7867_v59  ;;  %10860 = vst [vmem:[#allocation57_spill] sm:$0xff] %v7879_v6  ;;  %10861 = vst [vmem:[#allocation58_spill] sm:$0xff] %v7883_v50  ;;  %v7885_v52 = vld [vmem:[#allocation17 + $0xd8] sm:$0xff]  ;;  %v7889_v59 = vld [vmem:[#allocation17 + $0xc0] sm:$0xff] }
 0x2e2   :  { %2305 = vmatprep.subr.mxu0 %v7871_v40  ;;  %2376 = vmatprep.subr.mxu1 %v7873_v60  ;;  %10862 = vst [vmem:[#allocation59_spill] sm:$0xff] %v7885_v52  ;;  %10863 = vst [vmem:[#allocation60_spill] sm:$0xff] %v7889_v59  ;;  %v7895_v60 = vld [vmem:[#allocation17 + $0xa8] sm:$0xff] }
 0x2e3   :  { %2306 = vmatpush1.msra.mxu0 %v7875_v56  ;;  %2377 = vmatpush1.msra.mxu1 %v7879_v6  ;;  %10865 = vst [vmem:[#allocation62_spill] sm:$0xff] %v7895_v60  ;;  %v7897_v56 = vld [vmem:[#allocation17 + $0xb8] sm:$0xff]  ;;  %v7901_v6 = vld [vmem:[#allocation17 + $0xa0] sm:$0xff] }
 0x2e4   :  { %2307 = vmatprep.subr.mxu0 %v7883_v50  ;;  %2378 = vmatprep.subr.mxu1 %v7885_v52  ;;  %10866 = vst [vmem:[#allocation63_spill] sm:$0xff] %v7897_v56  ;;  %10867 = vst [vmem:[#allocation64_spill] sm:$0xff] %v7901_v6  ;;  %v7903_v50 = vld [vmem:[#allocation17 + $0xb0] sm:$0xff]  ;;  %v7907_v52 = vld [vmem:[#allocation17 + $0x88] sm:$0xff] }
 0x2e5   :  { %2308 = vmatpush1.msra.mxu0 %v7889_v59  ;;  %2379 = vmatpush1.msra.mxu1 %v7891_v36  ;;  %10868 = vst [vmem:[#allocation65_spill] sm:$0xff] %v7903_v50  ;;  %10869 = vst [vmem:[#allocation66_spill] sm:$0xff] %v7907_v52  ;;  %v7909_v59 = vld [vmem:[#allocation17 + $0x98] sm:$0xff]  ;;  %v7913_v36 = vld [vmem:[#allocation17 + $0x80] sm:$0xff] }
 0x2e6   :  { %2309 = vmatprep.subr.mxu0 %v7895_v60  ;;  %2380 = vmatprep.subr.mxu1 %v7897_v56  ;;  %10870 = vst [vmem:[#allocation67_spill] sm:$0xff] %v7909_v59  ;;  %10871 = vst [vmem:[#allocation68_spill] sm:$0xff] %v7913_v36  ;;  %v7915_v60 = vld [vmem:[#allocation17 + $0x90] sm:$0xff]  ;;  %v7919_v56 = vld [vmem:[#allocation17 + $0x68] sm:$0xff] }
 0x2e7   :  { %2310 = vmatpush1.msra.mxu0 %v7901_v6  ;;  %2381 = vmatpush1.msra.mxu1 %v7903_v50  ;;  %10872 = vst [vmem:[#allocation69_spill] sm:$0xff] %v7915_v60  ;;  %10873 = vst [vmem:[#allocation70_spill] sm:$0xff] %v7919_v56  ;;  %v7921_v6 = vld [vmem:[#allocation17 + $0x78] sm:$0xff]  ;;  %v7925_v50 = vld [vmem:[#allocation17 + $0x60] sm:$0xff] }
 0x2e8   :  { %2311 = vmatprep.subr.mxu0 %v7907_v52  ;;  %2382 = vmatprep.subr.mxu1 %v7909_v59  ;;  %10874 = vst [vmem:[#allocation71_spill] sm:$0xff] %v7921_v6  ;;  %10875 = vst [vmem:[#allocation72_spill] sm:$0xff] %v7925_v50  ;;  %v7927_v52 = vld [vmem:[#allocation17 + $0x70] sm:$0xff]  ;;  %v7931_v59 = vld [vmem:[#allocation17 + $0x48] sm:$0xff] }
 0x2e9   :  { %2312 = vmatpush1.msra.mxu0 %v7913_v36  ;;  %2383 = vmatpush1.msra.mxu1 %v7915_v60  ;;  %10876 = vst [vmem:[#allocation73_spill] sm:$0xff] %v7927_v52  ;;  %10877 = vst [vmem:[#allocation74_spill] sm:$0xff] %v7931_v59  ;;  %v7933_v36 = vld [vmem:[#allocation17 + $0x58] sm:$0xff]  ;;  %v7937_v60 = vld [vmem:[#allocation17 + $0x40] sm:$0xff] }
 0x2ea   :  { %2313 = vmatprep.subr.mxu0 %v7919_v56  ;;  %2384 = vmatprep.subr.mxu1 %v7921_v6  ;;  %10878 = vst [vmem:[#allocation75_spill] sm:$0xff] %v7933_v36  ;;  %10879 = vst [vmem:[#allocation76_spill] sm:$0xff] %v7937_v60  ;;  %v7939_v56 = vld [vmem:[#allocation17 + $0x50] sm:$0xff]  ;;  %v7943_v6 = vld [vmem:[#allocation17 + $0x28] sm:$0xff] }
 0x2eb   :  { %2314 = vmatpush1.msra.mxu0 %v7925_v50  ;;  %2385 = vmatpush1.msra.mxu1 %v7927_v52  ;;  %10880 = vst [vmem:[#allocation77_spill] sm:$0xff] %v7939_v56  ;;  %10881 = vst [vmem:[#allocation78_spill] sm:$0xff] %v7943_v6  ;;  %v7945_v50 = vld [vmem:[#allocation17 + $0x38] sm:$0xff]  ;;  %v7949_v52 = vld [vmem:[#allocation17 + $0x20] sm:$0xff] }
 0x2ec   :  { %2315 = vmatprep.subr.mxu0 %v7931_v59  ;;  %2386 = vmatprep.subr.mxu1 %v7933_v36  ;;  %10882 = vst [vmem:[#allocation79_spill] sm:$0xff] %v7945_v50  ;;  %10883 = vst [vmem:[#allocation80_spill] sm:$0xff] %v7949_v52  ;;  %v7951_v59 = vld [vmem:[#allocation17 + $0x30] sm:$0xff]  ;;  %v7955_v36 = vld [vmem:[#allocation17 + $0x8] sm:$0xff] }
 0x2ed   :  { %2316 = vmatpush1.msra.mxu0 %v7937_v60  ;;  %2387 = vmatpush1.msra.mxu1 %v7939_v56  ;;  %10884 = vst [vmem:[#allocation81_spill] sm:$0xff] %v7951_v59  ;;  %10885 = vst [vmem:[#allocation82_spill] sm:$0xff] %v7955_v36  ;;  %v7957_v60 = vld [vmem:[#allocation17 + $0x18] sm:$0xff]  ;;  %v7961_v56 = vld [vmem:[#allocation17] sm:$0xff] }
 0x2ee   :  { %2317 = vmatprep.subr.mxu0 %v7943_v6  ;;  %2388 = vmatprep.subr.mxu1 %v7945_v50  ;;  %10886 = vst [vmem:[#allocation83_spill] sm:$0xff] %v7957_v60  ;;  %10887 = vst [vmem:[#allocation84_spill] sm:$0xff] %v7961_v56  ;;  %v7963_v6 = vld [vmem:[#allocation17 + $0x10] sm:$0xff]  ;;  %v7967_v50 = vld [vmem:[#allocation16 + $0x1e8] sm:$0xff] }
 0x2ef   :  { %2318 = vmatpush1.msra.mxu0 %v7949_v52  ;;  %2389 = vmatpush1.msra.mxu1 %v7951_v59  ;;  %10888 = vst [vmem:[#allocation148_spill] sm:$0xff] %v7963_v6  ;;  %10889 = vst [vmem:[#allocation149_spill] sm:$0xff] %v7967_v50  ;;  %v7969_v52 = vld [vmem:[#allocation16 + $0x1f8] sm:$0xff] }
 0x2f0   :  { %2319 = vmatprep.subr.mxu0 %v7955_v36  ;;  %2390 = vmatprep.subr.mxu1 %v7957_v60  ;;  %10890 = vst [vmem:[#allocation150_spill] sm:$0xff] %v7969_v52 }
 0x2f1   :  { %2320 = vmatpush1.msra.mxu0 %v7961_v56  ;;  %2391 = vmatpush1.msra.mxu1 %v7963_v6 }
 0x2f2   :  { %2431 = vmatprep.subr.mxu0 %v7967_v50  ;;  %2502 = vmatprep.subr.mxu1 %v7969_v52 }
 0x34d   :  { %v1684_v59 = vpop.f32.mrf.mxu0  ;;  %v1755_v36 = vpop.f32.mrf.mxu1 }
 0x34f   :  { %v1686_v40 = vpop.f32.mrf.mxu0  ;;  %v1757_v60 = vpop.f32.mrf.mxu1 }
 0x36e   :  { %v1826_v34 = vpop.f32.mrf.mxu0  ;;  %v1897_v2 = vpop.f32.mrf.mxu1 }
 0x36f   :  { %v1827_v0 = vadd.f32 %v1826_v34, %v1684_v59  ;;  %v1898_v62 = vadd.f32 %v1897_v2, %v1755_v36 }
 0x370   :  { %v1828_v54 = vpop.f32.mrf.mxu0  ;;  %v1899_v50 = vpop.f32.mrf.mxu1 }
 0x371   :  { %v1902_v56 = vadd.f32 %v1827_v0, %v7540_v43  ;;  %v1829_v58 = vadd.f32 %v1828_v54, %v1686_v40  ;;  %v1904_v52 = vadd.f32 %v1898_v62, %v7549_v55  ;;  %v1900_v39 = vadd.f32 %v1899_v50, %v1757_v60  ;;  %v10892_v40 = vld [vmem:[#allocation152_spill] sm:$0xff]  ;;  %v10893_v60 = vld [vmem:[#allocation165_spill] sm:$0xff] }
 0x373   :  { %v1906_v6 = vmul.f32 0.5, %v1902_v56  ;;  %v1903_v44 = vadd.f32 %v1829_v58, %v7544_v63  ;;  %v1905_v57 = vadd.f32 %v1900_v39, %v7555_v35 }
 0x375   :  { %6336 = vtanh.f32 %v1906_v6  ;;  %v1910_v41 = vmul.f32 0.5, %v1903_v44  ;;  %v1915_v59 = vmul.f32 0.5, %v1905_v57 }
 0x377   :  { %6338 = vtanh.f32 %v1910_v41 }
 0x378   :  { %6340 = vtanh.f32 %v1904_v52  ;;  %v10891_v52 = vld [vmem:[#allocation151_spill] sm:$0xff] }
 0x379   :  { %6342 = vtanh.f32 %v1915_v59 }
 0x382   :  { %v6337_v34 = vpop.eup %6336 }
 0x383   :  { %v1908_v61 = vmul.f32 0.5, %v6337_v34 }
 0x384   :  { %v6339_v32 = vpop.eup %6338 }
 0x385   :  { %v1909_v0 = vadd.f32 0.5, %v1908_v61  ;;  %v1912_v54 = vmul.f32 0.5, %v6339_v32  ;;  %v6341_v2 = vpop.eup %6340 }
 0x386   :  { %v6343_v39 = vpop.eup %6342 }
 0x387   :  { %v1913_v56 = vadd.f32 0.5, %v1912_v54  ;;  %v1920_v44 = vmul.f32 %v6341_v2, %v1909_v0  ;;  %v1917_v32 = vmul.f32 0.5, %v6343_v39  ;;  %v7986_v2 = vld [vmem:[#allocation16 + $0x1e0] sm:$0xff] }
 0x388   :  { %v7997_v39 = vld [vmem:[#allocation16 + $0x1c0] sm:$0xff] }
 0x389   :  { %v1919_v6 = vmul.f32 %v1913_v56, %v7558_v4  ;;  %v1918_v4 = vadd.f32 0.5, %v1917_v32  ;;  %10896 = vst [vmem:[#allocation164_spill] sm:$0xff] %v7997_v39  ;;  %v8015_v32 = vld [vmem:[#allocation16 + $0x188] sm:$0xff] }
 0x38a   :  { %10902 = vst [vmem:[#allocation90_spill] sm:$0xff] %v8015_v32 }
 0x38b   :  { %v7978_v58 = vadd.f32 %v1920_v44, %v1919_v6  ;;  %v7988_v6 = vld [vmem:[#allocation16 + $0x1f0] sm:$0xff]  ;;  %v7990_v44 = vld [vmem:[#allocation16 + $0x1c8] sm:$0xff] }
 0x38d   :  { %6344 = vtanh.f32 %v7978_v58 }
 0x390   :  { %v2063_v50 = vpop.f32.mrf.mxu0  ;;  %v2134_v57 = vpop.f32.mrf.mxu1 }
 0x391   :  { %v2139_v41 = vadd.f32 %v2063_v50, %v10891_v52  ;;  %v2141_v59 = vadd.f32 %v2134_v57, %v10893_v60  ;;  %v7992_v50 = vld [vmem:[#allocation16 + $0x1d8] sm:$0xff]  ;;  %v10895_v52 = vld [vmem:[#allocation166_spill] sm:$0xff]  ;;  %v7999_v57 = vld [vmem:[#allocation16 + $0x1d0] sm:$0xff] }
 0x392   :  { %v2065_v62 = vpop.f32.mrf.mxu0  ;;  %v2136_v54 = vpop.f32.mrf.mxu1  ;;  %10897 = vst [vmem:[#allocation85_spill] sm:$0xff] %v7999_v57  ;;  %v8017_v60 = vld [vmem:[#allocation16 + $0x198] sm:$0xff] }
 0x393   :  { %v2143_v36 = vmul.f32 0.5, %v2139_v41  ;;  %v2140_v61 = vadd.f32 %v2065_v62, %v10892_v40  ;;  %v2142_v41 = vadd.f32 %v2136_v54, %v10895_v52  ;;  %v8003_v62 = vld [vmem:[#allocation16 + $0x1a8] sm:$0xff]  ;;  %v8009_v40 = vld [vmem:[#allocation16 + $0x1a0] sm:$0xff]  ;;  %10903 = vst [vmem:[#allocation91_spill] sm:$0xff] %v8017_v60  ;;  %v8029_v52 = vld [vmem:[#allocation16 + $0x178] sm:$0xff] }
 0x394   :  { %10898 = vst [vmem:[#allocation86_spill] sm:$0xff] %v8003_v62  ;;  %10900 = vst [vmem:[#allocation88_spill] sm:$0xff] %v8009_v40  ;;  %v8027_v54 = vld [vmem:[#allocation16 + $0x168] sm:$0xff] }
 0x395   :  { %6346 = vtanh.f32 %v2143_v36  ;;  %v2147_v34 = vmul.f32 0.5, %v2140_v61  ;;  %v8005_v36 = vld [vmem:[#allocation16 + $0x1b8] sm:$0xff]  ;;  %v8011_v61 = vld [vmem:[#allocation16 + $0x1b0] sm:$0xff]  ;;  %10906 = vst [vmem:[#allocation94_spill] sm:$0xff] %v8027_v54  ;;  %10907 = vst [vmem:[#allocation95_spill] sm:$0xff] %v8029_v52 }
 0x396   :  { %10899 = vst [vmem:[#allocation87_spill] sm:$0xff] %v8005_v36  ;;  %10901 = vst [vmem:[#allocation89_spill] sm:$0xff] %v8011_v61 }
 0x397   :  { %6348 = vtanh.f32 %v2147_v34  ;;  %v8021_v34 = vld [vmem:[#allocation16 + $0x180] sm:$0xff] }
 0x398   :  { %6350 = vtanh.f32 %v2141_v59  ;;  %v2152_v59 = vmul.f32 0.5, %v2142_v41  ;;  %10904 = vst [vmem:[#allocation92_spill] sm:$0xff] %v8021_v34  ;;  %v8033_v41 = vld [vmem:[#allocation16 + $0x160] sm:$0xff] }
 0x399   :  { %10908 = vst [vmem:[#allocation96_spill] sm:$0xff] %v8033_v41 }
 0x39a   :  { %v6345_v0 = vpop.eup %6344  ;;  %6352 = vtanh.f32 %v2152_v59  ;;  %v8057_v59 = vld [vmem:[#allocation16 + $0x120] sm:$0xff] }
 0x39b   :  { %v7984_v56 = vmul.f32 %v6345_v0, %v1918_v4  ;;  %v8023_v4 = vld [vmem:[#allocation16 + $0x190] sm:$0xff]  ;;  %10913 = vst [vmem:[#allocation101_spill] sm:$0xff] %v8057_v59 }
 0x39c   :  { %10905 = vst [vmem:[#allocation93_spill] sm:$0xff] %v8023_v4 }
 0x39d   :  { %10894 = vst [vmem:[#allocation163_spill] sm:$0xff] %v7984_v56  ;;  %2354 = vmatmul.mubr.f32.vlgmr.msra.gmra.mxu0 %v7984_v56  ;;  %2425 = vmatmul.mubr.f32.vlgmr.msra.gmra.mxu1 %v7984_v56 }
 0x39e   :  { %2432 = vmatpush1.msra.mxu0 %v7986_v2  ;;  %2503 = vmatpush1.msra.mxu1 %v7988_v6 }
 0x39f   :  { %2433 = vmatprep.subr.mxu0 %v7990_v44  ;;  %2504 = vmatprep.subr.mxu1 %v7992_v50 }
 0x3a0   :  { %2434 = vmatpush1.msra.mxu0 %v7997_v39  ;;  %2505 = vmatpush1.msra.mxu1 %v7999_v57 }
 0x3a1   :  { %2435 = vmatprep.subr.mxu0 %v8003_v62  ;;  %2506 = vmatprep.subr.mxu1 %v8005_v36  ;;  %v8035_v36 = vld [vmem:[#allocation16 + $0x170] sm:$0xff] }
 0x3a2   :  { %v6347_v0 = vpop.eup %6346  ;;  %2436 = vmatpush1.msra.mxu0 %v8009_v40  ;;  %2507 = vmatpush1.msra.mxu1 %v8011_v61  ;;  %10909 = vst [vmem:[#allocation97_spill] sm:$0xff] %v8035_v36  ;;  %v8039_v40 = vld [vmem:[#allocation16 + $0x148] sm:$0xff]  ;;  %v8041_v61 = vld [vmem:[#allocation16 + $0x158] sm:$0xff] }
 0x3a3   :  { %v2145_v56 = vmul.f32 0.5, %v6347_v0  ;;  %2437 = vmatprep.subr.mxu0 %v8015_v32  ;;  %2508 = vmatprep.subr.mxu1 %v8017_v60  ;;  %v8045_v0 = vld [vmem:[#allocation16 + $0x140] sm:$0xff]  ;;  %v8047_v60 = vld [vmem:[#allocation16 + $0x150] sm:$0xff] }
 0x3a4   :  { %v6349_v62 = vpop.eup %6348  ;;  %2438 = vmatpush1.msra.mxu0 %v8021_v34  ;;  %2509 = vmatpush1.msra.mxu1 %v8023_v4  ;;  %10910 = vst [vmem:[#allocation98_spill] sm:$0xff] %v8045_v0  ;;  %10911 = vst [vmem:[#allocation99_spill] sm:$0xff] %v8047_v60  ;;  %v8051_v4 = vld [vmem:[#allocation16 + $0x128] sm:$0xff]  ;;  %v8053_v34 = vld [vmem:[#allocation16 + $0x138] sm:$0xff] }
 0x3a5   :  { %v2146_v57 = vadd.f32 0.5, %v2145_v56  ;;  %v2149_v39 = vmul.f32 0.5, %v6349_v62  ;;  %2439 = vmatprep.subr.mxu0 %v8027_v54  ;;  %2510 = vmatprep.subr.mxu1 %v8029_v52  ;;  %v6351_v32 = vpop.eup %6350  ;;  %10912 = vst [vmem:[#allocation100_spill] sm:$0xff] %v8053_v34  ;;  %v8059_v52 = vld [vmem:[#allocation16 + $0x130] sm:$0xff] }
 0x3a6   :  { %2440 = vmatpush1.msra.mxu0 %v8033_v41  ;;  %2511 = vmatpush1.msra.mxu1 %v8035_v36  ;;  %10914 = vst [vmem:[#allocation102_spill] sm:$0xff] %v8059_v52  ;;  %v8063_v41 = vld [vmem:[#allocation16 + $0x108] sm:$0xff]  ;;  %v8065_v36 = vld [vmem:[#allocation16 + $0x118] sm:$0xff] }
 0x3a7   :  { %v2150_v56 = vadd.f32 0.5, %v2149_v39  ;;  %v2157_v62 = vmul.f32 %v6351_v32, %v2146_v57  ;;  %2441 = vmatprep.subr.mxu0 %v8039_v40  ;;  %2512 = vmatprep.subr.mxu1 %v8041_v61  ;;  %10915 = vst [vmem:[#allocation103_spill] sm:$0xff] %v8063_v41  ;;  %10916 = vst [vmem:[#allocation104_spill] sm:$0xff] %v8065_v36  ;;  %v8070_v39 = vld [vmem:[#allocation16 + $0x100] sm:$0xff]  ;;  %v8072_v57 = vld [vmem:[#allocation16 + $0x110] sm:$0xff] }
 0x3a8   :  { %2442 = vmatpush1.msra.mxu0 %v8045_v0  ;;  %2513 = vmatpush1.msra.mxu1 %v8047_v60  ;;  %10917 = vst [vmem:[#allocation105_spill] sm:$0xff] %v8070_v39  ;;  %10918 = vst [vmem:[#allocation106_spill] sm:$0xff] %v8072_v57  ;;  %v8076_v32 = vld [vmem:[#allocation16 + $0xe8] sm:$0xff]  ;;  %v8078_v60 = vld [vmem:[#allocation16 + $0xf8] sm:$0xff] }
 0x3a9   :  { %v2156_v54 = vmul.f32 %v2150_v56, %v7594_v37  ;;  %2443 = vmatprep.subr.mxu0 %v8051_v4  ;;  %2514 = vmatprep.subr.mxu1 %v8053_v34  ;;  %10919 = vst [vmem:[#allocation107_spill] sm:$0xff] %v8076_v32  ;;  %10920 = vst [vmem:[#allocation108_spill] sm:$0xff] %v8078_v60  ;;  %v8084_v37 = vld [vmem:[#allocation16 + $0xe0] sm:$0xff]  ;;  %v8086_v56 = vld [vmem:[#allocation16 + $0xf0] sm:$0xff] }
 0x3aa   :  { %2444 = vmatpush1.msra.mxu0 %v8057_v59  ;;  %2515 = vmatpush1.msra.mxu1 %v8059_v52  ;;  %10921 = vst [vmem:[#allocation109_spill] sm:$0xff] %v8084_v37  ;;  %10922 = vst [vmem:[#allocation110_spill] sm:$0xff] %v8086_v56  ;;  %v8090_v59 = vld [vmem:[#allocation16 + $0xc8] sm:$0xff]  ;;  %v8092_v52 = vld [vmem:[#allocation16 + $0xd8] sm:$0xff] }
 0x3ab   :  { %v8080_v0 = vadd.f32 %v2157_v62, %v2156_v54  ;;  %2445 = vmatprep.subr.mxu0 %v8063_v41  ;;  %2516 = vmatprep.subr.mxu1 %v8065_v36  ;;  %10923 = vst [vmem:[#allocation111_spill] sm:$0xff] %v8090_v59  ;;  %10924 = vst [vmem:[#allocation112_spill] sm:$0xff] %v8092_v52  ;;  %v8097_v54 = vld [vmem:[#allocation16 + $0xc0] sm:$0xff]  ;;  %v8099_v62 = vld [vmem:[#allocation16 + $0xd0] sm:$0xff] }
 0x3ac   :  { %2446 = vmatpush1.msra.mxu0 %v8070_v39  ;;  %2517 = vmatpush1.msra.mxu1 %v8072_v57  ;;  %10925 = vst [vmem:[#allocation113_spill] sm:$0xff] %v8097_v54  ;;  %10926 = vst [vmem:[#allocation114_spill] sm:$0xff] %v8099_v62  ;;  %v8103_v39 = vld [vmem:[#allocation16 + $0xa8] sm:$0xff]  ;;  %v8105_v57 = vld [vmem:[#allocation16 + $0xb8] sm:$0xff] }
 0x3ad   :  { %6354 = vtanh.f32 %v8080_v0  ;;  %2447 = vmatprep.subr.mxu0 %v8076_v32  ;;  %2518 = vmatprep.subr.mxu1 %v8078_v60  ;;  %10927 = vst [vmem:[#allocation115_spill] sm:$0xff] %v8103_v39  ;;  %10928 = vst [vmem:[#allocation116_spill] sm:$0xff] %v8105_v57  ;;  %v8109_v36 = vld [vmem:[#allocation16 + $0xa0] sm:$0xff]  ;;  %v8111_v32 = vld [vmem:[#allocation16 + $0xb0] sm:$0xff] }
 0x3ae   :  { %2448 = vmatpush1.msra.mxu0 %v8084_v37  ;;  %2519 = vmatpush1.msra.mxu1 %v8086_v56  ;;  %10929 = vst [vmem:[#allocation117_spill] sm:$0xff] %v8109_v36  ;;  %10930 = vst [vmem:[#allocation118_spill] sm:$0xff] %v8111_v32  ;;  %v8115_v60 = vld [vmem:[#allocation16 + $0x88] sm:$0xff]  ;;  %v8117_v37 = vld [vmem:[#allocation16 + $0x98] sm:$0xff] }
 0x3af   :  { %2449 = vmatprep.subr.mxu0 %v8090_v59  ;;  %2520 = vmatprep.subr.mxu1 %v8092_v52  ;;  %10931 = vst [vmem:[#allocation119_spill] sm:$0xff] %v8115_v60  ;;  %10932 = vst [vmem:[#allocation120_spill] sm:$0xff] %v8117_v37  ;;  %v8121_v56 = vld [vmem:[#allocation16 + $0x80] sm:$0xff]  ;;  %v8123_v59 = vld [vmem:[#allocation16 + $0x90] sm:$0xff]  ;;  %v6353_v52 = vpop.eup %6352 }
 0x3b0   :  { %2450 = vmatpush1.msra.mxu0 %v8097_v54  ;;  %2521 = vmatpush1.msra.mxu1 %v8099_v62  ;;  %10933 = vst [vmem:[#allocation121_spill] sm:$0xff] %v8121_v56  ;;  %10934 = vst [vmem:[#allocation122_spill] sm:$0xff] %v8123_v59  ;;  %v8127_v54 = vld [vmem:[#allocation16 + $0x68] sm:$0xff]  ;;  %v8129_v62 = vld [vmem:[#allocation16 + $0x78] sm:$0xff] }
 0x3b1   :  { %2451 = vmatprep.subr.mxu0 %v8103_v39  ;;  %2522 = vmatprep.subr.mxu1 %v8105_v57  ;;  %10935 = vst [vmem:[#allocation123_spill] sm:$0xff] %v8127_v54  ;;  %10936 = vst [vmem:[#allocation124_spill] sm:$0xff] %v8129_v62  ;;  %v8133_v39 = vld [vmem:[#allocation16 + $0x60] sm:$0xff]  ;;  %v8135_v57 = vld [vmem:[#allocation16 + $0x70] sm:$0xff] }
 0x3b2   :  { %2452 = vmatpush1.msra.mxu0 %v8109_v36  ;;  %2523 = vmatpush1.msra.mxu1 %v8111_v32  ;;  %10937 = vst [vmem:[#allocation125_spill] sm:$0xff] %v8133_v39  ;;  %10938 = vst [vmem:[#allocation126_spill] sm:$0xff] %v8135_v57  ;;  %v8139_v41 = vld [vmem:[#allocation16 + $0x48] sm:$0xff]  ;;  %v8141_v36 = vld [vmem:[#allocation16 + $0x58] sm:$0xff]  ;;  %v2154_v32 = vmul.f32 0.5, %v6353_v52 }
 0x3b3   :  { %2453 = vmatprep.subr.mxu0 %v8115_v60  ;;  %2524 = vmatprep.subr.mxu1 %v8117_v37  ;;  %10939 = vst [vmem:[#allocation127_spill] sm:$0xff] %v8139_v41  ;;  %10940 = vst [vmem:[#allocation128_spill] sm:$0xff] %v8141_v36  ;;  %v8145_v60 = vld [vmem:[#allocation16 + $0x40] sm:$0xff]  ;;  %v8147_v37 = vld [vmem:[#allocation16 + $0x50] sm:$0xff] }
 0x3b4   :  { %2454 = vmatpush1.msra.mxu0 %v8121_v56  ;;  %2525 = vmatpush1.msra.mxu1 %v8123_v59  ;;  %10941 = vst [vmem:[#allocation129_spill] sm:$0xff] %v8147_v37  ;;  %v8151_v56 = vld [vmem:[#allocation16 + $0x28] sm:$0xff]  ;;  %v8153_v59 = vld [vmem:[#allocation16 + $0x38] sm:$0xff]  ;;  %v8157_v52 = vld [vmem:[#allocation16 + $0x20] sm:$0xff] }
 0x3b5   :  { %2455 = vmatprep.subr.mxu0 %v8127_v54  ;;  %2526 = vmatprep.subr.mxu1 %v8129_v62  ;;  %10942 = vst [vmem:[#allocation130_spill] sm:$0xff] %v8157_v52  ;;  %v8159_v54 = vld [vmem:[#allocation16 + $0x30] sm:$0xff]  ;;  %v8163_v62 = vld [vmem:[#allocation16 + $0x8] sm:$0xff] }
 0x3b6   :  { %2456 = vmatpush1.msra.mxu0 %v8133_v39  ;;  %2527 = vmatpush1.msra.mxu1 %v8135_v57  ;;  %10943 = vst [vmem:[#allocation131_spill] sm:$0xff] %v8163_v62  ;;  %v8165_v39 = vld [vmem:[#allocation16 + $0x18] sm:$0xff]  ;;  %v2155_v57 = vadd.f32 0.5, %v2154_v32  ;;  %v8173_v34 = vld [vmem:[#allocation16 + $0x10] sm:$0xff]  ;;  %v8181_v32 = vld [vmem:[#allocation14 + $0x1e8] sm:$0xff] }
 0x3b7   :  { %2457 = vmatprep.subr.mxu0 %v8139_v41  ;;  %2528 = vmatprep.subr.mxu1 %v8141_v36  ;;  %v8169_v41 = vld [vmem:[#allocation16] sm:$0xff]  ;;  %10944 = vst [vmem:[#allocation132_spill] sm:$0xff] %v8173_v34  ;;  %10945 = vst [vmem:[#allocation133_spill] sm:$0xff] %v8181_v32 }
 0x3b8   :  { %2458 = vmatpush1.msra.mxu0 %v8145_v60  ;;  %2529 = vmatpush1.msra.mxu1 %v8147_v37 }
 0x3b9   :  { %2459 = vmatprep.subr.mxu0 %v8151_v56  ;;  %2530 = vmatprep.subr.mxu1 %v8153_v59 }
 0x3ba   :  { %v6355_v36 = vpop.eup %6354  ;;  %2460 = vmatpush1.msra.mxu0 %v8157_v52  ;;  %2531 = vmatpush1.msra.mxu1 %v8159_v54  ;;  %v8185_v52 = vld [vmem:[#allocation14 + $0x1e0] sm:$0xff] }
 0x3bb   :  { %2461 = vmatprep.subr.mxu0 %v8163_v62  ;;  %2532 = vmatprep.subr.mxu1 %v8165_v39  ;;  %v8177_v37 = vmul.f32 %v6355_v36, %v2155_v57  ;;  %v8189_v62 = vld [vmem:[#allocation14 + $0x1c8] sm:$0xff]  ;;  %v8193_v36 = vld [vmem:[#allocation14 + $0x1c0] sm:$0xff] }
 0x3bc   :  { %2462 = vmatpush1.msra.mxu0 %v8169_v41  ;;  %2495 = vmatprep.mubr.f32.mxu0 %v10607_v3  ;;  %v8197_v57 = vld [vmem:[#allocation14 + $0x1a8] sm:$0xff] }
 0x3bd   :  { %2533 = vmatpush1.msra.mxu1 %v8173_v34  ;;  %2566 = vmatprep.mubr.f32.mxu1 %v10607_v3  ;;  %v8201_v34 = vld [vmem:[#allocation14 + $0x1a0] sm:$0xff] }
 0x3be   :  { %2496 = vmatmul.mubr.f32.vlgmr.msra.gmra.mxu0 %v8177_v37  ;;  %2567 = vmatmul.mubr.f32.vlgmr.msra.gmra.mxu1 %v8177_v37 }
 0x3bf   :  { %2668 = vmatprep.subr.mxu0 %v8181_v32  ;;  %2739 = vmatprep.subr.mxu1 %v7637_v33  ;;  %v8205_v32 = vld [vmem:[#allocation14 + $0x188] sm:$0xff]  ;;  %v8209_v33 = vld [vmem:[#allocation14 + $0x180] sm:$0xff] }
 0x3c0   :  { %2669 = vmatpush1.msra.mxu0 %v8185_v52  ;;  %2740 = vmatpush1.msra.mxu1 %v7641_v42  ;;  %v8213_v42 = vld [vmem:[#allocation14 + $0x168] sm:$0xff] }
 0x3c1   :  { %2670 = vmatprep.subr.mxu0 %v8189_v62  ;;  %2741 = vmatprep.subr.mxu1 %v7645_v45  ;;  %v8217_v45 = vld [vmem:[#allocation14 + $0x160] sm:$0xff] }
 0x3c2   :  { %2671 = vmatpush1.msra.mxu0 %v8193_v36  ;;  %2742 = vmatpush1.msra.mxu1 %v7649_v38  ;;  %v8221_v38 = vld [vmem:[#allocation14 + $0x148] sm:$0xff] }
 0x3c3   :  { %2672 = vmatprep.subr.mxu0 %v8197_v57  ;;  %2743 = vmatprep.subr.mxu1 %v7653_v51  ;;  %v8225_v51 = vld [vmem:[#allocation14 + $0x140] sm:$0xff] }
 0x3c4   :  { %2673 = vmatpush1.msra.mxu0 %v8201_v34  ;;  %2744 = vmatpush1.msra.mxu1 %v7657_v47  ;;  %v8229_v47 = vld [vmem:[#allocation14 + $0x128] sm:$0xff] }
 0x3c5   :  { %2674 = vmatprep.subr.mxu0 %v8205_v32  ;;  %2745 = vmatprep.subr.mxu1 %v7661_v49  ;;  %v8233_v49 = vld [vmem:[#allocation14 + $0x120] sm:$0xff] }
 0x3c6   :  { %2675 = vmatpush1.msra.mxu0 %v8209_v33  ;;  %2746 = vmatpush1.msra.mxu1 %v7665_v53  ;;  %v8237_v53 = vld [vmem:[#allocation14 + $0x108] sm:$0xff] }
 0x3c7   :  { %2676 = vmatprep.subr.mxu0 %v8213_v42  ;;  %2747 = vmatprep.subr.mxu1 %v7669_v8  ;;  %v8241_v8 = vld [vmem:[#allocation14 + $0x100] sm:$0xff] }
 0x3c8   :  { %2677 = vmatpush1.msra.mxu0 %v8217_v45  ;;  %2748 = vmatpush1.msra.mxu1 %v7673_v5  ;;  %v8245_v5 = vld [vmem:[#allocation14 + $0xe8] sm:$0xff] }
 0x3c9   :  { %2678 = vmatprep.subr.mxu0 %v8221_v38  ;;  %2749 = vmatprep.subr.mxu1 %v7677_v7  ;;  %v8249_v7 = vld [vmem:[#allocation14 + $0xe0] sm:$0xff] }
 0x3ca   :  { %2679 = vmatpush1.msra.mxu0 %v8225_v51  ;;  %2750 = vmatpush1.msra.mxu1 %v7681_v46  ;;  %v8253_v46 = vld [vmem:[#allocation14 + $0xc8] sm:$0xff] }
 0x3cb   :  { %2680 = vmatprep.subr.mxu0 %v8229_v47  ;;  %2751 = vmatprep.subr.mxu1 %v7685_v48  ;;  %v8257_v48 = vld [vmem:[#allocation14 + $0xc0] sm:$0xff] }
 0x3cc   :  { %2681 = vmatpush1.msra.mxu0 %v8233_v49  ;;  %2752 = vmatpush1.msra.mxu1 %v7689_v1  ;;  %v8261_v1 = vld [vmem:[#allocation14 + $0xa8] sm:$0xff] }
 0x3cd   :  { %2682 = vmatprep.subr.mxu0 %v8237_v53  ;;  %2753 = vmatprep.subr.mxu1 %v7693_v9  ;;  %v8265_v9 = vld [vmem:[#allocation14 + $0xa0] sm:$0xff] }
 0x3ce   :  { %2683 = vmatpush1.msra.mxu0 %v8241_v8  ;;  %2754 = vmatpush1.msra.mxu1 %v7697_v10  ;;  %v8269_v10 = vld [vmem:[#allocation14 + $0x88] sm:$0xff] }
 0x3cf   :  { %2684 = vmatprep.subr.mxu0 %v8245_v5  ;;  %2755 = vmatprep.subr.mxu1 %v7701_v11  ;;  %v8273_v11 = vld [vmem:[#allocation14 + $0x80] sm:$0xff] }
 0x3d0   :  { %2685 = vmatpush1.msra.mxu0 %v8249_v7  ;;  %2756 = vmatpush1.msra.mxu1 %v7705_v12  ;;  %v8277_v12 = vld [vmem:[#allocation14 + $0x68] sm:$0xff] }
 0x3d1   :  { %2686 = vmatprep.subr.mxu0 %v8253_v46  ;;  %2757 = vmatprep.subr.mxu1 %v7709_v13  ;;  %v8281_v13 = vld [vmem:[#allocation14 + $0x60] sm:$0xff] }
 0x3d2   :  { %2687 = vmatpush1.msra.mxu0 %v8257_v48  ;;  %2758 = vmatpush1.msra.mxu1 %v7713_v14  ;;  %10946 = vst [vmem:[#allocation134_spill] sm:$0xff] %v8281_v13  ;;  %v8285_v14 = vld [vmem:[#allocation14 + $0x48] sm:$0xff] }
 0x3d3   :  { %2688 = vmatprep.subr.mxu0 %v8261_v1  ;;  %2759 = vmatprep.subr.mxu1 %v7717_v15  ;;  %10947 = vst [vmem:[#allocation135_spill] sm:$0xff] %v8285_v14  ;;  %v8289_v15 = vld [vmem:[#allocation14 + $0x40] sm:$0xff] }
 0x3d4   :  { %2689 = vmatpush1.msra.mxu0 %v8265_v9  ;;  %2760 = vmatpush1.msra.mxu1 %v7721_v16  ;;  %10948 = vst [vmem:[#allocation136_spill] sm:$0xff] %v8289_v15  ;;  %v8293_v16 = vld [vmem:[#allocation14 + $0x28] sm:$0xff] }
 0x3d5   :  { %2690 = vmatprep.subr.mxu0 %v8269_v10  ;;  %2761 = vmatprep.subr.mxu1 %v7725_v17  ;;  %10949 = vst [vmem:[#allocation137_spill] sm:$0xff] %v8293_v16  ;;  %v8297_v17 = vld [vmem:[#allocation14 + $0x20] sm:$0xff] }
 0x3d6   :  { %2691 = vmatpush1.msra.mxu0 %v8273_v11  ;;  %2762 = vmatpush1.msra.mxu1 %v7729_v18  ;;  %10950 = vst [vmem:[#allocation138_spill] sm:$0xff] %v8297_v17  ;;  %v8301_v18 = vld [vmem:[#allocation14 + $0x8] sm:$0xff] }
 0x3d7   :  { %2692 = vmatprep.subr.mxu0 %v8277_v12  ;;  %2763 = vmatprep.subr.mxu1 %v7733_v19  ;;  %10951 = vst [vmem:[#allocation139_spill] sm:$0xff] %v8301_v18  ;;  %v8305_v19 = vld [vmem:[#allocation14] sm:$0xff] }
 0x3d8   :  { %2693 = vmatpush1.msra.mxu0 %v8281_v13  ;;  %2764 = vmatpush1.msra.mxu1 %v7737_v20  ;;  %10952 = vst [vmem:[#allocation140_spill] sm:$0xff] %v8305_v19  ;;  %v10953_v20 = vld [vmem:[#allocation27_spill] sm:$0xff] }
 0x3d9   :  { %2694 = vmatprep.subr.mxu0 %v8285_v14  ;;  %2765 = vmatprep.subr.mxu1 %v7741_v21  ;;  %v10954_v21 = vld [vmem:[#allocation28_spill] sm:$0xff] }
 0x3da   :  { %2695 = vmatpush1.msra.mxu0 %v8289_v15  ;;  %2766 = vmatpush1.msra.mxu1 %v7745_v22  ;;  %v10955_v22 = vld [vmem:[#allocation29_spill] sm:$0xff] }
 0x3db   :  { %2696 = vmatprep.subr.mxu0 %v8293_v16  ;;  %2767 = vmatprep.subr.mxu1 %v7749_v23  ;;  %v10956_v23 = vld [vmem:[#allocation30_spill] sm:$0xff] }
 0x3dc   :  { %2697 = vmatpush1.msra.mxu0 %v8297_v17  ;;  %2768 = vmatpush1.msra.mxu1 %v7753_v24  ;;  %v10957_v24 = vld [vmem:[#allocation31_spill] sm:$0xff] }
 0x3dd   :  { %2698 = vmatprep.subr.mxu0 %v8301_v18  ;;  %2769 = vmatprep.subr.mxu1 %v7757_v25  ;;  %v10958_v25 = vld [vmem:[#allocation32_spill] sm:$0xff] }
 0x3de   :  { %2699 = vmatpush1.msra.mxu0 %v8305_v19  ;;  %2732 = vmatprep.mubr.f32.mxu0 %v10607_v3 }
 0x3df   :  { %2770 = vmatpush1.msra.mxu1 %v7763_v26  ;;  %2803 = vmatprep.mubr.f32.mxu1 %v10607_v3  ;;  %v10959_v26 = vld [vmem:[#allocation33_spill] sm:$0xff] }
 0x3e0   :  { %2733 = vmatmul.mubr.f32.vlgmr.msra.gmra.mxu0 %v8177_v37  ;;  %2804 = vmatmul.mubr.f32.vlgmr.msra.gmra.mxu1 %v8177_v37  ;;  %v10965_v37 = vld [vmem:[#allocation39_spill] sm:$0xff] }
 0x3e1   :  { %2960 = vmatprep.subr.mxu0 %v7775_v27  ;;  %3031 = vmatprep.subr.mxu1 %v7777_v28  ;;  %v10960_v27 = vld [vmem:[#allocation34_spill] sm:$0xff]  ;;  %v10961_v28 = vld [vmem:[#allocation35_spill] sm:$0xff] }
 0x3e2   :  { %2961 = vmatpush1.msra.mxu0 %v7781_v29  ;;  %3032 = vmatpush1.msra.mxu1 %v7783_v30  ;;  %v10962_v29 = vld [vmem:[#allocation36_spill] sm:$0xff]  ;;  %v10963_v30 = vld [vmem:[#allocation37_spill] sm:$0xff] }
 0x3e3   :  { %2962 = vmatprep.subr.mxu0 %v7787_v31  ;;  %3033 = vmatprep.subr.mxu1 %v10953_v20  ;;  %v10964_v31 = vld [vmem:[#allocation38_spill] sm:$0xff]  ;;  %v10966_v20 = vld [vmem:[#allocation40_spill] sm:$0xff] }
 0x3e4   :  { %2963 = vmatpush1.msra.mxu0 %v10954_v21  ;;  %3034 = vmatpush1.msra.mxu1 %v10955_v22  ;;  %v10967_v21 = vld [vmem:[#allocation41_spill] sm:$0xff]  ;;  %v10968_v22 = vld [vmem:[#allocation42_spill] sm:$0xff] }
 0x3e5   :  { %2964 = vmatprep.subr.mxu0 %v10956_v23  ;;  %3035 = vmatprep.subr.mxu1 %v10957_v24  ;;  %v10969_v23 = vld [vmem:[#allocation43_spill] sm:$0xff]  ;;  %v10970_v24 = vld [vmem:[#allocation44_spill] sm:$0xff] }
 0x3e6   :  { %2965 = vmatpush1.msra.mxu0 %v10958_v25  ;;  %3036 = vmatpush1.msra.mxu1 %v10959_v26  ;;  %v10971_v25 = vld [vmem:[#allocation45_spill] sm:$0xff]  ;;  %v10972_v26 = vld [vmem:[#allocation46_spill] sm:$0xff] }
 0x3e7   :  { %2966 = vmatprep.subr.mxu0 %v10960_v27  ;;  %3037 = vmatprep.subr.mxu1 %v10961_v28  ;;  %v10973_v27 = vld [vmem:[#allocation47_spill] sm:$0xff]  ;;  %v10974_v28 = vld [vmem:[#allocation48_spill] sm:$0xff] }
 0x3e8   :  { %2967 = vmatpush1.msra.mxu0 %v10962_v29  ;;  %3038 = vmatpush1.msra.mxu1 %v10963_v30  ;;  %v10975_v29 = vld [vmem:[#allocation49_spill] sm:$0xff]  ;;  %v10976_v30 = vld [vmem:[#allocation50_spill] sm:$0xff] }
 0x3e9   :  { %2968 = vmatprep.subr.mxu0 %v10964_v31  ;;  %3039 = vmatprep.subr.mxu1 %v10965_v37  ;;  %v10977_v31 = vld [vmem:[#allocation51_spill] sm:$0xff]  ;;  %v10978_v37 = vld [vmem:[#allocation52_spill] sm:$0xff] }
 0x3ea   :  { %2969 = vmatpush1.msra.mxu0 %v10966_v20  ;;  %3040 = vmatpush1.msra.mxu1 %v10967_v21  ;;  %v10979_v20 = vld [vmem:[#allocation53_spill] sm:$0xff]  ;;  %v10980_v21 = vld [vmem:[#allocation54_spill] sm:$0xff] }
 0x3eb   :  { %2970 = vmatprep.subr.mxu0 %v10968_v22  ;;  %3041 = vmatprep.subr.mxu1 %v10969_v23  ;;  %v10981_v22 = vld [vmem:[#allocation55_spill] sm:$0xff]  ;;  %v10982_v23 = vld [vmem:[#allocation56_spill] sm:$0xff] }
 0x3ec   :  { %2971 = vmatpush1.msra.mxu0 %v10970_v24  ;;  %3042 = vmatpush1.msra.mxu1 %v10971_v25  ;;  %v10983_v24 = vld [vmem:[#allocation57_spill] sm:$0xff]  ;;  %v10984_v25 = vld [vmem:[#allocation58_spill] sm:$0xff] }
 0x3ed   :  { %2972 = vmatprep.subr.mxu0 %v10972_v26  ;;  %3043 = vmatprep.subr.mxu1 %v10973_v27  ;;  %v10985_v26 = vld [vmem:[#allocation59_spill] sm:$0xff]  ;;  %v10986_v27 = vld [vmem:[#allocation60_spill] sm:$0xff] }
 0x3ee   :  { %2973 = vmatpush1.msra.mxu0 %v10974_v28  ;;  %3044 = vmatpush1.msra.mxu1 %v10975_v29  ;;  %v10987_v28 = vld [vmem:[#allocation61_spill] sm:$0xff]  ;;  %v10988_v29 = vld [vmem:[#allocation62_spill] sm:$0xff] }
 0x3ef   :  { %2974 = vmatprep.subr.mxu0 %v10976_v30  ;;  %3045 = vmatprep.subr.mxu1 %v10977_v31  ;;  %v10989_v30 = vld [vmem:[#allocation63_spill] sm:$0xff]  ;;  %v10990_v31 = vld [vmem:[#allocation64_spill] sm:$0xff] }
 0x3f0   :  { %2975 = vmatpush1.msra.mxu0 %v10978_v37  ;;  %3046 = vmatpush1.msra.mxu1 %v10979_v20  ;;  %v10991_v37 = vld [vmem:[#allocation65_spill] sm:$0xff]  ;;  %v10992_v20 = vld [vmem:[#allocation66_spill] sm:$0xff] }
 0x3f1   :  { %2976 = vmatprep.subr.mxu0 %v10980_v21  ;;  %3047 = vmatprep.subr.mxu1 %v10981_v22  ;;  %v10993_v21 = vld [vmem:[#allocation67_spill] sm:$0xff]  ;;  %v10994_v22 = vld [vmem:[#allocation68_spill] sm:$0xff] }
 0x3f2   :  { %2977 = vmatpush1.msra.mxu0 %v10982_v23  ;;  %3048 = vmatpush1.msra.mxu1 %v10983_v24  ;;  %v10995_v23 = vld [vmem:[#allocation69_spill] sm:$0xff]  ;;  %v10996_v24 = vld [vmem:[#allocation70_spill] sm:$0xff] }
 0x3f3   :  { %2978 = vmatprep.subr.mxu0 %v10984_v25  ;;  %3049 = vmatprep.subr.mxu1 %v10985_v26  ;;  %v10997_v25 = vld [vmem:[#allocation71_spill] sm:$0xff]  ;;  %v10998_v26 = vld [vmem:[#allocation72_spill] sm:$0xff] }
 0x3f4   :  { %2979 = vmatpush1.msra.mxu0 %v10986_v27  ;;  %3050 = vmatpush1.msra.mxu1 %v10987_v28  ;;  %v10999_v27 = vld [vmem:[#allocation73_spill] sm:$0xff]  ;;  %v11000_v28 = vld [vmem:[#allocation74_spill] sm:$0xff] }
 0x3f5   :  { %2980 = vmatprep.subr.mxu0 %v10988_v29  ;;  %3051 = vmatprep.subr.mxu1 %v10989_v30  ;;  %v11001_v29 = vld [vmem:[#allocation75_spill] sm:$0xff]  ;;  %v11002_v30 = vld [vmem:[#allocation76_spill] sm:$0xff] }
 0x3f6   :  { %2981 = vmatpush1.msra.mxu0 %v10990_v31  ;;  %3052 = vmatpush1.msra.mxu1 %v10991_v37  ;;  %v11003_v31 = vld [vmem:[#allocation77_spill] sm:$0xff]  ;;  %v11004_v37 = vld [vmem:[#allocation78_spill] sm:$0xff] }
 0x3f7   :  { %2982 = vmatprep.subr.mxu0 %v10992_v20  ;;  %3053 = vmatprep.subr.mxu1 %v10993_v21  ;;  %v11005_v20 = vld [vmem:[#allocation79_spill] sm:$0xff]  ;;  %v11006_v21 = vld [vmem:[#allocation80_spill] sm:$0xff] }
 0x3f8   :  { %2983 = vmatpush1.msra.mxu0 %v10994_v22  ;;  %3054 = vmatpush1.msra.mxu1 %v10995_v23  ;;  %v11007_v22 = vld [vmem:[#allocation81_spill] sm:$0xff]  ;;  %v11008_v23 = vld [vmem:[#allocation82_spill] sm:$0xff] }
 0x3f9   :  { %2984 = vmatprep.subr.mxu0 %v10996_v24  ;;  %3055 = vmatprep.subr.mxu1 %v10997_v25  ;;  %v11009_v24 = vld [vmem:[#allocation83_spill] sm:$0xff]  ;;  %v11010_v25 = vld [vmem:[#allocation84_spill] sm:$0xff] }
 0x3fa   :  { %2985 = vmatpush1.msra.mxu0 %v10998_v26  ;;  %3056 = vmatpush1.msra.mxu1 %v10999_v27  ;;  %v11011_v26 = vld [vmem:[#allocation148_spill] sm:$0xff]  ;;  %v11012_v27 = vld [vmem:[#allocation149_spill] sm:$0xff] }
 0x3fb   :  { %2986 = vmatprep.subr.mxu0 %v11000_v28  ;;  %3057 = vmatprep.subr.mxu1 %v11001_v29  ;;  %v11013_v28 = vld [vmem:[#allocation150_spill] sm:$0xff] }
 0x3fc   :  { %2987 = vmatpush1.msra.mxu0 %v11002_v30  ;;  %3058 = vmatpush1.msra.mxu1 %v11003_v31 }
 0x3fd   :  { %2988 = vmatprep.subr.mxu0 %v11004_v37  ;;  %3059 = vmatprep.subr.mxu1 %v11005_v20 }
 0x3fe   :  { %2989 = vmatpush1.msra.mxu0 %v11006_v21  ;;  %3060 = vmatpush1.msra.mxu1 %v11007_v22 }
 0x3ff   :  { %2990 = vmatprep.subr.mxu0 %v11008_v23  ;;  %3061 = vmatprep.subr.mxu1 %v11009_v24 }
 0x400   :  { %2991 = vmatpush1.msra.mxu0 %v11010_v25  ;;  %3062 = vmatpush1.msra.mxu1 %v11011_v26 }
 0x401   :  { %3024 = vmatprep.mubr.f32.mxu0 %v10607_v3  ;;  %3095 = vmatprep.mubr.f32.mxu1 %v10607_v3 }
 0x402   :  { %3102 = vmatprep.subr.mxu0 %v11012_v27  ;;  %3173 = vmatprep.subr.mxu1 %v11013_v28 }
 0x45d   :  { %v2355_v29 = vpop.f32.mrf.mxu0  ;;  %v2426_v30 = vpop.f32.mrf.mxu1 }
 0x45f   :  { %v2357_v31 = vpop.f32.mrf.mxu0  ;;  %v2428_v37 = vpop.f32.mrf.mxu1 }
 0x47e   :  { %v2497_v20 = vpop.f32.mrf.mxu0  ;;  %v2568_v22 = vpop.f32.mrf.mxu1 }
 0x47f   :  { %v2498_v21 = vadd.f32 %v2497_v20, %v2355_v29  ;;  %v2569_v19 = vadd.f32 %v2568_v22, %v2426_v30 }
 0x480   :  { %v2499_v23 = vpop.f32.mrf.mxu0  ;;  %v2570_v27 = vpop.f32.mrf.mxu1 }
 0x481   :  { %v2573_v24 = vadd.f32 %v2498_v21, %v7540_v43  ;;  %v2500_v25 = vadd.f32 %v2499_v23, %v2357_v31  ;;  %v2575_v28 = vadd.f32 %v2569_v19, %v7549_v55  ;;  %v2571_v16 = vadd.f32 %v2570_v27, %v2428_v37  ;;  %v11014_v19 = vld [vmem:[#allocation153_spill] sm:$0xff]  ;;  %v11015_v27 = vld [vmem:[#allocation154_spill] sm:$0xff] }
 0x483   :  { %v2577_v26 = vmul.f32 0.5, %v2573_v24  ;;  %v2574_v18 = vadd.f32 %v2500_v25, %v7544_v63  ;;  %v2576_v15 = vadd.f32 %v2571_v16, %v7555_v35 }
 0x485   :  { %6356 = vtanh.f32 %v2577_v26  ;;  %v2581_v17 = vmul.f32 0.5, %v2574_v18  ;;  %v2586_v29 = vmul.f32 0.5, %v2576_v15 }
 0x487   :  { %6358 = vtanh.f32 %v2581_v17 }
 0x488   :  { %6360 = vtanh.f32 %v2575_v28  ;;  %v11016_v28 = vld [vmem:[#allocation167_spill] sm:$0xff] }
 0x489   :  { %6362 = vtanh.f32 %v2586_v29 }
 0x492   :  { %v6357_v20 = vpop.eup %6356 }
 0x493   :  { %v2579_v14 = vmul.f32 0.5, %v6357_v20 }
 0x494   :  { %v6359_v13 = vpop.eup %6358 }
 0x495   :  { %v2580_v21 = vadd.f32 0.5, %v2579_v14  ;;  %v2583_v31 = vmul.f32 0.5, %v6359_v13  ;;  %v6361_v22 = vpop.eup %6360 }
 0x496   :  { %v6363_v16 = vpop.eup %6362 }
 0x497   :  { %v2584_v30 = vadd.f32 0.5, %v2583_v31  ;;  %v2591_v18 = vmul.f32 %v6361_v22, %v2580_v21  ;;  %v2588_v13 = vmul.f32 0.5, %v6363_v16  ;;  %v11018_v22 = vld [vmem:[#allocation168_spill] sm:$0xff]  ;;  %v11022_v16 = vld [vmem:[#allocation87_spill] sm:$0xff] }
 0x499   :  { %v2590_v23 = vmul.f32 %v2584_v30, %v7978_v58  ;;  %v2589_v58 = vadd.f32 0.5, %v2588_v13 }
 0x49b   :  { %v8390_v24 = vadd.f32 %v2591_v18, %v2590_v23  ;;  %v11019_v18 = vld [vmem:[#allocation164_spill] sm:$0xff] }
 0x49d   :  { %6364 = vtanh.f32 %v8390_v24 }
 0x4a0   :  { %v2734_v17 = vpop.f32.mrf.mxu0  ;;  %v2805_v15 = vpop.f32.mrf.mxu1 }
 0x4a1   :  { %v2810_v37 = vadd.f32 %v2734_v17, %v11014_v19  ;;  %v2812_v29 = vadd.f32 %v2805_v15, %v11016_v28  ;;  %v11020_v17 = vld [vmem:[#allocation85_spill] sm:$0xff] }
 0x4a2   :  { %v2736_v25 = vpop.f32.mrf.mxu0  ;;  %v2807_v31 = vpop.f32.mrf.mxu1 }
 0x4a3   :  { %v2814_v26 = vmul.f32 0.5, %v2810_v37  ;;  %v2811_v14 = vadd.f32 %v2736_v25, %v11015_v27  ;;  %v2813_v23 = vadd.f32 %v2807_v31, %v11018_v22  ;;  %v11021_v37 = vld [vmem:[#allocation86_spill] sm:$0xff]  ;;  %v11023_v25 = vld [vmem:[#allocation88_spill] sm:$0xff]  ;;  %v11032_v31 = vld [vmem:[#allocation97_spill] sm:$0xff] }
 0x4a4   :  { %v11027_v27 = vld [vmem:[#allocation92_spill] sm:$0xff] }
 0x4a5   :  { %6366 = vtanh.f32 %v2814_v26  ;;  %v2818_v20 = vmul.f32 0.5, %v2811_v14  ;;  %v2823_v19 = vmul.f32 0.5, %v2813_v23  ;;  %v11024_v26 = vld [vmem:[#allocation89_spill] sm:$0xff] }
 0x4a6   :  { %v11028_v14 = vld [vmem:[#allocation93_spill] sm:$0xff] }
 0x4a7   :  { %6368 = vtanh.f32 %v2818_v20  ;;  %v11030_v20 = vld [vmem:[#allocation95_spill] sm:$0xff] }
 0x4a8   :  { %6370 = vtanh.f32 %v2812_v29  ;;  %v11029_v29 = vld [vmem:[#allocation94_spill] sm:$0xff] }
 0x4a9   :  { %6372 = vtanh.f32 %v2823_v19 }
 0x4aa   :  { %v6365_v21 = vpop.eup %6364 }
 0x4ab   :  { %v8396_v30 = vmul.f32 %v6365_v21, %v2589_v58  ;;  %v11031_v21 = vld [vmem:[#allocation96_spill] sm:$0xff] }
 0x4ad   :  { %11017 = vst [vmem:[#allocation141_spill] sm:$0xff] %v8396_v30  ;;  %3025 = vmatmul.mubr.f32.vlgmr.msra.gmra.mxu0 %v8396_v30  ;;  %3096 = vmatmul.mubr.f32.vlgmr.msra.gmra.mxu1 %v8396_v30  ;;  %v8679_v30 = vld [vmem:[#allocation17 + $0x128] sm:$0xff] }
 0x4ae   :  { %3103 = vmatpush1.msra.mxu0 %v7986_v2  ;;  %3174 = vmatpush1.msra.mxu1 %v7988_v6  ;;  %v11025_v6 = vld [vmem:[#allocation90_spill] sm:$0xff]  ;;  %11095 = vst [vmem:[#allocation36_spill] sm:$0xff] %v8679_v30 }
 0x4af   :  { %3104 = vmatprep.subr.mxu0 %v7990_v44  ;;  %3175 = vmatprep.subr.mxu1 %v7992_v50  ;;  %v11026_v44 = vld [vmem:[#allocation91_spill] sm:$0xff] }
 0x4b0   :  { %3105 = vmatpush1.msra.mxu0 %v11019_v18  ;;  %3176 = vmatpush1.msra.mxu1 %v11020_v17  ;;  %v11033_v18 = vld [vmem:[#allocation98_spill] sm:$0xff]  ;;  %v11034_v17 = vld [vmem:[#allocation99_spill] sm:$0xff] }
 0x4b1   :  { %3106 = vmatprep.subr.mxu0 %v11021_v37  ;;  %3177 = vmatprep.subr.mxu1 %v11022_v16  ;;  %v11035_v37 = vld [vmem:[#allocation100_spill] sm:$0xff]  ;;  %v11036_v16 = vld [vmem:[#allocation101_spill] sm:$0xff] }
 0x4b2   :  { %v6367_v15 = vpop.eup %6366  ;;  %3107 = vmatpush1.msra.mxu0 %v11023_v25  ;;  %3178 = vmatpush1.msra.mxu1 %v11024_v26  ;;  %v11038_v26 = vld [vmem:[#allocation103_spill] sm:$0xff] }
 0x4b3   :  { %v2816_v2 = vmul.f32 0.5, %v6367_v15  ;;  %3108 = vmatprep.subr.mxu0 %v11025_v6  ;;  %3179 = vmatprep.subr.mxu1 %v11026_v44  ;;  %v11037_v15 = vld [vmem:[#allocation102_spill] sm:$0xff]  ;;  %v11044_v6 = vld [vmem:[#allocation109_spill] sm:$0xff] }
 0x4b4   :  { %v6369_v50 = vpop.eup %6368  ;;  %3109 = vmatpush1.msra.mxu0 %v11027_v27  ;;  %3180 = vmatpush1.msra.mxu1 %v11028_v14  ;;  %v11045_v44 = vld [vmem:[#allocation110_spill] sm:$0xff]  ;;  %v11047_v27 = vld [vmem:[#allocation112_spill] sm:$0xff]  ;;  %v11048_v14 = vld [vmem:[#allocation113_spill] sm:$0xff] }
 0x4b5   :  { %v2817_v13 = vadd.f32 0.5, %v2816_v2  ;;  %v2820_v28 = vmul.f32 0.5, %v6369_v50  ;;  %3110 = vmatprep.subr.mxu0 %v11029_v29  ;;  %3181 = vmatprep.subr.mxu1 %v11030_v20  ;;  %v6371_v58 = vpop.eup %6370  ;;  %v11041_v2 = vld [vmem:[#allocation106_spill] sm:$0xff]  ;;  %v11046_v50 = vld [vmem:[#allocation111_spill] sm:$0xff]  ;;  %v11051_v29 = vld [vmem:[#allocation116_spill] sm:$0xff] }
 0x4b6   :  { %3111 = vmatpush1.msra.mxu0 %v11031_v21  ;;  %3182 = vmatpush1.msra.mxu1 %v11032_v31  ;;  %v6373_v20 = vpop.eup %6372  ;;  %v11053_v21 = vld [vmem:[#allocation118_spill] sm:$0xff]  ;;  %v11054_v31 = vld [vmem:[#allocation119_spill] sm:$0xff] }
 0x4b7   :  { %v2821_v22 = vadd.f32 0.5, %v2820_v28  ;;  %v2828_v23 = vmul.f32 %v6371_v58, %v2817_v13  ;;  %3112 = vmatprep.subr.mxu0 %v8039_v40  ;;  %3183 = vmatprep.subr.mxu1 %v8041_v61  ;;  %v11039_v40 = vld [vmem:[#allocation104_spill] sm:$0xff]  ;;  %v11040_v61 = vld [vmem:[#allocation105_spill] sm:$0xff]  ;;  %v11049_v13 = vld [vmem:[#allocation114_spill] sm:$0xff] }
 0x4b8   :  { %3113 = vmatpush1.msra.mxu0 %v11033_v18  ;;  %3184 = vmatpush1.msra.mxu1 %v11034_v17  ;;  %v11050_v28 = vld [vmem:[#allocation115_spill] sm:$0xff]  ;;  %v11052_v58 = vld [vmem:[#allocation117_spill] sm:$0xff]  ;;  %v11057_v18 = vld [vmem:[#allocation122_spill] sm:$0xff]  ;;  %v2825_v17 = vmul.f32 0.5, %v6373_v20 }
 0x4b9   :  { %v2827_v19 = vmul.f32 %v2821_v22, %v8080_v0  ;;  %3114 = vmatprep.subr.mxu0 %v8051_v4  ;;  %3185 = vmatprep.subr.mxu1 %v11035_v37  ;;  %v11042_v0 = vld [vmem:[#allocation107_spill] sm:$0xff]  ;;  %v11043_v4 = vld [vmem:[#allocation108_spill] sm:$0xff]  ;;  %v11072_v20 = vld [vmem:[#allocation137_spill] sm:$0xff] }
 0x4ba   :  { %3115 = vmatpush1.msra.mxu0 %v11036_v16  ;;  %3186 = vmatpush1.msra.mxu1 %v11037_v15  ;;  %v11055_v22 = vld [vmem:[#allocation120_spill] sm:$0xff]  ;;  %v11060_v16 = vld [vmem:[#allocation125_spill] sm:$0xff]  ;;  %v11061_v15 = vld [vmem:[#allocation126_spill] sm:$0xff] }
 0x4bb   :  { %v8428_v25 = vadd.f32 %v2828_v23, %v2827_v19  ;;  %3116 = vmatprep.subr.mxu0 %v11038_v26  ;;  %3187 = vmatprep.subr.mxu1 %v11039_v40  ;;  %v11056_v23 = vld [vmem:[#allocation121_spill] sm:$0xff]  ;;  %v11058_v19 = vld [vmem:[#allocation123_spill] sm:$0xff]  ;;  %v11059_v37 = vld [vmem:[#allocation124_spill] sm:$0xff] }
 0x4bc   :  { %3117 = vmatpush1.msra.mxu0 %v11040_v61  ;;  %3188 = vmatpush1.msra.mxu1 %v11041_v2  ;;  %v11062_v26 = vld [vmem:[#allocation127_spill] sm:$0xff]  ;;  %v11063_v40 = vld [vmem:[#allocation128_spill] sm:$0xff]  ;;  %v11064_v61 = vld [vmem:[#allocation129_spill] sm:$0xff]  ;;  %v2826_v2 = vadd.f32 0.5, %v2825_v17 }
 0x4bd   :  { %6374 = vtanh.f32 %v8428_v25  ;;  %3118 = vmatprep.subr.mxu0 %v11042_v0  ;;  %3189 = vmatprep.subr.mxu1 %v11043_v4  ;;  %v11065_v4 = vld [vmem:[#allocation130_spill] sm:$0xff] }
 0x4be   :  { %3119 = vmatpush1.msra.mxu0 %v11044_v6  ;;  %3190 = vmatpush1.msra.mxu1 %v11045_v44  ;;  %v11066_v6 = vld [vmem:[#allocation131_spill] sm:$0xff]  ;;  %v8613_v17 = vld [vmem:[#allocation17 + $0x1e0] sm:$0xff] }
 0x4bf   :  { %3120 = vmatprep.subr.mxu0 %v11046_v50  ;;  %3191 = vmatprep.subr.mxu1 %v11047_v27  ;;  %v8485_v50 = vld [vmem:[#allocation14 + $0x1b8] sm:$0xff]  ;;  %v8489_v27 = vld [vmem:[#allocation14 + $0x1b0] sm:$0xff] }
 0x4c0   :  { %3121 = vmatpush1.msra.mxu0 %v11048_v14  ;;  %3192 = vmatpush1.msra.mxu1 %v11049_v13  ;;  %v8493_v14 = vld [vmem:[#allocation14 + $0x198] sm:$0xff]  ;;  %v11069_v13 = vld [vmem:[#allocation134_spill] sm:$0xff] }
 0x4c1   :  { %3122 = vmatprep.subr.mxu0 %v11050_v28  ;;  %3193 = vmatprep.subr.mxu1 %v11051_v29  ;;  %v11070_v28 = vld [vmem:[#allocation135_spill] sm:$0xff]  ;;  %v11071_v29 = vld [vmem:[#allocation136_spill] sm:$0xff] }
 0x4c2   :  { %3123 = vmatpush1.msra.mxu0 %v11052_v58  ;;  %3194 = vmatpush1.msra.mxu1 %v11053_v21  ;;  %v11073_v58 = vld [vmem:[#allocation138_spill] sm:$0xff]  ;;  %v8595_v21 = vld [vmem:[#allocation14 + $0x10] sm:$0xff] }
 0x4c3   :  { %3124 = vmatprep.subr.mxu0 %v11054_v31  ;;  %3195 = vmatprep.subr.mxu1 %v11055_v22  ;;  %v11074_v31 = vld [vmem:[#allocation139_spill] sm:$0xff]  ;;  %v11075_v22 = vld [vmem:[#allocation140_spill] sm:$0xff] }
 0x4c4   :  { %3125 = vmatpush1.msra.mxu0 %v11056_v23  ;;  %3196 = vmatpush1.msra.mxu1 %v11057_v18  ;;  %v8607_v23 = vld [vmem:[#allocation17 + $0x1e8] sm:$0xff]  ;;  %v8609_v18 = vld [vmem:[#allocation17 + $0x1f8] sm:$0xff] }
 0x4c5   :  { %3126 = vmatprep.subr.mxu0 %v11058_v19  ;;  %3197 = vmatprep.subr.mxu1 %v11059_v37  ;;  %v8615_v19 = vld [vmem:[#allocation17 + $0x1f0] sm:$0xff]  ;;  %v8619_v37 = vld [vmem:[#allocation17 + $0x1c8] sm:$0xff] }
 0x4c6   :  { %3127 = vmatpush1.msra.mxu0 %v11060_v16  ;;  %3198 = vmatpush1.msra.mxu1 %v11061_v15  ;;  %v8621_v16 = vld [vmem:[#allocation17 + $0x1d8] sm:$0xff]  ;;  %v8625_v15 = vld [vmem:[#allocation17 + $0x1c0] sm:$0xff] }
 0x4c7   :  { %3128 = vmatprep.subr.mxu0 %v11062_v26  ;;  %3199 = vmatprep.subr.mxu1 %v11063_v40  ;;  %11076 = vst [vmem:[#allocation142_spill] sm:$0xff] %v8621_v16  ;;  %11077 = vst [vmem:[#allocation143_spill] sm:$0xff] %v8625_v15  ;;  %v8627_v26 = vld [vmem:[#allocation17 + $0x1d0] sm:$0xff]  ;;  %v8631_v40 = vld [vmem:[#allocation17 + $0x1a8] sm:$0xff] }
 0x4c8   :  { %3129 = vmatpush1.msra.mxu0 %v8145_v60  ;;  %3200 = vmatpush1.msra.mxu1 %v11064_v61  ;;  %v8469_v60 = vld [vmem:[#allocation14 + $0x1f8] sm:$0xff]  ;;  %11078 = vst [vmem:[#allocation144_spill] sm:$0xff] %v8627_v26  ;;  %11079 = vst [vmem:[#allocation145_spill] sm:$0xff] %v8631_v40 }
 0x4c9   :  { %3130 = vmatprep.subr.mxu0 %v8151_v56  ;;  %3201 = vmatprep.subr.mxu1 %v8153_v59  ;;  %v11067_v56 = vld [vmem:[#allocation132_spill] sm:$0xff]  ;;  %v8633_v61 = vld [vmem:[#allocation17 + $0x1b8] sm:$0xff] }
 0x4ca   :  { %v6375_v0 = vpop.eup %6374  ;;  %3131 = vmatpush1.msra.mxu0 %v11065_v4  ;;  %3202 = vmatpush1.msra.mxu1 %v8159_v54  ;;  %v8473_v59 = vld [vmem:[#allocation14 + $0x1f0] sm:$0xff]  ;;  %v8477_v54 = vld [vmem:[#allocation14 + $0x1d8] sm:$0xff]  ;;  %11080 = vst [vmem:[#allocation146_spill] sm:$0xff] %v8633_v61  ;;  %v8643_v4 = vld [vmem:[#allocation17 + $0x188] sm:$0xff] }
 0x4cb   :  { %3132 = vmatprep.subr.mxu0 %v11066_v6  ;;  %3203 = vmatprep.subr.mxu1 %v8165_v39  ;;  %v8465_v44 = vmul.f32 %v6375_v0, %v2826_v2  ;;  %v11068_v39 = vld [vmem:[#allocation133_spill] sm:$0xff]  ;;  %v8637_v2 = vld [vmem:[#allocation17 + $0x1a0] sm:$0xff]  ;;  %v8639_v0 = vld [vmem:[#allocation17 + $0x1b0] sm:$0xff]  ;;  %11083 = vst [vmem:[#allocation152_spill] sm:$0xff] %v8643_v4 }
 0x4cc   :  { %3133 = vmatpush1.msra.mxu0 %v8169_v41  ;;  %3166 = vmatprep.mubr.f32.mxu0 %v10607_v3  ;;  %v8481_v41 = vld [vmem:[#allocation14 + $0x1d0] sm:$0xff]  ;;  %11081 = vst [vmem:[#allocation147_spill] sm:$0xff] %v8637_v2  ;;  %11082 = vst [vmem:[#allocation151_spill] sm:$0xff] %v8639_v0  ;;  %v8645_v6 = vld [vmem:[#allocation17 + $0x198] sm:$0xff] }
 0x4cd   :  { %3204 = vmatpush1.msra.mxu1 %v11067_v56  ;;  %3237 = vmatprep.mubr.f32.mxu1 %v10607_v3  ;;  %11084 = vst [vmem:[#allocation165_spill] sm:$0xff] %v8645_v6  ;;  %v8651_v56 = vld [vmem:[#allocation17 + $0x190] sm:$0xff] }
 0x4ce   :  { %3167 = vmatmul.mubr.f32.vlgmr.msra.gmra.mxu0 %v8465_v44  ;;  %3238 = vmatmul.mubr.f32.vlgmr.msra.gmra.mxu1 %v8465_v44  ;;  %11086 = vst [vmem:[#allocation27_spill] sm:$0xff] %v8651_v56 }
 0x4cf   :  { %3339 = vmatprep.subr.mxu0 %v11068_v39  ;;  %3410 = vmatprep.subr.mxu1 %v8469_v60  ;;  %v8655_v39 = vld [vmem:[#allocation17 + $0x168] sm:$0xff] }
 0x4d0   :  { %3340 = vmatpush1.msra.mxu0 %v8185_v52  ;;  %3411 = vmatpush1.msra.mxu1 %v8473_v59  ;;  %v8497_v52 = vld [vmem:[#allocation14 + $0x190] sm:$0xff]  ;;  %11087 = vst [vmem:[#allocation28_spill] sm:$0xff] %v8655_v39 }
 0x4d1   :  { %3341 = vmatprep.subr.mxu0 %v8189_v62  ;;  %3412 = vmatprep.subr.mxu1 %v8477_v54  ;;  %v8501_v62 = vld [vmem:[#allocation14 + $0x178] sm:$0xff] }
 0x4d2   :  { %3342 = vmatpush1.msra.mxu0 %v8193_v36  ;;  %3413 = vmatpush1.msra.mxu1 %v8481_v41  ;;  %v8505_v36 = vld [vmem:[#allocation14 + $0x170] sm:$0xff] }
 0x4d3   :  { %3343 = vmatprep.subr.mxu0 %v8197_v57  ;;  %3414 = vmatprep.subr.mxu1 %v8485_v50  ;;  %v8509_v57 = vld [vmem:[#allocation14 + $0x158] sm:$0xff] }
 0x4d4   :  { %3344 = vmatpush1.msra.mxu0 %v8201_v34  ;;  %3415 = vmatpush1.msra.mxu1 %v8489_v27  ;;  %v8513_v34 = vld [vmem:[#allocation14 + $0x150] sm:$0xff] }
 0x4d5   :  { %3345 = vmatprep.subr.mxu0 %v8205_v32  ;;  %3416 = vmatprep.subr.mxu1 %v8493_v14  ;;  %v8517_v32 = vld [vmem:[#allocation14 + $0x138] sm:$0xff] }
 0x4d6   :  { %3346 = vmatpush1.msra.mxu0 %v8209_v33  ;;  %3417 = vmatpush1.msra.mxu1 %v8497_v52  ;;  %v8521_v33 = vld [vmem:[#allocation14 + $0x130] sm:$0xff] }
 0x4d7   :  { %3347 = vmatprep.subr.mxu0 %v8213_v42  ;;  %3418 = vmatprep.subr.mxu1 %v8501_v62  ;;  %v8525_v42 = vld [vmem:[#allocation14 + $0x118] sm:$0xff] }
 0x4d8   :  { %3348 = vmatpush1.msra.mxu0 %v8217_v45  ;;  %3419 = vmatpush1.msra.mxu1 %v8505_v36  ;;  %v8529_v45 = vld [vmem:[#allocation14 + $0x110] sm:$0xff] }
 0x4d9   :  { %3349 = vmatprep.subr.mxu0 %v8221_v38  ;;  %3420 = vmatprep.subr.mxu1 %v8509_v57  ;;  %v8533_v38 = vld [vmem:[#allocation14 + $0xf8] sm:$0xff] }
 0x4da   :  { %3350 = vmatpush1.msra.mxu0 %v8225_v51  ;;  %3421 = vmatpush1.msra.mxu1 %v8513_v34  ;;  %v8537_v51 = vld [vmem:[#allocation14 + $0xf0] sm:$0xff] }
 0x4db   :  { %3351 = vmatprep.subr.mxu0 %v8229_v47  ;;  %3422 = vmatprep.subr.mxu1 %v8517_v32  ;;  %v8541_v47 = vld [vmem:[#allocation14 + $0xd8] sm:$0xff] }
 0x4dc   :  { %3352 = vmatpush1.msra.mxu0 %v8233_v49  ;;  %3423 = vmatpush1.msra.mxu1 %v8521_v33  ;;  %v8545_v49 = vld [vmem:[#allocation14 + $0xd0] sm:$0xff] }
 0x4dd   :  { %3353 = vmatprep.subr.mxu0 %v8237_v53  ;;  %3424 = vmatprep.subr.mxu1 %v8525_v42  ;;  %v8549_v53 = vld [vmem:[#allocation14 + $0xb8] sm:$0xff] }
 0x4de   :  { %3354 = vmatpush1.msra.mxu0 %v8241_v8  ;;  %3425 = vmatpush1.msra.mxu1 %v8529_v45  ;;  %v8553_v8 = vld [vmem:[#allocation14 + $0xb0] sm:$0xff] }
 0x4df   :  { %3355 = vmatprep.subr.mxu0 %v8245_v5  ;;  %3426 = vmatprep.subr.mxu1 %v8533_v38  ;;  %v8557_v5 = vld [vmem:[#allocation14 + $0x98] sm:$0xff] }
 0x4e0   :  { %3356 = vmatpush1.msra.mxu0 %v8249_v7  ;;  %3427 = vmatpush1.msra.mxu1 %v8537_v51  ;;  %v8561_v7 = vld [vmem:[#allocation14 + $0x90] sm:$0xff] }
 0x4e1   :  { %3357 = vmatprep.subr.mxu0 %v8253_v46  ;;  %3428 = vmatprep.subr.mxu1 %v8541_v47  ;;  %v8565_v46 = vld [vmem:[#allocation14 + $0x78] sm:$0xff] }
 0x4e2   :  { %3358 = vmatpush1.msra.mxu0 %v8257_v48  ;;  %3429 = vmatpush1.msra.mxu1 %v8545_v49  ;;  %v8569_v48 = vld [vmem:[#allocation14 + $0x70] sm:$0xff] }
 0x4e3   :  { %3359 = vmatprep.subr.mxu0 %v8261_v1  ;;  %3430 = vmatprep.subr.mxu1 %v8549_v53  ;;  %v8573_v1 = vld [vmem:[#allocation14 + $0x58] sm:$0xff] }
 0x4e4   :  { %3360 = vmatpush1.msra.mxu0 %v8265_v9  ;;  %3431 = vmatpush1.msra.mxu1 %v8553_v8  ;;  %v8577_v9 = vld [vmem:[#allocation14 + $0x50] sm:$0xff] }
 0x4e5   :  { %3361 = vmatprep.subr.mxu0 %v8269_v10  ;;  %3432 = vmatprep.subr.mxu1 %v8557_v5  ;;  %v8581_v10 = vld [vmem:[#allocation14 + $0x38] sm:$0xff] }
 0x4e6   :  { %3362 = vmatpush1.msra.mxu0 %v8273_v11  ;;  %3433 = vmatpush1.msra.mxu1 %v8561_v7  ;;  %v8585_v11 = vld [vmem:[#allocation14 + $0x30] sm:$0xff] }
 0x4e7   :  { %3363 = vmatprep.subr.mxu0 %v8277_v12  ;;  %3434 = vmatprep.subr.mxu1 %v8565_v46  ;;  %v8589_v12 = vld [vmem:[#allocation14 + $0x18] sm:$0xff] }
 0x4e8   :  { %3364 = vmatpush1.msra.mxu0 %v11069_v13  ;;  %3435 = vmatpush1.msra.mxu1 %v8569_v48  ;;  %v8657_v13 = vld [vmem:[#allocation17 + $0x178] sm:$0xff] }
 0x4e9   :  { %3365 = vmatprep.subr.mxu0 %v11070_v28  ;;  %3436 = vmatprep.subr.mxu1 %v8573_v1  ;;  %11088 = vst [vmem:[#allocation29_spill] sm:$0xff] %v8657_v13  ;;  %v8661_v28 = vld [vmem:[#allocation17 + $0x160] sm:$0xff] }
 0x4ea   :  { %3366 = vmatpush1.msra.mxu0 %v11071_v29  ;;  %3437 = vmatpush1.msra.mxu1 %v8577_v9  ;;  %11089 = vst [vmem:[#allocation30_spill] sm:$0xff] %v8661_v28  ;;  %v8663_v29 = vld [vmem:[#allocation17 + $0x170] sm:$0xff] }
 0x4eb   :  { %3367 = vmatprep.subr.mxu0 %v11072_v20  ;;  %3438 = vmatprep.subr.mxu1 %v8581_v10  ;;  %11090 = vst [vmem:[#allocation31_spill] sm:$0xff] %v8663_v29  ;;  %v8667_v20 = vld [vmem:[#allocation17 + $0x148] sm:$0xff] }
 0x4ec   :  { %3368 = vmatpush1.msra.mxu0 %v11073_v58  ;;  %3439 = vmatpush1.msra.mxu1 %v8585_v11  ;;  %11091 = vst [vmem:[#allocation32_spill] sm:$0xff] %v8667_v20  ;;  %v8669_v58 = vld [vmem:[#allocation17 + $0x158] sm:$0xff] }
 0x4ed   :  { %3369 = vmatprep.subr.mxu0 %v11074_v31  ;;  %3440 = vmatprep.subr.mxu1 %v8589_v12  ;;  %11092 = vst [vmem:[#allocation33_spill] sm:$0xff] %v8669_v58  ;;  %v8673_v31 = vld [vmem:[#allocation17 + $0x140] sm:$0xff] }
 0x4ee   :  { %3370 = vmatpush1.msra.mxu0 %v11075_v22  ;;  %3403 = vmatprep.mubr.f32.mxu0 %v10607_v3  ;;  %11093 = vst [vmem:[#allocation34_spill] sm:$0xff] %v8673_v31  ;;  %v8675_v22 = vld [vmem:[#allocation17 + $0x150] sm:$0xff] }
 0x4ef   :  { %3441 = vmatpush1.msra.mxu1 %v8595_v21  ;;  %3474 = vmatprep.mubr.f32.mxu1 %v10607_v3  ;;  %11094 = vst [vmem:[#allocation35_spill] sm:$0xff] %v8675_v22 }
 0x4f0   :  { %3404 = vmatmul.mubr.f32.vlgmr.msra.gmra.mxu0 %v8465_v44  ;;  %3475 = vmatmul.mubr.f32.vlgmr.msra.gmra.mxu1 %v8465_v44  ;;  %v8649_v44 = vld [vmem:[#allocation17 + $0x180] sm:$0xff] }
 0x4f1   :  { %3695 = vmatprep.mubr.f32.mxu0 %v10607_v3  ;;  %3766 = vmatprep.mubr.f32.mxu1 %v10607_v3  ;;  %11085 = vst [vmem:[#allocation166_spill] sm:$0xff] %v8649_v44 }
 0x4f2   :  { %3631 = vmatprep.subr.mxu0 %v8607_v23  ;;  %3702 = vmatprep.subr.mxu1 %v8609_v18 }
 0x4f3   :  { %3632 = vmatpush1.msra.mxu0 %v8613_v17  ;;  %3703 = vmatpush1.msra.mxu1 %v8615_v19 }
 0x4f4   :  { %3633 = vmatprep.subr.mxu0 %v8619_v37  ;;  %3704 = vmatprep.subr.mxu1 %v8621_v16 }
 0x4f5   :  { %3634 = vmatpush1.msra.mxu0 %v8625_v15  ;;  %3705 = vmatpush1.msra.mxu1 %v8627_v26 }
 0x4f6   :  { %3635 = vmatprep.subr.mxu0 %v8631_v40  ;;  %3706 = vmatprep.subr.mxu1 %v8633_v61 }
 0x4f7   :  { %3636 = vmatpush1.msra.mxu0 %v8637_v2  ;;  %3707 = vmatpush1.msra.mxu1 %v8639_v0 }
 0x4f8   :  { %3637 = vmatprep.subr.mxu0 %v8643_v4  ;;  %3708 = vmatprep.subr.mxu1 %v8645_v6 }
 0x4f9   :  { %3638 = vmatpush1.msra.mxu0 %v8649_v44  ;;  %3709 = vmatpush1.msra.mxu1 %v8651_v56 }
 0x4fa   :  { %3639 = vmatprep.subr.mxu0 %v8655_v39  ;;  %3710 = vmatprep.subr.mxu1 %v8657_v13  ;;  %v8723_v13 = vld [vmem:[#allocation17 + $0xd0] sm:$0xff] }
 0x4fb   :  { %3640 = vmatpush1.msra.mxu0 %v8661_v28  ;;  %3711 = vmatpush1.msra.mxu1 %v8663_v29  ;;  %v8681_v28 = vld [vmem:[#allocation17 + $0x138] sm:$0xff]  ;;  %v8685_v29 = vld [vmem:[#allocation17 + $0x120] sm:$0xff]  ;;  %11110 = vst [vmem:[#allocation51_spill] sm:$0xff] %v8723_v13 }
 0x4fc   :  { %3641 = vmatprep.subr.mxu0 %v8667_v20  ;;  %3712 = vmatprep.subr.mxu1 %v8669_v58  ;;  %11096 = vst [vmem:[#allocation37_spill] sm:$0xff] %v8681_v28  ;;  %11097 = vst [vmem:[#allocation38_spill] sm:$0xff] %v8685_v29  ;;  %v8687_v20 = vld [vmem:[#allocation17 + $0x130] sm:$0xff]  ;;  %v8691_v58 = vld [vmem:[#allocation17 + $0x108] sm:$0xff] }
 0x4fd   :  { %3642 = vmatpush1.msra.mxu0 %v8673_v31  ;;  %3713 = vmatpush1.msra.mxu1 %v8675_v22  ;;  %11098 = vst [vmem:[#allocation39_spill] sm:$0xff] %v8687_v20  ;;  %11099 = vst [vmem:[#allocation40_spill] sm:$0xff] %v8691_v58  ;;  %v8693_v31 = vld [vmem:[#allocation17 + $0x118] sm:$0xff]  ;;  %v8697_v22 = vld [vmem:[#allocation17 + $0x100] sm:$0xff] }
 0x4fe   :  { %3643 = vmatprep.subr.mxu0 %v8679_v30  ;;  %3714 = vmatprep.subr.mxu1 %v8681_v28  ;;  %11100 = vst [vmem:[#allocation41_spill] sm:$0xff] %v8693_v31  ;;  %11101 = vst [vmem:[#allocation42_spill] sm:$0xff] %v8697_v22  ;;  %v8699_v30 = vld [vmem:[#allocation17 + $0x110] sm:$0xff]  ;;  %v8703_v28 = vld [vmem:[#allocation17 + $0xe8] sm:$0xff] }
 0x4ff   :  { %3644 = vmatpush1.msra.mxu0 %v8685_v29  ;;  %3715 = vmatpush1.msra.mxu1 %v8687_v20  ;;  %11102 = vst [vmem:[#allocation43_spill] sm:$0xff] %v8699_v30  ;;  %11103 = vst [vmem:[#allocation44_spill] sm:$0xff] %v8703_v28  ;;  %v8705_v29 = vld [vmem:[#allocation17 + $0xf8] sm:$0xff]  ;;  %v8707_v20 = vld [vmem:[#allocation17 + $0xe0] sm:$0xff] }
 0x500   :  { %3645 = vmatprep.subr.mxu0 %v8691_v58  ;;  %3716 = vmatprep.subr.mxu1 %v8693_v31  ;;  %11104 = vst [vmem:[#allocation45_spill] sm:$0xff] %v8705_v29  ;;  %11105 = vst [vmem:[#allocation46_spill] sm:$0xff] %v8707_v20  ;;  %v8711_v58 = vld [vmem:[#allocation17 + $0xf0] sm:$0xff]  ;;  %v8715_v31 = vld [vmem:[#allocation17 + $0xc8] sm:$0xff] }
 0x501   :  { %3646 = vmatpush1.msra.mxu0 %v8697_v22  ;;  %3717 = vmatpush1.msra.mxu1 %v8699_v30  ;;  %11106 = vst [vmem:[#allocation47_spill] sm:$0xff] %v8711_v58  ;;  %11107 = vst [vmem:[#allocation48_spill] sm:$0xff] %v8715_v31  ;;  %v8717_v22 = vld [vmem:[#allocation17 + $0xd8] sm:$0xff]  ;;  %v8721_v30 = vld [vmem:[#allocation17 + $0xc0] sm:$0xff] }
 0x502   :  { %3647 = vmatprep.subr.mxu0 %v8703_v28  ;;  %3718 = vmatprep.subr.mxu1 %v8705_v29  ;;  %11108 = vst [vmem:[#allocation49_spill] sm:$0xff] %v8717_v22  ;;  %11109 = vst [vmem:[#allocation50_spill] sm:$0xff] %v8721_v30  ;;  %v8727_v29 = vld [vmem:[#allocation17 + $0xa8] sm:$0xff] }
 0x503   :  { %3648 = vmatpush1.msra.mxu0 %v8707_v20  ;;  %3719 = vmatpush1.msra.mxu1 %v8711_v58  ;;  %11111 = vst [vmem:[#allocation52_spill] sm:$0xff] %v8727_v29  ;;  %v8729_v20 = vld [vmem:[#allocation17 + $0xb8] sm:$0xff]  ;;  %v8733_v58 = vld [vmem:[#allocation17 + $0xa0] sm:$0xff] }
 0x504   :  { %3649 = vmatprep.subr.mxu0 %v8715_v31  ;;  %3720 = vmatprep.subr.mxu1 %v8717_v22  ;;  %11112 = vst [vmem:[#allocation53_spill] sm:$0xff] %v8729_v20  ;;  %11113 = vst [vmem:[#allocation54_spill] sm:$0xff] %v8733_v58  ;;  %v8735_v31 = vld [vmem:[#allocation17 + $0xb0] sm:$0xff]  ;;  %v8739_v22 = vld [vmem:[#allocation17 + $0x88] sm:$0xff] }
 0x505   :  { %3650 = vmatpush1.msra.mxu0 %v8721_v30  ;;  %3721 = vmatpush1.msra.mxu1 %v8723_v13  ;;  %11114 = vst [vmem:[#allocation55_spill] sm:$0xff] %v8735_v31  ;;  %11115 = vst [vmem:[#allocation56_spill] sm:$0xff] %v8739_v22  ;;  %v8741_v30 = vld [vmem:[#allocation17 + $0x98] sm:$0xff]  ;;  %v8745_v13 = vld [vmem:[#allocation17 + $0x80] sm:$0xff] }
 0x506   :  { %3651 = vmatprep.subr.mxu0 %v8727_v29  ;;  %3722 = vmatprep.subr.mxu1 %v8729_v20  ;;  %11116 = vst [vmem:[#allocation57_spill] sm:$0xff] %v8741_v30  ;;  %11117 = vst [vmem:[#allocation58_spill] sm:$0xff] %v8745_v13  ;;  %v8747_v29 = vld [vmem:[#allocation17 + $0x90] sm:$0xff]  ;;  %v8751_v20 = vld [vmem:[#allocation17 + $0x68] sm:$0xff] }
 0x507   :  { %3652 = vmatpush1.msra.mxu0 %v8733_v58  ;;  %3723 = vmatpush1.msra.mxu1 %v8735_v31  ;;  %11118 = vst [vmem:[#allocation59_spill] sm:$0xff] %v8747_v29  ;;  %11119 = vst [vmem:[#allocation60_spill] sm:$0xff] %v8751_v20  ;;  %v8753_v58 = vld [vmem:[#allocation17 + $0x78] sm:$0xff]  ;;  %v8757_v31 = vld [vmem:[#allocation17 + $0x60] sm:$0xff] }
 0x508   :  { %3653 = vmatprep.subr.mxu0 %v8739_v22  ;;  %3724 = vmatprep.subr.mxu1 %v8741_v30  ;;  %11120 = vst [vmem:[#allocation61_spill] sm:$0xff] %v8753_v58  ;;  %11121 = vst [vmem:[#allocation62_spill] sm:$0xff] %v8757_v31  ;;  %v8759_v22 = vld [vmem:[#allocation17 + $0x70] sm:$0xff]  ;;  %v8763_v30 = vld [vmem:[#allocation17 + $0x48] sm:$0xff] }
 0x509   :  { %3654 = vmatpush1.msra.mxu0 %v8745_v13  ;;  %3725 = vmatpush1.msra.mxu1 %v8747_v29  ;;  %11122 = vst [vmem:[#allocation63_spill] sm:$0xff] %v8759_v22  ;;  %11123 = vst [vmem:[#allocation64_spill] sm:$0xff] %v8763_v30  ;;  %v8765_v13 = vld [vmem:[#allocation17 + $0x58] sm:$0xff]  ;;  %v8769_v29 = vld [vmem:[#allocation17 + $0x40] sm:$0xff] }
 0x50a   :  { %3655 = vmatprep.subr.mxu0 %v8751_v20  ;;  %3726 = vmatprep.subr.mxu1 %v8753_v58  ;;  %11124 = vst [vmem:[#allocation65_spill] sm:$0xff] %v8765_v13  ;;  %11125 = vst [vmem:[#allocation66_spill] sm:$0xff] %v8769_v29  ;;  %v8771_v20 = vld [vmem:[#allocation17 + $0x50] sm:$0xff]  ;;  %v8775_v58 = vld [vmem:[#allocation17 + $0x28] sm:$0xff] }
 0x50b   :  { %3656 = vmatpush1.msra.mxu0 %v8757_v31  ;;  %3727 = vmatpush1.msra.mxu1 %v8759_v22  ;;  %11126 = vst [vmem:[#allocation67_spill] sm:$0xff] %v8771_v20  ;;  %11127 = vst [vmem:[#allocation68_spill] sm:$0xff] %v8775_v58  ;;  %v8777_v31 = vld [vmem:[#allocation17 + $0x38] sm:$0xff]  ;;  %v8781_v22 = vld [vmem:[#allocation17 + $0x20] sm:$0xff] }
 0x50c   :  { %3657 = vmatprep.subr.mxu0 %v8763_v30  ;;  %3728 = vmatprep.subr.mxu1 %v8765_v13  ;;  %11128 = vst [vmem:[#allocation69_spill] sm:$0xff] %v8777_v31  ;;  %11129 = vst [vmem:[#allocation70_spill] sm:$0xff] %v8781_v22  ;;  %v8783_v30 = vld [vmem:[#allocation17 + $0x30] sm:$0xff]  ;;  %v8787_v13 = vld [vmem:[#allocation17 + $0x8] sm:$0xff] }
 0x50d   :  { %3658 = vmatpush1.msra.mxu0 %v8769_v29  ;;  %3729 = vmatpush1.msra.mxu1 %v8771_v20  ;;  %11130 = vst [vmem:[#allocation71_spill] sm:$0xff] %v8783_v30  ;;  %11131 = vst [vmem:[#allocation72_spill] sm:$0xff] %v8787_v13  ;;  %v8789_v29 = vld [vmem:[#allocation17 + $0x18] sm:$0xff]  ;;  %v8793_v20 = vld [vmem:[#allocation17] sm:$0xff] }
 0x50e   :  { %3659 = vmatprep.subr.mxu0 %v8775_v58  ;;  %3730 = vmatprep.subr.mxu1 %v8777_v31  ;;  %11132 = vst [vmem:[#allocation73_spill] sm:$0xff] %v8789_v29  ;;  %11133 = vst [vmem:[#allocation74_spill] sm:$0xff] %v8793_v20  ;;  %v8795_v58 = vld [vmem:[#allocation17 + $0x10] sm:$0xff]  ;;  %v8799_v31 = vld [vmem:[#allocation16 + $0x1e8] sm:$0xff] }
 0x50f   :  { %3660 = vmatpush1.msra.mxu0 %v8781_v22  ;;  %3731 = vmatpush1.msra.mxu1 %v8783_v30  ;;  %11134 = vst [vmem:[#allocation75_spill] sm:$0xff] %v8795_v58  ;;  %11135 = vst [vmem:[#allocation76_spill] sm:$0xff] %v8799_v31  ;;  %v8801_v22 = vld [vmem:[#allocation16 + $0x1f8] sm:$0xff] }
 0x510   :  { %3661 = vmatprep.subr.mxu0 %v8787_v13  ;;  %3732 = vmatprep.subr.mxu1 %v8789_v29  ;;  %11136 = vst [vmem:[#allocation77_spill] sm:$0xff] %v8801_v22 }
 0x511   :  { %3662 = vmatpush1.msra.mxu0 %v8793_v20  ;;  %3733 = vmatpush1.msra.mxu1 %v8795_v58 }
 0x512   :  { %3773 = vmatprep.subr.mxu0 %v8799_v31  ;;  %3844 = vmatprep.subr.mxu1 %v8801_v22 }
 0x56d   :  { %v3026_v30 = vpop.f32.mrf.mxu0  ;;  %v3097_v13 = vpop.f32.mrf.mxu1 }
 0x56f   :  { %v3028_v28 = vpop.f32.mrf.mxu0  ;;  %v3099_v29 = vpop.f32.mrf.mxu1 }
 0x58e   :  { %v3168_v39 = vpop.f32.mrf.mxu0  ;;  %v3239_v44 = vpop.f32.mrf.mxu1 }
 0x58f   :  { %v3169_v56 = vadd.f32 %v3168_v39, %v3026_v30  ;;  %v3240_v0 = vadd.f32 %v3239_v44, %v3097_v13 }
 0x590   :  { %v3170_v6 = vpop.f32.mrf.mxu0  ;;  %v3241_v31 = vpop.f32.mrf.mxu1 }
 0x591   :  { %v3244_v20 = vadd.f32 %v3169_v56, %v7540_v43  ;;  %v3171_v4 = vadd.f32 %v3170_v6, %v3028_v28  ;;  %v3246_v22 = vadd.f32 %v3240_v0, %v7549_v55  ;;  %v3242_v40 = vadd.f32 %v3241_v31, %v3099_v29  ;;  %v11137_v0 = vld [vmem:[#allocation155_spill] sm:$0xff]  ;;  %v11138_v31 = vld [vmem:[#allocation156_spill] sm:$0xff] }
 0x593   :  { %v3248_v58 = vmul.f32 0.5, %v3244_v20  ;;  %v3245_v2 = vadd.f32 %v3171_v4, %v7544_v63  ;;  %v3247_v26 = vadd.f32 %v3242_v40, %v7555_v35 }
 0x595   :  { %6376 = vtanh.f32 %v3248_v58  ;;  %v3252_v61 = vmul.f32 0.5, %v3245_v2  ;;  %v3257_v30 = vmul.f32 0.5, %v3247_v26 }
 0x597   :  { %6378 = vtanh.f32 %v3252_v61 }
 0x598   :  { %6380 = vtanh.f32 %v3246_v22  ;;  %v11139_v22 = vld [vmem:[#allocation169_spill] sm:$0xff] }
 0x599   :  { %6382 = vtanh.f32 %v3257_v30 }
 0x5a2   :  { %v6377_v39 = vpop.eup %6376 }
 0x5a3   :  { %v3250_v15 = vmul.f32 0.5, %v6377_v39 }
 0x5a4   :  { %v6379_v16 = vpop.eup %6378 }
 0x5a5   :  { %v3251_v56 = vadd.f32 0.5, %v3250_v15  ;;  %v3254_v6 = vmul.f32 0.5, %v6379_v16  ;;  %v6381_v13 = vpop.eup %6380 }
 0x5a6   :  { %v6383_v40 = vpop.eup %6382 }
 0x5a7   :  { %v3255_v44 = vadd.f32 0.5, %v3254_v6  ;;  %v3262_v2 = vmul.f32 %v6381_v13, %v3251_v56  ;;  %v3259_v16 = vmul.f32 0.5, %v6383_v40  ;;  %v8818_v13 = vld [vmem:[#allocation16 + $0x1e0] sm:$0xff] }
 0x5a8   :  { %v8829_v40 = vld [vmem:[#allocation16 + $0x1c0] sm:$0xff] }
 0x5a9   :  { %v3261_v4 = vmul.f32 %v3255_v44, %v8390_v24  ;;  %v3260_v24 = vadd.f32 0.5, %v3259_v16  ;;  %11142 = vst [vmem:[#allocation79_spill] sm:$0xff] %v8829_v40  ;;  %v8847_v16 = vld [vmem:[#allocation16 + $0x188] sm:$0xff] }
 0x5aa   :  { %11148 = vst [vmem:[#allocation148_spill] sm:$0xff] %v8847_v16 }
 0x5ab   :  { %v8810_v28 = vadd.f32 %v3262_v2, %v3261_v4  ;;  %v8820_v4 = vld [vmem:[#allocation16 + $0x1f0] sm:$0xff]  ;;  %v8822_v2 = vld [vmem:[#allocation16 + $0x1c8] sm:$0xff] }
 0x5ad   :  { %6384 = vtanh.f32 %v8810_v28 }
 0x5b0   :  { %v3405_v61 = vpop.f32.mrf.mxu0  ;;  %v3476_v26 = vpop.f32.mrf.mxu1 }
 0x5b1   :  { %v3481_v29 = vadd.f32 %v3405_v61, %v11137_v0  ;;  %v3483_v30 = vadd.f32 %v3476_v26, %v11139_v22  ;;  %v8824_v61 = vld [vmem:[#allocation16 + $0x1d8] sm:$0xff]  ;;  %v11141_v0 = vld [vmem:[#allocation170_spill] sm:$0xff]  ;;  %v8831_v26 = vld [vmem:[#allocation16 + $0x1d0] sm:$0xff] }
 0x5b2   :  { %v3407_v20 = vpop.f32.mrf.mxu0  ;;  %v3478_v6 = vpop.f32.mrf.mxu1  ;;  %11143 = vst [vmem:[#allocation80_spill] sm:$0xff] %v8831_v26  ;;  %v8849_v22 = vld [vmem:[#allocation16 + $0x198] sm:$0xff] }
 0x5b3   :  { %v3485_v58 = vmul.f32 0.5, %v3481_v29  ;;  %v3482_v15 = vadd.f32 %v3407_v20, %v11138_v31  ;;  %v3484_v29 = vadd.f32 %v3478_v6, %v11141_v0  ;;  %v8835_v20 = vld [vmem:[#allocation16 + $0x1a8] sm:$0xff]  ;;  %v8841_v31 = vld [vmem:[#allocation16 + $0x1a0] sm:$0xff]  ;;  %11149 = vst [vmem:[#allocation149_spill] sm:$0xff] %v8849_v22  ;;  %v8861_v0 = vld [vmem:[#allocation16 + $0x178] sm:$0xff] }
 0x5b4   :  { %11144 = vst [vmem:[#allocation81_spill] sm:$0xff] %v8835_v20  ;;  %11146 = vst [vmem:[#allocation83_spill] sm:$0xff] %v8841_v31  ;;  %v8859_v6 = vld [vmem:[#allocation16 + $0x168] sm:$0xff] }
 0x5b5   :  { %6386 = vtanh.f32 %v3485_v58  ;;  %v3489_v39 = vmul.f32 0.5, %v3482_v15  ;;  %v8837_v58 = vld [vmem:[#allocation16 + $0x1b8] sm:$0xff]  ;;  %v8843_v15 = vld [vmem:[#allocation16 + $0x1b0] sm:$0xff]  ;;  %11152 = vst [vmem:[#allocation154_spill] sm:$0xff] %v8859_v6  ;;  %11153 = vst [vmem:[#allocation167_spill] sm:$0xff] %v8861_v0 }
 0x5b6   :  { %11145 = vst [vmem:[#allocation82_spill] sm:$0xff] %v8837_v58  ;;  %11147 = vst [vmem:[#allocation84_spill] sm:$0xff] %v8843_v15 }
 0x5b7   :  { %6388 = vtanh.f32 %v3489_v39  ;;  %v8853_v39 = vld [vmem:[#allocation16 + $0x180] sm:$0xff] }
 0x5b8   :  { %6390 = vtanh.f32 %v3483_v30  ;;  %v3494_v30 = vmul.f32 0.5, %v3484_v29  ;;  %11150 = vst [vmem:[#allocation150_spill] sm:$0xff] %v8853_v39  ;;  %v8865_v29 = vld [vmem:[#allocation16 + $0x160] sm:$0xff] }
 0x5b9   :  { %11154 = vst [vmem:[#allocation168_spill] sm:$0xff] %v8865_v29 }
 0x5ba   :  { %v6385_v56 = vpop.eup %6384  ;;  %6392 = vtanh.f32 %v3494_v30  ;;  %v8889_v30 = vld [vmem:[#allocation16 + $0x120] sm:$0xff] }
 0x5bb   :  { %v8816_v44 = vmul.f32 %v6385_v56, %v3260_v24  ;;  %v8855_v24 = vld [vmem:[#allocation16 + $0x190] sm:$0xff]  ;;  %11159 = vst [vmem:[#allocation88_spill] sm:$0xff] %v8889_v30 }
 0x5bc   :  { %11151 = vst [vmem:[#allocation153_spill] sm:$0xff] %v8855_v24 }
 0x5bd   :  { %11140 = vst [vmem:[#allocation78_spill] sm:$0xff] %v8816_v44  ;;  %3696 = vmatmul.mubr.f32.vlgmr.msra.gmra.mxu0 %v8816_v44  ;;  %3767 = vmatmul.mubr.f32.vlgmr.msra.gmra.mxu1 %v8816_v44 }
 0x5be   :  { %3774 = vmatpush1.msra.mxu0 %v8818_v13  ;;  %3845 = vmatpush1.msra.mxu1 %v8820_v4 }
 0x5bf   :  { %3775 = vmatprep.subr.mxu0 %v8822_v2  ;;  %3846 = vmatprep.subr.mxu1 %v8824_v61 }
 0x5c0   :  { %3776 = vmatpush1.msra.mxu0 %v8829_v40  ;;  %3847 = vmatpush1.msra.mxu1 %v8831_v26 }
 0x5c1   :  { %3777 = vmatprep.subr.mxu0 %v8835_v20  ;;  %3848 = vmatprep.subr.mxu1 %v8837_v58  ;;  %v8867_v58 = vld [vmem:[#allocation16 + $0x170] sm:$0xff] }
 0x5c2   :  { %v6387_v56 = vpop.eup %6386  ;;  %3778 = vmatpush1.msra.mxu0 %v8841_v31  ;;  %3849 = vmatpush1.msra.mxu1 %v8843_v15  ;;  %11155 = vst [vmem:[#allocation164_spill] sm:$0xff] %v8867_v58  ;;  %v8871_v31 = vld [vmem:[#allocation16 + $0x148] sm:$0xff]  ;;  %v8873_v15 = vld [vmem:[#allocation16 + $0x158] sm:$0xff] }
 0x5c3   :  { %v3487_v44 = vmul.f32 0.5, %v6387_v56  ;;  %3779 = vmatprep.subr.mxu0 %v8847_v16  ;;  %3850 = vmatprep.subr.mxu1 %v8849_v22  ;;  %v8877_v56 = vld [vmem:[#allocation16 + $0x140] sm:$0xff]  ;;  %v8879_v22 = vld [vmem:[#allocation16 + $0x150] sm:$0xff] }
 0x5c4   :  { %v6389_v20 = vpop.eup %6388  ;;  %3780 = vmatpush1.msra.mxu0 %v8853_v39  ;;  %3851 = vmatpush1.msra.mxu1 %v8855_v24  ;;  %11156 = vst [vmem:[#allocation85_spill] sm:$0xff] %v8877_v56  ;;  %11157 = vst [vmem:[#allocation86_spill] sm:$0xff] %v8879_v22  ;;  %v8883_v24 = vld [vmem:[#allocation16 + $0x128] sm:$0xff]  ;;  %v8885_v39 = vld [vmem:[#allocation16 + $0x138] sm:$0xff] }
 0x5c5   :  { %v3488_v26 = vadd.f32 0.5, %v3487_v44  ;;  %v3491_v40 = vmul.f32 0.5, %v6389_v20  ;;  %3781 = vmatprep.subr.mxu0 %v8859_v6  ;;  %3852 = vmatprep.subr.mxu1 %v8861_v0  ;;  %v6391_v16 = vpop.eup %6390  ;;  %11158 = vst [vmem:[#allocation87_spill] sm:$0xff] %v8885_v39  ;;  %v8891_v0 = vld [vmem:[#allocation16 + $0x130] sm:$0xff] }
 0x5c6   :  { %3782 = vmatpush1.msra.mxu0 %v8865_v29  ;;  %3853 = vmatpush1.msra.mxu1 %v8867_v58  ;;  %11160 = vst [vmem:[#allocation89_spill] sm:$0xff] %v8891_v0  ;;  %v8895_v29 = vld [vmem:[#allocation16 + $0x108] sm:$0xff]  ;;  %v8897_v58 = vld [vmem:[#allocation16 + $0x118] sm:$0xff] }
 0x5c7   :  { %v3492_v44 = vadd.f32 0.5, %v3491_v40  ;;  %v3499_v20 = vmul.f32 %v6391_v16, %v3488_v26  ;;  %3783 = vmatprep.subr.mxu0 %v8871_v31  ;;  %3854 = vmatprep.subr.mxu1 %v8873_v15  ;;  %11161 = vst [vmem:[#allocation90_spill] sm:$0xff] %v8895_v29  ;;  %11162 = vst [vmem:[#allocation91_spill] sm:$0xff] %v8897_v58  ;;  %v8902_v40 = vld [vmem:[#allocation16 + $0x100] sm:$0xff]  ;;  %v8904_v26 = vld [vmem:[#allocation16 + $0x110] sm:$0xff] }
 0x5c8   :  { %3784 = vmatpush1.msra.mxu0 %v8877_v56  ;;  %3855 = vmatpush1.msra.mxu1 %v8879_v22  ;;  %11163 = vst [vmem:[#allocation92_spill] sm:$0xff] %v8902_v40  ;;  %11164 = vst [vmem:[#allocation93_spill] sm:$0xff] %v8904_v26  ;;  %v8908_v16 = vld [vmem:[#allocation16 + $0xe8] sm:$0xff]  ;;  %v8910_v22 = vld [vmem:[#allocation16 + $0xf8] sm:$0xff] }
 0x5c9   :  { %v3498_v6 = vmul.f32 %v3492_v44, %v8428_v25  ;;  %3785 = vmatprep.subr.mxu0 %v8883_v24  ;;  %3856 = vmatprep.subr.mxu1 %v8885_v39  ;;  %11165 = vst [vmem:[#allocation94_spill] sm:$0xff] %v8908_v16  ;;  %11166 = vst [vmem:[#allocation95_spill] sm:$0xff] %v8910_v22  ;;  %v8916_v25 = vld [vmem:[#allocation16 + $0xe0] sm:$0xff]  ;;  %v8918_v44 = vld [vmem:[#allocation16 + $0xf0] sm:$0xff] }
 0x5ca   :  { %3786 = vmatpush1.msra.mxu0 %v8889_v30  ;;  %3857 = vmatpush1.msra.mxu1 %v8891_v0  ;;  %11167 = vst [vmem:[#allocation96_spill] sm:$0xff] %v8916_v25  ;;  %11168 = vst [vmem:[#allocation97_spill] sm:$0xff] %v8918_v44  ;;  %v8922_v30 = vld [vmem:[#allocation16 + $0xc8] sm:$0xff]  ;;  %v8924_v0 = vld [vmem:[#allocation16 + $0xd8] sm:$0xff] }
 0x5cb   :  { %v8912_v56 = vadd.f32 %v3499_v20, %v3498_v6  ;;  %3787 = vmatprep.subr.mxu0 %v8895_v29  ;;  %3858 = vmatprep.subr.mxu1 %v8897_v58  ;;  %11169 = vst [vmem:[#allocation98_spill] sm:$0xff] %v8922_v30  ;;  %11170 = vst [vmem:[#allocation99_spill] sm:$0xff] %v8924_v0  ;;  %v8929_v6 = vld [vmem:[#allocation16 + $0xc0] sm:$0xff]  ;;  %v8931_v20 = vld [vmem:[#allocation16 + $0xd0] sm:$0xff] }
 0x5cc   :  { %3788 = vmatpush1.msra.mxu0 %v8902_v40  ;;  %3859 = vmatpush1.msra.mxu1 %v8904_v26  ;;  %11171 = vst [vmem:[#allocation100_spill] sm:$0xff] %v8929_v6  ;;  %11172 = vst [vmem:[#allocation101_spill] sm:$0xff] %v8931_v20  ;;  %v8935_v40 = vld [vmem:[#allocation16 + $0xa8] sm:$0xff]  ;;  %v8937_v26 = vld [vmem:[#allocation16 + $0xb8] sm:$0xff] }
 0x5cd   :  { %6394 = vtanh.f32 %v8912_v56  ;;  %3789 = vmatprep.subr.mxu0 %v8908_v16  ;;  %3860 = vmatprep.subr.mxu1 %v8910_v22  ;;  %11173 = vst [vmem:[#allocation102_spill] sm:$0xff] %v8935_v40  ;;  %11174 = vst [vmem:[#allocation103_spill] sm:$0xff] %v8937_v26  ;;  %v8941_v58 = vld [vmem:[#allocation16 + $0xa0] sm:$0xff]  ;;  %v8943_v16 = vld [vmem:[#allocation16 + $0xb0] sm:$0xff] }
 0x5ce   :  { %3790 = vmatpush1.msra.mxu0 %v8916_v25  ;;  %3861 = vmatpush1.msra.mxu1 %v8918_v44  ;;  %11175 = vst [vmem:[#allocation104_spill] sm:$0xff] %v8941_v58  ;;  %11176 = vst [vmem:[#allocation105_spill] sm:$0xff] %v8943_v16  ;;  %v8947_v22 = vld [vmem:[#allocation16 + $0x88] sm:$0xff]  ;;  %v8949_v25 = vld [vmem:[#allocation16 + $0x98] sm:$0xff] }
 0x5cf   :  { %3791 = vmatprep.subr.mxu0 %v8922_v30  ;;  %3862 = vmatprep.subr.mxu1 %v8924_v0  ;;  %11177 = vst [vmem:[#allocation106_spill] sm:$0xff] %v8947_v22  ;;  %11178 = vst [vmem:[#allocation107_spill] sm:$0xff] %v8949_v25  ;;  %v8953_v44 = vld [vmem:[#allocation16 + $0x80] sm:$0xff]  ;;  %v8955_v30 = vld [vmem:[#allocation16 + $0x90] sm:$0xff]  ;;  %v6393_v0 = vpop.eup %6392 }
 0x5d0   :  { %3792 = vmatpush1.msra.mxu0 %v8929_v6  ;;  %3863 = vmatpush1.msra.mxu1 %v8931_v20  ;;  %11179 = vst [vmem:[#allocation108_spill] sm:$0xff] %v8953_v44  ;;  %11180 = vst [vmem:[#allocation109_spill] sm:$0xff] %v8955_v30  ;;  %v8959_v6 = vld [vmem:[#allocation16 + $0x68] sm:$0xff]  ;;  %v8961_v20 = vld [vmem:[#allocation16 + $0x78] sm:$0xff] }
 0x5d1   :  { %3793 = vmatprep.subr.mxu0 %v8935_v40  ;;  %3864 = vmatprep.subr.mxu1 %v8937_v26  ;;  %11181 = vst [vmem:[#allocation110_spill] sm:$0xff] %v8959_v6  ;;  %11182 = vst [vmem:[#allocation111_spill] sm:$0xff] %v8961_v20  ;;  %v8965_v40 = vld [vmem:[#allocation16 + $0x60] sm:$0xff]  ;;  %v8967_v26 = vld [vmem:[#allocation16 + $0x70] sm:$0xff] }
 0x5d2   :  { %3794 = vmatpush1.msra.mxu0 %v8941_v58  ;;  %3865 = vmatpush1.msra.mxu1 %v8943_v16  ;;  %11183 = vst [vmem:[#allocation112_spill] sm:$0xff] %v8965_v40  ;;  %11184 = vst [vmem:[#allocation113_spill] sm:$0xff] %v8967_v26  ;;  %v8971_v29 = vld [vmem:[#allocation16 + $0x48] sm:$0xff]  ;;  %v8973_v58 = vld [vmem:[#allocation16 + $0x58] sm:$0xff]  ;;  %v3496_v16 = vmul.f32 0.5, %v6393_v0 }
 0x5d3   :  { %3795 = vmatprep.subr.mxu0 %v8947_v22  ;;  %3866 = vmatprep.subr.mxu1 %v8949_v25  ;;  %11185 = vst [vmem:[#allocation114_spill] sm:$0xff] %v8971_v29  ;;  %11186 = vst [vmem:[#allocation115_spill] sm:$0xff] %v8973_v58  ;;  %v8977_v22 = vld [vmem:[#allocation16 + $0x40] sm:$0xff]  ;;  %v8979_v25 = vld [vmem:[#allocation16 + $0x50] sm:$0xff] }
 0x5d4   :  { %3796 = vmatpush1.msra.mxu0 %v8953_v44  ;;  %3867 = vmatpush1.msra.mxu1 %v8955_v30  ;;  %11187 = vst [vmem:[#allocation116_spill] sm:$0xff] %v8979_v25  ;;  %v8983_v44 = vld [vmem:[#allocation16 + $0x28] sm:$0xff]  ;;  %v8985_v30 = vld [vmem:[#allocation16 + $0x38] sm:$0xff]  ;;  %v8989_v0 = vld [vmem:[#allocation16 + $0x20] sm:$0xff] }
 0x5d5   :  { %3797 = vmatprep.subr.mxu0 %v8959_v6  ;;  %3868 = vmatprep.subr.mxu1 %v8961_v20  ;;  %11188 = vst [vmem:[#allocation117_spill] sm:$0xff] %v8989_v0  ;;  %v8991_v6 = vld [vmem:[#allocation16 + $0x30] sm:$0xff]  ;;  %v8995_v20 = vld [vmem:[#allocation16 + $0x8] sm:$0xff] }
 0x5d6   :  { %3798 = vmatpush1.msra.mxu0 %v8965_v40  ;;  %3869 = vmatpush1.msra.mxu1 %v8967_v26  ;;  %11189 = vst [vmem:[#allocation118_spill] sm:$0xff] %v8995_v20  ;;  %v8997_v40 = vld [vmem:[#allocation16 + $0x18] sm:$0xff]  ;;  %v3497_v26 = vadd.f32 0.5, %v3496_v16  ;;  %v9005_v39 = vld [vmem:[#allocation16 + $0x10] sm:$0xff]  ;;  %v9013_v16 = vld [vmem:[#allocation14 + $0x1e8] sm:$0xff] }
 0x5d7   :  { %3799 = vmatprep.subr.mxu0 %v8971_v29  ;;  %3870 = vmatprep.subr.mxu1 %v8973_v58  ;;  %v9001_v29 = vld [vmem:[#allocation16] sm:$0xff]  ;;  %11190 = vst [vmem:[#allocation119_spill] sm:$0xff] %v9005_v39  ;;  %11191 = vst [vmem:[#allocation120_spill] sm:$0xff] %v9013_v16 }
 0x5d8   :  { %3800 = vmatpush1.msra.mxu0 %v8977_v22  ;;  %3871 = vmatpush1.msra.mxu1 %v8979_v25 }
 0x5d9   :  { %3801 = vmatprep.subr.mxu0 %v8983_v44  ;;  %3872 = vmatprep.subr.mxu1 %v8985_v30 }
 0x5da   :  { %v6395_v58 = vpop.eup %6394  ;;  %3802 = vmatpush1.msra.mxu0 %v8989_v0  ;;  %3873 = vmatpush1.msra.mxu1 %v8991_v6  ;;  %v9017_v0 = vld [vmem:[#allocation14 + $0x1e0] sm:$0xff] }
 0x5db   :  { %3803 = vmatprep.subr.mxu0 %v8995_v20  ;;  %3874 = vmatprep.subr.mxu1 %v8997_v40  ;;  %v9009_v25 = vmul.f32 %v6395_v58, %v3497_v26  ;;  %v9021_v20 = vld [vmem:[#allocation14 + $0x1c8] sm:$0xff]  ;;  %v9025_v58 = vld [vmem:[#allocation14 + $0x1c0] sm:$0xff] }
 0x5dc   :  { %3804 = vmatpush1.msra.mxu0 %v9001_v29  ;;  %3837 = vmatprep.mubr.f32.mxu0 %v10607_v3  ;;  %v9029_v26 = vld [vmem:[#allocation14 + $0x1a8] sm:$0xff] }
 0x5dd   :  { %3875 = vmatpush1.msra.mxu1 %v9005_v39  ;;  %3908 = vmatprep.mubr.f32.mxu1 %v10607_v3  ;;  %v9033_v39 = vld [vmem:[#allocation14 + $0x1a0] sm:$0xff] }
 0x5de   :  { %3838 = vmatmul.mubr.f32.vlgmr.msra.gmra.mxu0 %v9009_v25  ;;  %3909 = vmatmul.mubr.f32.vlgmr.msra.gmra.mxu1 %v9009_v25 }
 0x5df   :  { %4010 = vmatprep.subr.mxu0 %v9013_v16  ;;  %4081 = vmatprep.subr.mxu1 %v8469_v60  ;;  %v9037_v16 = vld [vmem:[#allocation14 + $0x188] sm:$0xff]  ;;  %v9041_v60 = vld [vmem:[#allocation14 + $0x180] sm:$0xff] }
 0x5e0   :  { %4011 = vmatpush1.msra.mxu0 %v9017_v0  ;;  %4082 = vmatpush1.msra.mxu1 %v8473_v59  ;;  %v9045_v59 = vld [vmem:[#allocation14 + $0x168] sm:$0xff] }
 0x5e1   :  { %4012 = vmatprep.subr.mxu0 %v9021_v20  ;;  %4083 = vmatprep.subr.mxu1 %v8477_v54  ;;  %v9049_v54 = vld [vmem:[#allocation14 + $0x160] sm:$0xff] }
 0x5e2   :  { %4013 = vmatpush1.msra.mxu0 %v9025_v58  ;;  %4084 = vmatpush1.msra.mxu1 %v8481_v41  ;;  %v9053_v41 = vld [vmem:[#allocation14 + $0x148] sm:$0xff] }
 0x5e3   :  { %4014 = vmatprep.subr.mxu0 %v9029_v26  ;;  %4085 = vmatprep.subr.mxu1 %v8485_v50  ;;  %v9057_v50 = vld [vmem:[#allocation14 + $0x140] sm:$0xff] }
 0x5e4   :  { %4015 = vmatpush1.msra.mxu0 %v9033_v39  ;;  %4086 = vmatpush1.msra.mxu1 %v8489_v27  ;;  %v9061_v27 = vld [vmem:[#allocation14 + $0x128] sm:$0xff] }
 0x5e5   :  { %4016 = vmatprep.subr.mxu0 %v9037_v16  ;;  %4087 = vmatprep.subr.mxu1 %v8493_v14  ;;  %v9065_v14 = vld [vmem:[#allocation14 + $0x120] sm:$0xff] }
 0x5e6   :  { %4017 = vmatpush1.msra.mxu0 %v9041_v60  ;;  %4088 = vmatpush1.msra.mxu1 %v8497_v52  ;;  %v9069_v52 = vld [vmem:[#allocation14 + $0x108] sm:$0xff] }
 0x5e7   :  { %4018 = vmatprep.subr.mxu0 %v9045_v59  ;;  %4089 = vmatprep.subr.mxu1 %v8501_v62  ;;  %v9073_v62 = vld [vmem:[#allocation14 + $0x100] sm:$0xff] }
 0x5e8   :  { %4019 = vmatpush1.msra.mxu0 %v9049_v54  ;;  %4090 = vmatpush1.msra.mxu1 %v8505_v36  ;;  %v9077_v36 = vld [vmem:[#allocation14 + $0xe8] sm:$0xff] }
 0x5e9   :  { %4020 = vmatprep.subr.mxu0 %v9053_v41  ;;  %4091 = vmatprep.subr.mxu1 %v8509_v57  ;;  %v9081_v57 = vld [vmem:[#allocation14 + $0xe0] sm:$0xff] }
 0x5ea   :  { %4021 = vmatpush1.msra.mxu0 %v9057_v50  ;;  %4092 = vmatpush1.msra.mxu1 %v8513_v34  ;;  %v9085_v34 = vld [vmem:[#allocation14 + $0xc8] sm:$0xff] }
 0x5eb   :  { %4022 = vmatprep.subr.mxu0 %v9061_v27  ;;  %4093 = vmatprep.subr.mxu1 %v8517_v32  ;;  %v9089_v32 = vld [vmem:[#allocation14 + $0xc0] sm:$0xff] }
 0x5ec   :  { %4023 = vmatpush1.msra.mxu0 %v9065_v14  ;;  %4094 = vmatpush1.msra.mxu1 %v8521_v33  ;;  %v9093_v33 = vld [vmem:[#allocation14 + $0xa8] sm:$0xff] }
 0x5ed   :  { %4024 = vmatprep.subr.mxu0 %v9069_v52  ;;  %4095 = vmatprep.subr.mxu1 %v8525_v42  ;;  %v9097_v42 = vld [vmem:[#allocation14 + $0xa0] sm:$0xff] }
 0x5ee   :  { %4025 = vmatpush1.msra.mxu0 %v9073_v62  ;;  %4096 = vmatpush1.msra.mxu1 %v8529_v45  ;;  %v9101_v45 = vld [vmem:[#allocation14 + $0x88] sm:$0xff] }
 0x5ef   :  { %4026 = vmatprep.subr.mxu0 %v9077_v36  ;;  %4097 = vmatprep.subr.mxu1 %v8533_v38  ;;  %v9105_v38 = vld [vmem:[#allocation14 + $0x80] sm:$0xff] }
 0x5f0   :  { %4027 = vmatpush1.msra.mxu0 %v9081_v57  ;;  %4098 = vmatpush1.msra.mxu1 %v8537_v51  ;;  %v9109_v51 = vld [vmem:[#allocation14 + $0x68] sm:$0xff] }
 0x5f1   :  { %4028 = vmatprep.subr.mxu0 %v9085_v34  ;;  %4099 = vmatprep.subr.mxu1 %v8541_v47  ;;  %v9113_v47 = vld [vmem:[#allocation14 + $0x60] sm:$0xff] }
 0x5f2   :  { %4029 = vmatpush1.msra.mxu0 %v9089_v32  ;;  %4100 = vmatpush1.msra.mxu1 %v8545_v49  ;;  %11192 = vst [vmem:[#allocation121_spill] sm:$0xff] %v9113_v47  ;;  %v9117_v49 = vld [vmem:[#allocation14 + $0x48] sm:$0xff] }
 0x5f3   :  { %4030 = vmatprep.subr.mxu0 %v9093_v33  ;;  %4101 = vmatprep.subr.mxu1 %v8549_v53  ;;  %11193 = vst [vmem:[#allocation122_spill] sm:$0xff] %v9117_v49  ;;  %v9121_v53 = vld [vmem:[#allocation14 + $0x40] sm:$0xff] }
 0x5f4   :  { %4031 = vmatpush1.msra.mxu0 %v9097_v42  ;;  %4102 = vmatpush1.msra.mxu1 %v8553_v8  ;;  %11194 = vst [vmem:[#allocation123_spill] sm:$0xff] %v9121_v53  ;;  %v9125_v8 = vld [vmem:[#allocation14 + $0x28] sm:$0xff] }
 0x5f5   :  { %4032 = vmatprep.subr.mxu0 %v9101_v45  ;;  %4103 = vmatprep.subr.mxu1 %v8557_v5  ;;  %11195 = vst [vmem:[#allocation124_spill] sm:$0xff] %v9125_v8  ;;  %v9129_v5 = vld [vmem:[#allocation14 + $0x20] sm:$0xff] }
 0x5f6   :  { %4033 = vmatpush1.msra.mxu0 %v9105_v38  ;;  %4104 = vmatpush1.msra.mxu1 %v8561_v7  ;;  %11196 = vst [vmem:[#allocation125_spill] sm:$0xff] %v9129_v5  ;;  %v9133_v7 = vld [vmem:[#allocation14 + $0x8] sm:$0xff] }
 0x5f7   :  { %4034 = vmatprep.subr.mxu0 %v9109_v51  ;;  %4105 = vmatprep.subr.mxu1 %v8565_v46  ;;  %11197 = vst [vmem:[#allocation126_spill] sm:$0xff] %v9133_v7  ;;  %v9137_v46 = vld [vmem:[#allocation14] sm:$0xff] }
 0x5f8   :  { %4035 = vmatpush1.msra.mxu0 %v9113_v47  ;;  %4106 = vmatpush1.msra.mxu1 %v8569_v48  ;;  %11198 = vst [vmem:[#allocation127_spill] sm:$0xff] %v9137_v46  ;;  %v11199_v48 = vld [vmem:[#allocation142_spill] sm:$0xff] }
 0x5f9   :  { %4036 = vmatprep.subr.mxu0 %v9117_v49  ;;  %4107 = vmatprep.subr.mxu1 %v8573_v1  ;;  %v11200_v1 = vld [vmem:[#allocation143_spill] sm:$0xff] }
 0x5fa   :  { %4037 = vmatpush1.msra.mxu0 %v9121_v53  ;;  %4108 = vmatpush1.msra.mxu1 %v8577_v9  ;;  %v11201_v9 = vld [vmem:[#allocation144_spill] sm:$0xff] }
 0x5fb   :  { %4038 = vmatprep.subr.mxu0 %v9125_v8  ;;  %4109 = vmatprep.subr.mxu1 %v8581_v10  ;;  %v11202_v10 = vld [vmem:[#allocation145_spill] sm:$0xff] }
 0x5fc   :  { %4039 = vmatpush1.msra.mxu0 %v9129_v5  ;;  %4110 = vmatpush1.msra.mxu1 %v8585_v11  ;;  %v11203_v11 = vld [vmem:[#allocation146_spill] sm:$0xff] }
 0x5fd   :  { %4040 = vmatprep.subr.mxu0 %v9133_v7  ;;  %4111 = vmatprep.subr.mxu1 %v8589_v12  ;;  %v11204_v12 = vld [vmem:[#allocation147_spill] sm:$0xff] }
 0x5fe   :  { %4041 = vmatpush1.msra.mxu0 %v9137_v46  ;;  %4074 = vmatprep.mubr.f32.mxu0 %v10607_v3 }
 0x5ff   :  { %4112 = vmatpush1.msra.mxu1 %v8595_v21  ;;  %4145 = vmatprep.mubr.f32.mxu1 %v10607_v3  ;;  %v11205_v21 = vld [vmem:[#allocation151_spill] sm:$0xff] }
 0x600   :  { %4075 = vmatmul.mubr.f32.vlgmr.msra.gmra.mxu0 %v9009_v25  ;;  %4146 = vmatmul.mubr.f32.vlgmr.msra.gmra.mxu1 %v9009_v25  ;;  %v11211_v25 = vld [vmem:[#allocation29_spill] sm:$0xff] }
 0x601   :  { %4302 = vmatprep.subr.mxu0 %v8607_v23  ;;  %4373 = vmatprep.subr.mxu1 %v8609_v18  ;;  %v11206_v23 = vld [vmem:[#allocation152_spill] sm:$0xff]  ;;  %v11207_v18 = vld [vmem:[#allocation165_spill] sm:$0xff] }
 0x602   :  { %4303 = vmatpush1.msra.mxu0 %v8613_v17  ;;  %4374 = vmatpush1.msra.mxu1 %v8615_v19  ;;  %v11208_v17 = vld [vmem:[#allocation166_spill] sm:$0xff]  ;;  %v11209_v19 = vld [vmem:[#allocation27_spill] sm:$0xff] }
 0x603   :  { %4304 = vmatprep.subr.mxu0 %v8619_v37  ;;  %4375 = vmatprep.subr.mxu1 %v11199_v48  ;;  %v11210_v37 = vld [vmem:[#allocation28_spill] sm:$0xff]  ;;  %v11212_v48 = vld [vmem:[#allocation30_spill] sm:$0xff] }
 0x604   :  { %4305 = vmatpush1.msra.mxu0 %v11200_v1  ;;  %4376 = vmatpush1.msra.mxu1 %v11201_v9  ;;  %v11213_v1 = vld [vmem:[#allocation31_spill] sm:$0xff]  ;;  %v11214_v9 = vld [vmem:[#allocation32_spill] sm:$0xff] }
 0x605   :  { %4306 = vmatprep.subr.mxu0 %v11202_v10  ;;  %4377 = vmatprep.subr.mxu1 %v11203_v11  ;;  %v11215_v10 = vld [vmem:[#allocation33_spill] sm:$0xff]  ;;  %v11216_v11 = vld [vmem:[#allocation34_spill] sm:$0xff] }
 0x606   :  { %4307 = vmatpush1.msra.mxu0 %v11204_v12  ;;  %4378 = vmatpush1.msra.mxu1 %v11205_v21  ;;  %v11217_v12 = vld [vmem:[#allocation35_spill] sm:$0xff]  ;;  %v11218_v21 = vld [vmem:[#allocation36_spill] sm:$0xff] }
 0x607   :  { %4308 = vmatprep.subr.mxu0 %v11206_v23  ;;  %4379 = vmatprep.subr.mxu1 %v11207_v18  ;;  %v11219_v23 = vld [vmem:[#allocation37_spill] sm:$0xff]  ;;  %v11220_v18 = vld [vmem:[#allocation38_spill] sm:$0xff] }
 0x608   :  { %4309 = vmatpush1.msra.mxu0 %v11208_v17  ;;  %4380 = vmatpush1.msra.mxu1 %v11209_v19  ;;  %v11221_v17 = vld [vmem:[#allocation39_spill] sm:$0xff]  ;;  %v11222_v19 = vld [vmem:[#allocation40_spill] sm:$0xff] }
 0x609   :  { %4310 = vmatprep.subr.mxu0 %v11210_v37  ;;  %4381 = vmatprep.subr.mxu1 %v11211_v25  ;;  %v11223_v37 = vld [vmem:[#allocation41_spill] sm:$0xff]  ;;  %v11224_v25 = vld [vmem:[#allocation42_spill] sm:$0xff] }
 0x60a   :  { %4311 = vmatpush1.msra.mxu0 %v11212_v48  ;;  %4382 = vmatpush1.msra.mxu1 %v11213_v1  ;;  %v11225_v48 = vld [vmem:[#allocation43_spill] sm:$0xff]  ;;  %v11226_v1 = vld [vmem:[#allocation44_spill] sm:$0xff] }
 0x60b   :  { %4312 = vmatprep.subr.mxu0 %v11214_v9  ;;  %4383 = vmatprep.subr.mxu1 %v11215_v10  ;;  %v11227_v9 = vld [vmem:[#allocation45_spill] sm:$0xff]  ;;  %v11228_v10 = vld [vmem:[#allocation46_spill] sm:$0xff] }
 0x60c   :  { %4313 = vmatpush1.msra.mxu0 %v11216_v11  ;;  %4384 = vmatpush1.msra.mxu1 %v11217_v12  ;;  %v11229_v11 = vld [vmem:[#allocation47_spill] sm:$0xff]  ;;  %v11230_v12 = vld [vmem:[#allocation48_spill] sm:$0xff] }
 0x60d   :  { %4314 = vmatprep.subr.mxu0 %v11218_v21  ;;  %4385 = vmatprep.subr.mxu1 %v11219_v23  ;;  %v11231_v21 = vld [vmem:[#allocation49_spill] sm:$0xff]  ;;  %v11232_v23 = vld [vmem:[#allocation50_spill] sm:$0xff] }
 0x60e   :  { %4315 = vmatpush1.msra.mxu0 %v11220_v18  ;;  %4386 = vmatpush1.msra.mxu1 %v11221_v17  ;;  %v11233_v18 = vld [vmem:[#allocation51_spill] sm:$0xff]  ;;  %v11234_v17 = vld [vmem:[#allocation52_spill] sm:$0xff] }
 0x60f   :  { %4316 = vmatprep.subr.mxu0 %v11222_v19  ;;  %4387 = vmatprep.subr.mxu1 %v11223_v37  ;;  %v11235_v19 = vld [vmem:[#allocation53_spill] sm:$0xff]  ;;  %v11236_v37 = vld [vmem:[#allocation54_spill] sm:$0xff] }
 0x610   :  { %4317 = vmatpush1.msra.mxu0 %v11224_v25  ;;  %4388 = vmatpush1.msra.mxu1 %v11225_v48  ;;  %v11237_v25 = vld [vmem:[#allocation55_spill] sm:$0xff]  ;;  %v11238_v48 = vld [vmem:[#allocation56_spill] sm:$0xff] }
 0x611   :  { %4318 = vmatprep.subr.mxu0 %v11226_v1  ;;  %4389 = vmatprep.subr.mxu1 %v11227_v9  ;;  %v11239_v1 = vld [vmem:[#allocation57_spill] sm:$0xff]  ;;  %v11240_v9 = vld [vmem:[#allocation58_spill] sm:$0xff] }
 0x612   :  { %4319 = vmatpush1.msra.mxu0 %v11228_v10  ;;  %4390 = vmatpush1.msra.mxu1 %v11229_v11  ;;  %v11241_v10 = vld [vmem:[#allocation59_spill] sm:$0xff]  ;;  %v11242_v11 = vld [vmem:[#allocation60_spill] sm:$0xff] }
 0x613   :  { %4320 = vmatprep.subr.mxu0 %v11230_v12  ;;  %4391 = vmatprep.subr.mxu1 %v11231_v21  ;;  %v11243_v12 = vld [vmem:[#allocation61_spill] sm:$0xff]  ;;  %v11244_v21 = vld [vmem:[#allocation62_spill] sm:$0xff] }
 0x614   :  { %4321 = vmatpush1.msra.mxu0 %v11232_v23  ;;  %4392 = vmatpush1.msra.mxu1 %v11233_v18  ;;  %v11245_v23 = vld [vmem:[#allocation63_spill] sm:$0xff]  ;;  %v11246_v18 = vld [vmem:[#allocation64_spill] sm:$0xff] }
 0x615   :  { %4322 = vmatprep.subr.mxu0 %v11234_v17  ;;  %4393 = vmatprep.subr.mxu1 %v11235_v19  ;;  %v11247_v17 = vld [vmem:[#allocation65_spill] sm:$0xff]  ;;  %v11248_v19 = vld [vmem:[#allocation66_spill] sm:$0xff] }
 0x616   :  { %4323 = vmatpush1.msra.mxu0 %v11236_v37  ;;  %4394 = vmatpush1.msra.mxu1 %v11237_v25  ;;  %v11249_v37 = vld [vmem:[#allocation67_spill] sm:$0xff]  ;;  %v11250_v25 = vld [vmem:[#allocation68_spill] sm:$0xff] }
 0x617   :  { %4324 = vmatprep.subr.mxu0 %v11238_v48  ;;  %4395 = vmatprep.subr.mxu1 %v11239_v1  ;;  %v11251_v48 = vld [vmem:[#allocation69_spill] sm:$0xff]  ;;  %v11252_v1 = vld [vmem:[#allocation70_spill] sm:$0xff] }
 0x618   :  { %4325 = vmatpush1.msra.mxu0 %v11240_v9  ;;  %4396 = vmatpush1.msra.mxu1 %v11241_v10  ;;  %v11253_v9 = vld [vmem:[#allocation71_spill] sm:$0xff]  ;;  %v11254_v10 = vld [vmem:[#allocation72_spill] sm:$0xff] }
 0x619   :  { %4326 = vmatprep.subr.mxu0 %v11242_v11  ;;  %4397 = vmatprep.subr.mxu1 %v11243_v12  ;;  %v11255_v11 = vld [vmem:[#allocation73_spill] sm:$0xff]  ;;  %v11256_v12 = vld [vmem:[#allocation74_spill] sm:$0xff] }
 0x61a   :  { %4327 = vmatpush1.msra.mxu0 %v11244_v21  ;;  %4398 = vmatpush1.msra.mxu1 %v11245_v23  ;;  %v11257_v21 = vld [vmem:[#allocation75_spill] sm:$0xff]  ;;  %v11258_v23 = vld [vmem:[#allocation76_spill] sm:$0xff] }
 0x61b   :  { %4328 = vmatprep.subr.mxu0 %v11246_v18  ;;  %4399 = vmatprep.subr.mxu1 %v11247_v17  ;;  %v11259_v18 = vld [vmem:[#allocation77_spill] sm:$0xff] }
 0x61c   :  { %4329 = vmatpush1.msra.mxu0 %v11248_v19  ;;  %4400 = vmatpush1.msra.mxu1 %v11249_v37 }
 0x61d   :  { %4330 = vmatprep.subr.mxu0 %v11250_v25  ;;  %4401 = vmatprep.subr.mxu1 %v11251_v48 }
 0x61e   :  { %4331 = vmatpush1.msra.mxu0 %v11252_v1  ;;  %4402 = vmatpush1.msra.mxu1 %v11253_v9 }
 0x61f   :  { %4332 = vmatprep.subr.mxu0 %v11254_v10  ;;  %4403 = vmatprep.subr.mxu1 %v11255_v11 }
 0x620   :  { %4333 = vmatpush1.msra.mxu0 %v11256_v12  ;;  %4404 = vmatpush1.msra.mxu1 %v11257_v21 }
 0x621   :  { %4366 = vmatprep.mubr.f32.mxu0 %v10607_v3  ;;  %4437 = vmatprep.mubr.f32.mxu1 %v10607_v3 }
 0x622   :  { %4444 = vmatprep.subr.mxu0 %v11258_v23  ;;  %4515 = vmatprep.subr.mxu1 %v11259_v18 }
 0x67d   :  { %v3697_v17 = vpop.f32.mrf.mxu0  ;;  %v3768_v19 = vpop.f32.mrf.mxu1 }
 0x67f   :  { %v3699_v37 = vpop.f32.mrf.mxu0  ;;  %v3770_v25 = vpop.f32.mrf.mxu1 }
 0x69e   :  { %v3839_v48 = vpop.f32.mrf.mxu0  ;;  %v3910_v9 = vpop.f32.mrf.mxu1 }
 0x69f   :  { %v3840_v1 = vadd.f32 %v3839_v48, %v3697_v17  ;;  %v3911_v46 = vadd.f32 %v3910_v9, %v3768_v19 }
 0x6a0   :  { %v3841_v10 = vpop.f32.mrf.mxu0  ;;  %v3912_v23 = vpop.f32.mrf.mxu1 }
 0x6a1   :  { %v3915_v11 = vadd.f32 %v3840_v1, %v7540_v43  ;;  %v3842_v12 = vadd.f32 %v3841_v10, %v3699_v37  ;;  %v3917_v18 = vadd.f32 %v3911_v46, %v7549_v55  ;;  %v3913_v8 = vadd.f32 %v3912_v23, %v3770_v25  ;;  %v11260_v46 = vld [vmem:[#allocation157_spill] sm:$0xff]  ;;  %v11261_v23 = vld [vmem:[#allocation158_spill] sm:$0xff] }
 0x6a3   :  { %v3919_v21 = vmul.f32 0.5, %v3915_v11  ;;  %v3916_v7 = vadd.f32 %v3842_v12, %v7544_v63  ;;  %v3918_v53 = vadd.f32 %v3913_v8, %v7555_v35 }
 0x6a5   :  { %6396 = vtanh.f32 %v3919_v21  ;;  %v3923_v5 = vmul.f32 0.5, %v3916_v7  ;;  %v3928_v17 = vmul.f32 0.5, %v3918_v53 }
 0x6a7   :  { %6398 = vtanh.f32 %v3923_v5 }
 0x6a8   :  { %6400 = vtanh.f32 %v3917_v18  ;;  %v11262_v18 = vld [vmem:[#allocation171_spill] sm:$0xff] }
 0x6a9   :  { %6402 = vtanh.f32 %v3928_v17 }
 0x6b2   :  { %v6397_v48 = vpop.eup %6396 }
 0x6b3   :  { %v3921_v49 = vmul.f32 0.5, %v6397_v48 }
 0x6b4   :  { %v6399_v47 = vpop.eup %6398 }
 0x6b5   :  { %v3922_v1 = vadd.f32 0.5, %v3921_v49  ;;  %v3925_v37 = vmul.f32 0.5, %v6399_v47  ;;  %v6401_v9 = vpop.eup %6400 }
 0x6b6   :  { %v6403_v8 = vpop.eup %6402 }
 0x6b7   :  { %v3926_v19 = vadd.f32 0.5, %v3925_v37  ;;  %v3933_v7 = vmul.f32 %v6401_v9, %v3922_v1  ;;  %v3930_v47 = vmul.f32 0.5, %v6403_v8  ;;  %v11264_v9 = vld [vmem:[#allocation172_spill] sm:$0xff]  ;;  %v11268_v8 = vld [vmem:[#allocation82_spill] sm:$0xff] }
 0x6b9   :  { %v3932_v10 = vmul.f32 %v3926_v19, %v8810_v28  ;;  %v3931_v28 = vadd.f32 0.5, %v3930_v47 }
 0x6bb   :  { %v9222_v11 = vadd.f32 %v3933_v7, %v3932_v10  ;;  %v11265_v7 = vld [vmem:[#allocation79_spill] sm:$0xff] }
 0x6bd   :  { %6404 = vtanh.f32 %v9222_v11 }
 0x6c0   :  { %v4076_v5 = vpop.f32.mrf.mxu0  ;;  %v4147_v53 = vpop.f32.mrf.mxu1 }
 0x6c1   :  { %v4152_v25 = vadd.f32 %v4076_v5, %v11260_v46  ;;  %v4154_v17 = vadd.f32 %v4147_v53, %v11262_v18  ;;  %v11266_v5 = vld [vmem:[#allocation80_spill] sm:$0xff] }
 0x6c2   :  { %v4078_v12 = vpop.f32.mrf.mxu0  ;;  %v4149_v37 = vpop.f32.mrf.mxu1 }
 0x6c3   :  { %v4156_v21 = vmul.f32 0.5, %v4152_v25  ;;  %v4153_v49 = vadd.f32 %v4078_v12, %v11261_v23  ;;  %v4155_v10 = vadd.f32 %v4149_v37, %v11264_v9  ;;  %v11267_v25 = vld [vmem:[#allocation81_spill] sm:$0xff]  ;;  %v11269_v12 = vld [vmem:[#allocation83_spill] sm:$0xff]  ;;  %v11273_v23 = vld [vmem:[#allocation150_spill] sm:$0xff] }
 0x6c4   :  { %v11278_v37 = vld [vmem:[#allocation164_spill] sm:$0xff] }
 0x6c5   :  { %6406 = vtanh.f32 %v4156_v21  ;;  %v4160_v48 = vmul.f32 0.5, %v4153_v49  ;;  %v4165_v46 = vmul.f32 0.5, %v4155_v10  ;;  %v11270_v21 = vld [vmem:[#allocation84_spill] sm:$0xff]  ;;  %v11274_v49 = vld [vmem:[#allocation153_spill] sm:$0xff] }
 0x6c7   :  { %6408 = vtanh.f32 %v4160_v48  ;;  %v11276_v48 = vld [vmem:[#allocation167_spill] sm:$0xff] }
 0x6c8   :  { %6410 = vtanh.f32 %v4154_v17  ;;  %v11275_v17 = vld [vmem:[#allocation154_spill] sm:$0xff] }
 0x6c9   :  { %6412 = vtanh.f32 %v4165_v46 }
 0x6ca   :  { %v6405_v1 = vpop.eup %6404 }
 0x6cb   :  { %v9228_v19 = vmul.f32 %v6405_v1, %v3931_v28  ;;  %v11277_v1 = vld [vmem:[#allocation168_spill] sm:$0xff] }
 0x6cd   :  { %11263 = vst [vmem:[#allocation128_spill] sm:$0xff] %v9228_v19  ;;  %4367 = vmatmul.mubr.f32.vlgmr.msra.gmra.mxu0 %v9228_v19  ;;  %4438 = vmatmul.mubr.f32.vlgmr.msra.gmra.mxu1 %v9228_v19  ;;  %v9511_v19 = vld [vmem:[#allocation17 + $0x128] sm:$0xff] }
 0x6ce   :  { %4445 = vmatpush1.msra.mxu0 %v8818_v13  ;;  %4516 = vmatpush1.msra.mxu1 %v8820_v4  ;;  %v11271_v4 = vld [vmem:[#allocation148_spill] sm:$0xff]  ;;  %11341 = vst [vmem:[#allocation145_spill] sm:$0xff] %v9511_v19 }
 0x6cf   :  { %4446 = vmatprep.subr.mxu0 %v8822_v2  ;;  %4517 = vmatprep.subr.mxu1 %v8824_v61  ;;  %v11272_v2 = vld [vmem:[#allocation149_spill] sm:$0xff] }
 0x6d0   :  { %4447 = vmatpush1.msra.mxu0 %v11265_v7  ;;  %4518 = vmatpush1.msra.mxu1 %v11266_v5  ;;  %v11279_v7 = vld [vmem:[#allocation85_spill] sm:$0xff]  ;;  %v11280_v5 = vld [vmem:[#allocation86_spill] sm:$0xff] }
 0x6d1   :  { %4448 = vmatprep.subr.mxu0 %v11267_v25  ;;  %4519 = vmatprep.subr.mxu1 %v11268_v8  ;;  %v11281_v25 = vld [vmem:[#allocation87_spill] sm:$0xff]  ;;  %v11282_v8 = vld [vmem:[#allocation88_spill] sm:$0xff] }
 0x6d2   :  { %v6407_v53 = vpop.eup %6406  ;;  %4449 = vmatpush1.msra.mxu0 %v11269_v12  ;;  %4520 = vmatpush1.msra.mxu1 %v11270_v21  ;;  %v11284_v21 = vld [vmem:[#allocation90_spill] sm:$0xff] }
 0x6d3   :  { %v4158_v13 = vmul.f32 0.5, %v6407_v53  ;;  %4450 = vmatprep.subr.mxu0 %v11271_v4  ;;  %4521 = vmatprep.subr.mxu1 %v11272_v2  ;;  %v11283_v53 = vld [vmem:[#allocation89_spill] sm:$0xff]  ;;  %v11290_v4 = vld [vmem:[#allocation96_spill] sm:$0xff] }
 0x6d4   :  { %v6409_v61 = vpop.eup %6408  ;;  %4451 = vmatpush1.msra.mxu0 %v11273_v23  ;;  %4522 = vmatpush1.msra.mxu1 %v11274_v49  ;;  %v11291_v2 = vld [vmem:[#allocation97_spill] sm:$0xff]  ;;  %v11293_v23 = vld [vmem:[#allocation99_spill] sm:$0xff]  ;;  %v11294_v49 = vld [vmem:[#allocation100_spill] sm:$0xff] }
 0x6d5   :  { %v4159_v47 = vadd.f32 0.5, %v4158_v13  ;;  %v4162_v18 = vmul.f32 0.5, %v6409_v61  ;;  %4452 = vmatprep.subr.mxu0 %v11275_v17  ;;  %4523 = vmatprep.subr.mxu1 %v11276_v48  ;;  %v6411_v28 = vpop.eup %6410  ;;  %v11287_v13 = vld [vmem:[#allocation93_spill] sm:$0xff]  ;;  %v11292_v61 = vld [vmem:[#allocation98_spill] sm:$0xff]  ;;  %v11297_v17 = vld [vmem:[#allocation103_spill] sm:$0xff] }
 0x6d6   :  { %4453 = vmatpush1.msra.mxu0 %v11277_v1  ;;  %4524 = vmatpush1.msra.mxu1 %v11278_v37  ;;  %v6413_v48 = vpop.eup %6412  ;;  %v11299_v1 = vld [vmem:[#allocation105_spill] sm:$0xff]  ;;  %v11300_v37 = vld [vmem:[#allocation106_spill] sm:$0xff] }
 0x6d7   :  { %v4163_v9 = vadd.f32 0.5, %v4162_v18  ;;  %v4170_v10 = vmul.f32 %v6411_v28, %v4159_v47  ;;  %4454 = vmatprep.subr.mxu0 %v8871_v31  ;;  %4525 = vmatprep.subr.mxu1 %v8873_v15  ;;  %v11285_v31 = vld [vmem:[#allocation91_spill] sm:$0xff]  ;;  %v11286_v15 = vld [vmem:[#allocation92_spill] sm:$0xff]  ;;  %v11295_v47 = vld [vmem:[#allocation101_spill] sm:$0xff] }
 0x6d8   :  { %4455 = vmatpush1.msra.mxu0 %v11279_v7  ;;  %4526 = vmatpush1.msra.mxu1 %v11280_v5  ;;  %v11296_v18 = vld [vmem:[#allocation102_spill] sm:$0xff]  ;;  %v11298_v28 = vld [vmem:[#allocation104_spill] sm:$0xff]  ;;  %v11303_v7 = vld [vmem:[#allocation109_spill] sm:$0xff]  ;;  %v4167_v5 = vmul.f32 0.5, %v6413_v48 }
 0x6d9   :  { %v4169_v46 = vmul.f32 %v4163_v9, %v8912_v56  ;;  %4456 = vmatprep.subr.mxu0 %v8883_v24  ;;  %4527 = vmatprep.subr.mxu1 %v11281_v25  ;;  %v11288_v56 = vld [vmem:[#allocation94_spill] sm:$0xff]  ;;  %v11289_v24 = vld [vmem:[#allocation95_spill] sm:$0xff]  ;;  %v11318_v48 = vld [vmem:[#allocation124_spill] sm:$0xff] }
 0x6da   :  { %4457 = vmatpush1.msra.mxu0 %v11282_v8  ;;  %4528 = vmatpush1.msra.mxu1 %v11283_v53  ;;  %v11301_v9 = vld [vmem:[#allocation107_spill] sm:$0xff]  ;;  %v11306_v8 = vld [vmem:[#allocation112_spill] sm:$0xff]  ;;  %v11307_v53 = vld [vmem:[#allocation113_spill] sm:$0xff] }
 0x6db   :  { %v9260_v12 = vadd.f32 %v4170_v10, %v4169_v46  ;;  %4458 = vmatprep.subr.mxu0 %v11284_v21  ;;  %4529 = vmatprep.subr.mxu1 %v11285_v31  ;;  %v11302_v10 = vld [vmem:[#allocation108_spill] sm:$0xff]  ;;  %v11304_v46 = vld [vmem:[#allocation110_spill] sm:$0xff]  ;;  %v11305_v25 = vld [vmem:[#allocation111_spill] sm:$0xff] }
 0x6dc   :  { %4459 = vmatpush1.msra.mxu0 %v11286_v15  ;;  %4530 = vmatpush1.msra.mxu1 %v11287_v13  ;;  %v11308_v21 = vld [vmem:[#allocation114_spill] sm:$0xff]  ;;  %v11309_v31 = vld [vmem:[#allocation115_spill] sm:$0xff]  ;;  %v11310_v15 = vld [vmem:[#allocation116_spill] sm:$0xff]  ;;  %v4168_v13 = vadd.f32 0.5, %v4167_v5 }
 0x6dd   :  { %6414 = vtanh.f32 %v9260_v12  ;;  %4460 = vmatprep.subr.mxu0 %v11288_v56  ;;  %4531 = vmatprep.subr.mxu1 %v11289_v24  ;;  %v11311_v24 = vld [vmem:[#allocation117_spill] sm:$0xff]  ;;  %v9445_v5 = vld [vmem:[#allocation17 + $0x1e0] sm:$0xff] }
 0x6de   :  { %4461 = vmatpush1.msra.mxu0 %v11290_v4  ;;  %4532 = vmatpush1.msra.mxu1 %v11291_v2  ;;  %v11312_v4 = vld [vmem:[#allocation118_spill] sm:$0xff] }
 0x6df   :  { %4462 = vmatprep.subr.mxu0 %v11292_v61  ;;  %4533 = vmatprep.subr.mxu1 %v11293_v23  ;;  %v9317_v61 = vld [vmem:[#allocation14 + $0x1b8] sm:$0xff]  ;;  %v9321_v23 = vld [vmem:[#allocation14 + $0x1b0] sm:$0xff] }
 0x6e0   :  { %4463 = vmatpush1.msra.mxu0 %v11294_v49  ;;  %4534 = vmatpush1.msra.mxu1 %v11295_v47  ;;  %v9325_v49 = vld [vmem:[#allocation14 + $0x198] sm:$0xff] }
 0x6e1   :  { %4464 = vmatprep.subr.mxu0 %v11296_v18  ;;  %4535 = vmatprep.subr.mxu1 %v11297_v17  ;;  %v11315_v47 = vld [vmem:[#allocation121_spill] sm:$0xff]  ;;  %v11316_v18 = vld [vmem:[#allocation122_spill] sm:$0xff]  ;;  %v11317_v17 = vld [vmem:[#allocation123_spill] sm:$0xff] }
 0x6e2   :  { %4465 = vmatpush1.msra.mxu0 %v11298_v28  ;;  %4536 = vmatpush1.msra.mxu1 %v11299_v1  ;;  %v11319_v28 = vld [vmem:[#allocation125_spill] sm:$0xff]  ;;  %v9427_v1 = vld [vmem:[#allocation14 + $0x10] sm:$0xff] }
 0x6e3   :  { %4466 = vmatprep.subr.mxu0 %v11300_v37  ;;  %4537 = vmatprep.subr.mxu1 %v11301_v9  ;;  %v11320_v37 = vld [vmem:[#allocation126_spill] sm:$0xff]  ;;  %v11321_v9 = vld [vmem:[#allocation127_spill] sm:$0xff] }
 0x6e4   :  { %4467 = vmatpush1.msra.mxu0 %v11302_v10  ;;  %4538 = vmatpush1.msra.mxu1 %v11303_v7  ;;  %v9439_v10 = vld [vmem:[#allocation17 + $0x1e8] sm:$0xff]  ;;  %v9441_v7 = vld [vmem:[#allocation17 + $0x1f8] sm:$0xff] }
 0x6e5   :  { %4468 = vmatprep.subr.mxu0 %v11304_v46  ;;  %4539 = vmatprep.subr.mxu1 %v11305_v25  ;;  %v9447_v46 = vld [vmem:[#allocation17 + $0x1f0] sm:$0xff]  ;;  %v9451_v25 = vld [vmem:[#allocation17 + $0x1c8] sm:$0xff] }
 0x6e6   :  { %4469 = vmatpush1.msra.mxu0 %v11306_v8  ;;  %4540 = vmatpush1.msra.mxu1 %v11307_v53  ;;  %v9453_v8 = vld [vmem:[#allocation17 + $0x1d8] sm:$0xff]  ;;  %v9457_v53 = vld [vmem:[#allocation17 + $0x1c0] sm:$0xff] }
 0x6e7   :  { %4470 = vmatprep.subr.mxu0 %v11308_v21  ;;  %4541 = vmatprep.subr.mxu1 %v11309_v31  ;;  %11322 = vst [vmem:[#allocation129_spill] sm:$0xff] %v9453_v8  ;;  %11323 = vst [vmem:[#allocation130_spill] sm:$0xff] %v9457_v53  ;;  %v9459_v21 = vld [vmem:[#allocation17 + $0x1d0] sm:$0xff]  ;;  %v9463_v31 = vld [vmem:[#allocation17 + $0x1a8] sm:$0xff] }
 0x6e8   :  { %4471 = vmatpush1.msra.mxu0 %v8977_v22  ;;  %4542 = vmatpush1.msra.mxu1 %v11310_v15  ;;  %v9301_v22 = vld [vmem:[#allocation14 + $0x1f8] sm:$0xff]  ;;  %11324 = vst [vmem:[#allocation131_spill] sm:$0xff] %v9459_v21  ;;  %11325 = vst [vmem:[#allocation132_spill] sm:$0xff] %v9463_v31 }
 0x6e9   :  { %4472 = vmatprep.subr.mxu0 %v8983_v44  ;;  %4543 = vmatprep.subr.mxu1 %v8985_v30  ;;  %v11313_v44 = vld [vmem:[#allocation119_spill] sm:$0xff]  ;;  %v9305_v30 = vld [vmem:[#allocation14 + $0x1f0] sm:$0xff]  ;;  %v9465_v15 = vld [vmem:[#allocation17 + $0x1b8] sm:$0xff] }
 0x6ea   :  { %v6415_v56 = vpop.eup %6414  ;;  %4473 = vmatpush1.msra.mxu0 %v11311_v24  ;;  %4544 = vmatpush1.msra.mxu1 %v8991_v6  ;;  %v9309_v6 = vld [vmem:[#allocation14 + $0x1d8] sm:$0xff]  ;;  %11326 = vst [vmem:[#allocation133_spill] sm:$0xff] %v9465_v15  ;;  %v9475_v24 = vld [vmem:[#allocation17 + $0x188] sm:$0xff] }
 0x6eb   :  { %4474 = vmatprep.subr.mxu0 %v11312_v4  ;;  %4545 = vmatprep.subr.mxu1 %v8997_v40  ;;  %v9297_v2 = vmul.f32 %v6415_v56, %v4168_v13  ;;  %v11314_v40 = vld [vmem:[#allocation120_spill] sm:$0xff]  ;;  %v9469_v13 = vld [vmem:[#allocation17 + $0x1a0] sm:$0xff]  ;;  %11329 = vst [vmem:[#allocation136_spill] sm:$0xff] %v9475_v24  ;;  %v9477_v4 = vld [vmem:[#allocation17 + $0x198] sm:$0xff] }
 0x6ec   :  { %4475 = vmatpush1.msra.mxu0 %v9001_v29  ;;  %4508 = vmatprep.mubr.f32.mxu0 %v10607_v3  ;;  %v9313_v29 = vld [vmem:[#allocation14 + $0x1d0] sm:$0xff]  ;;  %11327 = vst [vmem:[#allocation134_spill] sm:$0xff] %v9469_v13  ;;  %11330 = vst [vmem:[#allocation137_spill] sm:$0xff] %v9477_v4 }
 0x6ed   :  { %4546 = vmatpush1.msra.mxu1 %v11313_v44  ;;  %4579 = vmatprep.mubr.f32.mxu1 %v10607_v3  ;;  %v9471_v56 = vld [vmem:[#allocation17 + $0x1b0] sm:$0xff] }
 0x6ee   :  { %4509 = vmatmul.mubr.f32.vlgmr.msra.gmra.mxu0 %v9297_v2  ;;  %4580 = vmatmul.mubr.f32.vlgmr.msra.gmra.mxu1 %v9297_v2  ;;  %11328 = vst [vmem:[#allocation135_spill] sm:$0xff] %v9471_v56  ;;  %v9483_v44 = vld [vmem:[#allocation17 + $0x190] sm:$0xff] }
 0x6ef   :  { %4681 = vmatprep.subr.mxu0 %v11314_v40  ;;  %4752 = vmatprep.subr.mxu1 %v9301_v22  ;;  %11332 = vst [vmem:[#allocation139_spill] sm:$0xff] %v9483_v44  ;;  %v9487_v40 = vld [vmem:[#allocation17 + $0x168] sm:$0xff] }
 0x6f0   :  { %4682 = vmatpush1.msra.mxu0 %v9017_v0  ;;  %4753 = vmatpush1.msra.mxu1 %v9305_v30  ;;  %v9329_v0 = vld [vmem:[#allocation14 + $0x190] sm:$0xff]  ;;  %11333 = vst [vmem:[#allocation140_spill] sm:$0xff] %v9487_v40 }
 0x6f1   :  { %4683 = vmatprep.subr.mxu0 %v9021_v20  ;;  %4754 = vmatprep.subr.mxu1 %v9309_v6  ;;  %v9333_v20 = vld [vmem:[#allocation14 + $0x178] sm:$0xff] }
 0x6f2   :  { %4684 = vmatpush1.msra.mxu0 %v9025_v58  ;;  %4755 = vmatpush1.msra.mxu1 %v9313_v29  ;;  %v9337_v58 = vld [vmem:[#allocation14 + $0x170] sm:$0xff] }
 0x6f3   :  { %4685 = vmatprep.subr.mxu0 %v9029_v26  ;;  %4756 = vmatprep.subr.mxu1 %v9317_v61  ;;  %v9341_v26 = vld [vmem:[#allocation14 + $0x158] sm:$0xff] }
 0x6f4   :  { %4686 = vmatpush1.msra.mxu0 %v9033_v39  ;;  %4757 = vmatpush1.msra.mxu1 %v9321_v23  ;;  %v9345_v39 = vld [vmem:[#allocation14 + $0x150] sm:$0xff] }
 0x6f5   :  { %4687 = vmatprep.subr.mxu0 %v9037_v16  ;;  %4758 = vmatprep.subr.mxu1 %v9325_v49  ;;  %v9349_v16 = vld [vmem:[#allocation14 + $0x138] sm:$0xff] }
 0x6f6   :  { %4688 = vmatpush1.msra.mxu0 %v9041_v60  ;;  %4759 = vmatpush1.msra.mxu1 %v9329_v0  ;;  %v9353_v60 = vld [vmem:[#allocation14 + $0x130] sm:$0xff] }
 0x6f7   :  { %4689 = vmatprep.subr.mxu0 %v9045_v59  ;;  %4760 = vmatprep.subr.mxu1 %v9333_v20  ;;  %v9357_v59 = vld [vmem:[#allocation14 + $0x118] sm:$0xff] }
 0x6f8   :  { %4690 = vmatpush1.msra.mxu0 %v9049_v54  ;;  %4761 = vmatpush1.msra.mxu1 %v9337_v58  ;;  %v9361_v54 = vld [vmem:[#allocation14 + $0x110] sm:$0xff] }
 0x6f9   :  { %4691 = vmatprep.subr.mxu0 %v9053_v41  ;;  %4762 = vmatprep.subr.mxu1 %v9341_v26  ;;  %v9365_v41 = vld [vmem:[#allocation14 + $0xf8] sm:$0xff] }
 0x6fa   :  { %4692 = vmatpush1.msra.mxu0 %v9057_v50  ;;  %4763 = vmatpush1.msra.mxu1 %v9345_v39  ;;  %v9369_v50 = vld [vmem:[#allocation14 + $0xf0] sm:$0xff] }
 0x6fb   :  { %4693 = vmatprep.subr.mxu0 %v9061_v27  ;;  %4764 = vmatprep.subr.mxu1 %v9349_v16  ;;  %v9373_v27 = vld [vmem:[#allocation14 + $0xd8] sm:$0xff] }
 0x6fc   :  { %4694 = vmatpush1.msra.mxu0 %v9065_v14  ;;  %4765 = vmatpush1.msra.mxu1 %v9353_v60  ;;  %v9377_v14 = vld [vmem:[#allocation14 + $0xd0] sm:$0xff] }
 0x6fd   :  { %4695 = vmatprep.subr.mxu0 %v9069_v52  ;;  %4766 = vmatprep.subr.mxu1 %v9357_v59  ;;  %v9381_v52 = vld [vmem:[#allocation14 + $0xb8] sm:$0xff] }
 0x6fe   :  { %4696 = vmatpush1.msra.mxu0 %v9073_v62  ;;  %4767 = vmatpush1.msra.mxu1 %v9361_v54  ;;  %v9385_v62 = vld [vmem:[#allocation14 + $0xb0] sm:$0xff] }
 0x6ff   :  { %4697 = vmatprep.subr.mxu0 %v9077_v36  ;;  %4768 = vmatprep.subr.mxu1 %v9365_v41  ;;  %v9389_v36 = vld [vmem:[#allocation14 + $0x98] sm:$0xff] }
 0x700   :  { %4698 = vmatpush1.msra.mxu0 %v9081_v57  ;;  %4769 = vmatpush1.msra.mxu1 %v9369_v50  ;;  %v9393_v57 = vld [vmem:[#allocation14 + $0x90] sm:$0xff] }
 0x701   :  { %4699 = vmatprep.subr.mxu0 %v9085_v34  ;;  %4770 = vmatprep.subr.mxu1 %v9373_v27  ;;  %v9397_v34 = vld [vmem:[#allocation14 + $0x78] sm:$0xff] }
 0x702   :  { %4700 = vmatpush1.msra.mxu0 %v9089_v32  ;;  %4771 = vmatpush1.msra.mxu1 %v9377_v14  ;;  %v9401_v32 = vld [vmem:[#allocation14 + $0x70] sm:$0xff] }
 0x703   :  { %4701 = vmatprep.subr.mxu0 %v9093_v33  ;;  %4772 = vmatprep.subr.mxu1 %v9381_v52  ;;  %v9405_v33 = vld [vmem:[#allocation14 + $0x58] sm:$0xff] }
 0x704   :  { %4702 = vmatpush1.msra.mxu0 %v9097_v42  ;;  %4773 = vmatpush1.msra.mxu1 %v9385_v62  ;;  %v9409_v42 = vld [vmem:[#allocation14 + $0x50] sm:$0xff] }
 0x705   :  { %4703 = vmatprep.subr.mxu0 %v9101_v45  ;;  %4774 = vmatprep.subr.mxu1 %v9389_v36  ;;  %v9413_v45 = vld [vmem:[#allocation14 + $0x38] sm:$0xff] }
 0x706   :  { %4704 = vmatpush1.msra.mxu0 %v9105_v38  ;;  %4775 = vmatpush1.msra.mxu1 %v9393_v57  ;;  %v9417_v38 = vld [vmem:[#allocation14 + $0x30] sm:$0xff] }
 0x707   :  { %4705 = vmatprep.subr.mxu0 %v9109_v51  ;;  %4776 = vmatprep.subr.mxu1 %v9397_v34  ;;  %v9421_v51 = vld [vmem:[#allocation14 + $0x18] sm:$0xff] }
 0x708   :  { %4706 = vmatpush1.msra.mxu0 %v11315_v47  ;;  %4777 = vmatpush1.msra.mxu1 %v9401_v32  ;;  %v9489_v47 = vld [vmem:[#allocation17 + $0x178] sm:$0xff] }
 0x709   :  { %4707 = vmatprep.subr.mxu0 %v11316_v18  ;;  %4778 = vmatprep.subr.mxu1 %v9405_v33  ;;  %11334 = vst [vmem:[#allocation155_spill] sm:$0xff] %v9489_v47  ;;  %v9493_v18 = vld [vmem:[#allocation17 + $0x160] sm:$0xff] }
 0x70a   :  { %4708 = vmatpush1.msra.mxu0 %v11317_v17  ;;  %4779 = vmatpush1.msra.mxu1 %v9409_v42  ;;  %11335 = vst [vmem:[#allocation156_spill] sm:$0xff] %v9493_v18  ;;  %v9495_v17 = vld [vmem:[#allocation17 + $0x170] sm:$0xff] }
 0x70b   :  { %4709 = vmatprep.subr.mxu0 %v11318_v48  ;;  %4780 = vmatprep.subr.mxu1 %v9413_v45  ;;  %11336 = vst [vmem:[#allocation169_spill] sm:$0xff] %v9495_v17  ;;  %v9499_v48 = vld [vmem:[#allocation17 + $0x148] sm:$0xff] }
 0x70c   :  { %4710 = vmatpush1.msra.mxu0 %v11319_v28  ;;  %4781 = vmatpush1.msra.mxu1 %v9417_v38  ;;  %11337 = vst [vmem:[#allocation170_spill] sm:$0xff] %v9499_v48  ;;  %v9501_v28 = vld [vmem:[#allocation17 + $0x158] sm:$0xff] }
 0x70d   :  { %4711 = vmatprep.subr.mxu0 %v11320_v37  ;;  %4782 = vmatprep.subr.mxu1 %v9421_v51  ;;  %11338 = vst [vmem:[#allocation142_spill] sm:$0xff] %v9501_v28  ;;  %v9505_v37 = vld [vmem:[#allocation17 + $0x140] sm:$0xff] }
 0x70e   :  { %4712 = vmatpush1.msra.mxu0 %v11321_v9  ;;  %4745 = vmatprep.mubr.f32.mxu0 %v10607_v3  ;;  %11339 = vst [vmem:[#allocation143_spill] sm:$0xff] %v9505_v37  ;;  %v9507_v9 = vld [vmem:[#allocation17 + $0x150] sm:$0xff] }
 0x70f   :  { %4783 = vmatpush1.msra.mxu1 %v9427_v1  ;;  %4816 = vmatprep.mubr.f32.mxu1 %v10607_v3  ;;  %11340 = vst [vmem:[#allocation144_spill] sm:$0xff] %v9507_v9 }
 0x710   :  { %4746 = vmatmul.mubr.f32.vlgmr.msra.gmra.mxu0 %v9297_v2  ;;  %4817 = vmatmul.mubr.f32.vlgmr.msra.gmra.mxu1 %v9297_v2  ;;  %v9481_v2 = vld [vmem:[#allocation17 + $0x180] sm:$0xff] }
 0x711   :  { %5037 = vmatprep.mubr.f32.mxu0 %v10607_v3  ;;  %5108 = vmatprep.mubr.f32.mxu1 %v10607_v3  ;;  %11331 = vst [vmem:[#allocation138_spill] sm:$0xff] %v9481_v2 }
 0x712   :  { %4973 = vmatprep.subr.mxu0 %v9439_v10  ;;  %5044 = vmatprep.subr.mxu1 %v9441_v7 }
 0x713   :  { %4974 = vmatpush1.msra.mxu0 %v9445_v5  ;;  %5045 = vmatpush1.msra.mxu1 %v9447_v46 }
 0x714   :  { %4975 = vmatprep.subr.mxu0 %v9451_v25  ;;  %5046 = vmatprep.subr.mxu1 %v9453_v8 }
 0x715   :  { %4976 = vmatpush1.msra.mxu0 %v9457_v53  ;;  %5047 = vmatpush1.msra.mxu1 %v9459_v21 }
 0x716   :  { %4977 = vmatprep.subr.mxu0 %v9463_v31  ;;  %5048 = vmatprep.subr.mxu1 %v9465_v15 }
 0x717   :  { %4978 = vmatpush1.msra.mxu0 %v9469_v13  ;;  %5049 = vmatpush1.msra.mxu1 %v9471_v56 }
 0x718   :  { %4979 = vmatprep.subr.mxu0 %v9475_v24  ;;  %5050 = vmatprep.subr.mxu1 %v9477_v4 }
 0x719   :  { %4980 = vmatpush1.msra.mxu0 %v9481_v2  ;;  %5051 = vmatpush1.msra.mxu1 %v9483_v44 }
 0x71a   :  { %4981 = vmatprep.subr.mxu0 %v9487_v40  ;;  %5052 = vmatprep.subr.mxu1 %v9489_v47  ;;  %v9555_v47 = vld [vmem:[#allocation17 + $0xd0] sm:$0xff] }
 0x71b   :  { %4982 = vmatpush1.msra.mxu0 %v9493_v18  ;;  %5053 = vmatpush1.msra.mxu1 %v9495_v17  ;;  %v9513_v18 = vld [vmem:[#allocation17 + $0x138] sm:$0xff]  ;;  %v9517_v17 = vld [vmem:[#allocation17 + $0x120] sm:$0xff]  ;;  %11356 = vst [vmem:[#allocation35_spill] sm:$0xff] %v9555_v47 }
 0x71c   :  { %4983 = vmatprep.subr.mxu0 %v9499_v48  ;;  %5054 = vmatprep.subr.mxu1 %v9501_v28  ;;  %11342 = vst [vmem:[#allocation146_spill] sm:$0xff] %v9513_v18  ;;  %11343 = vst [vmem:[#allocation147_spill] sm:$0xff] %v9517_v17  ;;  %v9519_v48 = vld [vmem:[#allocation17 + $0x130] sm:$0xff]  ;;  %v9523_v28 = vld [vmem:[#allocation17 + $0x108] sm:$0xff] }
 0x71d   :  { %4984 = vmatpush1.msra.mxu0 %v9505_v37  ;;  %5055 = vmatpush1.msra.mxu1 %v9507_v9  ;;  %11344 = vst [vmem:[#allocation151_spill] sm:$0xff] %v9519_v48  ;;  %11345 = vst [vmem:[#allocation152_spill] sm:$0xff] %v9523_v28  ;;  %v9525_v37 = vld [vmem:[#allocation17 + $0x118] sm:$0xff]  ;;  %v9529_v9 = vld [vmem:[#allocation17 + $0x100] sm:$0xff] }
 0x71e   :  { %4985 = vmatprep.subr.mxu0 %v9511_v19  ;;  %5056 = vmatprep.subr.mxu1 %v9513_v18  ;;  %11346 = vst [vmem:[#allocation165_spill] sm:$0xff] %v9525_v37  ;;  %11347 = vst [vmem:[#allocation166_spill] sm:$0xff] %v9529_v9  ;;  %v9531_v19 = vld [vmem:[#allocation17 + $0x110] sm:$0xff]  ;;  %v9535_v18 = vld [vmem:[#allocation17 + $0xe8] sm:$0xff] }
 0x71f   :  { %4986 = vmatpush1.msra.mxu0 %v9517_v17  ;;  %5057 = vmatpush1.msra.mxu1 %v9519_v48  ;;  %11348 = vst [vmem:[#allocation27_spill] sm:$0xff] %v9531_v19  ;;  %11349 = vst [vmem:[#allocation28_spill] sm:$0xff] %v9535_v18  ;;  %v9537_v17 = vld [vmem:[#allocation17 + $0xf8] sm:$0xff]  ;;  %v9539_v48 = vld [vmem:[#allocation17 + $0xe0] sm:$0xff] }
 0x720   :  { %4987 = vmatprep.subr.mxu0 %v9523_v28  ;;  %5058 = vmatprep.subr.mxu1 %v9525_v37  ;;  %11350 = vst [vmem:[#allocation29_spill] sm:$0xff] %v9537_v17  ;;  %11351 = vst [vmem:[#allocation30_spill] sm:$0xff] %v9539_v48  ;;  %v9543_v28 = vld [vmem:[#allocation17 + $0xf0] sm:$0xff]  ;;  %v9547_v37 = vld [vmem:[#allocation17 + $0xc8] sm:$0xff] }
 0x721   :  { %4988 = vmatpush1.msra.mxu0 %v9529_v9  ;;  %5059 = vmatpush1.msra.mxu1 %v9531_v19  ;;  %11352 = vst [vmem:[#allocation31_spill] sm:$0xff] %v9543_v28  ;;  %11353 = vst [vmem:[#allocation32_spill] sm:$0xff] %v9547_v37  ;;  %v9549_v9 = vld [vmem:[#allocation17 + $0xd8] sm:$0xff]  ;;  %v9553_v19 = vld [vmem:[#allocation17 + $0xc0] sm:$0xff] }
 0x722   :  { %4989 = vmatprep.subr.mxu0 %v9535_v18  ;;  %5060 = vmatprep.subr.mxu1 %v9537_v17  ;;  %11354 = vst [vmem:[#allocation33_spill] sm:$0xff] %v9549_v9  ;;  %11355 = vst [vmem:[#allocation34_spill] sm:$0xff] %v9553_v19  ;;  %v9559_v17 = vld [vmem:[#allocation17 + $0xa8] sm:$0xff] }
 0x723   :  { %4990 = vmatpush1.msra.mxu0 %v9539_v48  ;;  %5061 = vmatpush1.msra.mxu1 %v9543_v28  ;;  %11357 = vst [vmem:[#allocation36_spill] sm:$0xff] %v9559_v17  ;;  %v9561_v48 = vld [vmem:[#allocation17 + $0xb8] sm:$0xff]  ;;  %v9565_v28 = vld [vmem:[#allocation17 + $0xa0] sm:$0xff] }
 0x724   :  { %4991 = vmatprep.subr.mxu0 %v9547_v37  ;;  %5062 = vmatprep.subr.mxu1 %v9549_v9  ;;  %11358 = vst [vmem:[#allocation37_spill] sm:$0xff] %v9561_v48  ;;  %11359 = vst [vmem:[#allocation38_spill] sm:$0xff] %v9565_v28  ;;  %v9567_v37 = vld [vmem:[#allocation17 + $0xb0] sm:$0xff]  ;;  %v9571_v9 = vld [vmem:[#allocation17 + $0x88] sm:$0xff] }
 0x725   :  { %4992 = vmatpush1.msra.mxu0 %v9553_v19  ;;  %5063 = vmatpush1.msra.mxu1 %v9555_v47  ;;  %11360 = vst [vmem:[#allocation39_spill] sm:$0xff] %v9567_v37  ;;  %11361 = vst [vmem:[#allocation40_spill] sm:$0xff] %v9571_v9  ;;  %v9573_v19 = vld [vmem:[#allocation17 + $0x98] sm:$0xff]  ;;  %v9577_v47 = vld [vmem:[#allocation17 + $0x80] sm:$0xff] }
 0x726   :  { %4993 = vmatprep.subr.mxu0 %v9559_v17  ;;  %5064 = vmatprep.subr.mxu1 %v9561_v48  ;;  %11362 = vst [vmem:[#allocation41_spill] sm:$0xff] %v9573_v19  ;;  %11363 = vst [vmem:[#allocation42_spill] sm:$0xff] %v9577_v47  ;;  %v9579_v17 = vld [vmem:[#allocation17 + $0x90] sm:$0xff]  ;;  %v9583_v48 = vld [vmem:[#allocation17 + $0x68] sm:$0xff] }
 0x727   :  { %4994 = vmatpush1.msra.mxu0 %v9565_v28  ;;  %5065 = vmatpush1.msra.mxu1 %v9567_v37  ;;  %11364 = vst [vmem:[#allocation43_spill] sm:$0xff] %v9579_v17  ;;  %11365 = vst [vmem:[#allocation44_spill] sm:$0xff] %v9583_v48  ;;  %v9585_v28 = vld [vmem:[#allocation17 + $0x78] sm:$0xff]  ;;  %v9589_v37 = vld [vmem:[#allocation17 + $0x60] sm:$0xff] }
 0x728   :  { %4995 = vmatprep.subr.mxu0 %v9571_v9  ;;  %5066 = vmatprep.subr.mxu1 %v9573_v19  ;;  %11366 = vst [vmem:[#allocation45_spill] sm:$0xff] %v9585_v28  ;;  %11367 = vst [vmem:[#allocation46_spill] sm:$0xff] %v9589_v37  ;;  %v9591_v9 = vld [vmem:[#allocation17 + $0x70] sm:$0xff]  ;;  %v9595_v19 = vld [vmem:[#allocation17 + $0x48] sm:$0xff] }
 0x729   :  { %4996 = vmatpush1.msra.mxu0 %v9577_v47  ;;  %5067 = vmatpush1.msra.mxu1 %v9579_v17  ;;  %11368 = vst [vmem:[#allocation47_spill] sm:$0xff] %v9591_v9  ;;  %11369 = vst [vmem:[#allocation48_spill] sm:$0xff] %v9595_v19  ;;  %v9597_v47 = vld [vmem:[#allocation17 + $0x58] sm:$0xff]  ;;  %v9601_v17 = vld [vmem:[#allocation17 + $0x40] sm:$0xff] }
 0x72a   :  { %4997 = vmatprep.subr.mxu0 %v9583_v48  ;;  %5068 = vmatprep.subr.mxu1 %v9585_v28  ;;  %11370 = vst [vmem:[#allocation49_spill] sm:$0xff] %v9597_v47  ;;  %11371 = vst [vmem:[#allocation50_spill] sm:$0xff] %v9601_v17  ;;  %v9603_v48 = vld [vmem:[#allocation17 + $0x50] sm:$0xff]  ;;  %v9607_v28 = vld [vmem:[#allocation17 + $0x28] sm:$0xff] }
 0x72b   :  { %4998 = vmatpush1.msra.mxu0 %v9589_v37  ;;  %5069 = vmatpush1.msra.mxu1 %v9591_v9  ;;  %11372 = vst [vmem:[#allocation51_spill] sm:$0xff] %v9603_v48  ;;  %11373 = vst [vmem:[#allocation52_spill] sm:$0xff] %v9607_v28  ;;  %v9609_v37 = vld [vmem:[#allocation17 + $0x38] sm:$0xff]  ;;  %v9613_v9 = vld [vmem:[#allocation17 + $0x20] sm:$0xff] }
 0x72c   :  { %4999 = vmatprep.subr.mxu0 %v9595_v19  ;;  %5070 = vmatprep.subr.mxu1 %v9597_v47  ;;  %11374 = vst [vmem:[#allocation53_spill] sm:$0xff] %v9609_v37  ;;  %11375 = vst [vmem:[#allocation54_spill] sm:$0xff] %v9613_v9  ;;  %v9615_v19 = vld [vmem:[#allocation17 + $0x30] sm:$0xff]  ;;  %v9619_v47 = vld [vmem:[#allocation17 + $0x8] sm:$0xff] }
 0x72d   :  { %5000 = vmatpush1.msra.mxu0 %v9601_v17  ;;  %5071 = vmatpush1.msra.mxu1 %v9603_v48  ;;  %11376 = vst [vmem:[#allocation55_spill] sm:$0xff] %v9615_v19  ;;  %11377 = vst [vmem:[#allocation56_spill] sm:$0xff] %v9619_v47  ;;  %v9621_v17 = vld [vmem:[#allocation17 + $0x18] sm:$0xff]  ;;  %v9625_v48 = vld [vmem:[#allocation17] sm:$0xff] }
 0x72e   :  { %5001 = vmatprep.subr.mxu0 %v9607_v28  ;;  %5072 = vmatprep.subr.mxu1 %v9609_v37  ;;  %11378 = vst [vmem:[#allocation57_spill] sm:$0xff] %v9621_v17  ;;  %11379 = vst [vmem:[#allocation58_spill] sm:$0xff] %v9625_v48  ;;  %v9627_v28 = vld [vmem:[#allocation17 + $0x10] sm:$0xff]  ;;  %v9631_v37 = vld [vmem:[#allocation16 + $0x1e8] sm:$0xff] }
 0x72f   :  { %5002 = vmatpush1.msra.mxu0 %v9613_v9  ;;  %5073 = vmatpush1.msra.mxu1 %v9615_v19  ;;  %11380 = vst [vmem:[#allocation59_spill] sm:$0xff] %v9627_v28  ;;  %11381 = vst [vmem:[#allocation60_spill] sm:$0xff] %v9631_v37  ;;  %v9633_v9 = vld [vmem:[#allocation16 + $0x1f8] sm:$0xff] }
 0x730   :  { %5003 = vmatprep.subr.mxu0 %v9619_v47  ;;  %5074 = vmatprep.subr.mxu1 %v9621_v17  ;;  %11382 = vst [vmem:[#allocation61_spill] sm:$0xff] %v9633_v9 }
 0x731   :  { %5004 = vmatpush1.msra.mxu0 %v9625_v48  ;;  %5075 = vmatpush1.msra.mxu1 %v9627_v28 }
 0x732   :  { %5115 = vmatprep.subr.mxu0 %v9631_v37  ;;  %5186 = vmatprep.subr.mxu1 %v9633_v9 }
 0x78d   :  { %v4368_v19 = vpop.f32.mrf.mxu0  ;;  %v4439_v47 = vpop.f32.mrf.mxu1 }
 0x78f   :  { %v4370_v18 = vpop.f32.mrf.mxu0  ;;  %v4441_v17 = vpop.f32.mrf.mxu1 }
 0x7ae   :  { %v4510_v40 = vpop.f32.mrf.mxu0  ;;  %v4581_v2 = vpop.f32.mrf.mxu1 }
 0x7af   :  { %v4511_v44 = vadd.f32 %v4510_v40, %v4368_v19  ;;  %v4582_v56 = vadd.f32 %v4581_v2, %v4439_v47 }
 0x7b0   :  { %v4512_v4 = vpop.f32.mrf.mxu0  ;;  %v4583_v37 = vpop.f32.mrf.mxu1 }
 0x7b1   :  { %v4586_v48 = vadd.f32 %v4511_v44, %v7540_v43  ;;  %v4513_v24 = vadd.f32 %v4512_v4, %v4370_v18  ;;  %v4588_v9 = vadd.f32 %v4582_v56, %v7549_v55  ;;  %v4584_v31 = vadd.f32 %v4583_v37, %v4441_v17  ;;  %v11383_v56 = vld [vmem:[#allocation159_spill] sm:$0xff]  ;;  %v11384_v37 = vld [vmem:[#allocation160_spill] sm:$0xff] }
 0x7b3   :  { %v4590_v28 = vmul.f32 0.5, %v4586_v48  ;;  %v4587_v13 = vadd.f32 %v4513_v24, %v7544_v63  ;;  %v4589_v21 = vadd.f32 %v4584_v31, %v7555_v35 }
 0x7b5   :  { %6416 = vtanh.f32 %v4590_v28  ;;  %v4594_v15 = vmul.f32 0.5, %v4587_v13  ;;  %v4599_v19 = vmul.f32 0.5, %v4589_v21 }
 0x7b7   :  { %6418 = vtanh.f32 %v4594_v15 }
 0x7b8   :  { %6420 = vtanh.f32 %v4588_v9  ;;  %v11385_v9 = vld [vmem:[#allocation173_spill] sm:$0xff] }
 0x7b9   :  { %6422 = vtanh.f32 %v4599_v19 }
 0x7c2   :  { %v6417_v40 = vpop.eup %6416 }
 0x7c3   :  { %v4592_v53 = vmul.f32 0.5, %v6417_v40 }
 0x7c4   :  { %v6419_v8 = vpop.eup %6418 }
 0x7c5   :  { %v4593_v44 = vadd.f32 0.5, %v4592_v53  ;;  %v4596_v4 = vmul.f32 0.5, %v6419_v8  ;;  %v6421_v47 = vpop.eup %6420 }
 0x7c6   :  { %v6423_v31 = vpop.eup %6422 }
 0x7c7   :  { %v4597_v2 = vadd.f32 0.5, %v4596_v4  ;;  %v4604_v13 = vmul.f32 %v6421_v47, %v4593_v44  ;;  %v4601_v8 = vmul.f32 0.5, %v6423_v31  ;;  %v9650_v47 = vld [vmem:[#allocation16 + $0x1e0] sm:$0xff] }
 0x7c8   :  { %v9661_v31 = vld [vmem:[#allocation16 + $0x1c0] sm:$0xff] }
 0x7c9   :  { %v4603_v24 = vmul.f32 %v4597_v2, %v9222_v11  ;;  %v4602_v11 = vadd.f32 0.5, %v4601_v8  ;;  %11388 = vst [vmem:[#allocation63_spill] sm:$0xff] %v9661_v31  ;;  %v9679_v8 = vld [vmem:[#allocation16 + $0x188] sm:$0xff] }
 0x7ca   :  { %11394 = vst [vmem:[#allocation69_spill] sm:$0xff] %v9679_v8 }
 0x7cb   :  { %v9642_v18 = vadd.f32 %v4604_v13, %v4603_v24  ;;  %v9652_v24 = vld [vmem:[#allocation16 + $0x1f0] sm:$0xff]  ;;  %v9654_v13 = vld [vmem:[#allocation16 + $0x1c8] sm:$0xff] }
 0x7cd   :  { %6424 = vtanh.f32 %v9642_v18 }
 0x7d0   :  { %v4747_v15 = vpop.f32.mrf.mxu0  ;;  %v4818_v21 = vpop.f32.mrf.mxu1 }
 0x7d1   :  { %v4823_v17 = vadd.f32 %v4747_v15, %v11383_v56  ;;  %v4825_v19 = vadd.f32 %v4818_v21, %v11385_v9  ;;  %v9656_v15 = vld [vmem:[#allocation16 + $0x1d8] sm:$0xff]  ;;  %v11387_v56 = vld [vmem:[#allocation174_spill] sm:$0xff]  ;;  %v9663_v21 = vld [vmem:[#allocation16 + $0x1d0] sm:$0xff] }
 0x7d2   :  { %v4749_v48 = vpop.f32.mrf.mxu0  ;;  %v4820_v4 = vpop.f32.mrf.mxu1  ;;  %11389 = vst [vmem:[#allocation64_spill] sm:$0xff] %v9663_v21  ;;  %v9681_v9 = vld [vmem:[#allocation16 + $0x198] sm:$0xff] }
 0x7d3   :  { %v4827_v28 = vmul.f32 0.5, %v4823_v17  ;;  %v4824_v53 = vadd.f32 %v4749_v48, %v11384_v37  ;;  %v4826_v17 = vadd.f32 %v4820_v4, %v11387_v56  ;;  %v9667_v48 = vld [vmem:[#allocation16 + $0x1a8] sm:$0xff]  ;;  %v9673_v37 = vld [vmem:[#allocation16 + $0x1a0] sm:$0xff]  ;;  %11395 = vst [vmem:[#allocation70_spill] sm:$0xff] %v9681_v9  ;;  %v9693_v56 = vld [vmem:[#allocation16 + $0x178] sm:$0xff] }
 0x7d4   :  { %11390 = vst [vmem:[#allocation65_spill] sm:$0xff] %v9667_v48  ;;  %11392 = vst [vmem:[#allocation67_spill] sm:$0xff] %v9673_v37  ;;  %v9691_v4 = vld [vmem:[#allocation16 + $0x168] sm:$0xff] }
 0x7d5   :  { %6426 = vtanh.f32 %v4827_v28  ;;  %v4831_v40 = vmul.f32 0.5, %v4824_v53  ;;  %v9669_v28 = vld [vmem:[#allocation16 + $0x1b8] sm:$0xff]  ;;  %v9675_v53 = vld [vmem:[#allocation16 + $0x1b0] sm:$0xff]  ;;  %11398 = vst [vmem:[#allocation73_spill] sm:$0xff] %v9691_v4  ;;  %11399 = vst [vmem:[#allocation74_spill] sm:$0xff] %v9693_v56 }
 0x7d6   :  { %11391 = vst [vmem:[#allocation66_spill] sm:$0xff] %v9669_v28  ;;  %11393 = vst [vmem:[#allocation68_spill] sm:$0xff] %v9675_v53 }
 0x7d7   :  { %6428 = vtanh.f32 %v4831_v40  ;;  %v9685_v40 = vld [vmem:[#allocation16 + $0x180] sm:$0xff] }
 0x7d8   :  { %6430 = vtanh.f32 %v4825_v19  ;;  %v4836_v19 = vmul.f32 0.5, %v4826_v17  ;;  %11396 = vst [vmem:[#allocation71_spill] sm:$0xff] %v9685_v40  ;;  %v9697_v17 = vld [vmem:[#allocation16 + $0x160] sm:$0xff] }
 0x7d9   :  { %11400 = vst [vmem:[#allocation75_spill] sm:$0xff] %v9697_v17 }
 0x7da   :  { %v6425_v44 = vpop.eup %6424  ;;  %6432 = vtanh.f32 %v4836_v19  ;;  %v9721_v19 = vld [vmem:[#allocation16 + $0x120] sm:$0xff] }
 0x7db   :  { %v9648_v2 = vmul.f32 %v6425_v44, %v4602_v11  ;;  %v9687_v11 = vld [vmem:[#allocation16 + $0x190] sm:$0xff]  ;;  %11405 = vst [vmem:[#allocation171_spill] sm:$0xff] %v9721_v19 }
 0x7dc   :  { %11397 = vst [vmem:[#allocation72_spill] sm:$0xff] %v9687_v11 }
 0x7dd   :  { %11386 = vst [vmem:[#allocation62_spill] sm:$0xff] %v9648_v2  ;;  %5038 = vmatmul.mubr.f32.vlgmr.msra.gmra.mxu0 %v9648_v2  ;;  %5109 = vmatmul.mubr.f32.vlgmr.msra.gmra.mxu1 %v9648_v2 }
 0x7de   :  { %5116 = vmatpush1.msra.mxu0 %v9650_v47  ;;  %5187 = vmatpush1.msra.mxu1 %v9652_v24 }
 0x7df   :  { %5117 = vmatprep.subr.mxu0 %v9654_v13  ;;  %5188 = vmatprep.subr.mxu1 %v9656_v15 }
 0x7e0   :  { %5118 = vmatpush1.msra.mxu0 %v9661_v31  ;;  %5189 = vmatpush1.msra.mxu1 %v9663_v21 }
 0x7e1   :  { %5119 = vmatprep.subr.mxu0 %v9667_v48  ;;  %5190 = vmatprep.subr.mxu1 %v9669_v28  ;;  %v9699_v28 = vld [vmem:[#allocation16 + $0x170] sm:$0xff] }
 0x7e2   :  { %v6427_v44 = vpop.eup %6426  ;;  %5120 = vmatpush1.msra.mxu0 %v9673_v37  ;;  %5191 = vmatpush1.msra.mxu1 %v9675_v53  ;;  %11401 = vst [vmem:[#allocation76_spill] sm:$0xff] %v9699_v28  ;;  %v9703_v37 = vld [vmem:[#allocation16 + $0x148] sm:$0xff]  ;;  %v9705_v53 = vld [vmem:[#allocation16 + $0x158] sm:$0xff] }
 0x7e3   :  { %v4829_v2 = vmul.f32 0.5, %v6427_v44  ;;  %5121 = vmatprep.subr.mxu0 %v9679_v8  ;;  %5192 = vmatprep.subr.mxu1 %v9681_v9  ;;  %v9709_v44 = vld [vmem:[#allocation16 + $0x140] sm:$0xff]  ;;  %v9711_v9 = vld [vmem:[#allocation16 + $0x150] sm:$0xff] }
 0x7e4   :  { %v6429_v48 = vpop.eup %6428  ;;  %5122 = vmatpush1.msra.mxu0 %v9685_v40  ;;  %5193 = vmatpush1.msra.mxu1 %v9687_v11  ;;  %11402 = vst [vmem:[#allocation77_spill] sm:$0xff] %v9709_v44  ;;  %11403 = vst [vmem:[#allocation157_spill] sm:$0xff] %v9711_v9  ;;  %v9715_v11 = vld [vmem:[#allocation16 + $0x128] sm:$0xff]  ;;  %v9717_v40 = vld [vmem:[#allocation16 + $0x138] sm:$0xff] }
 0x7e5   :  { %v4830_v21 = vadd.f32 0.5, %v4829_v2  ;;  %v4833_v31 = vmul.f32 0.5, %v6429_v48  ;;  %5123 = vmatprep.subr.mxu0 %v9691_v4  ;;  %5194 = vmatprep.subr.mxu1 %v9693_v56  ;;  %v6431_v8 = vpop.eup %6430  ;;  %11404 = vst [vmem:[#allocation158_spill] sm:$0xff] %v9717_v40  ;;  %v9723_v56 = vld [vmem:[#allocation16 + $0x130] sm:$0xff] }
 0x7e6   :  { %5124 = vmatpush1.msra.mxu0 %v9697_v17  ;;  %5195 = vmatpush1.msra.mxu1 %v9699_v28  ;;  %11406 = vst [vmem:[#allocation172_spill] sm:$0xff] %v9723_v56  ;;  %v9727_v17 = vld [vmem:[#allocation16 + $0x108] sm:$0xff]  ;;  %v9729_v28 = vld [vmem:[#allocation16 + $0x118] sm:$0xff] }
 0x7e7   :  { %v4834_v2 = vadd.f32 0.5, %v4833_v31  ;;  %v4841_v48 = vmul.f32 %v6431_v8, %v4830_v21  ;;  %5125 = vmatprep.subr.mxu0 %v9703_v37  ;;  %5196 = vmatprep.subr.mxu1 %v9705_v53  ;;  %11407 = vst [vmem:[#allocation79_spill] sm:$0xff] %v9727_v17  ;;  %11408 = vst [vmem:[#allocation80_spill] sm:$0xff] %v9729_v28  ;;  %v9734_v31 = vld [vmem:[#allocation16 + $0x100] sm:$0xff]  ;;  %v9736_v21 = vld [vmem:[#allocation16 + $0x110] sm:$0xff] }
 0x7e8   :  { %5126 = vmatpush1.msra.mxu0 %v9709_v44  ;;  %5197 = vmatpush1.msra.mxu1 %v9711_v9  ;;  %11409 = vst [vmem:[#allocation81_spill] sm:$0xff] %v9734_v31  ;;  %11410 = vst [vmem:[#allocation82_spill] sm:$0xff] %v9736_v21  ;;  %v9740_v8 = vld [vmem:[#allocation16 + $0xe8] sm:$0xff]  ;;  %v9742_v9 = vld [vmem:[#allocation16 + $0xf8] sm:$0xff] }
 0x7e9   :  { %v4840_v4 = vmul.f32 %v4834_v2, %v9260_v12  ;;  %5127 = vmatprep.subr.mxu0 %v9715_v11  ;;  %5198 = vmatprep.subr.mxu1 %v9717_v40  ;;  %11411 = vst [vmem:[#allocation83_spill] sm:$0xff] %v9740_v8  ;;  %11412 = vst [vmem:[#allocation84_spill] sm:$0xff] %v9742_v9  ;;  %v9748_v12 = vld [vmem:[#allocation16 + $0xe0] sm:$0xff]  ;;  %v9750_v2 = vld [vmem:[#allocation16 + $0xf0] sm:$0xff] }
 0x7ea   :  { %5128 = vmatpush1.msra.mxu0 %v9721_v19  ;;  %5199 = vmatpush1.msra.mxu1 %v9723_v56  ;;  %11413 = vst [vmem:[#allocation148_spill] sm:$0xff] %v9748_v12  ;;  %11414 = vst [vmem:[#allocation149_spill] sm:$0xff] %v9750_v2  ;;  %v9754_v19 = vld [vmem:[#allocation16 + $0xc8] sm:$0xff]  ;;  %v9756_v56 = vld [vmem:[#allocation16 + $0xd8] sm:$0xff] }
 0x7eb   :  { %v9744_v44 = vadd.f32 %v4841_v48, %v4840_v4  ;;  %5129 = vmatprep.subr.mxu0 %v9727_v17  ;;  %5200 = vmatprep.subr.mxu1 %v9729_v28  ;;  %11415 = vst [vmem:[#allocation150_spill] sm:$0xff] %v9754_v19  ;;  %11416 = vst [vmem:[#allocation153_spill] sm:$0xff] %v9756_v56  ;;  %v9761_v4 = vld [vmem:[#allocation16 + $0xc0] sm:$0xff]  ;;  %v9763_v48 = vld [vmem:[#allocation16 + $0xd0] sm:$0xff] }
 0x7ec   :  { %5130 = vmatpush1.msra.mxu0 %v9734_v31  ;;  %5201 = vmatpush1.msra.mxu1 %v9736_v21  ;;  %11417 = vst [vmem:[#allocation154_spill] sm:$0xff] %v9761_v4  ;;  %11418 = vst [vmem:[#allocation167_spill] sm:$0xff] %v9763_v48  ;;  %v9767_v31 = vld [vmem:[#allocation16 + $0xa8] sm:$0xff]  ;;  %v9769_v21 = vld [vmem:[#allocation16 + $0xb8] sm:$0xff] }
 0x7ed   :  { %6434 = vtanh.f32 %v9744_v44  ;;  %5131 = vmatprep.subr.mxu0 %v9740_v8  ;;  %5202 = vmatprep.subr.mxu1 %v9742_v9  ;;  %11419 = vst [vmem:[#allocation168_spill] sm:$0xff] %v9767_v31  ;;  %11420 = vst [vmem:[#allocation164_spill] sm:$0xff] %v9769_v21  ;;  %v9773_v28 = vld [vmem:[#allocation16 + $0xa0] sm:$0xff]  ;;  %v9775_v8 = vld [vmem:[#allocation16 + $0xb0] sm:$0xff] }
 0x7ee   :  { %5132 = vmatpush1.msra.mxu0 %v9748_v12  ;;  %5203 = vmatpush1.msra.mxu1 %v9750_v2  ;;  %11421 = vst [vmem:[#allocation85_spill] sm:$0xff] %v9773_v28  ;;  %11422 = vst [vmem:[#allocation86_spill] sm:$0xff] %v9775_v8  ;;  %v9779_v9 = vld [vmem:[#allocation16 + $0x88] sm:$0xff]  ;;  %v9781_v12 = vld [vmem:[#allocation16 + $0x98] sm:$0xff] }
 0x7ef   :  { %5133 = vmatprep.subr.mxu0 %v9754_v19  ;;  %5204 = vmatprep.subr.mxu1 %v9756_v56  ;;  %11423 = vst [vmem:[#allocation87_spill] sm:$0xff] %v9779_v9  ;;  %11424 = vst [vmem:[#allocation88_spill] sm:$0xff] %v9781_v12  ;;  %v9785_v2 = vld [vmem:[#allocation16 + $0x80] sm:$0xff]  ;;  %v9787_v19 = vld [vmem:[#allocation16 + $0x90] sm:$0xff]  ;;  %v6433_v56 = vpop.eup %6432 }
 0x7f0   :  { %5134 = vmatpush1.msra.mxu0 %v9761_v4  ;;  %5205 = vmatpush1.msra.mxu1 %v9763_v48  ;;  %11425 = vst [vmem:[#allocation89_spill] sm:$0xff] %v9785_v2  ;;  %11426 = vst [vmem:[#allocation90_spill] sm:$0xff] %v9787_v19  ;;  %v9791_v4 = vld [vmem:[#allocation16 + $0x68] sm:$0xff]  ;;  %v9793_v48 = vld [vmem:[#allocation16 + $0x78] sm:$0xff] }
 0x7f1   :  { %5135 = vmatprep.subr.mxu0 %v9767_v31  ;;  %5206 = vmatprep.subr.mxu1 %v9769_v21  ;;  %11427 = vst [vmem:[#allocation91_spill] sm:$0xff] %v9791_v4  ;;  %11428 = vst [vmem:[#allocation92_spill] sm:$0xff] %v9793_v48  ;;  %v9797_v31 = vld [vmem:[#allocation16 + $0x60] sm:$0xff]  ;;  %v9799_v21 = vld [vmem:[#allocation16 + $0x70] sm:$0xff] }
 0x7f2   :  { %5136 = vmatpush1.msra.mxu0 %v9773_v28  ;;  %5207 = vmatpush1.msra.mxu1 %v9775_v8  ;;  %11429 = vst [vmem:[#allocation93_spill] sm:$0xff] %v9797_v31  ;;  %11430 = vst [vmem:[#allocation94_spill] sm:$0xff] %v9799_v21  ;;  %v9803_v17 = vld [vmem:[#allocation16 + $0x48] sm:$0xff]  ;;  %v9805_v28 = vld [vmem:[#allocation16 + $0x58] sm:$0xff]  ;;  %v4838_v8 = vmul.f32 0.5, %v6433_v56 }
 0x7f3   :  { %5137 = vmatprep.subr.mxu0 %v9779_v9  ;;  %5208 = vmatprep.subr.mxu1 %v9781_v12  ;;  %11431 = vst [vmem:[#allocation95_spill] sm:$0xff] %v9803_v17  ;;  %11432 = vst [vmem:[#allocation96_spill] sm:$0xff] %v9805_v28  ;;  %v9809_v9 = vld [vmem:[#allocation16 + $0x40] sm:$0xff]  ;;  %v9811_v12 = vld [vmem:[#allocation16 + $0x50] sm:$0xff] }
 0x7f4   :  { %5138 = vmatpush1.msra.mxu0 %v9785_v2  ;;  %5209 = vmatpush1.msra.mxu1 %v9787_v19  ;;  %11433 = vst [vmem:[#allocation97_spill] sm:$0xff] %v9811_v12  ;;  %v9815_v2 = vld [vmem:[#allocation16 + $0x28] sm:$0xff]  ;;  %v9817_v19 = vld [vmem:[#allocation16 + $0x38] sm:$0xff]  ;;  %v9821_v56 = vld [vmem:[#allocation16 + $0x20] sm:$0xff] }
 0x7f5   :  { %5139 = vmatprep.subr.mxu0 %v9791_v4  ;;  %5210 = vmatprep.subr.mxu1 %v9793_v48  ;;  %11434 = vst [vmem:[#allocation98_spill] sm:$0xff] %v9821_v56  ;;  %v9823_v4 = vld [vmem:[#allocation16 + $0x30] sm:$0xff]  ;;  %v9827_v48 = vld [vmem:[#allocation16 + $0x8] sm:$0xff] }
 0x7f6   :  { %5140 = vmatpush1.msra.mxu0 %v9797_v31  ;;  %5211 = vmatpush1.msra.mxu1 %v9799_v21  ;;  %11435 = vst [vmem:[#allocation99_spill] sm:$0xff] %v9823_v4  ;;  %v9829_v31 = vld [vmem:[#allocation16 + $0x18] sm:$0xff]  ;;  %v4839_v21 = vadd.f32 0.5, %v4838_v8  ;;  %v9837_v40 = vld [vmem:[#allocation16 + $0x10] sm:$0xff]  ;;  %v5349_v8 = vld [vmem:[#allocation14 + $0x1e8] sm:$0xff] }
 0x7f7   :  { %5141 = vmatprep.subr.mxu0 %v9803_v17  ;;  %5212 = vmatprep.subr.mxu1 %v9805_v28  ;;  %11436 = vst [vmem:[#allocation100_spill] sm:$0xff] %v9829_v31  ;;  %v9833_v17 = vld [vmem:[#allocation16] sm:$0xff]  ;;  %11438 = vst [vmem:[#allocation102_spill] sm:$0xff] %v9837_v40 }
 0x7f8   :  { %5142 = vmatpush1.msra.mxu0 %v9809_v9  ;;  %5213 = vmatpush1.msra.mxu1 %v9811_v12  ;;  %11437 = vst [vmem:[#allocation101_spill] sm:$0xff] %v9833_v17 }
 0x7f9   :  { %5143 = vmatprep.subr.mxu0 %v9815_v2  ;;  %5214 = vmatprep.subr.mxu1 %v9817_v19 }
 0x7fa   :  { %v6435_v28 = vpop.eup %6434  ;;  %5144 = vmatpush1.msra.mxu0 %v9821_v56  ;;  %5215 = vmatpush1.msra.mxu1 %v9823_v4  ;;  %v5348_v56 = vld [vmem:[#allocation14 + $0x1e0] sm:$0xff]  ;;  %v5345_v4 = vld [vmem:[#allocation14 + $0x1c8] sm:$0xff] }
 0x7fb   :  { %5145 = vmatprep.subr.mxu0 %v9827_v48  ;;  %5216 = vmatprep.subr.mxu1 %v9829_v31  ;;  %v9841_v12 = vmul.f32 %v6435_v28, %v4839_v21  ;;  %v5344_v28 = vld [vmem:[#allocation14 + $0x1c0] sm:$0xff]  ;;  %v5341_v21 = vld [vmem:[#allocation14 + $0x1a8] sm:$0xff] }
 0x7fc   :  { %5146 = vmatpush1.msra.mxu0 %v9833_v17  ;;  %5179 = vmatprep.mubr.f32.mxu0 %v10607_v3  ;;  %v5337_v17 = vld [vmem:[#allocation14 + $0x188] sm:$0xff]  ;;  %v5336_v31 = vld [vmem:[#allocation14 + $0x180] sm:$0xff] }
 0x7fd   :  { %5217 = vmatpush1.msra.mxu1 %v9837_v40  ;;  %5250 = vmatprep.mubr.f32.mxu1 %v10607_v3  ;;  %v5340_v40 = vld [vmem:[#allocation14 + $0x1a0] sm:$0xff] }
 0x7fe   :  { %5180 = vmatmul.mubr.f32.vlgmr.msra.gmra.mxu0 %v9841_v12  ;;  %5251 = vmatmul.mubr.f32.vlgmr.msra.gmra.mxu1 %v9841_v12 }
 0x7ff   :  { %5352 = vmatprep.subr.mxu0 %v5349_v8  ;;  %5423 = vmatprep.subr.mxu1 %v9301_v22  ;;  %v5333_v22 = vld [vmem:[#allocation14 + $0x168] sm:$0xff]  ;;  %v11458_v8 = vld [vmem:[#allocation145_spill] sm:$0xff] }
 0x800   :  { %5353 = vmatpush1.msra.mxu0 %v5348_v56  ;;  %5424 = vmatpush1.msra.mxu1 %v9305_v30  ;;  %v5332_v30 = vld [vmem:[#allocation14 + $0x160] sm:$0xff]  ;;  %v11457_v56 = vld [vmem:[#allocation144_spill] sm:$0xff] }
 0x801   :  { %5354 = vmatprep.subr.mxu0 %v5345_v4  ;;  %5425 = vmatprep.subr.mxu1 %v9309_v6  ;;  %v5329_v6 = vld [vmem:[#allocation14 + $0x148] sm:$0xff] }
 0x802   :  { %5355 = vmatpush1.msra.mxu0 %v5344_v28  ;;  %5426 = vmatpush1.msra.mxu1 %v9313_v29  ;;  %v5328_v29 = vld [vmem:[#allocation14 + $0x140] sm:$0xff]  ;;  %v11456_v4 = vld [vmem:[#allocation143_spill] sm:$0xff] }
 0x803   :  { %5356 = vmatprep.subr.mxu0 %v5341_v21  ;;  %5427 = vmatprep.subr.mxu1 %v9317_v61  ;;  %v5325_v61 = vld [vmem:[#allocation14 + $0x128] sm:$0xff]  ;;  %v11459_v28 = vld [vmem:[#allocation146_spill] sm:$0xff] }
 0x804   :  { %5357 = vmatpush1.msra.mxu0 %v5340_v40  ;;  %5428 = vmatpush1.msra.mxu1 %v9321_v23  ;;  %v5324_v23 = vld [vmem:[#allocation14 + $0x120] sm:$0xff]  ;;  %v11452_v40 = vld [vmem:[#allocation156_spill] sm:$0xff]  ;;  %v11460_v21 = vld [vmem:[#allocation147_spill] sm:$0xff] }
 0x805   :  { %5358 = vmatprep.subr.mxu0 %v5337_v17  ;;  %5429 = vmatprep.subr.mxu1 %v9325_v49  ;;  %v5321_v49 = vld [vmem:[#allocation14 + $0x108] sm:$0xff]  ;;  %v11453_v17 = vld [vmem:[#allocation169_spill] sm:$0xff] }
 0x806   :  { %5359 = vmatpush1.msra.mxu0 %v5336_v31  ;;  %5430 = vmatpush1.msra.mxu1 %v9329_v0  ;;  %v5320_v0 = vld [vmem:[#allocation14 + $0x100] sm:$0xff] }
 0x807   :  { %5360 = vmatprep.subr.mxu0 %v5333_v22  ;;  %5431 = vmatprep.subr.mxu1 %v9333_v20  ;;  %v5317_v20 = vld [vmem:[#allocation14 + $0xe8] sm:$0xff]  ;;  %v11454_v31 = vld [vmem:[#allocation170_spill] sm:$0xff] }
 0x808   :  { %5361 = vmatpush1.msra.mxu0 %v5332_v30  ;;  %5432 = vmatpush1.msra.mxu1 %v9337_v58  ;;  %v5316_v58 = vld [vmem:[#allocation14 + $0xe0] sm:$0xff]  ;;  %v11461_v22 = vld [vmem:[#allocation151_spill] sm:$0xff]  ;;  %v11462_v30 = vld [vmem:[#allocation152_spill] sm:$0xff] }
 0x809   :  { %5362 = vmatprep.subr.mxu0 %v5329_v6  ;;  %5433 = vmatprep.subr.mxu1 %v9341_v26  ;;  %v5313_v26 = vld [vmem:[#allocation14 + $0xc8] sm:$0xff]  ;;  %v11463_v6 = vld [vmem:[#allocation165_spill] sm:$0xff] }
 0x80a   :  { %5363 = vmatpush1.msra.mxu0 %v5328_v29  ;;  %5434 = vmatpush1.msra.mxu1 %v9345_v39  ;;  %v5312_v39 = vld [vmem:[#allocation14 + $0xc0] sm:$0xff] }
 0x80b   :  { %5364 = vmatprep.subr.mxu0 %v5325_v61  ;;  %5435 = vmatprep.subr.mxu1 %v9349_v16  ;;  %v5309_v16 = vld [vmem:[#allocation14 + $0xa8] sm:$0xff]  ;;  %v11464_v29 = vld [vmem:[#allocation166_spill] sm:$0xff] }
 0x80c   :  { %5365 = vmatpush1.msra.mxu0 %v5324_v23  ;;  %5436 = vmatpush1.msra.mxu1 %v9353_v60  ;;  %v5308_v60 = vld [vmem:[#allocation14 + $0xa0] sm:$0xff]  ;;  %v11465_v61 = vld [vmem:[#allocation27_spill] sm:$0xff]  ;;  %v11466_v23 = vld [vmem:[#allocation28_spill] sm:$0xff] }
 0x80d   :  { %5366 = vmatprep.subr.mxu0 %v5321_v49  ;;  %5437 = vmatprep.subr.mxu1 %v9357_v59  ;;  %v5305_v59 = vld [vmem:[#allocation14 + $0x88] sm:$0xff]  ;;  %v11467_v49 = vld [vmem:[#allocation29_spill] sm:$0xff] }
 0x80e   :  { %5367 = vmatpush1.msra.mxu0 %v5320_v0  ;;  %5438 = vmatpush1.msra.mxu1 %v9361_v54  ;;  %v5304_v54 = vld [vmem:[#allocation14 + $0x80] sm:$0xff] }
 0x80f   :  { %5368 = vmatprep.subr.mxu0 %v5317_v20  ;;  %5439 = vmatprep.subr.mxu1 %v9365_v41  ;;  %v5301_v41 = vld [vmem:[#allocation14 + $0x68] sm:$0xff]  ;;  %v11468_v0 = vld [vmem:[#allocation30_spill] sm:$0xff] }
 0x810   :  { %5369 = vmatpush1.msra.mxu0 %v5316_v58  ;;  %5440 = vmatpush1.msra.mxu1 %v9369_v50  ;;  %v5300_v50 = vld [vmem:[#allocation14 + $0x60] sm:$0xff]  ;;  %v11469_v20 = vld [vmem:[#allocation31_spill] sm:$0xff]  ;;  %v11470_v58 = vld [vmem:[#allocation32_spill] sm:$0xff] }
 0x811   :  { %5370 = vmatprep.subr.mxu0 %v5313_v26  ;;  %5441 = vmatprep.subr.mxu1 %v9373_v27  ;;  %v5297_v27 = vld [vmem:[#allocation14 + $0x48] sm:$0xff]  ;;  %v11471_v26 = vld [vmem:[#allocation33_spill] sm:$0xff] }
 0x812   :  { %5371 = vmatpush1.msra.mxu0 %v5312_v39  ;;  %5442 = vmatpush1.msra.mxu1 %v9377_v14  ;;  %v5296_v14 = vld [vmem:[#allocation14 + $0x40] sm:$0xff] }
 0x813   :  { %5372 = vmatprep.subr.mxu0 %v5309_v16  ;;  %5443 = vmatprep.subr.mxu1 %v9381_v52  ;;  %v5293_v52 = vld [vmem:[#allocation14 + $0x28] sm:$0xff]  ;;  %v11472_v39 = vld [vmem:[#allocation34_spill] sm:$0xff] }
 0x814   :  { %5373 = vmatpush1.msra.mxu0 %v5308_v60  ;;  %5444 = vmatpush1.msra.mxu1 %v9385_v62  ;;  %v5292_v62 = vld [vmem:[#allocation14 + $0x20] sm:$0xff]  ;;  %v11473_v16 = vld [vmem:[#allocation35_spill] sm:$0xff]  ;;  %v11474_v60 = vld [vmem:[#allocation36_spill] sm:$0xff] }
 0x815   :  { %5374 = vmatprep.subr.mxu0 %v5305_v59  ;;  %5445 = vmatprep.subr.mxu1 %v9389_v36  ;;  %v5289_v36 = vld [vmem:[#allocation14 + $0x8] sm:$0xff]  ;;  %v11475_v59 = vld [vmem:[#allocation37_spill] sm:$0xff] }
 0x816   :  { %5375 = vmatpush1.msra.mxu0 %v5304_v54  ;;  %5446 = vmatpush1.msra.mxu1 %v9393_v57  ;;  %v5288_v57 = vld [vmem:[#allocation14] sm:$0xff] }
 0x817   :  { %5376 = vmatprep.subr.mxu0 %v5301_v41  ;;  %5447 = vmatprep.subr.mxu1 %v9397_v34  ;;  %v11439_v34 = vld [vmem:[#allocation129_spill] sm:$0xff]  ;;  %v11476_v54 = vld [vmem:[#allocation38_spill] sm:$0xff]  ;;  %v11477_v41 = vld [vmem:[#allocation39_spill] sm:$0xff] }
 0x818   :  { %5377 = vmatpush1.msra.mxu0 %v5300_v50  ;;  %5448 = vmatpush1.msra.mxu1 %v9401_v32  ;;  %v11440_v32 = vld [vmem:[#allocation130_spill] sm:$0xff]  ;;  %v11478_v50 = vld [vmem:[#allocation40_spill] sm:$0xff] }
 0x819   :  { %5378 = vmatprep.subr.mxu0 %v5297_v27  ;;  %5449 = vmatprep.subr.mxu1 %v9405_v33  ;;  %v11441_v33 = vld [vmem:[#allocation131_spill] sm:$0xff]  ;;  %v11479_v27 = vld [vmem:[#allocation41_spill] sm:$0xff] }
 0x81a   :  { %5379 = vmatpush1.msra.mxu0 %v5296_v14  ;;  %5450 = vmatpush1.msra.mxu1 %v9409_v42  ;;  %v11442_v42 = vld [vmem:[#allocation132_spill] sm:$0xff]  ;;  %v11480_v14 = vld [vmem:[#allocation42_spill] sm:$0xff] }
 0x81b   :  { %5380 = vmatprep.subr.mxu0 %v5293_v52  ;;  %5451 = vmatprep.subr.mxu1 %v9413_v45  ;;  %v11443_v45 = vld [vmem:[#allocation133_spill] sm:$0xff]  ;;  %v11481_v52 = vld [vmem:[#allocation43_spill] sm:$0xff] }
 0x81c   :  { %5381 = vmatpush1.msra.mxu0 %v5292_v62  ;;  %5452 = vmatpush1.msra.mxu1 %v9417_v38  ;;  %v11444_v38 = vld [vmem:[#allocation134_spill] sm:$0xff]  ;;  %v11482_v62 = vld [vmem:[#allocation44_spill] sm:$0xff] }
 0x81d   :  { %5382 = vmatprep.subr.mxu0 %v5289_v36  ;;  %5453 = vmatprep.subr.mxu1 %v9421_v51  ;;  %v11445_v51 = vld [vmem:[#allocation135_spill] sm:$0xff]  ;;  %v11483_v36 = vld [vmem:[#allocation45_spill] sm:$0xff] }
 0x81e   :  { %5383 = vmatpush1.msra.mxu0 %v5288_v57  ;;  %5416 = vmatprep.mubr.f32.mxu0 %v10607_v3  ;;  %v11484_v57 = vld [vmem:[#allocation46_spill] sm:$0xff] }
 0x81f   :  { %5454 = vmatpush1.msra.mxu1 %v9427_v1  ;;  %5487 = vmatprep.mubr.f32.mxu1 %v10607_v3  ;;  %v11446_v1 = vld [vmem:[#allocation136_spill] sm:$0xff] }
 0x820   :  { %5417 = vmatmul.mubr.f32.vlgmr.msra.gmra.mxu0 %v9841_v12  ;;  %5488 = vmatmul.mubr.f32.vlgmr.msra.gmra.mxu1 %v9841_v12  ;;  %v11455_v12 = vld [vmem:[#allocation142_spill] sm:$0xff] }
 0x821   :  { %5644 = vmatprep.subr.mxu0 %v9439_v10  ;;  %5715 = vmatprep.subr.mxu1 %v9441_v7  ;;  %v11447_v10 = vld [vmem:[#allocation137_spill] sm:$0xff]  ;;  %v11448_v7 = vld [vmem:[#allocation138_spill] sm:$0xff] }
 0x822   :  { %5645 = vmatpush1.msra.mxu0 %v9445_v5  ;;  %5716 = vmatpush1.msra.mxu1 %v9447_v46  ;;  %v11449_v5 = vld [vmem:[#allocation139_spill] sm:$0xff]  ;;  %v11450_v46 = vld [vmem:[#allocation140_spill] sm:$0xff] }
 0x823   :  { %5646 = vmatprep.subr.mxu0 %v9451_v25  ;;  %5717 = vmatprep.subr.mxu1 %v11439_v34  ;;  %v11451_v25 = vld [vmem:[#allocation155_spill] sm:$0xff] }
 0x824   :  { %5647 = vmatpush1.msra.mxu0 %v11440_v32  ;;  %5718 = vmatpush1.msra.mxu1 %v11441_v33  ;;  %v11485_v34 = vld [vmem:[#allocation47_spill] sm:$0xff]  ;;  %v11486_v32 = vld [vmem:[#allocation48_spill] sm:$0xff]  ;;  %v11487_v33 = vld [vmem:[#allocation49_spill] sm:$0xff] }
 0x825   :  { %5648 = vmatprep.subr.mxu0 %v11442_v42  ;;  %5719 = vmatprep.subr.mxu1 %v11443_v45  ;;  %v11488_v42 = vld [vmem:[#allocation50_spill] sm:$0xff]  ;;  %v11489_v45 = vld [vmem:[#allocation51_spill] sm:$0xff] }
 0x826   :  { %5649 = vmatpush1.msra.mxu0 %v11444_v38  ;;  %5720 = vmatpush1.msra.mxu1 %v11445_v51  ;;  %v11490_v38 = vld [vmem:[#allocation52_spill] sm:$0xff]  ;;  %v11491_v51 = vld [vmem:[#allocation53_spill] sm:$0xff] }
 0x827   :  { %5650 = vmatprep.subr.mxu0 %v11446_v1  ;;  %5721 = vmatprep.subr.mxu1 %v11447_v10  ;;  %v11492_v1 = vld [vmem:[#allocation54_spill] sm:$0xff]  ;;  %v11493_v10 = vld [vmem:[#allocation55_spill] sm:$0xff] }
 0x828   :  { %5651 = vmatpush1.msra.mxu0 %v11448_v7  ;;  %5722 = vmatpush1.msra.mxu1 %v11449_v5  ;;  %v11494_v7 = vld [vmem:[#allocation56_spill] sm:$0xff]  ;;  %v11495_v5 = vld [vmem:[#allocation57_spill] sm:$0xff] }
 0x829   :  { %5652 = vmatprep.subr.mxu0 %v11450_v46  ;;  %5723 = vmatprep.subr.mxu1 %v11451_v25  ;;  %v11496_v46 = vld [vmem:[#allocation58_spill] sm:$0xff]  ;;  %v11497_v25 = vld [vmem:[#allocation59_spill] sm:$0xff] }
 0x82a   :  { %5653 = vmatpush1.msra.mxu0 %v11452_v40  ;;  %5724 = vmatpush1.msra.mxu1 %v11453_v17  ;;  %v11498_v40 = vld [vmem:[#allocation60_spill] sm:$0xff]  ;;  %v11499_v17 = vld [vmem:[#allocation61_spill] sm:$0xff] }
 0x82b   :  { %5654 = vmatprep.subr.mxu0 %v11454_v31  ;;  %5725 = vmatprep.subr.mxu1 %v11455_v12 }
 0x82c   :  { %5655 = vmatpush1.msra.mxu0 %v11456_v4  ;;  %5726 = vmatpush1.msra.mxu1 %v11457_v56 }
 0x82d   :  { %5656 = vmatprep.subr.mxu0 %v11458_v8  ;;  %5727 = vmatprep.subr.mxu1 %v11459_v28 }
 0x82e   :  { %5657 = vmatpush1.msra.mxu0 %v11460_v21  ;;  %5728 = vmatpush1.msra.mxu1 %v11461_v22 }
 0x82f   :  { %5658 = vmatprep.subr.mxu0 %v11462_v30  ;;  %5729 = vmatprep.subr.mxu1 %v11463_v6 }
 0x830   :  { %5659 = vmatpush1.msra.mxu0 %v11464_v29  ;;  %5730 = vmatpush1.msra.mxu1 %v11465_v61 }
 0x831   :  { %5660 = vmatprep.subr.mxu0 %v11466_v23  ;;  %5731 = vmatprep.subr.mxu1 %v11467_v49 }
 0x832   :  { %5661 = vmatpush1.msra.mxu0 %v11468_v0  ;;  %5732 = vmatpush1.msra.mxu1 %v11469_v20 }
 0x833   :  { %5662 = vmatprep.subr.mxu0 %v11470_v58  ;;  %5733 = vmatprep.subr.mxu1 %v11471_v26 }
 0x834   :  { %5663 = vmatpush1.msra.mxu0 %v11472_v39  ;;  %5734 = vmatpush1.msra.mxu1 %v11473_v16 }
 0x835   :  { %5664 = vmatprep.subr.mxu0 %v11474_v60  ;;  %5735 = vmatprep.subr.mxu1 %v11475_v59 }
 0x836   :  { %5665 = vmatpush1.msra.mxu0 %v11476_v54  ;;  %5736 = vmatpush1.msra.mxu1 %v11477_v41 }
 0x837   :  { %5666 = vmatprep.subr.mxu0 %v11478_v50  ;;  %5737 = vmatprep.subr.mxu1 %v11479_v27 }
 0x838   :  { %5667 = vmatpush1.msra.mxu0 %v11480_v14  ;;  %5738 = vmatpush1.msra.mxu1 %v11481_v52 }
 0x839   :  { %5668 = vmatprep.subr.mxu0 %v11482_v62  ;;  %5739 = vmatprep.subr.mxu1 %v11483_v36 }
 0x83a   :  { %5669 = vmatpush1.msra.mxu0 %v11484_v57  ;;  %5740 = vmatpush1.msra.mxu1 %v11485_v34  ;;  %v11500_v57 = vld [vmem:[#allocation161_spill] sm:$0xff] }
 0x83b   :  { %5670 = vmatprep.subr.mxu0 %v11486_v32  ;;  %5741 = vmatprep.subr.mxu1 %v11487_v33 }
 0x83c   :  { %5671 = vmatpush1.msra.mxu0 %v11488_v42  ;;  %5742 = vmatpush1.msra.mxu1 %v11489_v45 }
 0x83d   :  { %5672 = vmatprep.subr.mxu0 %v11490_v38  ;;  %5743 = vmatprep.subr.mxu1 %v11491_v51  ;;  %v11501_v38 = vld [vmem:[#allocation162_spill] sm:$0xff] }
 0x83e   :  { %5673 = vmatpush1.msra.mxu0 %v11492_v1  ;;  %5744 = vmatpush1.msra.mxu1 %v11493_v10  ;;  %v11502_v10 = vld [vmem:[#allocation175_spill] sm:$0xff] }
 0x83f   :  { %5674 = vmatprep.subr.mxu0 %v11494_v7  ;;  %5745 = vmatprep.subr.mxu1 %v11495_v5 }
 0x840   :  { %5675 = vmatpush1.msra.mxu0 %v11496_v46  ;;  %5746 = vmatpush1.msra.mxu1 %v11497_v25 }
 0x841   :  { %5708 = vmatprep.mubr.f32.mxu0 %v10607_v3  ;;  %5779 = vmatprep.mubr.f32.mxu1 %v10607_v3 }
 0x842   :  { %5786 = vmatprep.subr.mxu0 %v11498_v40  ;;  %5857 = vmatprep.subr.mxu1 %v11499_v17  ;;  %v11503_v17 = vld [vmem:[#allocation176_spill] sm:$0xff] }
 0x89d   :  { %v5039_v31 = vpop.f32.mrf.mxu0  ;;  %v5110_v12 = vpop.f32.mrf.mxu1 }
 0x89f   :  { %v5041_v4 = vpop.f32.mrf.mxu0  ;;  %v5112_v56 = vpop.f32.mrf.mxu1 }
 0x8be   :  { %v5181_v8 = vpop.f32.mrf.mxu0  ;;  %v5252_v21 = vpop.f32.mrf.mxu1 }
 0x8bf   :  { %v5182_v28 = vadd.f32 %v5181_v8, %v5039_v31  ;;  %v5253_v61 = vadd.f32 %v5252_v21, %v5110_v12  ;;  %v11504_v12 = vld [vmem:[#allocation63_spill] sm:$0xff]  ;;  %v11506_v8 = vld [vmem:[#allocation65_spill] sm:$0xff] }
 0x8c0   :  { %v5183_v22 = vpop.f32.mrf.mxu0  ;;  %v5254_v0 = vpop.f32.mrf.mxu1 }
 0x8c1   :  { %v5257_v30 = vadd.f32 %v5182_v28, %v7540_v43  ;;  %v5184_v6 = vadd.f32 %v5183_v22, %v5041_v4  ;;  %v5259_v20 = vadd.f32 %v5253_v61, %v7549_v55  ;;  %v5255_v58 = vadd.f32 %v5254_v0, %v5112_v56  ;;  %v11505_v4 = vld [vmem:[#allocation64_spill] sm:$0xff]  ;;  %v11507_v28 = vld [vmem:[#allocation66_spill] sm:$0xff]  ;;  %v11508_v22 = vld [vmem:[#allocation67_spill] sm:$0xff] }
 0x8c2   :  { %v11515_v0 = vld [vmem:[#allocation74_spill] sm:$0xff] }
 0x8c3   :  { %v5261_v29 = vmul.f32 0.5, %v5257_v30  ;;  %v5258_v23 = vadd.f32 %v5184_v6, %v7544_v63  ;;  %v5260_v26 = vadd.f32 %v5255_v58, %v7555_v35  ;;  %v11509_v30 = vld [vmem:[#allocation68_spill] sm:$0xff]  ;;  %v11512_v6 = vld [vmem:[#allocation71_spill] sm:$0xff] }
 0x8c4   :  { %v11516_v58 = vld [vmem:[#allocation75_spill] sm:$0xff] }
 0x8c5   :  { %6436 = vtanh.f32 %v5261_v29  ;;  %v5265_v49 = vmul.f32 0.5, %v5258_v23  ;;  %v5270_v39 = vmul.f32 0.5, %v5260_v26  ;;  %v11513_v29 = vld [vmem:[#allocation72_spill] sm:$0xff] }
 0x8c6   :  { %v11517_v26 = vld [vmem:[#allocation76_spill] sm:$0xff] }
 0x8c7   :  { %6438 = vtanh.f32 %v5265_v49  ;;  %v11514_v49 = vld [vmem:[#allocation73_spill] sm:$0xff] }
 0x8c8   :  { %6440 = vtanh.f32 %v5259_v20 }
 0x8c9   :  { %6442 = vtanh.f32 %v5270_v39 }
 0x8d2   :  { %v6437_v16 = vpop.eup %6436 }
 0x8d3   :  { %v5263_v60 = vmul.f32 0.5, %v6437_v16 }
 0x8d4   :  { %v6439_v59 = vpop.eup %6438 }
 0x8d5   :  { %v5264_v54 = vadd.f32 0.5, %v5263_v60  ;;  %v5267_v41 = vmul.f32 0.5, %v6439_v59  ;;  %v6441_v27 = vpop.eup %6440  ;;  %v11518_v60 = vld [vmem:[#allocation77_spill] sm:$0xff] }
 0x8d6   :  { %v6443_v32 = vpop.eup %6442  ;;  %v11519_v59 = vld [vmem:[#allocation157_spill] sm:$0xff] }
 0x8d7   :  { %v5268_v50 = vadd.f32 0.5, %v5267_v41  ;;  %v5275_v52 = vmul.f32 %v6441_v27, %v5264_v54  ;;  %v5272_v1 = vmul.f32 0.5, %v6443_v32  ;;  %v11520_v41 = vld [vmem:[#allocation158_spill] sm:$0xff]  ;;  %v11522_v27 = vld [vmem:[#allocation172_spill] sm:$0xff] }
 0x8d8   :  { %v11531_v32 = vld [vmem:[#allocation150_spill] sm:$0xff] }
 0x8d9   :  { %v5274_v14 = vmul.f32 %v5268_v50, %v9642_v18  ;;  %v5273_v18 = vadd.f32 0.5, %v5272_v1  ;;  %v11521_v50 = vld [vmem:[#allocation171_spill] sm:$0xff] }
 0x8db   :  { %v9958_v62 = vadd.f32 %v5275_v52, %v5274_v14  ;;  %v11523_v52 = vld [vmem:[#allocation79_spill] sm:$0xff] }
 0x8dd   :  { %6444 = vtanh.f32 %v9958_v62 }
 0x8e0   :  { %v5418_v36 = vpop.f32.mrf.mxu0  ;;  %v5489_v33 = vpop.f32.mrf.mxu1 }
 0x8e1   :  { %v5494_v34 = vadd.f32 %v5418_v36, %v11500_v57  ;;  %v5496_v7 = vadd.f32 %v5489_v33, %v11502_v10  ;;  %v11526_v36 = vld [vmem:[#allocation82_spill] sm:$0xff]  ;;  %v11527_v57 = vld [vmem:[#allocation83_spill] sm:$0xff]  ;;  %v11532_v33 = vld [vmem:[#allocation153_spill] sm:$0xff] }
 0x8e2   :  { %v5420_v42 = vpop.f32.mrf.mxu0  ;;  %v5491_v25 = vpop.f32.mrf.mxu1  ;;  %v11537_v10 = vld [vmem:[#allocation85_spill] sm:$0xff] }
 0x8e3   :  { %v5498_v45 = vmul.f32 0.5, %v5494_v34  ;;  %v5495_v51 = vadd.f32 %v5420_v42, %v11501_v38  ;;  %v5497_v31 = vadd.f32 %v5491_v25, %v11503_v17  ;;  %v11530_v34 = vld [vmem:[#allocation149_spill] sm:$0xff]  ;;  %v11533_v42 = vld [vmem:[#allocation154_spill] sm:$0xff]  ;;  %v11535_v38 = vld [vmem:[#allocation168_spill] sm:$0xff] }
 0x8e4   :  { %v11542_v25 = vld [vmem:[#allocation90_spill] sm:$0xff] }
 0x8e5   :  { %6446 = vtanh.f32 %v5498_v45  ;;  %v5502_v5 = vmul.f32 0.5, %v5495_v51  ;;  %v5507_v56 = vmul.f32 0.5, %v5497_v31  ;;  %v11534_v45 = vld [vmem:[#allocation167_spill] sm:$0xff]  ;;  %v11536_v51 = vld [vmem:[#allocation164_spill] sm:$0xff] }
 0x8e6   :  { %v11543_v31 = vld [vmem:[#allocation91_spill] sm:$0xff] }
 0x8e7   :  { %6448 = vtanh.f32 %v5502_v5  ;;  %v11539_v5 = vld [vmem:[#allocation87_spill] sm:$0xff] }
 0x8e8   :  { %6450 = vtanh.f32 %v5496_v7  ;;  %v11538_v7 = vld [vmem:[#allocation86_spill] sm:$0xff] }
 0x8e9   :  { %6452 = vtanh.f32 %v5507_v56  ;;  %v11546_v56 = vld [vmem:[#allocation94_spill] sm:$0xff] }
 0x8ea   :  { %v6445_v46 = vpop.eup %6444 }
 0x8eb   :  { %v9964_v40 = vmul.f32 %v6445_v46, %v5273_v18  ;;  %v11540_v18 = vld [vmem:[#allocation88_spill] sm:$0xff]  ;;  %v11541_v46 = vld [vmem:[#allocation89_spill] sm:$0xff] }
 0x8ed   :  { %5709 = vmatmul.mubr.f32.vlgmr.msra.gmra.mxu0 %v9964_v40  ;;  %5780 = vmatmul.mubr.f32.vlgmr.msra.gmra.mxu1 %v9964_v40 }
 0x8ee   :  { %5787 = vmatpush1.msra.mxu0 %v9650_v47  ;;  %5858 = vmatpush1.msra.mxu1 %v9652_v24  ;;  %v11510_v24 = vld [vmem:[#allocation69_spill] sm:$0xff] }
 0x8ef   :  { %5788 = vmatprep.subr.mxu0 %v9654_v13  ;;  %5859 = vmatprep.subr.mxu1 %v9656_v15  ;;  %v11511_v13 = vld [vmem:[#allocation70_spill] sm:$0xff] }
 0x8f0   :  { %5789 = vmatpush1.msra.mxu0 %v11504_v12  ;;  %5860 = vmatpush1.msra.mxu1 %v11505_v4  ;;  %v11544_v12 = vld [vmem:[#allocation92_spill] sm:$0xff]  ;;  %v11545_v4 = vld [vmem:[#allocation93_spill] sm:$0xff] }
 0x8f1   :  { %5790 = vmatprep.subr.mxu0 %v11506_v8  ;;  %5861 = vmatprep.subr.mxu1 %v11507_v28  ;;  %v11547_v8 = vld [vmem:[#allocation95_spill] sm:$0xff]  ;;  %v11548_v28 = vld [vmem:[#allocation96_spill] sm:$0xff] }
 0x8f2   :  { %v6447_v21 = vpop.eup %6446  ;;  %5791 = vmatpush1.msra.mxu0 %v11508_v22  ;;  %5862 = vmatpush1.msra.mxu1 %v11509_v30 }
 0x8f3   :  { %v5500_v47 = vmul.f32 0.5, %v6447_v21  ;;  %5792 = vmatprep.subr.mxu0 %v11510_v24  ;;  %5863 = vmatprep.subr.mxu1 %v11511_v13  ;;  %v11549_v21 = vld [vmem:[#allocation97_spill] sm:$0xff]  ;;  %v11551_v24 = vld [vmem:[#allocation99_spill] sm:$0xff]  ;;  %v11552_v13 = vld [vmem:[#allocation100_spill] sm:$0xff] }
 0x8f4   :  { %v6449_v15 = vpop.eup %6448  ;;  %5793 = vmatpush1.msra.mxu0 %v11512_v6  ;;  %5864 = vmatpush1.msra.mxu1 %v11513_v29  ;;  %v6298_v6 = vld [vmem:[#allocation19 + $0x38] sm:$0xff]  }
 0x8f5   :  { %v5501_v61 = vadd.f32 0.5, %v5500_v47  ;;  %v5504_v23 = vmul.f32 0.5, %v6449_v15  ;;  %5794 = vmatprep.subr.mxu0 %v11514_v49  ;;  %5865 = vmatprep.subr.mxu1 %v11515_v0  ;;  %v6451_v20 = vpop.eup %6450  ;;  %v11550_v47 = vld [vmem:[#allocation98_spill] sm:$0xff]  ;;  %v11553_v29 = vld [vmem:[#allocation101_spill] sm:$0xff] }
 0x8f6   :  { %5795 = vmatpush1.msra.mxu0 %v11516_v58  ;;  %5866 = vmatpush1.msra.mxu1 %v11517_v26  ;;  %v6453_v1 = vpop.eup %6452  ;;  %v6301_v49 = vld [vmem:[#allocation19 + $0x20] sm:$0xff]   ;;  %v6302_v0 = vld [vmem:[#allocation19 + $0x18] sm:$0xff]  }
 0x8f7   :  { %v5505_v39 = vadd.f32 0.5, %v5504_v23  ;;  %v5512_v16 = vmul.f32 %v6451_v20, %v5501_v61  ;;  %5796 = vmatprep.subr.mxu0 %v9703_v37  ;;  %5867 = vmatprep.subr.mxu1 %v9705_v53  ;;  %v11524_v37 = vld [vmem:[#allocation80_spill] sm:$0xff]  ;;  %v11525_v53 = vld [vmem:[#allocation81_spill] sm:$0xff]  ;;  %v5509_v17 = vmul.f32 0.5, %v6453_v1  ;;  %v6304_v20 = vld [vmem:[#allocation19 + $0x8] sm:$0xff]  }
 0x8f8   :  { %5797 = vmatpush1.msra.mxu0 %v11518_v60  ;;  %5868 = vmatpush1.msra.mxu1 %v11519_v59  ;;  %v6299_v23 = vld [vmem:[#allocation19 + $0x30] sm:$0xff]   ;;  %v6305_v58 = vld [vmem:[#allocation19] sm:$0xff]   ;;  %v11557_v26 = vld [vmem:[#allocation141_spill] sm:$0xff] }
 0x8f9   :  { %v5511_v54 = vmul.f32 %v5505_v39, %v9744_v44  ;;  %5798 = vmatprep.subr.mxu0 %v9715_v11  ;;  %5869 = vmatprep.subr.mxu1 %v11520_v41  ;;  %v11528_v44 = vld [vmem:[#allocation84_spill] sm:$0xff]  ;;  %v5510_v22 = vadd.f32 0.5, %v5509_v17  ;;  %v11558_v39 = vld [vmem:[#allocation78_spill] sm:$0xff] }
 0x8fa   :  { %5799 = vmatpush1.msra.mxu0 %v11521_v50  ;;  %5870 = vmatpush1.msra.mxu1 %v11522_v27  ;;  %v11529_v11 = vld [vmem:[#allocation148_spill] sm:$0xff]  ;;  %v11560_v59 = vld [vmem:[#allocation62_spill] sm:$0xff] }
 0x8fb   :  { %v5513_v14 = vadd.f32 %v5512_v16, %v5511_v54  ;;  %5800 = vmatprep.subr.mxu0 %v11523_v52  ;;  %5871 = vmatprep.subr.mxu1 %v11524_v37  ;;  %v5965_v16 = vpack.c.bf16 %v11558_v39, %v11557_v26  ;;  %v11559_v60 = vld [vmem:[#allocation128_spill] sm:$0xff] }
 0x8fc   :  { %5801 = vmatpush1.msra.mxu0 %v11525_v53  ;;  %5872 = vmatpush1.msra.mxu1 %v11526_v36  ;;  %v5966_v54 = vpack.c.bf16 %v11560_v59, %v11559_v60 }
 0x8fd   :  { %6454 = vtanh.f32 %v5513_v14  ;;  %5802 = vmatprep.subr.mxu0 %v11527_v57  ;;  %5873 = vmatprep.subr.mxu1 %v11528_v44 }
 0x8fe   :  { %5803 = vmatpush1.msra.mxu0 %v11529_v11  ;;  %5874 = vmatpush1.msra.mxu1 %v11530_v34 }
 0x8ff   :  { %5804 = vmatprep.subr.mxu0 %v11531_v32  ;;  %5875 = vmatprep.subr.mxu1 %v11532_v33 }
 0x900   :  { %5805 = vmatpush1.msra.mxu0 %v11533_v42  ;;  %5876 = vmatpush1.msra.mxu1 %v11534_v45 }
 0x901   :  { %5806 = vmatprep.subr.mxu0 %v11535_v38  ;;  %5877 = vmatprep.subr.mxu1 %v11536_v51 }
 0x902   :  { %5807 = vmatpush1.msra.mxu0 %v11537_v10  ;;  %5878 = vmatpush1.msra.mxu1 %v11538_v7 }
 0x903   :  { %5808 = vmatprep.subr.mxu0 %v11539_v5  ;;  %5879 = vmatprep.subr.mxu1 %v11540_v18 }
 0x904   :  { %5809 = vmatpush1.msra.mxu0 %v11541_v46  ;;  %5880 = vmatpush1.msra.mxu1 %v11542_v25 }
 0x905   :  { %5810 = vmatprep.subr.mxu0 %v11543_v31  ;;  %5881 = vmatprep.subr.mxu1 %v11544_v12 }
 0x906   :  { %5811 = vmatpush1.msra.mxu0 %v11545_v4  ;;  %5882 = vmatpush1.msra.mxu1 %v11546_v56 }
 0x907   :  { %5812 = vmatprep.subr.mxu0 %v11547_v8  ;;  %5883 = vmatprep.subr.mxu1 %v11548_v28 }
 0x908   :  { %5813 = vmatpush1.msra.mxu0 %v9809_v9  ;;  %5884 = vmatpush1.msra.mxu1 %v11549_v21  ;;  %v11554_v9 = vld [vmem:[#allocation102_spill] sm:$0xff] }
 0x909   :  { %5814 = vmatprep.subr.mxu0 %v9815_v2  ;;  %5885 = vmatprep.subr.mxu1 %v9817_v19  ;;  %v11555_v19 = vld [vmem:[#allocation26_spill] sm:$0xff]  ;;  %v11556_v2 = vld [vmem:[#allocation163_spill] sm:$0xff] }
 0x90a   :  { %v6455_v30 = vpop.eup %6454  ;;  %5815 = vmatpush1.msra.mxu0 %v11550_v47  ;;  %5886 = vmatpush1.msra.mxu1 %v11551_v24  ;;  %v5964_v61 = vpack.c.bf16 %v11556_v2, %v11555_v19 }
 0x90b   :  { %5816 = vmatprep.subr.mxu0 %v9827_v48  ;;  %5887 = vmatprep.subr.mxu1 %v11552_v13  ;;  %v5515_v15 = vmul.f32 %v6455_v30, %v5510_v22  ;;  %v6300_v48 = vld [vmem:[#allocation19 + $0x28] sm:$0xff]  }
 0x90c   :  { %5817 = vmatpush1.msra.mxu0 %v11553_v29  ;;  %5850 = vmatprep.mubr.f32.mxu0 %v10607_v3 }
 0x90d   :  { %5888 = vmatpush1.msra.mxu1 %v11554_v9  ;;  %5921 = vmatprep.mubr.f32.mxu1 %v10607_v3  ;;  %v6303_v3 = vld [vmem:[#allocation19 + $0x10] sm:$0xff]  }
 0x90e   :  { %5851 = vmatmul.mubr.f32.vlgmr.msra.gmra.mxu0 %v5515_v15  ;;  %5922 = vmatmul.mubr.f32.vlgmr.msra.gmra.mxu1 %v5515_v15 }
 0x90f   :  { %6204 = vmatprep.subr.bf16.mxu0 %v6298_v6  ;;  %6220 = vmatprep.mubr.bf16.mxu0 %v5964_v61 }
 0x910   :  { %6205 = vmatpush3.bf16.msra.mxu0 %v6298_v6 }
 0x911   :  { %6206 = vmatprep.subr.bf16.mxu0 %v6299_v23 }
 0x914   :  { %6207 = vmatpush3.bf16.msra.mxu0 %v6299_v23 }
 0x915   :  { %6208 = vmatprep.subr.bf16.mxu0 %v6300_v48 }
 0x918   :  { %6209 = vmatpush3.bf16.msra.mxu0 %v6300_v48 }
 0x919   :  { %6210 = vmatprep.subr.bf16.mxu0 %v6301_v49 }
 0x91c   :  { %6211 = vmatpush3.bf16.msra.mxu0 %v6301_v49 }
 0x91d   :  { %6212 = vmatprep.subr.bf16.mxu0 %v6302_v0 }
 0x920   :  { %6213 = vmatpush3.bf16.msra.mxu0 %v6302_v0 }
 0x921   :  { %6214 = vmatprep.subr.bf16.mxu0 %v6303_v3 }
 0x924   :  { %6215 = vmatpush3.bf16.msra.mxu0 %v6303_v3 }
 0x925   :  { %6216 = vmatprep.subr.bf16.mxu0 %v6304_v20 }
 0x928   :  { %6217 = vmatpush3.bf16.msra.mxu0 %v6304_v20 }
 0x929   :  { %6218 = vmatprep.subr.bf16.mxu0 %v6305_v58 }
 0x92c   :  { %6219 = vmatpush3.bf16.msra.mxu0 %v6305_v58 }
 0x92f   :  { %6221 = vmatmul.mubr.bf16.vlgmr.msra.gmra.mxu0 %v5965_v16 }
 0x930   :  { %6224 = vmatprep.mubr.bf16.mxu0 %v5966_v54 }
 0x9ad   :  { %v5710_v41 = vpop.f32.mrf.mxu0  ;;  %v5781_v50 = vpop.f32.mrf.mxu1 }
 0x9af   :  { %v5712_v27 = vpop.f32.mrf.mxu0  ;;  %v5783_v14 = vpop.f32.mrf.mxu1 }
 0x9ce   :  { %v5852_v52 = vpop.f32.mrf.mxu0  ;;  %v5923_v53 = vpop.f32.mrf.mxu1 }
 0x9cf   :  { %v5853_v37 = vadd.f32 %v5852_v52, %v5710_v41  ;;  %v5924_v34 = vadd.f32 %v5923_v53, %v5781_v50 }
 0x9d0   :  { %v5854_v36 = vpop.f32.mrf.mxu0  ;;  %v5925_v42 = vpop.f32.mrf.mxu1 }
 0x9d1   :  { %v5928_v57 = vadd.f32 %v5853_v37, %v7540_v43  ;;  %v5855_v44 = vadd.f32 %v5854_v36, %v5712_v27  ;;  %v5930_v45 = vadd.f32 %v5924_v34, %v7549_v55  ;;  %v5926_v38 = vadd.f32 %v5925_v42, %v5783_v14  ;;  %v6183_v55 = vld [vmem:[%s10060_s8] ss:$0 sm:$0xff]  ;;  %s6667_s8 = smov [#allocation20]  }
 0x9d2   :  { %s6125_s20 = sshll.u32 %s6667_s8, 4  ;;  %s6126_s20 = int_to_ptr.vmem [resolvable:$true] %s6125_s20 }
 0x9d3   :  { %v5932_v11 = vmul.f32 0.5, %v5928_v57  ;;  %v5929_v32 = vadd.f32 %v5855_v44, %v7544_v63  ;;  %v5931_v51 = vadd.f32 %v5926_v38, %v7555_v35  ;;  %s6622_s25 = scalar_lea.vmem %s6126_s20, 1024  ;;  %p6627_p8 = scmp.lt.s32.totalorder %s6126_s20, %s6126_s20 }
 0x9d4   :  { %p6623_p7 = scmp.ne.s32.totalorder %s6126_s20, %s6622_s25  ;;  %p6628_p9 = scmp.lt.s32.totalorder %s6622_s25, %s6622_s25 }
 0x9d5   :  { %6456 = vtanh.f32 %v5932_v11  ;;  %v5936_v33 = vmul.f32 0.5, %v5929_v32  ;;  %v5941_v1 = vmul.f32 0.5, %v5931_v51 }
 0x9d6   :  { %p6629_p10 = por %p6628_p9, %p6627_p8 }
 0x9d7   :  { %6458 = vtanh.f32 %v5936_v33 }
 0x9d8   :  { %6460 = vtanh.f32 %v5930_v45  ;;  %p6630_p11 = pnand %p6629_p10, %p6623_p7 }
 0x9d9   :  { %6462 = vtanh.f32 %v5941_v1 }
 0x9e2   :  { %v6457_v10 = vpop.eup %6456 }
 0x9e3   :  { %v5934_v7 = vmul.f32 0.5, %v6457_v10 }
 0x9e4   :  { %v6459_v5 = vpop.eup %6458 }
 0x9e5   :  { %v5935_v43 = vadd.f32 0.5, %v5934_v7  ;;  %v5938_v18 = vmul.f32 0.5, %v6459_v5  ;;  %v6461_v25 = vpop.eup %6460 }
 0x9e6   :  { %v6463_v56 = vpop.eup %6462 }
 0x9e7   :  { %v5939_v46 = vadd.f32 0.5, %v5938_v18  ;;  %v5946_v17 = vmul.f32 %v6461_v25, %v5935_v43  ;;  %v5943_v22 = vmul.f32 0.5, %v6463_v56 }
 0x9e9   :  { %v5945_v63 = vmul.f32 %v5939_v46, %v9958_v62  ;;  %v5944_v47 = vadd.f32 0.5, %v5943_v22 }
 0x9eb   :  { %v5947_v31 = vadd.f32 %v5946_v17, %v5945_v63 }
 0x9ed   :  { %6464 = vtanh.f32 %v5947_v31 }
 0x9ef   :  { %v6222_v12 = vpop.f32.mrf.mxu0 }
 0x9f0   :  { %v6082_v35 = vadd.f32 %v6222_v12, %v6183_v55 }
 0x9f1   :  { %v6073_v4 = vpop.f32.mrf.mxu0 }
 0x9f2   :  { %6466 = vtanh.f32 %v6082_v35  ;;  %v6074_v8 = vadd.f32 %v6183_v55, %v6073_v4 }
 0x9f3   :  { %v6223_v28 = vpop.f32.mrf.mxu0 }
 0x9f4   :  { %6468 = vtanh.f32 %v6074_v8  ;;  %v6085_v21 = vadd.f32 %v6223_v28, %v6183_v55 }
 0x9f5   :  { %v6076_v30 = vpop.f32.mrf.mxu0 }
 0x9f6   :  { %6470 = vtanh.f32 %v6085_v21  ;;  %v6077_v62 = vadd.f32 %v6183_v55, %v6076_v30 }
 0x9f8   :  { %6472 = vtanh.f32 %v6077_v62 }
 0x9fa   :  { %v6465_v24 = vpop.eup %6464 }
 0x9fb   :  { %v5949_v13 = vmul.f32 %v6465_v24, %v5944_v47 }
 0x9fd   :  { %v5967_v15 = vpack.c.bf16 %v5949_v13, %v9964_v40 }
 0x9ff   :  { %v6467_v6 = vpop.eup %6466  ;;  %6225 = vmatmul.mubr.bf16.gmra.mxu0 %v5967_v15 }
 0xa00   :  { %6114 = vst [vmem:[#allocation20 + $0x10] sm:$0xff] %v6467_v6 }
 0xa01   :  { %v6469_v29 = vpop.eup %6468 }
 0xa02   :  { %6112 = vst [vmem:[#allocation20] sm:$0xff] %v6469_v29 }
 0xa03   :  { %v6471_v9 = vpop.eup %6470 }
 0xa04   :  { %6115 = vst [vmem:[#allocation20 + $0x18] sm:$0xff] %v6471_v9 }
 0xa05   :  { %v6473_v19 = vpop.eup %6472 }
 0xa06   :  { %6113 = vst [vmem:[#allocation20 + $0x8] sm:$0xff] %v6473_v19 }
 0xabf   :  { %v6226_v2 = vpop.f32.mrf.mxu0 }
 0xac0   :  { %v6098_v61 = vadd.f32 %v6226_v2, %v6183_v55 }
 0xac1   :  { %v6089_v23 = vpop.f32.mrf.mxu0 }
 0xac2   :  { %6474 = vtanh.f32 %v6098_v61  ;;  %v6090_v48 = vadd.f32 %v6183_v55, %v6089_v23 }
 0xac3   :  { %v6227_v49 = vpop.f32.mrf.mxu0 }
 0xac4   :  { %6476 = vtanh.f32 %v6090_v48  ;;  %v6101_v0 = vadd.f32 %v6227_v49, %v6183_v55 }
 0xac5   :  { %v6092_v3 = vpop.f32.mrf.mxu0 }
 0xac6   :  { %6478 = vtanh.f32 %v6101_v0  ;;  %v6093_v40 = vadd.f32 %v6183_v55, %v6092_v3 }
 0xac8   :  { %6480 = vtanh.f32 %v6093_v40 }
 0xacf   :  { %v6475_v20 = vpop.eup %6474 }
 0xad0   :  { %6118 = vst [vmem:[#allocation20 + $0x30] sm:$0xff] %v6475_v20 }
 0xad1   :  { %v6477_v58 = vpop.eup %6476 }
 0xad2   :  { %6116 = vst [vmem:[#allocation20 + $0x20] sm:$0xff] %v6477_v58 }
 0xad3   :  { %v6479_v26 = vpop.eup %6478 }
 0xad4   :  { %6119 = vst [vmem:[#allocation20 + $0x38] sm:$0xff] %v6479_v26 }
 0xad5   :  { %v6481_v39 = vpop.eup %6480 }
 0xad6   :  { %6117 = vst [vmem:[#allocation20 + $0x28] sm:$0xff] %v6481_v39 }
 0xad7   :  { %6633 = shalt.err (!%p6630_p11)
}
 0xad8   :  { %s6668_s26 = smov 128   ;;  %s6669_s27 = smov 8  }
 0xad9   :  { %6131 = dma.vmem_to_hbm [thread:$0]  %s6126_s20, 1024, %s10061_s9, [#allocation10], %s6668_s26, %s6668_s26, %s6669_s27  }
 0xada   :  { %6650 = dma.done.wait [#allocation10], 1024  }
 0xadb   :  { %6651 = vsyncadd [#allocation10], 4294966272 }
 0xadc   :  { %6135 = vsyncpa [#allocation9], 1 }
 0xadd   :  { %6136 = vsyncpa [#allocation12], 1 }
 0xade   :  { %6137 = vsyncpa [#allocation15], 1 }
 0xadf   :  { %6138 = vsyncpa [#allocation18], 1 }
 0xae0   :  { %6139 = vsyncpa [#allocation10], 1 }

</bundles_post_ra>
